<compile_context>
chip_gen: v7x
topology: tpu7x:2x2x1
jax: 0.10.0
libtpu: 0.0.40
codegen_flags: <defaults>
</compile_context>

<pallas_src>
import math

import jax
import jax.numpy as jnp
from jax.experimental import pallas as pl
from jax.experimental.pallas import tpu as pltpu

EMBED = 128          # embedding_dim
FFDIM = 512          # feedforward_dim
NHEADS = 16          # num_heads
HEAD = EMBED // NHEADS

# Row order of the packed (18, EMBED) f32 vector-parameter array.
VEC_ORDER = (
    "ln1_g", "ln1_b", "bo",
    "rc1_c1b", "rc1_bn1s", "rc1_bn1t", "rc1_c2b", "rc1_bn2s", "rc1_bn2t",
    "ln2_g", "ln2_b", "ff_b2",
    "rc2_c1b", "rc2_bn1s", "rc2_bn1t", "rc2_c2b", "rc2_bn2s", "rc2_bn2t",
)


# ----------------------------- kernel-side math helpers -----------------------


def _ln_k(x, g, b):
    # torch-style manual LayerNorm: unbiased std (ddof=1), eps added to std.
    n = x.shape[-1]
    mean = jnp.mean(x, axis=-1, keepdims=True)
    c = x - mean
    var = jnp.sum(c * c, axis=-1, keepdims=True) * (1.0 / (n - 1))
    inv = pl.reciprocal(jnp.sqrt(var) + 1e-6, approx=True)
    return g * (c * inv) + b


def _wdot(a, w_bf16):
    # bf16 operands on the MXU, f32 accumulation.
    return jnp.dot(a.astype(jnp.bfloat16), w_bf16,
                   preferred_element_type=jnp.float32)


def _row_shift(u, shift):
    # TODO(synk): pltpu.roll would route this through the otherwise idle XLU on
    # hardware; jnp.roll (static shift -> slice+concat) is used for portability
    # with the TPU interpreter.  The wrapped rows land exactly on rows that the
    # sequence-boundary masks zero out.
    return jnp.roll(u, shift, axis=0)


def _conv3_fused_k(x, w_stack, bias, is_first, is_last):
    """3-tap conv over the sequence as ONE (M,E)@(E,3E) matmul + masked row shifts."""
    u = _wdot(x, w_stack)                          # (M, 3E)
    u_prev = u[:, :EMBED]                          # tap applied to x[s-1]
    u_mid = u[:, EMBED:2 * EMBED]                  # tap applied to x[s]
    u_next = u[:, 2 * EMBED:]                      # tap applied to x[s+1]
    down = jnp.where(is_first, 0.0, _row_shift(u_prev, 1))   # out[r] = u_prev[r-1]
    up = jnp.where(is_last, 0.0, _row_shift(u_next, -1))     # out[r] = u_next[r+1]
    return down + u_mid + up + bias


def _resblock_k(x, w1, b1, s1, t1, w2, b2, s2, t2, is_first, is_last):
    h = _conv3_fused_k(x, w1, b1, is_first, is_last)
    h = jnp.maximum(h * s1 + t1, 0.0)              # BN1 (eval, folded) + ReLU
    h = _conv3_fused_k(h, w2, b2, is_first, is_last)
    h = h * s2 + t2                                # BN2 (eval, folded)
    return jnp.maximum(h + x, 0.0)                 # identity shortcut + ReLU


# ------------------------------------------------------------ Pallas kernel ---


def encoder_kernel(x_ref, vec_ref, bqkv_ref, ffb1_ref, hmask_ref,
                   wqkv_ref, wo_ref, rc1w1_ref, rc1w2_ref,
                   ffw1_ref, ffw2_ref, rc2w1_ref, rc2w2_ref, o_ref):
    bb, seq, emb = x_ref.shape
    m = bb * seq
    x = x_ref[...].reshape(m, emb)
    vec = vec_ref[...]

    def vrow(i):
        return vec[i:i + 1, :]

    # Hoisted sequence-boundary masks (batch folding never leaks conv taps
    # across sequences).
    row_in_seq = jax.lax.broadcasted_iota(jnp.int32, (m, 1), 0) % seq
    is_first = row_in_seq == 0
    is_last = row_in_seq == (seq - 1)

    # ----- norm1 --------------------------------------------------------------
    xn = _ln_k(x, vrow(0), vrow(1))

    # ----- multi-head attention ------------------------------------------------
    # Reference applies softmax AFTER multiplying by v:
    #   softmax(((q k^T)/sqrt(d)) v) == softmax((q (k^T v))/sqrt(d))
    # so with heads on aligned 8-lane groups this is q @ (k^T v masked block-diag).
    qkv = _wdot(xn, wqkv_ref[...]) + bqkv_ref[...]           # (M, 3E), fused bias
    q3 = qkv[:, :emb].reshape(bb, seq, emb).astype(jnp.bfloat16)
    k3 = qkv[:, emb:2 * emb].reshape(bb, seq, emb).astype(jnp.bfloat16)
    v3 = qkv[:, 2 * emb:].reshape(bb, seq, emb).astype(jnp.bfloat16)
    hmask = hmask_ref[...]                                   # (E, E) bf16 0/1 block-diag

    kv = jnp.einsum("bse,bsf->bef", k3, v3,
                    preferred_element_type=jnp.float32)      # (BB, E, E), no swapaxes
    kv = kv.astype(jnp.bfloat16) * hmask                     # per-head block-diag
    t3 = jnp.einsum("bse,bef->bsf", q3, kv,
                    preferred_element_type=jnp.float32)      # (BB, S, E)
    t = t3.reshape(m, emb) * (1.0 / math.sqrt(HEAD))

    # Per-head softmax without per-head slicing: a global row max is
    # shift-invariant within every 8-lane head group; per-head sums come from a
    # single matmul with the 0/1 block-diagonal mask (broadcasts the sum per head).
    m_row = jnp.max(t, axis=-1, keepdims=True)
    ex = jnp.exp(t - m_row)
    gsum = jnp.dot(ex.astype(jnp.bfloat16), hmask,
                   preferred_element_type=jnp.float32)       # (M, E)
    gsum = jnp.maximum(gsum, 1e-30)   # guard: head far below the global max
    attn = ex * pl.reciprocal(gsum, approx=True)

    out = _wdot(attn, wo_ref[...]) + vrow(2)
    # dropout -> identity (eval)

    # ----- residual conv block 1 ------------------------------------------------
    out = _resblock_k(out, rc1w1_ref[...], vrow(3), vrow(4), vrow(5),
                      rc1w2_ref[...], vrow(6), vrow(7), vrow(8),
                      is_first, is_last)

    # ----- norm2 + feed-forward --------------------------------------------------
    out2 = _ln_k(out, vrow(9), vrow(10))
    h1 = _wdot(out2, ffw1_ref[...]) + ffb1_ref[...]
    h1 = 0.5 * h1 * (1.0 + jax.lax.erf(h1 * (1.0 / math.sqrt(2.0))))  # exact GELU
    out = _wdot(h1, ffw2_ref[...]) + vrow(11)
    # dropout -> identity (eval)

    # ----- residual conv block 2 -------------------------------------------------
    out = _resblock_k(out, rc2w1_ref[...], vrow(12), vrow(13), vrow(14),
                      rc2w2_ref[...], vrow(15), vrow(16), vrow(17),
                      is_first, is_last)

    o_ref[...] = out.reshape(bb, seq, emb)


# --------------------------------------------------------------- host wrapper --


def _choose_block_batch(batch, seq, max_rows=2048):
    """Largest BB dividing batch with BB*S <= max_rows: fewest, fullest grid steps.

    v5e/v6e: single TensorCore, so a single big step minimizes per-step overhead
    and maximizes MXU M.  v7x: pass block_batch explicitly (e.g. batch//2) for a
    2-way balanced grid across the two TensorCores.
    """
    best = 1
    for bb in range(1, batch + 1):
        if batch % bb != 0:
            continue
        if bb * seq > max_rows:
            continue
        best = bb
    return best


def _pack_params(p):
    bf = lambda a: a.astype(jnp.bfloat16)
    stack3 = lambda w: jnp.concatenate([w[0], w[1], w[2]], axis=1)   # (E, 3E)
    vec = jnp.concatenate([p[n] for n in VEC_ORDER], axis=0).astype(jnp.float32)
    bqkv = jnp.concatenate([p["bq"], p["bk"], p["bv"]], axis=1).astype(jnp.float32)
    hd = jnp.arange(EMBED) // HEAD
    hmask = (hd[:, None] == hd[None, :]).astype(jnp.bfloat16)        # (E, E) 0/1
    return [
        vec,                                                         # (18, E) f32
        bqkv,                                                        # (1, 3E) f32
        p["ff_b1"].astype(jnp.float32),                              # (1, FFDIM)
        hmask,                                                       # (E, E) bf16
        bf(jnp.concatenate([p["wq"], p["wk"], p["wv"]], axis=1)),    # (E, 3E)
        bf(p["wo"]),                                                 # (E, E)
        bf(stack3(p["rc1_c1w"])), bf(stack3(p["rc1_c2w"])),          # (E, 3E) x2
        bf(p["ff_w1"]), bf(p["ff_w2"]),                              # (E,FF),(FF,E)
        bf(stack3(p["rc2_c1w"])), bf(stack3(p["rc2_c2w"])),          # (E, 3E) x2
    ]


def encoder_pallas(x, params, *, block_batch=None):
    B, S, E = x.shape
    assert E == EMBED
    bb = _choose_block_batch(B, S) if block_batch is None else block_batch
    assert B % bb == 0
    grid = (B // bb,)

    packed = _pack_params(params)

    in_specs = [pl.BlockSpec((bb, S, E), lambda i: (i, 0, 0))]
    for arr in packed:
        nd = arr.ndim
        in_specs.append(pl.BlockSpec(arr.shape, lambda i, _nd=nd: (0,) * _nd))
    out_spec = pl.BlockSpec((bb, S, E), lambda i: (i, 0, 0))

    return pl.pallas_call(
        encoder_kernel,
        out_shape=jax.ShapeDtypeStruct((B, S, E), jnp.float32),
        grid_spec=pltpu.PrefetchScalarGridSpec(
            num_scalar_prefetch=0,
            grid=grid,
            in_specs=in_specs,
            out_specs=out_spec,
        ),
        compiler_params=pltpu.CompilerParams(
            dimension_semantics=("parallel",),
        ),
    )(x, *packed)


# --------------------------------------------- pure-JAX reference (faithful) ---


def _ref_encoder_single(x, p):
    prec = jax.lax.Precision.HIGHEST
    dot = lambda a, b: jnp.dot(a, b, preferred_element_type=jnp.float32,
                               precision=prec)

    def ln(h, g, b):
        n = h.shape[-1]
        mean = jnp.mean(h, axis=-1, keepdims=True)
        var = jnp.sum((h - mean) ** 2, axis=-1, keepdims=True) / (n - 1)
        return g * ((h - mean) / (jnp.sqrt(var) + 1e-6)) + b

    def conv3(h, w, b):
        zero = jnp.zeros((1, h.shape[1]), h.dtype)
        hp = jnp.concatenate([zero, h[:-1]], axis=0)
        hn = jnp.concatenate([h[1:], zero], axis=0)
        return dot(hp, w[0]) + dot(h, w[1]) + dot(hn, w[2]) + b

    def resblock(h, pre):
        y = conv3(h, p[pre + "c1w"], p[pre + "c1b"])
        y = jnp.maximum(y * p[pre + "bn1s"] + p[pre + "bn1t"], 0.0)
        y = conv3(y, p[pre + "c2w"], p[pre + "c2b"])
        y = y * p[pre + "bn2s"] + p[pre + "bn2t"]
        return jnp.maximum(y + h, 0.0)

    out = ln(x, p["ln1_g"], p["ln1_b"])
    q = dot(out, p["wq"]) + p["bq"]
    k = dot(out, p["wk"]) + p["bk"]
    v = dot(out, p["wv"]) + p["bv"]
    heads = []
    for h in range(NHEADS):
        sl = slice(h * HEAD, (h + 1) * HEAD)
        qh, kh, vh = q[:, sl], k[:, sl], v[:, sl]
        t = dot(dot(qh, kh.T) / math.sqrt(HEAD), vh)   # softmax AFTER v, as in spec
        mm = jnp.max(t, axis=-1, keepdims=True)
        e = jnp.exp(t - mm)
        heads.append(e / jnp.sum(e, axis=-1, keepdims=True))
    out = dot(jnp.concatenate(heads, axis=-1), p["wo"]) + p["bo"]
    out = resblock(out, "rc1_")
    out = ln(out, p["ln2_g"], p["ln2_b"])
    h1 = dot(out, p["ff_w1"]) + p["ff_b1"]
    h1 = 0.5 * h1 * (1.0 + jax.lax.erf(h1 / math.sqrt(2.0)))
    out = dot(h1, p["ff_w2"]) + p["ff_b2"]
    out = resblock(out, "rc2_")
    return out


# --------------------------------------------------------- parameter set-up ---


def init_params(key):
    keys = iter(jax.random.split(key, 48))
    nrm = lambda shape, scale: jax.random.normal(next(keys), shape, jnp.float32) * scale

    p = {}
    p["ln1_g"] = 1.0 + 0.1 * nrm((1, EMBED), 1.0)
    p["ln1_b"] = 0.1 * nrm((1, EMBED), 1.0)

    s_e = 1.0 / math.sqrt(EMBED)
    for name in ("wq", "wk", "wv", "wo"):
        p[name] = nrm((EMBED, EMBED), s_e)          # y = x @ W + b convention
    for name in ("bq", "bk", "bv", "bo"):
        p[name] = nrm((1, EMBED), s_e)

    for pre in ("rc1_", "rc2_"):
        p[pre + "c1w"] = nrm((3, EMBED, EMBED), 1.0 / math.sqrt(3 * EMBED))
        p[pre + "c1b"] = nrm((1, EMBED), 0.05)
        p[pre + "c2w"] = nrm((3, EMBED, EMBED), 1.0 / math.sqrt(3 * EMBED))
        p[pre + "c2b"] = nrm((1, EMBED), 0.05)
        for bn in ("bn1", "bn2"):
            gamma = 1.0 + 0.1 * nrm((1, EMBED), 1.0)
            beta = 0.1 * nrm((1, EMBED), 1.0)
            rmean = 0.1 * nrm((1, EMBED), 1.0)
            rvar = 1.0 + 0.1 * jnp.abs(nrm((1, EMBED), 1.0))
            scale = gamma / jnp.sqrt(rvar + 1e-5)   # eval-mode BN folded
            p[pre + bn + "s"] = scale
            p[pre + bn + "t"] = beta - rmean * scale

    p["ln2_g"] = 1.0 + 0.1 * nrm((1, EMBED), 1.0)
    p["ln2_b"] = 0.1 * nrm((1, EMBED), 1.0)

    p["ff_w1"] = nrm((EMBED, FFDIM), 1.0 / math.sqrt(EMBED))
    p["ff_b1"] = nrm((1, FFDIM), 0.05)
    p["ff_w2"] = nrm((FFDIM, EMBED), 1.0 / math.sqrt(FFDIM))
    p["ff_b2"] = nrm((1, EMBED), 0.05)
    return p


# ------------------------------------------------------------------- driver ---


if __name__ == "__main__":
    key = jax.random.PRNGKey(0)
    kx, kp = jax.random.split(key)

    B, S = 8, 16
    x = jax.random.normal(kx, (B, S, EMBED), jnp.float32)
    params = init_params(kp)

    out = jax.block_until_ready(encoder_pallas(x, params))
    assert out.shape == (B, S, EMBED)
    assert bool(jnp.all(jnp.isfinite(out)))

    # Faithful pure-JAX reference (f32 HIGHEST precision).  The kernel runs all
    # matmuls with bf16 operands (f32 accumulation), so compare with a tolerance
    # sized for bf16 mixed precision over ~10 chained matmuls with residual
    # growth: 3% of the output range plus a small absolute floor.
    ref = jax.vmap(lambda xb: _ref_encoder_single(xb, params))(x)
    err = float(jnp.max(jnp.abs(out - ref)))
    scale = float(jnp.max(jnp.abs(ref)))
    assert err <= 3e-2 * scale + 6e-2, (err, scale)

    print("KERNEL_OK")
</pallas_src>

<mosaic_0001>
module attributes {stable_mosaic.version = 11 : i64} {
  func.func @encoder_kernel(%arg0: i32, %arg1: memref<8x16x128xf32, #tpu.memory_space<vmem>>, %arg2: memref<18x128xf32, #tpu.memory_space<vmem>>, %arg3: memref<1x384xf32, #tpu.memory_space<vmem>>, %arg4: memref<1x512xf32, #tpu.memory_space<vmem>>, %arg5: memref<128x128xbf16, #tpu.memory_space<vmem>>, %arg6: memref<128x384xbf16, #tpu.memory_space<vmem>>, %arg7: memref<128x128xbf16, #tpu.memory_space<vmem>>, %arg8: memref<128x384xbf16, #tpu.memory_space<vmem>>, %arg9: memref<128x384xbf16, #tpu.memory_space<vmem>>, %arg10: memref<128x512xbf16, #tpu.memory_space<vmem>>, %arg11: memref<512x128xbf16, #tpu.memory_space<vmem>>, %arg12: memref<128x384xbf16, #tpu.memory_space<vmem>>, %arg13: memref<128x384xbf16, #tpu.memory_space<vmem>>, %arg14: memref<8x16x128xf32, #tpu.memory_space<vmem>>) attributes {dimension_semantics = [#tpu.dimension_semantics<parallel>], iteration_bounds = array<i64: 1>, scalar_prefetch = 0 : i64, scratch_operands = 0 : i64, tpu.core_type = #tpu.core_type<tc>, window_params = [{transform_indices = @transform_0, window_bounds = array<i64: 8, 16, 128>}, {pipeline_mode = #tpu.pipeline_mode<synchronous>, transform_indices = @transform_1, window_bounds = array<i64: 18, 128>}, {pipeline_mode = #tpu.pipeline_mode<synchronous>, transform_indices = @transform_2, window_bounds = array<i64: 1, 384>}, {pipeline_mode = #tpu.pipeline_mode<synchronous>, transform_indices = @transform_3, window_bounds = array<i64: 1, 512>}, {pipeline_mode = #tpu.pipeline_mode<synchronous>, transform_indices = @transform_4, window_bounds = array<i64: 128, 128>}, {pipeline_mode = #tpu.pipeline_mode<synchronous>, transform_indices = @transform_5, window_bounds = array<i64: 128, 384>}, {pipeline_mode = #tpu.pipeline_mode<synchronous>, transform_indices = @transform_6, window_bounds = array<i64: 128, 128>}, {pipeline_mode = #tpu.pipeline_mode<synchronous>, transform_indices = @transform_7, window_bounds = array<i64: 128, 384>}, {pipeline_mode = #tpu.pipeline_mode<synchronous>, transform_indices = @transform_8, window_bounds = array<i64: 128, 384>}, {pipeline_mode = #tpu.pipeline_mode<synchronous>, transform_indices = @transform_9, window_bounds = array<i64: 128, 512>}, {pipeline_mode = #tpu.pipeline_mode<synchronous>, transform_indices = @transform_10, window_bounds = array<i64: 512, 128>}, {pipeline_mode = #tpu.pipeline_mode<synchronous>, transform_indices = @transform_11, window_bounds = array<i64: 128, 384>}, {pipeline_mode = #tpu.pipeline_mode<synchronous>, transform_indices = @transform_12, window_bounds = array<i64: 128, 384>}, {transform_indices = @transform_13, window_bounds = array<i64: 8, 16, 128>}]} {
    %c0 = arith.constant 0 : index
    %c0_0 = arith.constant 0 : index
    %c0_1 = arith.constant 0 : index
    %0 = vector.load %arg1[%c0, %c0_0, %c0_1] : memref<8x16x128xf32, #tpu.memory_space<vmem>>, vector<8x16x128xf32>
    %1 = vector.shape_cast %0 : vector<8x16x128xf32> to vector<128x128xf32>
    %c0_2 = arith.constant 0 : index
    %c0_3 = arith.constant 0 : index
    %2 = vector.load %arg2[%c0_2, %c0_3] : memref<18x128xf32, #tpu.memory_space<vmem>>, vector<18x128xf32>
    %3 = tpu.iota {dimensions = array<i32: 0>} : vector<128x1xi32>
    %c16_i32 = arith.constant 16 : i32
    %c0_i32 = arith.constant 0 : i32
    %4 = arith.cmpi eq, %c16_i32, %c0_i32 : i32
    %c1_i32 = arith.constant 1 : i32
    %5 = arith.select %4, %c1_i32, %c16_i32 : i32
    %6 = vector.broadcast %5 : i32 to vector<128x1xi32>
    %7 = arith.remsi %3, %6 : vector<128x1xi32>
    %c0_i32_4 = arith.constant 0 : i32
    %8 = vector.broadcast %c0_i32_4 : i32 to vector<128x1xi32>
    %9 = arith.cmpi ne, %7, %8 : vector<128x1xi32>
    %c0_i32_5 = arith.constant 0 : i32
    %10 = vector.broadcast %c0_i32_5 : i32 to vector<128x1xi32>
    %11 = arith.cmpi slt, %7, %10 : vector<128x1xi32>
    %c0_i32_6 = arith.constant 0 : i32
    %12 = arith.cmpi slt, %5, %c0_i32_6 : i32
    %13 = vector.broadcast %12 : i1 to vector<128x1xi1>
    %14 = vector.broadcast %13 : vector<128x1xi1> to vector<128x1xi1>
    %15 = arith.xori %11, %14 : vector<128x1xi1>
    %16 = arith.andi %15, %9 : vector<128x1xi1>
    %17 = vector.broadcast %5 : i32 to vector<128x1xi32>
    %18 = arith.addi %7, %17 : vector<128x1xi32>
    %19 = arith.select %16, %18, %7 : vector<128x1xi1>, vector<128x1xi32>
    %c0_i32_7 = arith.constant 0 : i32
    %20 = vector.broadcast %c0_i32_7 : i32 to vector<128x1xi32>
    %21 = arith.cmpi eq, %19, %20 : vector<128x1xi32>
    %c15_i32 = arith.constant 15 : i32
    %22 = vector.broadcast %c15_i32 : i32 to vector<128x1xi32>
    %23 = arith.cmpi eq, %19, %22 : vector<128x1xi32>
    %24 = vector.extract_strided_slice %2 {offsets = [0, 0], sizes = [1, 128], strides = [1, 1]} : vector<18x128xf32> to vector<1x128xf32>
    %25 = vector.extract_strided_slice %2 {offsets = [1, 0], sizes = [1, 128], strides = [1, 1]} : vector<18x128xf32> to vector<1x128xf32>
    %cst = arith.constant dense<0.000000e+00> : vector<128xf32>
    %26 = vector.multi_reduction <add>, %1, %cst [1] : vector<128x128xf32> to vector<128xf32>
    %27 = vector.shape_cast %26 : vector<128xf32> to vector<128x1xf32>
    %cst_8 = arith.constant 1.280000e+02 : f32
    %28 = vector.broadcast %cst_8 : f32 to vector<128x1xf32>
    %29 = arith.divf %27, %28 : vector<128x1xf32>
    %30 = vector.broadcast %29 : vector<128x1xf32> to vector<128x128xf32>
    %31 = arith.subf %1, %30 : vector<128x128xf32>
    %32 = arith.mulf %31, %31 : vector<128x128xf32>
    %cst_9 = arith.constant dense<0.000000e+00> : vector<128xf32>
    %33 = vector.multi_reduction <add>, %32, %cst_9 [1] : vector<128x128xf32> to vector<128xf32>
    %34 = vector.shape_cast %33 : vector<128xf32> to vector<128x1xf32>
    %cst_10 = arith.constant 0.00787401571 : f32
    %35 = vector.broadcast %cst_10 : f32 to vector<128x1xf32>
    %36 = arith.mulf %34, %35 : vector<128x1xf32>
    %37 = math.sqrt %36 : vector<128x1xf32>
    %cst_11 = arith.constant 9.99999997E-7 : f32
    %38 = vector.broadcast %cst_11 : f32 to vector<128x1xf32>
    %39 = arith.addf %37, %38 : vector<128x1xf32>
    %40 = tpu.reciprocal %39 {approx = true} : vector<128x1xf32> -> vector<128x1xf32>
    %41 = vector.broadcast %40 : vector<128x1xf32> to vector<128x128xf32>
    %42 = arith.mulf %31, %41 : vector<128x128xf32>
    %43 = vector.broadcast %24 : vector<1x128xf32> to vector<128x128xf32>
    %44 = arith.mulf %43, %42 : vector<128x128xf32>
    %45 = vector.broadcast %25 : vector<1x128xf32> to vector<128x128xf32>
    %46 = arith.addf %44, %45 : vector<128x128xf32>
    %c0_12 = arith.constant 0 : index
    %c0_13 = arith.constant 0 : index
    %47 = vector.load %arg6[%c0_12, %c0_13] : memref<128x384xbf16, #tpu.memory_space<vmem>>, vector<128x384xbf16>
    %48 = arith.truncf %46 : vector<128x128xf32> to vector<128x128xbf16>
    %cst_14 = arith.constant dense<0.000000e+00> : vector<128x384xf32>
    %49 = tpu.matmul %48, %47, %cst_14 {dimension_numbers = #tpu.dot_dimension_numbers<[1], [0], [0], [1], [0, 0, 1, 1], [], []>} : vector<128x128xbf16>, vector<128x384xbf16>, vector<128x384xf32> -> vector<128x384xf32>
    %c0_15 = arith.constant 0 : index
    %c0_16 = arith.constant 0 : index
    %50 = vector.load %arg3[%c0_15, %c0_16] : memref<1x384xf32, #tpu.memory_space<vmem>>, vector<1x384xf32>
    %51 = vector.broadcast %50 : vector<1x384xf32> to vector<128x384xf32>
    %52 = arith.addf %49, %51 : vector<128x384xf32>
    %53 = vector.extract_strided_slice %52 {offsets = [0, 0], sizes = [128, 128], strides = [1, 1]} : vector<128x384xf32> to vector<128x128xf32>
    %54 = vector.shape_cast %53 : vector<128x128xf32> to vector<8x16x128xf32>
    %55 = arith.truncf %54 : vector<8x16x128xf32> to vector<8x16x128xbf16>
    %56 = vector.extract_strided_slice %52 {offsets = [0, 128], sizes = [128, 128], strides = [1, 1]} : vector<128x384xf32> to vector<128x128xf32>
    %57 = vector.shape_cast %56 : vector<128x128xf32> to vector<8x16x128xf32>
    %58 = arith.truncf %57 : vector<8x16x128xf32> to vector<8x16x128xbf16>
    %59 = vector.extract_strided_slice %52 {offsets = [0, 256], sizes = [128, 128], strides = [1, 1]} : vector<128x384xf32> to vector<128x128xf32>
    %60 = vector.shape_cast %59 : vector<128x128xf32> to vector<8x16x128xf32>
    %61 = arith.truncf %60 : vector<8x16x128xf32> to vector<8x16x128xbf16>
    %c0_17 = arith.constant 0 : index
    %c0_18 = arith.constant 0 : index
    %62 = vector.load %arg5[%c0_17, %c0_18] : memref<128x128xbf16, #tpu.memory_space<vmem>>, vector<128x128xbf16>
    "tpu.trace_start"() <{level = 10 : i32, message = "bse,bsf->bef"}> : () -> ()
    %cst_19 = arith.constant dense<0.000000e+00> : vector<8x128x128xf32>
    %63 = tpu.matmul %58, %61, %cst_19 {dimension_numbers = #tpu.dot_dimension_numbers<[1], [1], [2], [2], [0, 0, 0, 2, 1, 2], [0], [0]>} : vector<8x16x128xbf16>, vector<8x16x128xbf16>, vector<8x128x128xf32> -> vector<8x128x128xf32>
    "tpu.trace_stop"() : () -> ()
    %64 = arith.truncf %63 : vector<8x128x128xf32> to vector<8x128x128xbf16>
    %65 = vector.shape_cast %62 : vector<128x128xbf16> to vector<1x128x128xbf16>
    %66 = vector.broadcast %65 : vector<1x128x128xbf16> to vector<8x128x128xbf16>
    %67 = arith.mulf %64, %66 : vector<8x128x128xbf16>
    "tpu.trace_start"() <{level = 10 : i32, message = "bse,bef->bsf"}> : () -> ()
    %cst_20 = arith.constant dense<0.000000e+00> : vector<8x16x128xf32>
    %68 = tpu.matmul %55, %67, %cst_20 {dimension_numbers = #tpu.dot_dimension_numbers<[2], [1], [1], [2], [0, 0, 0, 1, 1, 2], [0], [0]>} : vector<8x16x128xbf16>, vector<8x128x128xbf16>, vector<8x16x128xf32> -> vector<8x16x128xf32>
    "tpu.trace_stop"() : () -> ()
    %69 = vector.shape_cast %68 : vector<8x16x128xf32> to vector<128x128xf32>
    %cst_21 = arith.constant 0.353553385 : f32
    %70 = vector.broadcast %cst_21 : f32 to vector<128x128xf32>
    %71 = arith.mulf %69, %70 : vector<128x128xf32>
    %cst_22 = arith.constant dense<0xFF800000> : vector<128xf32>
    %72 = vector.multi_reduction <maximumf>, %71, %cst_22 [1] : vector<128x128xf32> to vector<128xf32>
    %73 = vector.shape_cast %72 : vector<128xf32> to vector<128x1xf32>
    %74 = vector.broadcast %73 : vector<128x1xf32> to vector<128x128xf32>
    %75 = arith.subf %71, %74 : vector<128x128xf32>
    %76 = math.exp %75 : vector<128x128xf32>
    %77 = arith.truncf %76 : vector<128x128xf32> to vector<128x128xbf16>
    %cst_23 = arith.constant dense<0.000000e+00> : vector<128x128xf32>
    %78 = tpu.matmul %77, %62, %cst_23 {dimension_numbers = #tpu.dot_dimension_numbers<[1], [0], [0], [1], [0, 0, 1, 1], [], []>} : vector<128x128xbf16>, vector<128x128xbf16>, vector<128x128xf32> -> vector<128x128xf32>
    %cst_24 = arith.constant 1.000000e-30 : f32
    %79 = vector.broadcast %cst_24 : f32 to vector<128x128xf32>
    %80 = arith.maximumf %78, %79 : vector<128x128xf32>
    %81 = tpu.reciprocal %80 {approx = true} : vector<128x128xf32> -> vector<128x128xf32>
    %82 = arith.mulf %76, %81 : vector<128x128xf32>
    %c0_25 = arith.constant 0 : index
    %c0_26 = arith.constant 0 : index
    %83 = vector.load %arg7[%c0_25, %c0_26] : memref<128x128xbf16, #tpu.memory_space<vmem>>, vector<128x128xbf16>
    %84 = arith.truncf %82 : vector<128x128xf32> to vector<128x128xbf16>
    %cst_27 = arith.constant dense<0.000000e+00> : vector<128x128xf32>
    %85 = tpu.matmul %84, %83, %cst_27 {dimension_numbers = #tpu.dot_dimension_numbers<[1], [0], [0], [1], [0, 0, 1, 1], [], []>} : vector<128x128xbf16>, vector<128x128xbf16>, vector<128x128xf32> -> vector<128x128xf32>
    %86 = vector.extract_strided_slice %2 {offsets = [2, 0], sizes = [1, 128], strides = [1, 1]} : vector<18x128xf32> to vector<1x128xf32>
    %87 = vector.broadcast %86 : vector<1x128xf32> to vector<128x128xf32>
    %88 = arith.addf %85, %87 : vector<128x128xf32>
    %c0_28 = arith.constant 0 : index
    %c0_29 = arith.constant 0 : index
    %89 = vector.load %arg8[%c0_28, %c0_29] : memref<128x384xbf16, #tpu.memory_space<vmem>>, vector<128x384xbf16>
    %90 = vector.extract_strided_slice %2 {offsets = [3, 0], sizes = [1, 128], strides = [1, 1]} : vector<18x128xf32> to vector<1x128xf32>
    %91 = vector.extract_strided_slice %2 {offsets = [4, 0], sizes = [1, 128], strides = [1, 1]} : vector<18x128xf32> to vector<1x128xf32>
    %92 = vector.extract_strided_slice %2 {offsets = [5, 0], sizes = [1, 128], strides = [1, 1]} : vector<18x128xf32> to vector<1x128xf32>
    %c0_30 = arith.constant 0 : index
    %c0_31 = arith.constant 0 : index
    %93 = vector.load %arg9[%c0_30, %c0_31] : memref<128x384xbf16, #tpu.memory_space<vmem>>, vector<128x384xbf16>
    %94 = vector.extract_strided_slice %2 {offsets = [6, 0], sizes = [1, 128], strides = [1, 1]} : vector<18x128xf32> to vector<1x128xf32>
    %95 = vector.extract_strided_slice %2 {offsets = [7, 0], sizes = [1, 128], strides = [1, 1]} : vector<18x128xf32> to vector<1x128xf32>
    %96 = vector.extract_strided_slice %2 {offsets = [8, 0], sizes = [1, 128], strides = [1, 1]} : vector<18x128xf32> to vector<1x128xf32>
    %97 = arith.truncf %88 : vector<128x128xf32> to vector<128x128xbf16>
    %cst_32 = arith.constant dense<0.000000e+00> : vector<128x384xf32>
    %98 = tpu.matmul %97, %89, %cst_32 {dimension_numbers = #tpu.dot_dimension_numbers<[1], [0], [0], [1], [0, 0, 1, 1], [], []>} : vector<128x128xbf16>, vector<128x384xbf16>, vector<128x384xf32> -> vector<128x384xf32>
    %99 = vector.extract_strided_slice %98 {offsets = [0, 0], sizes = [128, 128], strides = [1, 1]} : vector<128x384xf32> to vector<128x128xf32>
    %100 = vector.extract_strided_slice %98 {offsets = [0, 128], sizes = [128, 128], strides = [1, 1]} : vector<128x384xf32> to vector<128x128xf32>
    %101 = vector.extract_strided_slice %98 {offsets = [0, 256], sizes = [128, 128], strides = [1, 1]} : vector<128x384xf32> to vector<128x128xf32>
    %102 = vector.extract_strided_slice %99 {offsets = [127, 0], sizes = [1, 128], strides = [1, 1]} : vector<128x128xf32> to vector<1x128xf32>
    %103 = vector.extract_strided_slice %99 {offsets = [0, 0], sizes = [127, 128], strides = [1, 1]} : vector<128x128xf32> to vector<127x128xf32>
    %104 = tpu.concatenate %102, %103 in 0 : vector<1x128xf32>, vector<127x128xf32> -> vector<128x128xf32>
    %cst_33 = arith.constant 0.000000e+00 : f32
    %105 = vector.shape_cast %21 : vector<128x1xi1> to vector<128x1xi1>
    %106 = vector.broadcast %105 : vector<128x1xi1> to vector<128x128xi1>
    %107 = vector.broadcast %cst_33 : f32 to vector<128x128xf32>
    %108 = arith.select %106, %107, %104 : vector<128x128xi1>, vector<128x128xf32>
    %109 = vector.extract_strided_slice %101 {offsets = [1, 0], sizes = [127, 128], strides = [1, 1]} : vector<128x128xf32> to vector<127x128xf32>
    %110 = vector.extract_strided_slice %101 {offsets = [0, 0], sizes = [1, 128], strides = [1, 1]} : vector<128x128xf32> to vector<1x128xf32>
    %111 = tpu.concatenate %109, %110 in 0 : vector<127x128xf32>, vector<1x128xf32> -> vector<128x128xf32>
    %cst_34 = arith.constant 0.000000e+00 : f32
    %112 = vector.shape_cast %23 : vector<128x1xi1> to vector<128x1xi1>
    %113 = vector.broadcast %112 : vector<128x1xi1> to vector<128x128xi1>
    %114 = vector.broadcast %cst_34 : f32 to vector<128x128xf32>
    %115 = arith.select %113, %114, %111 : vector<128x128xi1>, vector<128x128xf32>
    %116 = arith.addf %108, %100 : vector<128x128xf32>
    %117 = arith.addf %116, %115 : vector<128x128xf32>
    %118 = vector.broadcast %90 : vector<1x128xf32> to vector<128x128xf32>
    %119 = arith.addf %117, %118 : vector<128x128xf32>
    %120 = vector.broadcast %91 : vector<1x128xf32> to vector<128x128xf32>
    %121 = arith.mulf %119, %120 : vector<128x128xf32>
    %122 = vector.broadcast %92 : vector<1x128xf32> to vector<128x128xf32>
    %123 = arith.addf %121, %122 : vector<128x128xf32>
    %cst_35 = arith.constant 0.000000e+00 : f32
    %124 = vector.broadcast %cst_35 : f32 to vector<128x128xf32>
    %125 = arith.maximumf %123, %124 : vector<128x128xf32>
    %126 = arith.truncf %125 : vector<128x128xf32> to vector<128x128xbf16>
    %cst_36 = arith.constant dense<0.000000e+00> : vector<128x384xf32>
    %127 = tpu.matmul %126, %93, %cst_36 {dimension_numbers = #tpu.dot_dimension_numbers<[1], [0], [0], [1], [0, 0, 1, 1], [], []>} : vector<128x128xbf16>, vector<128x384xbf16>, vector<128x384xf32> -> vector<128x384xf32>
    %128 = vector.extract_strided_slice %127 {offsets = [0, 0], sizes = [128, 128], strides = [1, 1]} : vector<128x384xf32> to vector<128x128xf32>
    %129 = vector.extract_strided_slice %127 {offsets = [0, 128], sizes = [128, 128], strides = [1, 1]} : vector<128x384xf32> to vector<128x128xf32>
    %130 = vector.extract_strided_slice %127 {offsets = [0, 256], sizes = [128, 128], strides = [1, 1]} : vector<128x384xf32> to vector<128x128xf32>
    %131 = vector.extract_strided_slice %128 {offsets = [127, 0], sizes = [1, 128], strides = [1, 1]} : vector<128x128xf32> to vector<1x128xf32>
    %132 = vector.extract_strided_slice %128 {offsets = [0, 0], sizes = [127, 128], strides = [1, 1]} : vector<128x128xf32> to vector<127x128xf32>
    %133 = tpu.concatenate %131, %132 in 0 : vector<1x128xf32>, vector<127x128xf32> -> vector<128x128xf32>
    %cst_37 = arith.constant 0.000000e+00 : f32
    %134 = vector.shape_cast %21 : vector<128x1xi1> to vector<128x1xi1>
    %135 = vector.broadcast %134 : vector<128x1xi1> to vector<128x128xi1>
    %136 = vector.broadcast %cst_37 : f32 to vector<128x128xf32>
    %137 = arith.select %135, %136, %133 : vector<128x128xi1>, vector<128x128xf32>
    %138 = vector.extract_strided_slice %130 {offsets = [1, 0], sizes = [127, 128], strides = [1, 1]} : vector<128x128xf32> to vector<127x128xf32>
    %139 = vector.extract_strided_slice %130 {offsets = [0, 0], sizes = [1, 128], strides = [1, 1]} : vector<128x128xf32> to vector<1x128xf32>
    %140 = tpu.concatenate %138, %139 in 0 : vector<127x128xf32>, vector<1x128xf32> -> vector<128x128xf32>
    %cst_38 = arith.constant 0.000000e+00 : f32
    %141 = vector.shape_cast %23 : vector<128x1xi1> to vector<128x1xi1>
    %142 = vector.broadcast %141 : vector<128x1xi1> to vector<128x128xi1>
    %143 = vector.broadcast %cst_38 : f32 to vector<128x128xf32>
    %144 = arith.select %142, %143, %140 : vector<128x128xi1>, vector<128x128xf32>
    %145 = arith.addf %137, %129 : vector<128x128xf32>
    %146 = arith.addf %145, %144 : vector<128x128xf32>
    %147 = vector.broadcast %94 : vector<1x128xf32> to vector<128x128xf32>
    %148 = arith.addf %146, %147 : vector<128x128xf32>
    %149 = vector.broadcast %95 : vector<1x128xf32> to vector<128x128xf32>
    %150 = arith.mulf %148, %149 : vector<128x128xf32>
    %151 = vector.broadcast %96 : vector<1x128xf32> to vector<128x128xf32>
    %152 = arith.addf %150, %151 : vector<128x128xf32>
    %153 = arith.addf %152, %88 : vector<128x128xf32>
    %cst_39 = arith.constant 0.000000e+00 : f32
    %154 = vector.broadcast %cst_39 : f32 to vector<128x128xf32>
    %155 = arith.maximumf %153, %154 : vector<128x128xf32>
    %156 = vector.extract_strided_slice %2 {offsets = [9, 0], sizes = [1, 128], strides = [1, 1]} : vector<18x128xf32> to vector<1x128xf32>
    %157 = vector.extract_strided_slice %2 {offsets = [10, 0], sizes = [1, 128], strides = [1, 1]} : vector<18x128xf32> to vector<1x128xf32>
    %cst_40 = arith.constant dense<0.000000e+00> : vector<128xf32>
    %158 = vector.multi_reduction <add>, %155, %cst_40 [1] : vector<128x128xf32> to vector<128xf32>
    %159 = vector.shape_cast %158 : vector<128xf32> to vector<128x1xf32>
    %cst_41 = arith.constant 1.280000e+02 : f32
    %160 = vector.broadcast %cst_41 : f32 to vector<128x1xf32>
    %161 = arith.divf %159, %160 : vector<128x1xf32>
    %162 = vector.broadcast %161 : vector<128x1xf32> to vector<128x128xf32>
    %163 = arith.subf %155, %162 : vector<128x128xf32>
    %164 = arith.mulf %163, %163 : vector<128x128xf32>
    %cst_42 = arith.constant dense<0.000000e+00> : vector<128xf32>
    %165 = vector.multi_reduction <add>, %164, %cst_42 [1] : vector<128x128xf32> to vector<128xf32>
    %166 = vector.shape_cast %165 : vector<128xf32> to vector<128x1xf32>
    %cst_43 = arith.constant 0.00787401571 : f32
    %167 = vector.broadcast %cst_43 : f32 to vector<128x1xf32>
    %168 = arith.mulf %166, %167 : vector<128x1xf32>
    %169 = math.sqrt %168 : vector<128x1xf32>
    %cst_44 = arith.constant 9.99999997E-7 : f32
    %170 = vector.broadcast %cst_44 : f32 to vector<128x1xf32>
    %171 = arith.addf %169, %170 : vector<128x1xf32>
    %172 = tpu.reciprocal %171 {approx = true} : vector<128x1xf32> -> vector<128x1xf32>
    %173 = vector.broadcast %172 : vector<128x1xf32> to vector<128x128xf32>
    %174 = arith.mulf %163, %173 : vector<128x128xf32>
    %175 = vector.broadcast %156 : vector<1x128xf32> to vector<128x128xf32>
    %176 = arith.mulf %175, %174 : vector<128x128xf32>
    %177 = vector.broadcast %157 : vector<1x128xf32> to vector<128x128xf32>
    %178 = arith.addf %176, %177 : vector<128x128xf32>
    %c0_45 = arith.constant 0 : index
    %c0_46 = arith.constant 0 : index
    %179 = vector.load %arg10[%c0_45, %c0_46] : memref<128x512xbf16, #tpu.memory_space<vmem>>, vector<128x512xbf16>
    %180 = arith.truncf %178 : vector<128x128xf32> to vector<128x128xbf16>
    %cst_47 = arith.constant dense<0.000000e+00> : vector<128x512xf32>
    %181 = tpu.matmul %180, %179, %cst_47 {dimension_numbers = #tpu.dot_dimension_numbers<[1], [0], [0], [1], [0, 0, 1, 1], [], []>} : vector<128x128xbf16>, vector<128x512xbf16>, vector<128x512xf32> -> vector<128x512xf32>
    %c0_48 = arith.constant 0 : index
    %c0_49 = arith.constant 0 : index
    %182 = vector.load %arg4[%c0_48, %c0_49] : memref<1x512xf32, #tpu.memory_space<vmem>>, vector<1x512xf32>
    %183 = vector.broadcast %182 : vector<1x512xf32> to vector<128x512xf32>
    %184 = arith.addf %181, %183 : vector<128x512xf32>
    %cst_50 = arith.constant 5.000000e-01 : f32
    %185 = vector.broadcast %cst_50 : f32 to vector<128x512xf32>
    %186 = arith.mulf %185, %184 : vector<128x512xf32>
    %cst_51 = arith.constant 0.707106769 : f32
    %187 = vector.broadcast %cst_51 : f32 to vector<128x512xf32>
    %188 = arith.mulf %184, %187 : vector<128x512xf32>
    %189 = math.erf %188 : vector<128x512xf32>
    %cst_52 = arith.constant 1.000000e+00 : f32
    %190 = vector.broadcast %cst_52 : f32 to vector<128x512xf32>
    %191 = arith.addf %190, %189 : vector<128x512xf32>
    %192 = arith.mulf %186, %191 : vector<128x512xf32>
    %c0_53 = arith.constant 0 : index
    %c0_54 = arith.constant 0 : index
    %193 = vector.load %arg11[%c0_53, %c0_54] : memref<512x128xbf16, #tpu.memory_space<vmem>>, vector<512x128xbf16>
    %194 = arith.truncf %192 : vector<128x512xf32> to vector<128x512xbf16>
    %cst_55 = arith.constant dense<0.000000e+00> : vector<128x128xf32>
    %195 = tpu.matmul %194, %193, %cst_55 {dimension_numbers = #tpu.dot_dimension_numbers<[1], [0], [0], [1], [0, 0, 1, 1], [], []>} : vector<128x512xbf16>, vector<512x128xbf16>, vector<128x128xf32> -> vector<128x128xf32>
    %196 = vector.extract_strided_slice %2 {offsets = [11, 0], sizes = [1, 128], strides = [1, 1]} : vector<18x128xf32> to vector<1x128xf32>
    %197 = vector.broadcast %196 : vector<1x128xf32> to vector<128x128xf32>
    %198 = arith.addf %195, %197 : vector<128x128xf32>
    %c0_56 = arith.constant 0 : index
    %c0_57 = arith.constant 0 : index
    %199 = vector.load %arg12[%c0_56, %c0_57] : memref<128x384xbf16, #tpu.memory_space<vmem>>, vector<128x384xbf16>
    %200 = vector.extract_strided_slice %2 {offsets = [12, 0], sizes = [1, 128], strides = [1, 1]} : vector<18x128xf32> to vector<1x128xf32>
    %201 = vector.extract_strided_slice %2 {offsets = [13, 0], sizes = [1, 128], strides = [1, 1]} : vector<18x128xf32> to vector<1x128xf32>
    %202 = vector.extract_strided_slice %2 {offsets = [14, 0], sizes = [1, 128], strides = [1, 1]} : vector<18x128xf32> to vector<1x128xf32>
    %c0_58 = arith.constant 0 : index
    %c0_59 = arith.constant 0 : index
    %203 = vector.load %arg13[%c0_58, %c0_59] : memref<128x384xbf16, #tpu.memory_space<vmem>>, vector<128x384xbf16>
    %204 = vector.extract_strided_slice %2 {offsets = [15, 0], sizes = [1, 128], strides = [1, 1]} : vector<18x128xf32> to vector<1x128xf32>
    %205 = vector.extract_strided_slice %2 {offsets = [16, 0], sizes = [1, 128], strides = [1, 1]} : vector<18x128xf32> to vector<1x128xf32>
    %206 = vector.extract_strided_slice %2 {offsets = [17, 0], sizes = [1, 128], strides = [1, 1]} : vector<18x128xf32> to vector<1x128xf32>
    %207 = arith.truncf %198 : vector<128x128xf32> to vector<128x128xbf16>
    %cst_60 = arith.constant dense<0.000000e+00> : vector<128x384xf32>
    %208 = tpu.matmul %207, %199, %cst_60 {dimension_numbers = #tpu.dot_dimension_numbers<[1], [0], [0], [1], [0, 0, 1, 1], [], []>} : vector<128x128xbf16>, vector<128x384xbf16>, vector<128x384xf32> -> vector<128x384xf32>
    %209 = vector.extract_strided_slice %208 {offsets = [0, 0], sizes = [128, 128], strides = [1, 1]} : vector<128x384xf32> to vector<128x128xf32>
    %210 = vector.extract_strided_slice %208 {offsets = [0, 128], sizes = [128, 128], strides = [1, 1]} : vector<128x384xf32> to vector<128x128xf32>
    %211 = vector.extract_strided_slice %208 {offsets = [0, 256], sizes = [128, 128], strides = [1, 1]} : vector<128x384xf32> to vector<128x128xf32>
    %212 = vector.extract_strided_slice %209 {offsets = [127, 0], sizes = [1, 128], strides = [1, 1]} : vector<128x128xf32> to vector<1x128xf32>
    %213 = vector.extract_strided_slice %209 {offsets = [0, 0], sizes = [127, 128], strides = [1, 1]} : vector<128x128xf32> to vector<127x128xf32>
    %214 = tpu.concatenate %212, %213 in 0 : vector<1x128xf32>, vector<127x128xf32> -> vector<128x128xf32>
    %cst_61 = arith.constant 0.000000e+00 : f32
    %215 = vector.shape_cast %21 : vector<128x1xi1> to vector<128x1xi1>
    %216 = vector.broadcast %215 : vector<128x1xi1> to vector<128x128xi1>
    %217 = vector.broadcast %cst_61 : f32 to vector<128x128xf32>
    %218 = arith.select %216, %217, %214 : vector<128x128xi1>, vector<128x128xf32>
    %219 = vector.extract_strided_slice %211 {offsets = [1, 0], sizes = [127, 128], strides = [1, 1]} : vector<128x128xf32> to vector<127x128xf32>
    %220 = vector.extract_strided_slice %211 {offsets = [0, 0], sizes = [1, 128], strides = [1, 1]} : vector<128x128xf32> to vector<1x128xf32>
    %221 = tpu.concatenate %219, %220 in 0 : vector<127x128xf32>, vector<1x128xf32> -> vector<128x128xf32>
    %cst_62 = arith.constant 0.000000e+00 : f32
    %222 = vector.shape_cast %23 : vector<128x1xi1> to vector<128x1xi1>
    %223 = vector.broadcast %222 : vector<128x1xi1> to vector<128x128xi1>
    %224 = vector.broadcast %cst_62 : f32 to vector<128x128xf32>
    %225 = arith.select %223, %224, %221 : vector<128x128xi1>, vector<128x128xf32>
    %226 = arith.addf %218, %210 : vector<128x128xf32>
    %227 = arith.addf %226, %225 : vector<128x128xf32>
    %228 = vector.broadcast %200 : vector<1x128xf32> to vector<128x128xf32>
    %229 = arith.addf %227, %228 : vector<128x128xf32>
    %230 = vector.broadcast %201 : vector<1x128xf32> to vector<128x128xf32>
    %231 = arith.mulf %229, %230 : vector<128x128xf32>
    %232 = vector.broadcast %202 : vector<1x128xf32> to vector<128x128xf32>
    %233 = arith.addf %231, %232 : vector<128x128xf32>
    %cst_63 = arith.constant 0.000000e+00 : f32
    %234 = vector.broadcast %cst_63 : f32 to vector<128x128xf32>
    %235 = arith.maximumf %233, %234 : vector<128x128xf32>
    %236 = arith.truncf %235 : vector<128x128xf32> to vector<128x128xbf16>
    %cst_64 = arith.constant dense<0.000000e+00> : vector<128x384xf32>
    %237 = tpu.matmul %236, %203, %cst_64 {dimension_numbers = #tpu.dot_dimension_numbers<[1], [0], [0], [1], [0, 0, 1, 1], [], []>} : vector<128x128xbf16>, vector<128x384xbf16>, vector<128x384xf32> -> vector<128x384xf32>
    %238 = vector.extract_strided_slice %237 {offsets = [0, 0], sizes = [128, 128], strides = [1, 1]} : vector<128x384xf32> to vector<128x128xf32>
    %239 = vector.extract_strided_slice %237 {offsets = [0, 128], sizes = [128, 128], strides = [1, 1]} : vector<128x384xf32> to vector<128x128xf32>
    %240 = vector.extract_strided_slice %237 {offsets = [0, 256], sizes = [128, 128], strides = [1, 1]} : vector<128x384xf32> to vector<128x128xf32>
    %241 = vector.extract_strided_slice %238 {offsets = [127, 0], sizes = [1, 128], strides = [1, 1]} : vector<128x128xf32> to vector<1x128xf32>
    %242 = vector.extract_strided_slice %238 {offsets = [0, 0], sizes = [127, 128], strides = [1, 1]} : vector<128x128xf32> to vector<127x128xf32>
    %243 = tpu.concatenate %241, %242 in 0 : vector<1x128xf32>, vector<127x128xf32> -> vector<128x128xf32>
    %cst_65 = arith.constant 0.000000e+00 : f32
    %244 = vector.shape_cast %21 : vector<128x1xi1> to vector<128x1xi1>
    %245 = vector.broadcast %244 : vector<128x1xi1> to vector<128x128xi1>
    %246 = vector.broadcast %cst_65 : f32 to vector<128x128xf32>
    %247 = arith.select %245, %246, %243 : vector<128x128xi1>, vector<128x128xf32>
    %248 = vector.extract_strided_slice %240 {offsets = [1, 0], sizes = [127, 128], strides = [1, 1]} : vector<128x128xf32> to vector<127x128xf32>
    %249 = vector.extract_strided_slice %240 {offsets = [0, 0], sizes = [1, 128], strides = [1, 1]} : vector<128x128xf32> to vector<1x128xf32>
    %250 = tpu.concatenate %248, %249 in 0 : vector<127x128xf32>, vector<1x128xf32> -> vector<128x128xf32>
    %cst_66 = arith.constant 0.000000e+00 : f32
    %251 = vector.shape_cast %23 : vector<128x1xi1> to vector<128x1xi1>
    %252 = vector.broadcast %251 : vector<128x1xi1> to vector<128x128xi1>
    %253 = vector.broadcast %cst_66 : f32 to vector<128x128xf32>
    %254 = arith.select %252, %253, %250 : vector<128x128xi1>, vector<128x128xf32>
    %255 = arith.addf %247, %239 : vector<128x128xf32>
    %256 = arith.addf %255, %254 : vector<128x128xf32>
    %257 = vector.broadcast %204 : vector<1x128xf32> to vector<128x128xf32>
    %258 = arith.addf %256, %257 : vector<128x128xf32>
    %259 = vector.broadcast %205 : vector<1x128xf32> to vector<128x128xf32>
    %260 = arith.mulf %258, %259 : vector<128x128xf32>
    %261 = vector.broadcast %206 : vector<1x128xf32> to vector<128x128xf32>
    %262 = arith.addf %260, %261 : vector<128x128xf32>
    %263 = arith.addf %262, %198 : vector<128x128xf32>
    %cst_67 = arith.constant 0.000000e+00 : f32
    %264 = vector.broadcast %cst_67 : f32 to vector<128x128xf32>
    %265 = arith.maximumf %263, %264 : vector<128x128xf32>
    %266 = vector.shape_cast %265 : vector<128x128xf32> to vector<8x16x128xf32>
    %c0_68 = arith.constant 0 : index
    %c0_69 = arith.constant 0 : index
    %c0_70 = arith.constant 0 : index
    %267 = vector.load %arg14[%c0_68, %c0_69, %c0_70] : memref<8x16x128xf32, #tpu.memory_space<vmem>>, vector<8x16x128xf32>
    tpu.vector_store %arg14[%c0_68, %c0_69, %c0_70], %266 {strides = array<i32>} : memref<8x16x128xf32, #tpu.memory_space<vmem>>, vector<8x16x128xf32>,
    return
  }
  func.func @transform_0(%arg0: i32) -> (i32, i32, i32) {
    %c0_i32 = arith.constant 0 : i32
    %c0_i32_0 = arith.constant 0 : i32
    %c0_i32_1 = arith.constant 0 : i32
    return %arg0, %c0_i32, %c0_i32_0 : i32, i32, i32
  }
  func.func @transform_1(%arg0: i32) -> (i32, i32) {
    %c0_i32 = arith.constant 0 : i32
    %c0_i32_0 = arith.constant 0 : i32
    %c0_i32_1 = arith.constant 0 : i32
    return %c0_i32, %c0_i32_0 : i32, i32
  }
  func.func @transform_2(%arg0: i32) -> (i32, i32) {
    %c0_i32 = arith.constant 0 : i32
    %c0_i32_0 = arith.constant 0 : i32
    %c0_i32_1 = arith.constant 0 : i32
    return %c0_i32, %c0_i32_0 : i32, i32
  }
  func.func @transform_3(%arg0: i32) -> (i32, i32) {
    %c0_i32 = arith.constant 0 : i32
    %c0_i32_0 = arith.constant 0 : i32
    %c0_i32_1 = arith.constant 0 : i32
    return %c0_i32, %c0_i32_0 : i32, i32
  }
  func.func @transform_4(%arg0: i32) -> (i32, i32) {
    %c0_i32 = arith.constant 0 : i32
    %c0_i32_0 = arith.constant 0 : i32
    %c0_i32_1 = arith.constant 0 : i32
    return %c0_i32, %c0_i32_0 : i32, i32
  }
  func.func @transform_5(%arg0: i32) -> (i32, i32) {
    %c0_i32 = arith.constant 0 : i32
    %c0_i32_0 = arith.constant 0 : i32
    %c0_i32_1 = arith.constant 0 : i32
    return %c0_i32, %c0_i32_0 : i32, i32
  }
  func.func @transform_6(%arg0: i32) -> (i32, i32) {
    %c0_i32 = arith.constant 0 : i32
    %c0_i32_0 = arith.constant 0 : i32
    %c0_i32_1 = arith.constant 0 : i32
    return %c0_i32, %c0_i32_0 : i32, i32
  }
  func.func @transform_7(%arg0: i32) -> (i32, i32) {
    %c0_i32 = arith.constant 0 : i32
    %c0_i32_0 = arith.constant 0 : i32
    %c0_i32_1 = arith.constant 0 : i32
    return %c0_i32, %c0_i32_0 : i32, i32
  }
  func.func @transform_8(%arg0: i32) -> (i32, i32) {
    %c0_i32 = arith.constant 0 : i32
    %c0_i32_0 = arith.constant 0 : i32
    %c0_i32_1 = arith.constant 0 : i32
    return %c0_i32, %c0_i32_0 : i32, i32
  }
  func.func @transform_9(%arg0: i32) -> (i32, i32) {
    %c0_i32 = arith.constant 0 : i32
    %c0_i32_0 = arith.constant 0 : i32
    %c0_i32_1 = arith.constant 0 : i32
    return %c0_i32, %c0_i32_0 : i32, i32
  }
  func.func @transform_10(%arg0: i32) -> (i32, i32) {
    %c0_i32 = arith.constant 0 : i32
    %c0_i32_0 = arith.constant 0 : i32
    %c0_i32_1 = arith.constant 0 : i32
    return %c0_i32, %c0_i32_0 : i32, i32
  }
  func.func @transform_11(%arg0: i32) -> (i32, i32) {
    %c0_i32 = arith.constant 0 : i32
    %c0_i32_0 = arith.constant 0 : i32
    %c0_i32_1 = arith.constant 0 : i32
    return %c0_i32, %c0_i32_0 : i32, i32
  }
  func.func @transform_12(%arg0: i32) -> (i32, i32) {
    %c0_i32 = arith.constant 0 : i32
    %c0_i32_0 = arith.constant 0 : i32
    %c0_i32_1 = arith.constant 0 : i32
    return %c0_i32, %c0_i32_0 : i32, i32
  }
  func.func @transform_13(%arg0: i32) -> (i32, i32, i32) {
    %c0_i32 = arith.constant 0 : i32
    %c0_i32_0 = arith.constant 0 : i32
    %c0_i32_1 = arith.constant 0 : i32
    return %arg0, %c0_i32, %c0_i32_0 : i32, i32, i32
  }
}

</mosaic_0001>

<bundles_post_ra>
// kernel: tpu_custom_call.1
= control target key start
LH: loop header
LB: loop body
LE: loop exit
PB: predicated region body
PF: predicated region fallthrough
CT: control target
= control target key end

     0   :  { %18 = vsyncpa [#allocation3], 0  ;;  %s12501_s0 = inlined_call_operand.hbm [shape: f32[8,16,128], index: 0, kind: input, shape index: {}]   ;;  %s12502_s1 = inlined_call_operand.hbm [shape: f32[18,128], index: 1, kind: input, shape index: {}]   ;;  %s12503_s2 = inlined_call_operand.vmem [shape: f32[1,384], index: 2, kind: input, shape index: {}]   ;;  %s12504_s3 = inlined_call_operand.vmem [shape: f32[1,512], index: 3, kind: input, shape index: {}]   ;;  %s12505_s4 = inlined_call_operand.hbm [shape: bf16[128,128], index: 4, kind: input, shape index: {}]   ;;  %s12506_s5 = inlined_call_operand.hbm [shape: bf16[128,384], index: 5, kind: input, shape index: {}]   ;;  %s12507_s6 = inlined_call_operand.hbm [shape: bf16[128,128], index: 6, kind: input, shape index: {}]   ;;  %s12508_s7 = inlined_call_operand.hbm [shape: bf16[128,384], index: 7, kind: input, shape index: {}]   ;;  %s12509_s8 = inlined_call_operand.hbm [shape: bf16[128,384], index: 8, kind: input, shape index: {}]   ;;  %s12510_s9 = inlined_call_operand.hbm [shape: bf16[128,512], index: 9, kind: input, shape index: {}]   ;;  %s12511_s10 = inlined_call_operand.hbm [shape: bf16[512,128], index: 10, kind: input, shape index: {}]   ;;  %s12512_s11 = inlined_call_operand.hbm [shape: bf16[128,384], index: 11, kind: input, shape index: {}]   ;;  %s12513_s12 = inlined_call_operand.hbm [shape: bf16[128,384], index: 12, kind: input, shape index: {}]   ;;  %s12514_s13 = inlined_call_operand.hbm [shape: f32[8,16,128], index: 13, kind: output, shape index: {}]  }
   0x1   :  { %19 = vsyncpa [#allocation6], 0 }
   0x2   :  { %20 = vsyncpa [#allocation9], 0 }
   0x3   :  { %21 = vsyncpa [#allocation12], 0 }
   0x4   :  { %22 = vsyncpa [#allocation15], 0 }
   0x5   :  { %23 = vsyncpa [#allocation18], 0 }
   0x6   :  { %24 = vsyncpa [#allocation4], 0  ;;  %s9609_s25 = smov [#allocation5]   ;;  %s9610_s27 = smov [#allocation8]  }
   0x7   :  { %s42_s26 = sshll.u32 %s9609_s25, 4  ;;  %s70_s28 = sshll.u32 %s9610_s27, 4  ;;  %s43_s26 = int_to_ptr.vmem [resolvable:$true] %s42_s26  ;;  %s9702_s28 = int_to_ptr.vmem [resolvable:$true] %s70_s28 }
   0x8   :  { %s9331_s14 = scalar_lea.hbm %s12502_s1, 384 }
   0x9   :  { %p9332_p0 = scmp.ne.s32.totalorder %s12502_s1, %s9331_s14  ;;  %p9335_p1 = scmp.lt.u32.totalorder %s9331_s14, %s12502_s1 }
   0xb   :  { %p9337_p2 = pnand %p9335_p1, %p9332_p0 }
   0xd   :  { %9340 = shalt.err (!%p9337_p2)
}
   0xe   :  { %s9341_s19 = scalar_lea.vmem %s43_s26, 384  ;;  %p9346_p4 = scmp.lt.s32.totalorder %s43_s26, %s43_s26 }
   0xf   :  { %p9342_p3 = scmp.ne.s32.totalorder %s43_s26, %s9341_s19  ;;  %p9347_p5 = scmp.lt.s32.totalorder %s9341_s19, %s9341_s19 }
  0x11   :  { %p9348_p6 = por %p9347_p5, %p9346_p4 }
  0x13   :  { %p9349_p7 = pnand %p9348_p6, %p9342_p3 }
  0x15   :  { %9352 = shalt.err (!%p9349_p7)
}
  0x16   :  { %s9611_s20 = smov 128   ;;  %s9612_s21 = smov 8  }
  0x17   :  { %48 = dma.hbm_to_vmem [thread:$0]  %s12502_s1, 384, %s43_s26, [#allocation6], %s9611_s20, %s9611_s20, %s9612_s21  }
  0x18   :  { %s9353_s27 = scalar_lea.hbm %s12506_s5, 3072 }
  0x19   :  { %p9354_p8 = scmp.ne.s32.totalorder %s12506_s5, %s9353_s27  ;;  %p9357_p9 = scmp.lt.u32.totalorder %s9353_s27, %s12506_s5 }
  0x1b   :  { %p9359_p10 = pnand %p9357_p9, %p9354_p8 }
  0x1d   :  { %9362 = shalt.err (!%p9359_p10)
}
  0x1e   :  { %s9363_s16 = scalar_lea.vmem %s9702_s28, 3072  ;;  %p9368_p12 = scmp.lt.s32.totalorder %s9702_s28, %s9702_s28 }
  0x1f   :  { %p9364_p11 = scmp.ne.s32.totalorder %s9702_s28, %s9363_s16  ;;  %p9369_p13 = scmp.lt.s32.totalorder %s9363_s16, %s9363_s16 }
  0x21   :  { %p9370_p0 = por %p9369_p13, %p9368_p12 }
  0x23   :  { %p9371_p1 = pnand %p9370_p0, %p9364_p11 }
  0x25   :  { %9374 = shalt.err (!%p9371_p1)
}
  0x26   :  { %s9613_s1 = smov 192   ;;  %s9614_s26 = smov 12  }
  0x27   :  { %76 = dma.hbm_to_vmem [thread:$0]  %s12506_s5, 3072, %s9702_s28, [#allocation9], %s9613_s1, %s9613_s1, %s9614_s26  }
  0x28   :  { %s9615_s19 = smov [#allocation11]   ;;  %s9616_s23 = smov [#allocation14]  }
  0x29   :  { %s94_s22 = sshll.u32 %s9615_s19, 4  ;;  %s118_s24 = sshll.u32 %s9616_s23, 4  ;;  %s95_s22 = int_to_ptr.vmem [resolvable:$true] %s94_s22  ;;  %s9739_s24 = int_to_ptr.vmem [resolvable:$true] %s118_s24 }
  0x2a   :  { %s9375_s29 = scalar_lea.hbm %s12508_s7, 3072 }
  0x2b   :  { %p9376_p2 = scmp.ne.s32.totalorder %s12508_s7, %s9375_s29  ;;  %p9379_p3 = scmp.lt.u32.totalorder %s9375_s29, %s12508_s7 }
  0x2d   :  { %p9381_p4 = pnand %p9379_p3, %p9376_p2 }
  0x2f   :  { %9384 = shalt.err (!%p9381_p4)
}
  0x30   :  { %s9385_s5 = scalar_lea.vmem %s95_s22, 3072  ;;  %p9390_p6 = scmp.lt.s32.totalorder %s95_s22, %s95_s22 }
  0x31   :  { %p9386_p5 = scmp.ne.s32.totalorder %s95_s22, %s9385_s5  ;;  %p9391_p7 = scmp.lt.s32.totalorder %s9385_s5, %s9385_s5 }
  0x33   :  { %p9392_p8 = por %p9391_p7, %p9390_p6 }
  0x35   :  { %p9393_p9 = pnand %p9392_p8, %p9386_p5 }
  0x37   :  { %9396 = shalt.err (!%p9393_p9)
}
  0x38   :  { %100 = dma.hbm_to_vmem [thread:$0]  %s12508_s7, 3072, %s95_s22, [#allocation12], %s9613_s1, %s9613_s1, %s9614_s26  }
  0x39   :  { %s9397_s23 = scalar_lea.hbm %s12510_s9, 4096 }
  0x3a   :  { %p9398_p10 = scmp.ne.s32.totalorder %s12510_s9, %s9397_s23  ;;  %p9401_p11 = scmp.lt.u32.totalorder %s9397_s23, %s12510_s9 }
  0x3c   :  { %p9403_p12 = pnand %p9401_p11, %p9398_p10 }
  0x3e   :  { %9406 = shalt.err (!%p9403_p12)
}
  0x3f   :  { %s9407_s14 = scalar_lea.vmem %s9739_s24, 4096  ;;  %p9412_p0 = scmp.lt.s32.totalorder %s9739_s24, %s9739_s24 }
  0x40   :  { %p9408_p13 = scmp.ne.s32.totalorder %s9739_s24, %s9407_s14  ;;  %p9413_p1 = scmp.lt.s32.totalorder %s9407_s14, %s9407_s14 }
  0x42   :  { %p9414_p2 = por %p9413_p1, %p9412_p0 }
  0x44   :  { %p9415_p3 = pnand %p9414_p2, %p9408_p13 }
  0x46   :  { %9418 = shalt.err (!%p9415_p3)
}
  0x47   :  { %s9617_s7 = smov 256   ;;  %s9618_s22 = smov 16  }
  0x48   :  { %124 = dma.hbm_to_vmem [thread:$0]  %s12510_s9, 4096, %s9739_s24, [#allocation15], %s9617_s7, %s9617_s7, %s9618_s22  }
  0x49   :  { %s9619_s5 = smov [#allocation17]   ;;  %s9620_s17 = smov [#allocation2]  }
  0x4a   :  { %s142_s28 = sshll.u32 %s9619_s5, 4  ;;  %s30_s18 = sshll.u32 %s9620_s17, 4  ;;  %s143_s28 = int_to_ptr.vmem [resolvable:$true] %s142_s28  ;;  %s9773_s18 = int_to_ptr.vmem [resolvable:$true] %s30_s18 }
  0x4b   :  { %s9419_s25 = scalar_lea.hbm %s12512_s11, 3072 }
  0x4c   :  { %p9420_p4 = scmp.ne.s32.totalorder %s12512_s11, %s9419_s25  ;;  %p9423_p5 = scmp.lt.u32.totalorder %s9419_s25, %s12512_s11 }
  0x4e   :  { %p9425_p6 = pnand %p9423_p5, %p9420_p4 }
  0x50   :  { %9428 = shalt.err (!%p9425_p6)
}
  0x51   :  { %s9429_s9 = scalar_lea.vmem %s143_s28, 3072  ;;  %p9434_p8 = scmp.lt.s32.totalorder %s143_s28, %s143_s28 }
  0x52   :  { %p9430_p7 = scmp.ne.s32.totalorder %s143_s28, %s9429_s9  ;;  %p9435_p9 = scmp.lt.s32.totalorder %s9429_s9, %s9429_s9 }
  0x54   :  { %p9436_p10 = por %p9435_p9, %p9434_p8 }
  0x56   :  { %p9437_p11 = pnand %p9436_p10, %p9430_p7 }
  0x58   :  { %9440 = shalt.err (!%p9437_p11)
}
  0x59   :  { %148 = dma.hbm_to_vmem [thread:$0]  %s12512_s11, 3072, %s143_s28, [#allocation18], %s9613_s1, %s9613_s1, %s9614_s26  }
  0x5a   :  { %s9441_s16 = scalar_lea.hbm %s12501_s0, 2048 }
  0x5b   :  { %p9442_p12 = scmp.ne.s32.totalorder %s12501_s0, %s9441_s16  ;;  %p9445_p13 = scmp.lt.u32.totalorder %s9441_s16, %s12501_s0 }
  0x5d   :  { %p9447_p0 = pnand %p9445_p13, %p9442_p12 }
  0x5f   :  { %9450 = shalt.err (!%p9447_p0)
}
  0x60   :  { %s9451_s25 = scalar_lea.vmem %s9773_s18, 2048  ;;  %p9456_p2 = scmp.lt.s32.totalorder %s9773_s18, %s9773_s18 }
  0x61   :  { %p9452_p1 = scmp.ne.s32.totalorder %s9773_s18, %s9451_s25  ;;  %p9457_p3 = scmp.lt.s32.totalorder %s9451_s25, %s9451_s25 }
  0x63   :  { %p9458_p4 = por %p9457_p3, %p9456_p2 }
  0x65   :  { %p9459_p5 = pnand %p9458_p4, %p9452_p1 }
  0x67   :  { %9462 = shalt.err (!%p9459_p5)
}
  0x68   :  { %36 = dma.hbm_to_vmem [thread:$0]  %s12501_s0, 2048, %s9773_s18, [#allocation3], %s9611_s20, %s9611_s20, %s9612_s21  }
  0x69   :  { %s9621_s27 = smov [#allocation7]   ;;  %s9463_s9 = scalar_lea.hbm %s12505_s4, 1024 }
  0x6a   :  { %s58_s29 = sshll.u32 %s9621_s27, 4  ;;  %p9464_p6 = scmp.ne.s32.totalorder %s12505_s4, %s9463_s9  ;;  %s59_s29 = int_to_ptr.vmem [resolvable:$true] %s58_s29 }
  0x6b   :  { %p9467_p7 = scmp.lt.u32.totalorder %s9463_s9, %s12505_s4 }
  0x6d   :  { %p9469_p8 = pnand %p9467_p7, %p9464_p6 }
  0x6f   :  { %9472 = shalt.err (!%p9469_p8)
}
  0x70   :  { %s9473_s16 = scalar_lea.vmem %s59_s29, 1024  ;;  %p9478_p10 = scmp.lt.s32.totalorder %s59_s29, %s59_s29 }
  0x71   :  { %p9474_p9 = scmp.ne.s32.totalorder %s59_s29, %s9473_s16  ;;  %p9479_p11 = scmp.lt.s32.totalorder %s9473_s16, %s9473_s16 }
  0x73   :  { %p9480_p12 = por %p9479_p11, %p9478_p10 }
  0x75   :  { %p9481_p13 = pnand %p9480_p12, %p9474_p9 }
  0x77   :  { %9484 = shalt.err (!%p9481_p13)
}
  0x78   :  { %s9622_s0 = smov 64   ;;  %s9623_s18 = smov 4  }
  0x79   :  { %64 = dma.hbm_to_vmem [thread:$0]  %s12505_s4, 1024, %s59_s29, [#allocation6], %s9622_s0, %s9622_s0, %s9623_s18  }
  0x7a   :  { %s9624_s19 = smov [#allocation10]   ;;  %s9625_s25 = smov [#allocation13]  }
  0x7b   :  { %s82_s23 = sshll.u32 %s9624_s19, 4  ;;  %s106_s11 = sshll.u32 %s9625_s25, 4  ;;  %s83_s23 = int_to_ptr.vmem [resolvable:$true] %s82_s23  ;;  %s107_s11 = int_to_ptr.vmem [resolvable:$true] %s106_s11 }
  0x7c   :  { %s9485_s30 = scalar_lea.hbm %s12507_s6, 1024 }
  0x7d   :  { %p9486_p0 = scmp.ne.s32.totalorder %s12507_s6, %s9485_s30  ;;  %p9489_p1 = scmp.lt.u32.totalorder %s9485_s30, %s12507_s6 }
  0x7f   :  { %p9491_p2 = pnand %p9489_p1, %p9486_p0 }
  0x81   :  { %9494 = shalt.err (!%p9491_p2)
}
  0x82   :  { %s9495_s4 = scalar_lea.vmem %s83_s23, 1024  ;;  %p9500_p4 = scmp.lt.s32.totalorder %s83_s23, %s83_s23 }
  0x83   :  { %p9496_p3 = scmp.ne.s32.totalorder %s83_s23, %s9495_s4  ;;  %p9501_p5 = scmp.lt.s32.totalorder %s9495_s4, %s9495_s4 }
  0x85   :  { %p9502_p6 = por %p9501_p5, %p9500_p4 }
  0x87   :  { %p9503_p7 = pnand %p9502_p6, %p9496_p3 }
  0x89   :  { %9506 = shalt.err (!%p9503_p7)
}
  0x8a   :  { %88 = dma.hbm_to_vmem [thread:$0]  %s12507_s6, 1024, %s83_s23, [#allocation9], %s9622_s0, %s9622_s0, %s9623_s18  }
  0x8b   :  { %s9507_s5 = scalar_lea.hbm %s12509_s8, 3072 }
  0x8c   :  { %p9508_p8 = scmp.ne.s32.totalorder %s12509_s8, %s9507_s5  ;;  %p9511_p9 = scmp.lt.u32.totalorder %s9507_s5, %s12509_s8 }
  0x8e   :  { %p9513_p10 = pnand %p9511_p9, %p9508_p8 }
  0x90   :  { %9516 = shalt.err (!%p9513_p10)
}
  0x91   :  { %s9517_s27 = scalar_lea.vmem %s107_s11, 3072  ;;  %p9522_p12 = scmp.lt.s32.totalorder %s107_s11, %s107_s11 }
  0x92   :  { %p9518_p11 = scmp.ne.s32.totalorder %s107_s11, %s9517_s27  ;;  %p9523_p13 = scmp.lt.s32.totalorder %s9517_s27, %s9517_s27 }
  0x94   :  { %p9524_p0 = por %p9523_p13, %p9522_p12 }
  0x96   :  { %p9525_p1 = pnand %p9524_p0, %p9518_p11 }
  0x98   :  { %9528 = shalt.err (!%p9525_p1)
}
  0x99   :  { %112 = dma.hbm_to_vmem [thread:$0]  %s12509_s8, 3072, %s107_s11, [#allocation12], %s9613_s1, %s9613_s1, %s9614_s26  }
  0x9a   :  { %s9626_s30 = smov [#allocation16]   ;;  %s9627_s9 = smov [#allocation19]  }
  0x9b   :  { %s130_s14 = sshll.u32 %s9626_s30, 4  ;;  %s154_s24 = sshll.u32 %s9627_s9, 4  ;;  %s131_s14 = int_to_ptr.vmem [resolvable:$true] %s130_s14  ;;  %s155_s24 = int_to_ptr.vmem [resolvable:$true] %s154_s24 }
  0x9c   :  { %s9529_s29 = scalar_lea.hbm %s12511_s10, 4096 }
  0x9d   :  { %p9530_p2 = scmp.ne.s32.totalorder %s12511_s10, %s9529_s29  ;;  %p9533_p3 = scmp.lt.u32.totalorder %s9529_s29, %s12511_s10 }
  0x9f   :  { %p9535_p4 = pnand %p9533_p3, %p9530_p2 }
  0xa1   :  { %9538 = shalt.err (!%p9535_p4)
}
  0xa2   :  { %s9539_s8 = scalar_lea.vmem %s131_s14, 4096  ;;  %p9544_p6 = scmp.lt.s32.totalorder %s131_s14, %s131_s14 }
  0xa3   :  { %p9540_p5 = scmp.ne.s32.totalorder %s131_s14, %s9539_s8  ;;  %p9545_p7 = scmp.lt.s32.totalorder %s9539_s8, %s9539_s8 }
  0xa5   :  { %p9546_p8 = por %p9545_p7, %p9544_p6 }
  0xa7   :  { %p9547_p9 = pnand %p9546_p8, %p9540_p5 }
  0xa9   :  { %9550 = shalt.err (!%p9547_p9)
}
  0xaa   :  { %136 = dma.hbm_to_vmem [thread:$0]  %s12511_s10, 4096, %s131_s14, [#allocation15], %s9622_s0, %s9622_s0, %s9623_s18  }
  0xab   :  { %s9551_s28 = scalar_lea.hbm %s12513_s12, 3072 }
  0xac   :  { %p9552_p10 = scmp.ne.s32.totalorder %s12513_s12, %s9551_s28  ;;  %p9555_p11 = scmp.lt.u32.totalorder %s9551_s28, %s12513_s12 }
  0xae   :  { %p9557_p12 = pnand %p9555_p11, %p9552_p10 }
  0xb0   :  { %9560 = shalt.err (!%p9557_p12)
}
  0xb1   :  { %s9561_s9 = scalar_lea.vmem %s155_s24, 3072  ;;  %p9566_p0 = scmp.lt.s32.totalorder %s155_s24, %s155_s24 }
  0xb2   :  { %p9562_p13 = scmp.ne.s32.totalorder %s155_s24, %s9561_s9  ;;  %p9567_p1 = scmp.lt.s32.totalorder %s9561_s9, %s9561_s9 }
  0xb4   :  { %p9568_p2 = por %p9567_p1, %p9566_p0 }
  0xb6   :  { %p9569_p3 = pnand %p9568_p2, %p9562_p13 }
  0xb8   :  { %9572 = shalt.err (!%p9569_p3)
}
  0xb9   :  { %160 = dma.hbm_to_vmem [thread:$0]  %s12513_s12, 3072, %s155_s24, [#allocation18], %s9613_s1, %s9613_s1, %s9614_s26  }
  0xba   :  { %9595 = dma.done.wait [#allocation3], 2048  }
  0xbb   :  { %9596 = vsyncadd [#allocation3], 4294965248 }
  0xbc   :  { %9597 = dma.done.wait [#allocation6], 1408  }
  0xbd   :  { %9598 = vsyncadd [#allocation6], 4294965888 }
  0xbe   :  { %9599 = dma.done.wait [#allocation9], 4096  }
  0xbf   :  { %9600 = vsyncadd [#allocation9], 4294963200 }
  0xc0   :  { %9601 = dma.done.wait [#allocation12], 6144  }
  0xc1   :  { %9602 = vsyncadd [#allocation12], 4294961152 }
  0xc2   :  { %9603 = dma.done.wait [#allocation15], 8192  }
  0xc3   :  { %9604 = vsyncadd [#allocation15], 4294959104 }
  0xc4   :  { %9605 = dma.done.wait [#allocation18], 6144  }
  0xc5   :  { %9606 = vsyncadd [#allocation18], 4294961152  ;;  %v195_v0 = vld [vmem:[#allocation2] sm:$0xff]  ;;  %v197_v1 = vld [vmem:[#allocation2 + $0x10] sm:$0xff] }
  0xc6   :  { %455 = vadd.xlane.f32.xlu0 %v195_v0  ;;  %459 = vadd.xlane.f32.xlu1 %v197_v1  ;;  %v196_v2 = vld [vmem:[#allocation2 + $0x8] sm:$0xff]  ;;  %v198_v3 = vld [vmem:[#allocation2 + $0x18] sm:$0xff]  ;;  %v199_v4 = vld [vmem:[#allocation2 + $0x20] sm:$0xff] }
  0xc7   :  { %v200_v5 = vld [vmem:[#allocation2 + $0x28] sm:$0xff]  ;;  %v201_v6 = vld [vmem:[#allocation2 + $0x30] sm:$0xff]  ;;  %v202_v7 = vld [vmem:[#allocation2 + $0x38] sm:$0xff] }
  0xc8   :  { %v203_v8 = vld [vmem:[#allocation2 + $0x40] sm:$0xff]  ;;  %v9885_v9 = vld [vmem:[#allocation2 + $0x48] sm:$0xff]  ;;  %v9896_v22 = vld [vmem:[#allocation2 + $0x50] sm:$0xff] }
  0xc9   :  { %v9905_v27 = vld [vmem:[#allocation2 + $0x58] sm:$0xff]  ;;  %v9910_v32 = vld [vmem:[#allocation2 + $0x60] sm:$0xff]  ;;  %v9915_v37 = vld [vmem:[#allocation2 + $0x70] sm:$0xff] }
  0xca   :  { %457 = vadd.xlane.f32.xlu0 %v196_v2  ;;  %461 = vadd.xlane.f32.xlu1 %v198_v3  ;;  %v9917_v38 = vld [vmem:[#allocation2 + $0x68] sm:$0xff]  ;;  %v9927_v45 = vld [vmem:[#allocation2 + $0x78] sm:$0xff]  ;;  %v8756_v57 = vld [vmem:[#allocation8 + $0x1c] ss:$12 sps:$4 sm:$0xff]  }
  0xcb   :  { %v8753_v52 = vld [vmem:[#allocation8 + $0x4] ss:$12 sps:$4 sm:$0xff]   ;;  %v8755_v56 = vld [vmem:[#allocation8] ss:$12 sps:$4 sm:$0xff]   ;;  %v8761_v61 = vld [vmem:[#allocation8 + $0x8] ss:$12 sps:$4 sm:$0xff]  }
  0xcc   :  { %969 = vmatprep.subr.bf16.mxu0 %v8753_v52  ;;  %v8758_v59 = vld [vmem:[#allocation8 + $0x18] ss:$12 sps:$4 sm:$0xff]   ;;  %v8759_v60 = vld [vmem:[#allocation8 + $0x34] ss:$12 sps:$4 sm:$0xff]   ;;  %v8762_v62 = vld [vmem:[#allocation8 + $0x30] ss:$12 sps:$4 sm:$0xff]   ;;  %8200 = vmatprep.subr.bf16.mxu1 %v8761_v61 }
  0xcd   :  { %970 = vmatpush1.bf16.msra.mxu0 %v8755_v56  ;;  %8201 = vmatpush3.bf16.msra.mxu1 %v8761_v61  ;;  %v8763_v63 = vld [vmem:[#allocation8 + $0x4c] ss:$12 sps:$4 sm:$0xff]  }
  0xce   :  { %463 = vadd.xlane.f32.xlu0 %v199_v4  ;;  %465 = vadd.xlane.f32.xlu1 %v200_v5 }
  0xcf   :  { %971 = vmatprep.subr.bf16.mxu0 %v8756_v57 }
  0xd1   :  { %972 = vmatpush1.bf16.msra.mxu0 %v8758_v59  ;;  %v214_v59 = vlaneseq }
  0xd2   :  { %467 = vadd.xlane.f32.xlu0 %v201_v6  ;;  %469 = vadd.xlane.f32.xlu1 %v202_v7 }
  0xd3   :  { %973 = vmatprep.subr.bf16.mxu0 %v8759_v60 }
  0xd5   :  { %974 = vmatpush1.bf16.msra.mxu0 %v8762_v62 }
  0xd6   :  { %471 = vadd.xlane.f32.xlu0 %v203_v8  ;;  %473 = vadd.xlane.f32.xlu1 %v9885_v9 }
  0xd7   :  { %975 = vmatprep.subr.bf16.mxu0 %v8763_v63 }
 0x153   :  { %v456_v10 = vpop.xlane.xlu0 %455  ;;  %v460_v11 = vpop.xlane.xlu1 %459 }
 0x154   :  { %v488_v12 = vmul.f32 0.0078125, %v456_v10  ;;  %v490_v14 = vmul.f32 0.0078125, %v460_v11  ;;  %v8778_v10 = vld [vmem:[#allocation8 + $0x90] ss:$12 sps:$4 sm:$0xff]   ;;  %v8779_v11 = vld [vmem:[#allocation8 + $0xac] ss:$12 sps:$4 sm:$0xff]  }
 0x156   :  { %v9888_v13 = vsub.f32 %v195_v0, %v488_v12  ;;  %v9894_v21 = vsub.f32 %v197_v1, %v490_v14  ;;  %v8765_v0 = vld [vmem:[#allocation8 + $0x20] ss:$12 sps:$4 sm:$0xff]   ;;  %v8766_v1 = vld [vmem:[#allocation8 + $0x48] ss:$12 sps:$4 sm:$0xff]  }
 0x157   :  { %v458_v15 = vpop.xlane.xlu0 %457  ;;  %v462_v16 = vpop.xlane.xlu1 %461  ;;  %8202 = vmatprep.subr.bf16.mxu1 %v8765_v0  ;;  %976 = vmatpush1.bf16.msra.mxu0 %v8766_v1  ;;  %v8781_v12 = vld [vmem:[#allocation8 + $0x80] ss:$12 sps:$4 sm:$0xff]   ;;  %v8782_v14 = vld [vmem:[#allocation8 + $0xa8] ss:$12 sps:$4 sm:$0xff]  }
 0x158   :  { %v489_v17 = vmul.f32 0.0078125, %v458_v15  ;;  %v520_v18 = vmul.f32 %v9888_v13, %v9888_v13  ;;  %v491_v20 = vmul.f32 0.0078125, %v462_v16  ;;  %v522_v25 = vmul.f32 %v9894_v21, %v9894_v21  ;;  %8203 = vmatpush3.bf16.msra.mxu1 %v8765_v0  ;;  %v8783_v16 = vld [vmem:[#allocation8 + $0x98] ss:$12 sps:$4 sm:$0xff]  }
 0x159   :  { %v12517_v15 = vmov 0  }
 0x15a   :  { %536 = vadd.xlane.f32.xlu0 %v520_v18  ;;  %v9892_v19 = vsub.f32 %v196_v2, %v489_v17  ;;  %v9903_v26 = vsub.f32 %v198_v3, %v491_v20  ;;  %v8767_v2 = vld [vmem:[#allocation8 + $0x64] ss:$12 sps:$4 sm:$0xff]   ;;  %1001 = vmatprep.mubr.bf16.mxu0 %v12517_v15 }
 0x15b   :  { %v464_v23 = vpop.xlane.xlu0 %463  ;;  %v466_v28 = vpop.xlane.xlu1 %465  ;;  %v8769_v3 = vld [vmem:[#allocation8 + $0x38] ss:$12 sps:$4 sm:$0xff]   ;;  %977 = vmatprep.subr.bf16.mxu0 %v8767_v2  ;;  %v8784_v17 = vld [vmem:[#allocation8 + $0xb0] ss:$12 sps:$4 sm:$0xff]  }
 0x15c   :  { %v521_v24 = vmul.f32 %v9892_v19, %v9892_v19  ;;  %v523_v30 = vmul.f32 %v9903_v26, %v9903_v26  ;;  %v492_v31 = vmul.f32 0.0078125, %v464_v23  ;;  %v493_v33 = vmul.f32 0.0078125, %v466_v28  ;;  %8204 = vmatprep.subr.bf16.mxu1 %v8769_v3 }
 0x15d   :  { %8205 = vmatpush3.bf16.msra.mxu1 %v8769_v3 }
 0x15e   :  { %475 = vadd.xlane.f32.xlu0 %v9896_v22  ;;  %538 = vadd.xlane.f32.xlu1 %v521_v24  ;;  %v9913_v36 = vsub.f32 %v199_v4, %v492_v31  ;;  %v9919_v40 = vsub.f32 %v200_v5, %v493_v33  ;;  %v8770_v4 = vld [vmem:[#allocation8 + $0x60] ss:$12 sps:$4 sm:$0xff]   ;;  %v8771_v5 = vld [vmem:[#allocation8 + $0x7c] ss:$12 sps:$4 sm:$0xff]  }
 0x15f   :  { %v468_v29 = vpop.xlane.xlu0 %467  ;;  %v470_v34 = vpop.xlane.xlu1 %469  ;;  %978 = vmatpush1.bf16.msra.mxu0 %v8770_v4 }
 0x160   :  { %v494_v35 = vmul.f32 0.0078125, %v468_v29  ;;  %v524_v41 = vmul.f32 %v9913_v36, %v9913_v36  ;;  %v495_v42 = vmul.f32 0.0078125, %v470_v34  ;;  %v525_v47 = vmul.f32 %v9919_v40, %v9919_v40  ;;  %979 = vmatprep.subr.bf16.mxu0 %v8771_v5 }
 0x162   :  { %540 = vadd.xlane.f32.xlu0 %v522_v25  ;;  %477 = vadd.xlane.f32.xlu1 %v9905_v27  ;;  %v9925_v44 = vsub.f32 %v201_v6, %v494_v35  ;;  %v9934_v50 = vsub.f32 %v202_v7, %v495_v42  ;;  %v8773_v6 = vld [vmem:[#allocation8 + $0x50] ss:$12 sps:$4 sm:$0xff]   ;;  %v8774_v7 = vld [vmem:[#allocation8 + $0x78] ss:$12 sps:$4 sm:$0xff]  }
 0x163   :  { %v472_v39 = vpop.xlane.xlu0 %471  ;;  %v474_v46 = vpop.xlane.xlu1 %473  ;;  %8206 = vmatprep.subr.bf16.mxu1 %v8773_v6  ;;  %980 = vmatpush1.bf16.msra.mxu0 %v8774_v7 }
 0x164   :  { %v496_v43 = vmul.f32 0.0078125, %v472_v39  ;;  %v526_v48 = vmul.f32 %v9925_v44, %v9925_v44  ;;  %v497_v49 = vmul.f32 0.0078125, %v474_v46  ;;  %v527_v53 = vmul.f32 %v9934_v50, %v9934_v50  ;;  %8207 = vmatpush3.bf16.msra.mxu1 %v8773_v6 }
 0x166   :  { %479 = vadd.xlane.f32.xlu0 %v9910_v32  ;;  %542 = vadd.xlane.f32.xlu1 %v523_v30  ;;  %v9936_v51 = vsub.f32 %v203_v8, %v496_v43  ;;  %v9943_v55 = vsub.f32 %v9885_v9, %v497_v49  ;;  %v8775_v8 = vld [vmem:[#allocation8 + $0x94] ss:$12 sps:$4 sm:$0xff]  }
 0x167   :  { %v8777_v9 = vld [vmem:[#allocation8 + $0x68] ss:$12 sps:$4 sm:$0xff]   ;;  %981 = vmatprep.subr.bf16.mxu0 %v8775_v8 }
 0x168   :  { %v528_v54 = vmul.f32 %v9936_v51, %v9936_v51  ;;  %v529_v58 = vmul.f32 %v9943_v55, %v9943_v55  ;;  %8208 = vmatprep.subr.bf16.mxu1 %v8777_v9  ;;  %982 = vmatpush1.bf16.msra.mxu0 %v8778_v10 }
 0x169   :  { %8209 = vmatpush3.bf16.msra.mxu1 %v8777_v9  ;;  %983 = vmatprep.subr.bf16.mxu0 %v8779_v11  ;;  %v9988_v11 = vshrl.u32 %v214_v59, 7 }
 0x16a   :  { %483 = vadd.xlane.f32.xlu0 %v9915_v37  ;;  %481 = vadd.xlane.f32.xlu1 %v9917_v38 }
 0x16b   :  { %8210 = vmatprep.subr.bf16.mxu1 %v8781_v12  ;;  %12602 = vst [vmem:[#allocation28_spill] sm:$0xff] %v9988_v11 }
 0x16c   :  { %984 = vmatpush1.bf16.msra.mxu0 %v8782_v14 }
 0x16d   :  { %8211 = vmatpush3.bf16.msra.mxu1 %v8781_v12 }
 0x16e   :  { %485 = vadd.xlane.f32.xlu1 %v9927_v45  ;;  %544 = vadd.xlane.f32.xlu0 %v524_v41 }
 0x16f   :  { %8212 = vmatprep.subr.bf16.mxu1 %v8783_v16 }
 0x171   :  { %8213 = vmatpush3.bf16.msra.mxu1 %v8783_v16 }
 0x172   :  { %546 = vadd.xlane.f32.xlu1 %v525_v47  ;;  %548 = vadd.xlane.f32.xlu0 %v526_v48 }
 0x173   :  { %8214 = vmatprep.subr.bf16.mxu1 %v8784_v17 }
 0x175   :  { %8215 = vmatpush3.bf16.msra.mxu1 %v8784_v17 }
 0x176   :  { %550 = vadd.xlane.f32.xlu1 %v527_v53  ;;  %552 = vadd.xlane.f32.xlu0 %v528_v54 }
 0x17a   :  { %554 = vadd.xlane.f32.xlu1 %v529_v58 }
 0x1e7   :  { %v537_v18 = vpop.xlane.xlu0 %536 }
 0x1e8   :  { %v568_v20 = vmul.f32 0.007874016, %v537_v18 }
 0x1ea   :  { %9009 = vrsqrt.f32 %v568_v20  ;;  %vm586_vm0 = vcmp.eq.f32.partialorder %v568_v20, inf  ;;  %v589_v49 = vand.u32 2147483648, %v568_v20  ;;  %vm588_vm1 = vcmp.eq.f32.partialorder %v568_v20, 0.0 }
 0x1eb   :  { %v539_v23 = vpop.xlane.xlu1 %538  ;;  %v476_v24 = vpop.xlane.xlu0 %475 }
 0x1ec   :  { %v569_v25 = vmul.f32 0.007874016, %v539_v23  ;;  %v498_v28 = vmul.f32 0.0078125, %v476_v24 }
 0x1ee   :  { %9011 = vrsqrt.f32 %v569_v25  ;;  %v9949_v31 = vsub.f32 %v9896_v22, %v498_v28  ;;  %vm593_vm2 = vcmp.eq.f32.partialorder %v569_v25, inf  ;;  %vm595_vm3 = vcmp.eq.f32.partialorder %v569_v25, 0.0 }
 0x1ef   :  { %v478_v29 = vpop.xlane.xlu1 %477  ;;  %v541_v30 = vpop.xlane.xlu0 %540  ;;  %v596_v0 = vand.u32 2147483648, %v569_v25 }
 0x1f0   :  { %v499_v33 = vmul.f32 0.0078125, %v478_v29  ;;  %v9951_v34 = vmul.f32 0.007874016, %v541_v30  ;;  %v530_v35 = vmul.f32 %v9949_v31, %v9949_v31 }
 0x1f2   :  { %9013 = vrsqrt.f32 %v9951_v34  ;;  %556 = vadd.xlane.f32.xlu0 %v530_v35  ;;  %v9957_v42 = vsub.f32 %v9905_v27, %v499_v33  ;;  %vm600_vm4 = vcmp.eq.f32.partialorder %v9951_v34, inf  ;;  %v603_v3 = vand.u32 2147483648, %v9951_v34 }
 0x1f3   :  { %v543_v39 = vpop.xlane.xlu1 %542  ;;  %v480_v41 = vpop.xlane.xlu0 %479  ;;  %vm602_vm5 = vcmp.eq.f32.partialorder %v9951_v34, 0.0 }
 0x1f4   :  { %v9010_v43 = vpop.eup %9009  ;;  %v9959_v46 = vmul.f32 0.007874016, %v543_v39  ;;  %v500_v47 = vmul.f32 0.0078125, %v480_v41  ;;  %v531_v48 = vmul.f32 %v9957_v42, %v9957_v42 }
 0x1f5   :  { %v585_v22 = vmul.f32 %v9010_v43, %v568_v20 }
 0x1f6   :  { %9015 = vrsqrt.f32 %v9959_v46  ;;  %558 = vadd.xlane.f32.xlu1 %v531_v48  ;;  %v9965_v27 = vsub.f32 %v9910_v32, %v500_v47  ;;  %vm607_vm6 = vcmp.eq.f32.partialorder %v9959_v46, inf  ;;  %vm609_vm7 = vcmp.eq.f32.partialorder %v9959_v46, 0.0  ;;  %v211_v47 = vld [vmem:[#allocation5] sm:$0xff] }
 0x1f7   :  { %v587_v52 = vsel %vm586_vm0, %v568_v20, %v585_v22  ;;  %v482_v53 = vpop.xlane.xlu1 %481  ;;  %v484_v54 = vpop.xlane.xlu0 %483  ;;  %v610_v23 = vand.u32 2147483648, %v9959_v46 }
 0x1f8   :  { %v9012_v56 = vpop.eup %9011  ;;  %v501_v57 = vmul.f32 0.0078125, %v482_v53  ;;  %v502_v58 = vmul.f32 0.0078125, %v484_v54  ;;  %v590_v60 = vsel %vm588_vm1, %v589_v49, %v587_v52  ;;  %v532_v62 = vmul.f32 %v9965_v27, %v9965_v27 }
 0x1f9   :  { %v592_v61 = vmul.f32 %v9012_v56, %v569_v25  ;;  %v696_v63 = vadd.f32 1e-06, %v590_v60  ;;  %v10022_v49 = vsub.s32 1, %v9988_v11 }
 0x1fa   :  { %v9970_v1 = vsub.f32 %v9917_v38, %v501_v57  ;;  %v9973_v2 = vsub.f32 %v9915_v37, %v502_v58  ;;  %560 = vadd.xlane.f32.xlu0 %v532_v62 }
 0x1fb   :  { %v594_v32 = vsel %vm593_vm2, %v569_v25, %v592_v61  ;;  %v486_v4 = vpop.xlane.xlu1 %485  ;;  %v545_v5 = vpop.xlane.xlu0 %544  ;;  %9017 = vrcp.f32 %v696_v63  ;;  %12604 = vst [vmem:[#allocation30_spill] sm:$0xff] %v10022_v49  ;;  %v10037_v60 = vrot.slane %v211_v47, %v10022_v49 }
 0x1fc   :  { %v9014_v6 = vpop.eup %9013  ;;  %v503_v7 = vmul.f32 0.0078125, %v486_v4  ;;  %v9977_v8 = vmul.f32 0.007874016, %v545_v5  ;;  %v533_v38 = vmul.f32 %v9970_v1, %v9970_v1  ;;  %v534_v37 = vmul.f32 %v9973_v2, %v9973_v2 }
 0x1fd   :  { %v599_v9 = vmul.f32 %v9014_v6, %v9951_v34  ;;  %v597_v10 = vsel %vm595_vm3, %v596_v0, %v594_v32 }
 0x1fe   :  { %9019 = vrsqrt.f32 %v9977_v8  ;;  %562 = vadd.xlane.f32.xlu1 %v533_v38  ;;  %564 = vadd.xlane.f32.xlu0 %v534_v37  ;;  %v9995_v17 = vsub.f32 %v9927_v45, %v503_v7  ;;  %v697_v18 = vadd.f32 1e-06, %v597_v10  ;;  %vm614_vm8 = vcmp.eq.f32.partialorder %v9977_v8, inf }
 0x1ff   :  { %v601_v12 = vsel %vm600_vm4, %v9951_v34, %v599_v9  ;;  %v547_v14 = vpop.xlane.xlu1 %546  ;;  %v549_v16 = vpop.xlane.xlu0 %548  ;;  %v10013_v34 = vsub.s32 0, %v9988_v11  ;;  %vm616_vm9 = vcmp.eq.f32.partialorder %v9977_v8, 0.0 }
 0x200   :  { %v9016_v20 = vpop.eup %9015  ;;  %v9998_v24 = vmul.f32 0.007874016, %v547_v14  ;;  %v10000_v25 = vmul.f32 0.007874016, %v549_v16  ;;  %v604_v28 = vsel %vm602_vm5, %v603_v3, %v601_v12  ;;  %v535_v30 = vmul.f32 %v9995_v17, %v9995_v17 }
 0x201   :  { %v606_v29 = vmul.f32 %v9016_v20, %v9959_v46  ;;  %9021 = vrcp.f32 %v697_v18  ;;  %v698_v33 = vadd.f32 1e-06, %v604_v28  ;;  %12603 = vst [vmem:[#allocation29_spill] sm:$0xff] %v10013_v34  ;;  %v10028_v54 = vrot.slane %v211_v47, %v10013_v34 }
 0x202   :  { %9023 = vrsqrt.f32 %v9998_v24  ;;  %566 = vadd.xlane.f32.xlu1 %v535_v30  ;;  %vm621_vm10 = vcmp.eq.f32.partialorder %v9998_v24, inf  ;;  %vm623_vm11 = vcmp.eq.f32.partialorder %v9998_v24, 0.0  ;;  %v624_v61 = vand.u32 2147483648, %v9998_v24 }
 0x203   :  { %v608_v45 = vsel %vm607_vm6, %v9959_v46, %v606_v29  ;;  %9025 = vrsqrt.f32 %v10000_v25  ;;  %v551_v35 = vpop.xlane.xlu1 %550  ;;  %v553_v39 = vpop.xlane.xlu0 %552  ;;  %v617_v46 = vand.u32 2147483648, %v9977_v8  ;;  %vm628_vm12 = vcmp.eq.f32.partialorder %v10000_v25, inf }
 0x204   :  { %v10015_v41 = vmul.f32 0.007874016, %v551_v35  ;;  %v10017_v43 = vmul.f32 0.007874016, %v553_v39  ;;  %v611_v22 = vsel %vm609_vm7, %v610_v23, %v608_v45  ;;  %9027 = vrcp.f32 %v698_v33 }
 0x205   :  { %v9018_v48 = vpop.eup %9017  ;;  %v699_v52 = vadd.f32 1e-06, %v611_v22  ;;  %vm630_vm13 = vcmp.eq.f32.partialorder %v10000_v25, 0.0  ;;  %v631_v32 = vand.u32 2147483648, %v10000_v25 }
 0x206   :  { %9029 = vrsqrt.f32 %v10015_v41  ;;  %v728_v58 = vmul.f32 %v9018_v48, %v9888_v13  ;;  %vm635_vm14 = vcmp.eq.f32.partialorder %v10015_v41, inf  ;;  %vm637_vm15 = vcmp.eq.f32.partialorder %v10015_v41, 0.0 }
 0x207   :  { %9031 = vrsqrt.f32 %v10017_v43  ;;  %v555_v53 = vpop.xlane.xlu1 %554  ;;  %v638_v7 = vand.u32 2147483648, %v10015_v41  ;;  %vm642_vm0 = vcmp.eq.f32.partialorder %v10017_v43, inf  ;;  %vm644_vm1 = vcmp.eq.f32.partialorder %v10017_v43, 0.0 }
 0x208   :  { %v9020_v56 = vpop.eup %9019  ;;  %v10031_v57 = vmul.f32 0.007874016, %v555_v53  ;;  %9033 = vrcp.f32 %v699_v52  ;;  %v748_v63 = vmul.f32 %v10028_v54, %v728_v58  ;;  %v645_v10 = vand.u32 2147483648, %v10017_v43 }
 0x209   :  { %v613_v59 = vmul.f32 %v9020_v56, %v9977_v8 }
 0x20a   :  { %9035 = vrsqrt.f32 %v10031_v57  ;;  %v768_v12 = vadd.f32 %v10037_v60, %v748_v63  ;;  %vm649_vm2 = vcmp.eq.f32.partialorder %v10031_v57, inf  ;;  %vm651_vm3 = vcmp.eq.f32.partialorder %v10031_v57, 0.0 }
 0x20b   :  { %v9022_v62 = vpop.eup %9021  ;;  %v615_v13 = vsel %vm614_vm8, %v9977_v8, %v613_v59  ;;  %v652_v52 = vand.u32 2147483648, %v10031_v57 }
 0x20c   :  { %v9024_v0 = vpop.eup %9023  ;;  %v729_v3 = vmul.f32 %v9022_v62, %v9892_v19  ;;  %v618_v4 = vsel %vm616_vm9, %v617_v46, %v615_v13 }
 0x20d   :  { %v9026_v5 = vpop.eup %9025  ;;  %v620_v6 = vmul.f32 %v9024_v0, %v9998_v24  ;;  %v700_v8 = vadd.f32 1e-06, %v618_v4 }
 0x20e   :  { %v627_v38 = vmul.f32 %v9026_v5, %v10000_v25  ;;  %v749_v37 = vmul.f32 %v10028_v54, %v729_v3  ;;  %v9028_v9 = vpop.eup %9027 }
 0x20f   :  { %v622_v19 = vsel %vm621_vm10, %v9998_v24, %v620_v6  ;;  %9037 = vrcp.f32 %v700_v8  ;;  %v730_v20 = vmul.f32 %v9028_v9, %v9894_v21 }
 0x210   :  { %v9030_v14 = vpop.eup %9029  ;;  %v629_v16 = vsel %vm628_vm12, %v10000_v25, %v627_v38  ;;  %v769_v18 = vadd.f32 %v10037_v60, %v749_v37  ;;  %v625_v23 = vsel %vm623_vm11, %v624_v61, %v622_v19 }
 0x211   :  { %v9032_v28 = vpop.eup %9031  ;;  %v634_v29 = vmul.f32 %v9030_v14, %v10015_v41  ;;  %v701_v30 = vadd.f32 1e-06, %v625_v23  ;;  %v632_v33 = vsel %vm630_vm13, %v631_v32, %v629_v16  ;;  %v750_v22 = vmul.f32 %v10028_v54, %v730_v20 }
 0x212   :  { %v9034_v45 = vpop.eup %9033  ;;  %v641_v35 = vmul.f32 %v9032_v28, %v10017_v43  ;;  %v816_v39 = vpack.c.bf16 %v769_v18, %v768_v12  ;;  %v702_v47 = vadd.f32 1e-06, %v632_v33 }
 0x213   :  { %v636_v21 = vsel %vm635_vm14, %v10015_v41, %v634_v29  ;;  %v731_v24 = vmul.f32 %v9034_v45, %v9903_v26  ;;  %9039 = vrcp.f32 %v701_v30  ;;  %v770_v62 = vadd.f32 %v10037_v60, %v750_v22 }
 0x214   :  { %v9036_v48 = vpop.eup %9035  ;;  %v643_v25 = vsel %vm642_vm0, %v10017_v43, %v641_v35  ;;  %1002 = vmatmul.mubr.bf16.vlgmr.msra.gmra.mrb[0].mxu0 %v816_v39  ;;  %8216 = vmatprep.mubr.bf16.mxu1 %v816_v39  ;;  %v639_v53 = vsel %vm637_vm15, %v638_v7, %v636_v21  ;;  %9041 = vrcp.f32 %v702_v47  ;;  %vm1235_vm0 = vcmask 130048  }
 0x215   :  { %v648_v56 = vmul.f32 %v9036_v48, %v10031_v57  ;;  %1011 = vmatprep.mubr.bf16.mxu0 %v12517_v15  ;;  %v751_v26 = vmul.f32 %v10028_v54, %v731_v24  ;;  %v703_v46 = vadd.f32 1e-06, %v639_v53  ;;  %v646_v58 = vsel %vm644_vm1, %v645_v10, %v643_v25 }
 0x216   :  { %v704_v59 = vadd.f32 1e-06, %v646_v58  ;;  %vm9630_vm1 = vmmov 0  }
 0x217   :  { %v650_v61 = vsel %vm649_vm2, %v10031_v57, %v648_v56  ;;  %v771_v41 = vadd.f32 %v10037_v60, %v751_v26  ;;  %9043 = vrcp.f32 %v703_v46  ;;  %vm12553_vm2 = vcmask 1040384  }
 0x218   :  { %v653_v13 = vsel %vm651_vm3, %v652_v52, %v650_v61  ;;  %9045 = vrcp.f32 %v704_v59  ;;  %vm12535_vm3 = vcmask 1046528  }
 0x219   :  { %v9038_v63 = vpop.eup %9037  ;;  %v817_v0 = vpack.c.bf16 %v771_v41, %v770_v62  ;;  %v705_v32 = vadd.f32 1e-06, %v653_v13 }
 0x21a   :  { %v732_v43 = vmul.f32 %v9038_v63, %v9913_v36 }
 0x21b   :  { %8217 = vmatmul.mubr.bf16.vlgmr.msra.gmra.mrb[0].mxu1 %v817_v0  ;;  %9047 = vrcp.f32 %v705_v32 }
 0x21c   :  { %1012 = vmatmul.mubr.bf16.gmra.mrb[4].mxu0 %v817_v0  ;;  %v752_v6 = vmul.f32 %v10028_v54, %v732_v43 }
 0x21d   :  { %v9040_v3 = vpop.eup %9039  ;;  %1021 = vmatprep.mubr.bf16.mxu0 %v12517_v15 }
 0x21e   :  { %v9042_v4 = vpop.eup %9041  ;;  %v733_v5 = vmul.f32 %v9040_v3, %v9919_v40  ;;  %v772_v36 = vadd.f32 %v10037_v60, %v752_v6 }
 0x21f   :  { %v734_v57 = vmul.f32 %v9042_v4, %v9925_v44 }
 0x220   :  { %v753_v7 = vmul.f32 %v10028_v54, %v733_v5 }
 0x221   :  { %v9044_v8 = vpop.eup %9043  ;;  %v754_v38 = vmul.f32 %v10028_v54, %v734_v57 }
 0x222   :  { %v9046_v37 = vpop.eup %9045  ;;  %v773_v9 = vadd.f32 %v10037_v60, %v753_v7  ;;  %v735_v19 = vmul.f32 %v9044_v8, %v9934_v50 }
 0x223   :  { %v736_v10 = vmul.f32 %v9046_v37, %v9936_v51  ;;  %v774_v44 = vadd.f32 %v10037_v60, %v754_v38 }
 0x224   :  { %v818_v12 = vpack.c.bf16 %v773_v9, %v772_v36  ;;  %v755_v40 = vmul.f32 %v10028_v54, %v735_v19 }
 0x225   :  { %v9048_v14 = vpop.eup %9047  ;;  %v756_v20 = vmul.f32 %v10028_v54, %v736_v10 }
 0x226   :  { %1022 = vmatmul.mubr.bf16.gmra.mrb[8].mxu0 %v818_v12  ;;  %8220 = vmatprep.mubr.bf16.mxu1 %v818_v12  ;;  %v775_v16 = vadd.f32 %v10037_v60, %v755_v40  ;;  %v737_v18 = vmul.f32 %v9048_v14, %v9943_v55 }
 0x227   :  { %1031 = vmatprep.mubr.bf16.mxu0 %v12517_v15  ;;  %v776_v51 = vadd.f32 %v10037_v60, %v756_v20 }
 0x228   :  { %v819_v23 = vpack.c.bf16 %v775_v16, %v774_v44  ;;  %v757_v50 = vmul.f32 %v10028_v54, %v737_v18 }
 0x22a   :  { %8221 = vmatmul.mubr.bf16.gmra.mrb[4].mxu1 %v819_v23  ;;  %v777_v28 = vadd.f32 %v10037_v60, %v757_v50 }
 0x22c   :  { %v820_v29 = vpack.c.bf16 %v777_v28, %v776_v51 }
 0x22e   :  { %1032 = vmatmul.mubr.bf16.gmra.mrb[12].mxu0 %v819_v23  ;;  %8224 = vmatprep.mubr.bf16.mxu1 %v820_v29 }
 0x22f   :  { %1041 = vmatprep.mubr.bf16.mxu0 %v12517_v15 }
 0x236   :  { %1042 = vmatmul.mubr.bf16.gmra.mrb[16].mxu0 %v820_v29 }
 0x237   :  { %1051 = vmatprep.mubr.bf16.mxu0 %v12517_v15 }
 0x27f   :  { %v557_v55 = vpop.xlane.xlu0 %556 }
 0x280   :  { %v578_v30 = vmul.f32 0.007874016, %v557_v55 }
 0x282   :  { %9049 = vrsqrt.f32 %v578_v30  ;;  %vm656_vm4 = vcmp.eq.f32.partialorder %v578_v30, inf  ;;  %v659_v52 = vand.u32 2147483648, %v578_v30  ;;  %vm658_vm5 = vcmp.eq.f32.partialorder %v578_v30, 0.0 }
 0x283   :  { %v559_v33 = vpop.xlane.xlu1 %558 }
 0x284   :  { %v579_v45 = vmul.f32 0.007874016, %v559_v33 }
 0x286   :  { %9051 = vrsqrt.f32 %v579_v45  ;;  %vm663_vm6 = vcmp.eq.f32.partialorder %v579_v45, inf  ;;  %v666_v62 = vand.u32 2147483648, %v579_v45  ;;  %vm665_vm7 = vcmp.eq.f32.partialorder %v579_v45, 0.0 }
 0x287   :  { %v561_v35 = vpop.xlane.xlu0 %560 }
 0x288   :  { %v580_v39 = vmul.f32 0.007874016, %v561_v35 }
 0x28a   :  { %9053 = vrsqrt.f32 %v580_v39  ;;  %vm670_vm8 = vcmp.eq.f32.partialorder %v580_v39, inf  ;;  %v673_v63 = vand.u32 2147483648, %v580_v39  ;;  %vm672_vm9 = vcmp.eq.f32.partialorder %v580_v39, 0.0 }
 0x28b   :  { %v563_v47 = vpop.xlane.xlu1 %562  ;;  %v565_v24 = vpop.xlane.xlu0 %564 }
 0x28c   :  { %v581_v21 = vmul.f32 0.007874016, %v563_v47  ;;  %v9050_v22 = vpop.eup %9049  ;;  %v582_v48 = vmul.f32 0.007874016, %v565_v24 }
 0x28d   :  { %v655_v25 = vmul.f32 %v9050_v22, %v578_v30 }
 0x28e   :  { %9055 = vrsqrt.f32 %v581_v21  ;;  %vm677_vm10 = vcmp.eq.f32.partialorder %v581_v21, inf  ;;  %vm679_vm11 = vcmp.eq.f32.partialorder %v581_v21, 0.0  ;;  %v680_v5 = vand.u32 2147483648, %v581_v21 }
 0x28f   :  { %9057 = vrsqrt.f32 %v582_v48  ;;  %v657_v53 = vsel %vm656_vm4, %v578_v30, %v655_v25  ;;  %v567_v56 = vpop.xlane.xlu1 %566  ;;  %vm684_vm12 = vcmp.eq.f32.partialorder %v582_v48, inf  ;;  %v687_v7 = vand.u32 2147483648, %v582_v48 }
 0x290   :  { %v9052_v26 = vpop.eup %9051  ;;  %v583_v46 = vmul.f32 0.007874016, %v567_v56  ;;  %v660_v58 = vsel %vm658_vm5, %v659_v52, %v657_v53  ;;  %vm686_vm13 = vcmp.eq.f32.partialorder %v582_v48, 0.0 }
 0x291   :  { %v662_v59 = vmul.f32 %v9052_v26, %v579_v45  ;;  %v706_v61 = vadd.f32 1e-06, %v660_v58 }
 0x292   :  { %9059 = vrsqrt.f32 %v583_v46  ;;  %vm691_vm14 = vcmp.eq.f32.partialorder %v583_v46, inf  ;;  %v694_v12 = vand.u32 2147483648, %v583_v46  ;;  %vm693_vm15 = vcmp.eq.f32.partialorder %v583_v46, 0.0 }
 0x293   :  { %v664_v41 = vsel %vm663_vm6, %v579_v45, %v662_v59  ;;  %9061 = vrcp.f32 %v706_v61 }
 0x294   :  { %v9054_v13 = vpop.eup %9053  ;;  %v667_v0 = vsel %vm665_vm7, %v666_v62, %v664_v41 }
 0x295   :  { %v669_v32 = vmul.f32 %v9054_v13, %v580_v39  ;;  %v707_v43 = vadd.f32 1e-06, %v667_v0 }
 0x297   :  { %v671_v4 = vsel %vm670_vm8, %v580_v39, %v669_v32  ;;  %9063 = vrcp.f32 %v707_v43 }
 0x298   :  { %v9056_v3 = vpop.eup %9055  ;;  %v674_v8 = vsel %vm672_vm9, %v673_v63, %v671_v4 }
 0x299   :  { %v9058_v6 = vpop.eup %9057  ;;  %v676_v57 = vmul.f32 %v9056_v3, %v581_v21  ;;  %v708_v37 = vadd.f32 1e-06, %v674_v8 }
 0x29a   :  { %v683_v38 = vmul.f32 %v9058_v6, %v582_v48 }
 0x29b   :  { %v678_v36 = vsel %vm677_vm10, %v581_v21, %v676_v57  ;;  %9065 = vrcp.f32 %v708_v37 }
 0x29c   :  { %v685_v9 = vsel %vm684_vm12, %v582_v48, %v683_v38  ;;  %v681_v19 = vsel %vm679_vm11, %v680_v5, %v678_v36  ;;  %v9060_v10 = vpop.eup %9059 }
 0x29d   :  { %v709_v40 = vadd.f32 1e-06, %v681_v19  ;;  %v688_v14 = vsel %vm686_vm13, %v687_v7, %v685_v9  ;;  %v9062_v44 = vpop.eup %9061  ;;  %v690_v16 = vmul.f32 %v9060_v10, %v583_v46 }
 0x29e   :  { %v710_v18 = vadd.f32 1e-06, %v688_v14  ;;  %v738_v20 = vmul.f32 %v9062_v44, %v9949_v31 }
 0x29f   :  { %9067 = vrcp.f32 %v709_v40  ;;  %v692_v23 = vsel %vm691_vm14, %v583_v46, %v690_v16 }
 0x2a0   :  { %9069 = vrcp.f32 %v710_v18  ;;  %v695_v50 = vsel %vm693_vm15, %v694_v12, %v692_v23  ;;  %v758_v55 = vmul.f32 %v10028_v54, %v738_v20 }
 0x2a1   :  { %v9064_v51 = vpop.eup %9063  ;;  %v711_v28 = vadd.f32 1e-06, %v695_v50 }
 0x2a2   :  { %v739_v29 = vmul.f32 %v9064_v51, %v9957_v42  ;;  %v778_v45 = vadd.f32 %v10037_v60, %v758_v55 }
 0x2a3   :  { %9071 = vrcp.f32 %v711_v28 }
 0x2a4   :  { %v759_v30 = vmul.f32 %v10028_v54, %v739_v29 }
 0x2a5   :  { %v9066_v33 = vpop.eup %9065 }
 0x2a6   :  { %v779_v35 = vadd.f32 %v10037_v60, %v759_v30  ;;  %v740_v31 = vmul.f32 %v9066_v33, %v9965_v27 }
 0x2a8   :  { %v821_v47 = vpack.c.bf16 %v779_v35, %v778_v45  ;;  %v760_v22 = vmul.f32 %v10028_v54, %v740_v31 }
 0x2a9   :  { %v9068_v39 = vpop.eup %9067 }
 0x2aa   :  { %v9070_v21 = vpop.eup %9069  ;;  %v741_v24 = vmul.f32 %v9068_v39, %v9970_v1  ;;  %1052 = vmatmul.mubr.bf16.gmra.mrb[20].mxu0 %v821_v47  ;;  %8225 = vmatmul.mubr.bf16.gmra.mrb[8].mxu1 %v821_v47  ;;  %v780_v52 = vadd.f32 %v10037_v60, %v760_v22 }
 0x2ab   :  { %v742_v42 = vmul.f32 %v9070_v21, %v9973_v2  ;;  %1061 = vmatprep.mubr.bf16.mxu0 %v12517_v15 }
 0x2ac   :  { %v761_v48 = vmul.f32 %v10028_v54, %v741_v24 }
 0x2ad   :  { %v9072_v25 = vpop.eup %9071  ;;  %v762_v56 = vmul.f32 %v10028_v54, %v742_v42 }
 0x2ae   :  { %v781_v27 = vadd.f32 %v10037_v60, %v761_v48  ;;  %v743_v53 = vmul.f32 %v9072_v25, %v9995_v17  ;;  %v824_v17 = vld [vmem:[%s12503_s2] sm:$0x7] }
 0x2af   :  { %v782_v2 = vadd.f32 %v10037_v60, %v762_v56  ;;  %v10146_v59 = vrot.slane %v824_v17, %v10013_v34 }
 0x2b0   :  { %v822_v1 = vpack.c.bf16 %v781_v27, %v780_v52  ;;  %v763_v26 = vmul.f32 %v10028_v54, %v743_v53  ;;  %v10149_v54 = vrot.slane %v824_v17, %v10022_v49 }
 0x2b2   :  { %8228 = vmatprep.mubr.bf16.mxu1 %v822_v1  ;;  %1062 = vmatmul.mubr.bf16.gmra.mrb[24].mxu0 %v822_v1  ;;  %v783_v46 = vadd.f32 %v10037_v60, %v763_v26  ;;  %v10152_v60 = vsub.s32 2, %v9988_v11 }
 0x2b3   :  { %1071 = vmatprep.mubr.bf16.mxu0 %v12517_v15 }
 0x2b4   :  { %v823_v58 = vpack.c.bf16 %v783_v46, %v782_v2  ;;  %12605 = vst [vmem:[#allocation31_spill] sm:$0xff] %v10152_v60  ;;  %v10165_v4 = vrot.slane %v824_v17, %v10152_v60 }
 0x2b6   :  { %8229 = vmatmul.mubr.bf16.gmra.mrb[12].mxu1 %v823_v58 }
 0x2ba   :  { %1072 = vmatmul.mubr.bf16.gmra.mrb[28].mxu0 %v823_v58 }
 0x2e7   :  { %v1003_v61 = vpop.f32.mrb[0].mxu0 }
 0x2e8   :  { %v1005_v62 = vpop.f32.mrb[1].mxu0  ;;  %v10155_v13 = vadd.f32 %v1003_v61, %v10146_v59 }
 0x2e9   :  { %v1007_v41 = vpop.f32.mrb[2].mxu0  ;;  %v1006_v32 = vadd.f32 %v1005_v62, %v10149_v54 }
 0x2ea   :  { %v10158_v63 = vadd.f32 %v1007_v41, %v10146_v59  ;;  %v1009_v0 = vpop.f32.mrb[3].mxu0 }
 0x2eb   :  { %v1010_v43 = vadd.f32 %v1009_v0, %v10149_v54 }
 0x2ec   :  { %v1179_v3 = vpack.c.bf16 %v10158_v63, %v10155_v13 }
 0x2ed   :  { %v1187_v5 = vpack.c.bf16 %v1010_v43, %v1006_v32 }
 0x2ee   :  { %v8218_v6 = vpop.f32.mrb[0].mxu1 }
 0x2ef   :  { %v1013_v57 = vpop.f32.mrb[4].mxu0  ;;  %1219 = vxpose.xlu0.c.b16.start.end [1/1] (short) %v1187_v5, 128  ;;  %v1116_v7 = vpop.f32.mrb[1].mxu1  ;;  %v1125_v37 = vadd.f32 %v8218_v6, %v10165_v4 }
 0x2f0   :  { %v1015_v8 = vpop.f32.mrb[5].mxu0  ;;  %v8219_v38 = vpop.f32.mrb[2].mxu1  ;;  %v10170_v10 = vadd.f32 %v1013_v57, %v10146_v59  ;;  %v1117_v12 = vadd.f32 %v1116_v7, %v10165_v4 }
 0x2f1   :  { %v1017_v36 = vpop.f32.mrb[6].mxu0  ;;  %v1128_v9 = vadd.f32 %v8219_v38, %v10165_v4  ;;  %v1119_v19 = vpop.f32.mrb[3].mxu1  ;;  %v1016_v18 = vadd.f32 %v1015_v8, %v10149_v54 }
 0x2f2   :  { %v10174_v40 = vadd.f32 %v1017_v36, %v10146_v59  ;;  %v1019_v14 = vpop.f32.mrb[7].mxu0  ;;  %v1120_v44 = vadd.f32 %v1119_v19, %v10165_v4 }
 0x2f3   :  { %v1196_v16 = vpack.c.bf16 %v1128_v9, %v1125_v37  ;;  %v1020_v20 = vadd.f32 %v1019_v14, %v10149_v54 }
 0x2f4   :  { %v1180_v23 = vpack.c.bf16 %v10174_v40, %v10170_v10  ;;  %v1195_v50 = vpack.c.bf16 %v1120_v44, %v1117_v12 }
 0x2f5   :  { %8250 = vmatprep.subr.bf16.mxu0 %v1196_v16  ;;  %v1188_v51 = vpack.c.bf16 %v1020_v20, %v1016_v18 }
 0x2f6   :  { %8232 = vmatprep.subr.bf16.mxu1 %v1195_v50  ;;  %8251 = vmatpush3.bf16.msra.mxu0 %v1196_v16 }
 0x2f7   :  { %1357 = vxpose.xlu1.c.b16.start.end [1/1] (short) %v1188_v51, 128  ;;  %8233 = vmatpush3.bf16.msra.mxu1 %v1195_v50 }
 0x2f8   :  { %8728 = vmatprep.subr.bf16.mxu1 %v1196_v16 }
 0x2f9   :  { %v1023_v28 = vpop.f32.mrb[8].mxu0 }
 0x2fa   :  { %v1025_v29 = vpop.f32.mrb[9].mxu0  ;;  %v10182_v30 = vadd.f32 %v1023_v28, %v10146_v59 }
 0x2fb   :  { %v1027_v55 = vpop.f32.mrb[10].mxu0  ;;  %v1026_v31 = vadd.f32 %v1025_v29, %v10149_v54 }
 0x2fc   :  { %v10185_v33 = vadd.f32 %v1027_v55, %v10146_v59  ;;  %v1029_v45 = vpop.f32.mrb[11].mxu0 }
 0x2fd   :  { %v8222_v35 = vpop.f32.mrb[4].mxu1  ;;  %v1030_v39 = vadd.f32 %v1029_v45, %v10149_v54 }
 0x2fe   :  { %v1181_v47 = vpack.c.bf16 %v10185_v33, %v10182_v30  ;;  %v1132_v21 = vpop.f32.mrb[5].mxu1  ;;  %v1141_v42 = vadd.f32 %v8222_v35, %v10165_v4 }
 0x2ff   :  { %v8223_v24 = vpop.f32.mrb[6].mxu1  ;;  %v1189_v22 = vpack.c.bf16 %v1030_v39, %v1026_v31  ;;  %v1133_v52 = vadd.f32 %v1132_v21, %v10165_v4 }
 0x300   :  { %v1144_v48 = vadd.f32 %v8223_v24, %v10165_v4  ;;  %v1135_v25 = vpop.f32.mrb[7].mxu1 }
 0x301   :  { %v1136_v27 = vadd.f32 %v1135_v25, %v10165_v4  ;;  %v1033_v53 = vpop.f32.mrb[12].mxu0 }
 0x302   :  { %v1035_v56 = vpop.f32.mrb[13].mxu0  ;;  %v1198_v1 = vpack.c.bf16 %v1144_v48, %v1141_v42  ;;  %v10196_v46 = vadd.f32 %v1033_v53, %v10146_v59 }
 0x303   :  { %v1037_v26 = vpop.f32.mrb[14].mxu0  ;;  %v1197_v2 = vpack.c.bf16 %v1136_v27, %v1133_v52  ;;  %v1036_v61 = vadd.f32 %v1035_v56, %v10149_v54 }
 0x304   :  { %v10199_v58 = vadd.f32 %v1037_v26, %v10146_v59  ;;  %v1039_v17 = vpop.f32.mrb[15].mxu0  ;;  %8286 = vmatprep.subr.bf16.mxu0 %v1198_v1 }
 0x305   :  { %v1040_v62 = vadd.f32 %v1039_v17, %v10149_v54 }
 0x306   :  { %v1182_v41 = vpack.c.bf16 %v10199_v58, %v10196_v46 }
 0x307   :  { %v1190_v0 = vpack.c.bf16 %v1040_v62, %v1036_v61 }
 0x309   :  { %v1043_v32 = vpop.f32.mrb[16].mxu0 }
 0x30a   :  { %v1045_v43 = vpop.f32.mrb[17].mxu0  ;;  %v10206_v6 = vadd.f32 %v1043_v32, %v10146_v59 }
 0x30b   :  { %v1047_v5 = vpop.f32.mrb[18].mxu0  ;;  %v1046_v8 = vadd.f32 %v1045_v43, %v10149_v54 }
 0x30c   :  { %1494 = vxpose.xlu0.c.b16.start.end [1/1] (short) %v1189_v22, 128  ;;  %v10209_v57 = vadd.f32 %v1047_v5, %v10146_v59  ;;  %v1049_v7 = vpop.f32.mrb[19].mxu0 }
 0x30d   :  { %v1050_v38 = vadd.f32 %v1049_v7, %v10149_v54 }
 0x30e   :  { %v1183_v37 = vpack.c.bf16 %v10209_v57, %v10206_v6 }
 0x30f   :  { %v1191_v36 = vpack.c.bf16 %v1050_v38, %v1046_v8 }
 0x314   :  { %1631 = vxpose.xlu1.c.b16.start.end [1/1] (short) %v1190_v0, 128 }
 0x329   :  { %1768 = vxpose.xlu0.c.b16.start.end [1/1] (short) %v1191_v36, 128 }
 0x355   :  { %v1227_v9 = vpop.trf.xlu0 }
 0x356   :  { %8234 = vmatprep.mubr.msk.bf16.mxu1 %vm1235_vm0, %v1227_v9 }
 0x359   :  { %v1228_v19 = vpop.trf.xlu0 }
 0x35a   :  { %8235 = vmatmul.mubr.msk.bf16.vlgmr.msra.gmra.mrb[16].mxu1 %vm1235_vm0, %v1228_v19 }
 0x35b   :  { %8729 = vmatpush3.bf16.msra.mxu1 %v1196_v16 }
 0x35c   :  { %8268 = vmatprep.subr.bf16.mxu1 %v1197_v2 }
 0x35d   :  { %v1365_v12 = vpop.trf.xlu1  ;;  %v1229_v14 = vpop.trf.xlu0 }
 0x35e   :  { %8238 = vmatprep.mubr.msk.bf16.mxu1 %vm1235_vm0, %v1229_v14  ;;  %8252 = vmatprep.mubr.msk.bf16.mxu0 %vm1235_vm0, %v1365_v12 }
 0x361   :  { %v1366_v44 = vpop.trf.xlu1  ;;  %v1230_v18 = vpop.trf.xlu0 }
 0x362   :  { %8239 = vmatmul.mubr.msk.bf16.gmra.mrb[20].mxu1 %vm1235_vm0, %v1230_v18  ;;  %8253 = vmatmul.mubr.msk.bf16.vlgmr.msra.gmra.mrb[32].mxu0 %vm1235_vm0, %v1366_v44 }
 0x363   :  { %8287 = vmatpush3.bf16.msra.mxu0 %v1198_v1 }
 0x365   :  { %v1231_v20 = vpop.trf.xlu0  ;;  %v1367_v50 = vpop.trf.xlu1 }
 0x366   :  { %8242 = vmatprep.mubr.msk.bf16.mxu1 %vm1235_vm0, %v1231_v20  ;;  %8256 = vmatprep.mubr.msk.bf16.mxu0 %vm1235_vm0, %v1367_v50 }
 0x369   :  { %v1232_v16 = vpop.trf.xlu0  ;;  %v1368_v51 = vpop.trf.xlu1 }
 0x36a   :  { %8243 = vmatmul.mubr.msk.bf16.gmra.mrb[24].mxu1 %vm1235_vm0, %v1232_v16  ;;  %8257 = vmatmul.mubr.msk.bf16.gmra.mrb[36].mxu0 %vm1235_vm0, %v1368_v51 }
 0x36d   :  { %v1233_v28 = vpop.trf.xlu0  ;;  %v1369_v29 = vpop.trf.xlu1 }
 0x36e   :  { %8246 = vmatprep.mubr.msk.bf16.mxu1 %vm1235_vm0, %v1233_v28 }
 0x371   :  { %v1234_v55 = vpop.trf.xlu0  ;;  %v1370_v45 = vpop.trf.xlu1 }
 0x372   :  { %8247 = vmatmul.mubr.msk.bf16.gmra.mrb[28].mxu1 %vm1235_vm0, %v1234_v55 }
 0x373   :  { %8260 = vmatprep.mubr.msk.bf16.mxu1 %vm1235_vm0, %v1369_v29 }
 0x375   :  { %v1371_v35 = vpop.trf.xlu1  ;;  %v1502_v31 = vpop.trf.xlu0 }
 0x379   :  { %v1372_v39 = vpop.trf.xlu1  ;;  %v1503_v21 = vpop.trf.xlu0 }
 0x37a   :  { %8261 = vmatmul.mubr.msk.bf16.vlgmr.msra.gmra.mrb[32].mxu1 %vm1235_vm0, %v1370_v45 }
 0x37b   :  { %8269 = vmatpush3.bf16.msra.mxu1 %v1197_v2  ;;  %8264 = vmatprep.mubr.msk.bf16.mxu1 %vm1235_vm0, %v1371_v35 }
 0x37d   :  { %v1639_v24 = vpop.trf.xlu1  ;;  %v1504_v22 = vpop.trf.xlu0 }
 0x37e   :  { %v1053_v42 = vpop.f32.mrb[20].mxu0  ;;  %v8226_v48 = vpop.f32.mrb[8].mxu1  ;;  %8288 = vmatprep.mubr.msk.bf16.mxu0 %vm1235_vm0, %v1639_v24 }
 0x37f   :  { %v1055_v25 = vpop.f32.mrb[21].mxu0  ;;  %v1148_v52 = vpop.f32.mrb[9].mxu1  ;;  %v10232_v56 = vadd.f32 %v1053_v42, %v10146_v59  ;;  %v1157_v1 = vadd.f32 %v8226_v48, %v10165_v4 }
 0x380   :  { %v1057_v27 = vpop.f32.mrb[22].mxu0  ;;  %v8227_v53 = vpop.f32.mrb[10].mxu1  ;;  %v1149_v62 = vadd.f32 %v1148_v52, %v10165_v4  ;;  %v1056_v43 = vadd.f32 %v1055_v25, %v10149_v54 }
 0x381   :  { %v10236_v26 = vadd.f32 %v1057_v27, %v10146_v59  ;;  %v1160_v2 = vadd.f32 %v8227_v53, %v10165_v4  ;;  %v1059_v17 = vpop.f32.mrb[23].mxu0  ;;  %v1151_v61 = vpop.f32.mrb[11].mxu1 }
 0x382   :  { %v1152_v0 = vadd.f32 %v1151_v61, %v10165_v4  ;;  %8265 = vmatmul.mubr.msk.bf16.gmra.mrb[36].mxu1 %vm1235_vm0, %v1372_v39  ;;  %v1640_v32 = vpop.trf.xlu1  ;;  %v1060_v5 = vadd.f32 %v1059_v17, %v10149_v54  ;;  %v1505_v7 = vpop.trf.xlu0 }
 0x383   :  { %v1184_v8 = vpack.c.bf16 %v10236_v26, %v10232_v56  ;;  %v1200_v38 = vpack.c.bf16 %v1160_v2, %v1157_v1  ;;  %8289 = vmatmul.mubr.msk.bf16.vlgmr.msra.gmra.mrb[40].mxu0 %vm1235_vm0, %v1640_v32  ;;  %8270 = vmatprep.mubr.msk.bf16.mxu1 %vm1235_vm0, %v1502_v31 }
 0x384   :  { %v1192_v36 = vpack.c.bf16 %v1060_v5, %v1056_v43  ;;  %v1199_v9 = vpack.c.bf16 %v1152_v0, %v1149_v62 }
 0x385   :  { %8322 = vmatprep.subr.bf16.mxu0 %v1200_v38  ;;  %v1063_v19 = vpop.f32.mrb[24].mxu0 }
 0x386   :  { %1905 = vxpose.xlu1.c.b16.start.end [1/1] (short) %v1192_v36, 128  ;;  %8304 = vmatprep.subr.bf16.mxu1 %v1199_v9  ;;  %v1641_v12 = vpop.trf.xlu1  ;;  %v1065_v14 = vpop.f32.mrb[25].mxu0  ;;  %v10250_v20 = vadd.f32 %v1063_v19, %v10146_v59 }
 0x387   :  { %8323 = vmatpush3.bf16.msra.mxu0 %v1200_v38  ;;  %8292 = vmatprep.mubr.msk.bf16.mxu0 %vm1235_vm0, %v1641_v12  ;;  %v1506_v44 = vpop.trf.xlu0  ;;  %v1067_v18 = vpop.f32.mrb[26].mxu0  ;;  %v1066_v51 = vadd.f32 %v1065_v14, %v10149_v54 }
 0x388   :  { %v10253_v50 = vadd.f32 %v1067_v18, %v10146_v59  ;;  %v1069_v16 = vpop.f32.mrb[27].mxu0 }
 0x389   :  { %v1070_v28 = vadd.f32 %v1069_v16, %v10149_v54  ;;  %v8230_v29 = vpop.f32.mrb[12].mxu1  ;;  %v9629_v16 = vmov 0.0  }
 0x38a   :  { %8271 = vmatmul.mubr.msk.bf16.vlgmr.msra.gmra.mrb[40].mxu1 %vm1235_vm0, %v1503_v21  ;;  %v1642_v55 = vpop.trf.xlu1  ;;  %v1185_v45 = vpack.c.bf16 %v10253_v50, %v10250_v20  ;;  %v1164_v35 = vpop.f32.mrb[13].mxu1  ;;  %v1173_v42 = vadd.f32 %v8230_v29, %v10165_v4 }
 0x38b   :  { %8305 = vmatpush3.bf16.msra.mxu1 %v1199_v9  ;;  %8274 = vmatprep.mubr.msk.bf16.mxu1 %vm1235_vm0, %v1504_v22  ;;  %v1507_v31 = vpop.trf.xlu0  ;;  %v8231_v39 = vpop.f32.mrb[14].mxu1  ;;  %v1193_v24 = vpack.c.bf16 %v1070_v28, %v1066_v51  ;;  %v1165_v21 = vadd.f32 %v1164_v35, %v10165_v4 }
 0x38c   :  { %8293 = vmatmul.mubr.msk.bf16.gmra.mrb[44].mxu0 %vm1235_vm0, %v1642_v55  ;;  %v1176_v48 = vadd.f32 %v8231_v39, %v10165_v4  ;;  %v1167_v25 = vpop.f32.mrb[15].mxu1 }
 0x38d   :  { %v1168_v52 = vadd.f32 %v1167_v25, %v10165_v4  ;;  %2042 = vxpose.xlu0.c.b16.start.end [1/1] (short) %v1193_v24, 128  ;;  %v1073_v27 = vpop.f32.mrb[28].mxu0 }
 0x38e   :  { %v1643_v53 = vpop.trf.xlu1  ;;  %v1075_v1 = vpop.f32.mrb[29].mxu0  ;;  %v1202_v2 = vpack.c.bf16 %v1176_v48, %v1173_v42  ;;  %v10268_v62 = vadd.f32 %v1073_v27, %v10146_v59 }
 0x38f   :  { %8296 = vmatprep.mubr.msk.bf16.mxu0 %vm1235_vm0, %v1643_v53  ;;  %v1508_v22 = vpop.trf.xlu0  ;;  %v1077_v17 = vpop.f32.mrb[30].mxu0  ;;  %v1201_v61 = vpack.c.bf16 %v1168_v52, %v1165_v21  ;;  %v1076_v4 = vadd.f32 %v1075_v1, %v10149_v54 }
 0x390   :  { %v10271_v0 = vadd.f32 %v1077_v17, %v10146_v59  ;;  %v1079_v32 = vpop.f32.mrb[31].mxu0  ;;  %8358 = vmatprep.subr.bf16.mxu0 %v1202_v2 }
 0x391   :  { %v1080_v43 = vadd.f32 %v1079_v32, %v10149_v54  ;;  %8340 = vmatprep.subr.bf16.mxu1 %v1201_v61 }
 0x392   :  { %8275 = vmatmul.mubr.msk.bf16.gmra.mrb[44].mxu1 %vm1235_vm0, %v1505_v7  ;;  %v1644_v5 = vpop.trf.xlu1  ;;  %v1186_v38 = vpack.c.bf16 %v10271_v0, %v10268_v62 }
 0x393   :  { %8278 = vmatprep.mubr.msk.bf16.mxu1 %vm1235_vm0, %v1506_v44  ;;  %v1509_v36 = vpop.trf.xlu0  ;;  %v1194_v59 = vpack.c.bf16 %v1080_v43, %v1076_v4 }
 0x394   :  { %8297 = vmatmul.mubr.msk.bf16.gmra.mrb[48].mxu0 %vm1235_vm0, %v1644_v5 }
 0x396   :  { %v1645_v9 = vpop.trf.xlu1 }
 0x397   :  { %8300 = vmatprep.mubr.msk.bf16.mxu0 %vm1235_vm0, %v1645_v9  ;;  %v1776_v19 = vpop.trf.xlu0 }
 0x39a   :  { %8279 = vmatmul.mubr.msk.bf16.gmra.mrb[48].mxu1 %vm1235_vm0, %v1507_v31  ;;  %v1646_v54 = vpop.trf.xlu1 }
 0x39b   :  { %8282 = vmatprep.mubr.msk.bf16.mxu1 %vm1235_vm0, %v1508_v22  ;;  %v1777_v7 = vpop.trf.xlu0 }
 0x39c   :  { %8301 = vmatmul.mubr.msk.bf16.gmra.mrb[52].mxu0 %vm1235_vm0, %v1646_v54 }
 0x39f   :  { %v1778_v12 = vpop.trf.xlu0 }
 0x3a2   :  { %8283 = vmatmul.mubr.msk.bf16.gmra.mrb[52].mxu1 %vm1235_vm0, %v1509_v36 }
 0x3a3   :  { %2179 = vxpose.xlu1.c.b16.start.end [1/1] (short) %v1194_v59, 128  ;;  %8306 = vmatprep.mubr.msk.bf16.mxu1 %vm1235_vm0, %v1776_v19  ;;  %v1779_v14 = vpop.trf.xlu0 }
 0x3a7   :  { %v1780_v44 = vpop.trf.xlu0 }
 0x3aa   :  { %8307 = vmatmul.mubr.msk.bf16.vlgmr.msra.gmra.mrb[56].mxu1 %vm1235_vm0, %v1777_v7  ;;  %v10323_v7 = vld [vmem:[#allocation7] sm:$0xff]  }
 0x3ab   :  { %8341 = vmatpush3.bf16.msra.mxu1 %v1201_v61  ;;  %8310 = vmatprep.mubr.msk.bf16.mxu1 %vm1235_vm0, %v1778_v12  ;;  %v1781_v18 = vpop.trf.xlu0 }
 0x3ac   :  { %8376 = vmatprep.subr.bf16.mxu1 %v9629_v16 }
 0x3af   :  { %v1782_v51 = vpop.trf.xlu0 }
 0x3b2   :  { %8311 = vmatmul.mubr.msk.bf16.gmra.mrb[60].mxu1 %vm1235_vm0, %v1779_v14 }
 0x3b3   :  { %8314 = vmatprep.mubr.msk.bf16.mxu1 %vm1235_vm0, %v1780_v44  ;;  %v1783_v28 = vpop.trf.xlu0  ;;  %v10325_v44 = vld [vmem:[#allocation7 + $0x8] sm:$0xff]  }
 0x3ba   :  { %8315 = vmatmul.mubr.msk.bf16.gmra.mrb[64].mxu1 %vm1235_vm0, %v1781_v18 }
 0x3bb   :  { %8318 = vmatprep.mubr.msk.bf16.mxu1 %vm1235_vm0, %v1782_v51 }
 0x3c2   :  { %8319 = vmatmul.mubr.msk.bf16.gmra.mrb[68].mxu1 %vm1235_vm0, %v1783_v28 }
 0x3ec   :  { %v1913_v29 = vpop.trf.xlu1 }
 0x3ed   :  { %8324 = vmatprep.mubr.msk.bf16.mxu0 %vm1235_vm0, %v1913_v29 }
 0x3f0   :  { %v1914_v55 = vpop.trf.xlu1 }
 0x3f1   :  { %8325 = vmatmul.mubr.msk.bf16.vlgmr.msra.gmra.mrb[56].mxu0 %vm1235_vm0, %v1914_v55 }
 0x3f2   :  { %8359 = vmatpush3.bf16.msra.mxu0 %v1202_v2 }
 0x3f3   :  { %8396 = vmatprep.subr.bf16.mxu0 %v9629_v16  ;;  %v2050_v31 = vpop.trf.xlu0 }
 0x3f4   :  { %v1915_v35 = vpop.trf.xlu1  ;;  %8342 = vmatprep.mubr.msk.bf16.mxu1 %vm1235_vm0, %v2050_v31 }
 0x3f5   :  { %8328 = vmatprep.mubr.msk.bf16.mxu0 %vm1235_vm0, %v1915_v35 }
 0x3f7   :  { %v2051_v24 = vpop.trf.xlu0 }
 0x3f8   :  { %v1916_v39 = vpop.trf.xlu1  ;;  %8343 = vmatmul.mubr.msk.bf16.vlgmr.msra.gmra.mrb[72].mxu1 %vm1235_vm0, %v2051_v24  ;;  %v10330_v24 = vld [vmem:[#allocation7 + $0x10] sm:$0xff]  }
 0x3f9   :  { %8329 = vmatmul.mubr.msk.bf16.gmra.mrb[60].mxu0 %vm1235_vm0, %v1916_v39 }
 0x3fb   :  { %v2052_v48 = vpop.trf.xlu0 }
 0x3fc   :  { %v1917_v42 = vpop.trf.xlu1  ;;  %8346 = vmatprep.mubr.msk.bf16.mxu1 %vm1235_vm0, %v2052_v48 }
 0x3fd   :  { %8332 = vmatprep.mubr.msk.bf16.mxu0 %vm1235_vm0, %v1917_v42 }
 0x3ff   :  { %v2053_v21 = vpop.trf.xlu0 }
 0x400   :  { %v1918_v25 = vpop.trf.xlu1  ;;  %8347 = vmatmul.mubr.msk.bf16.gmra.mrb[76].mxu1 %vm1235_vm0, %v2053_v21 }
 0x401   :  { %8333 = vmatmul.mubr.msk.bf16.gmra.mrb[64].mxu0 %vm1235_vm0, %v1918_v25 }
 0x403   :  { %v2054_v27 = vpop.trf.xlu0 }
 0x404   :  { %v1919_v52 = vpop.trf.xlu1  ;;  %8350 = vmatprep.mubr.msk.bf16.mxu1 %vm1235_vm0, %v2054_v27  ;;  %v10332_v27 = vld [vmem:[#allocation7 + $0x18] sm:$0xff]  }
 0x405   :  { %8336 = vmatprep.mubr.msk.bf16.mxu0 %vm1235_vm0, %v1919_v52 }
 0x407   :  { %v2055_v1 = vpop.trf.xlu0 }
 0x408   :  { %v1920_v53 = vpop.trf.xlu1  ;;  %8351 = vmatmul.mubr.msk.bf16.gmra.mrb[80].mxu1 %vm1235_vm0, %v2055_v1 }
 0x409   :  { %8337 = vmatmul.mubr.msk.bf16.gmra.mrb[68].mxu0 %vm1235_vm0, %v1920_v53 }
 0x40b   :  { %v2056_v22 = vpop.trf.xlu0 }
 0x40c   :  { %v2187_v2 = vpop.trf.xlu1  ;;  %8354 = vmatprep.mubr.msk.bf16.mxu1 %vm1235_vm0, %v2056_v22 }
 0x40d   :  { %8360 = vmatprep.mubr.msk.bf16.mxu0 %vm1235_vm0, %v2187_v2 }
 0x40f   :  { %v2057_v61 = vpop.trf.xlu0 }
 0x410   :  { %v2188_v17 = vpop.trf.xlu1  ;;  %8355 = vmatmul.mubr.msk.bf16.gmra.mrb[84].mxu1 %vm1235_vm0, %v2057_v61 }
 0x411   :  { %8361 = vmatmul.mubr.msk.bf16.vlgmr.msra.gmra.mrb[72].mxu0 %vm1235_vm0, %v2188_v17  ;;  %8392 = vmatprep.mubr.msk.bf16.mxu1 %vm9630_vm1, %v9629_v16 }
 0x414   :  { %v2189_v32 = vpop.trf.xlu1 }
 0x415   :  { %8364 = vmatprep.mubr.msk.bf16.mxu0 %vm1235_vm0, %v2189_v32 }
 0x418   :  { %v2190_v4 = vpop.trf.xlu1 }
 0x419   :  { %8365 = vmatmul.mubr.msk.bf16.gmra.mrb[76].mxu0 %vm1235_vm0, %v2190_v4 }
 0x41c   :  { %v2191_v43 = vpop.trf.xlu1 }
 0x41d   :  { %8368 = vmatprep.mubr.msk.bf16.mxu0 %vm1235_vm0, %v2191_v43 }
 0x420   :  { %v2192_v5 = vpop.trf.xlu1 }
 0x421   :  { %8369 = vmatmul.mubr.msk.bf16.gmra.mrb[80].mxu0 %vm1235_vm0, %v2192_v5 }
 0x424   :  { %v2193_v36 = vpop.trf.xlu1 }
 0x425   :  { %8372 = vmatprep.mubr.msk.bf16.mxu0 %vm1235_vm0, %v2193_v36 }
 0x428   :  { %v2194_v59 = vpop.trf.xlu1 }
 0x429   :  { %8373 = vmatmul.mubr.msk.bf16.gmra.mrb[84].mxu0 %vm1235_vm0, %v2194_v59  ;;  %v10341_v59 = vld [vmem:[#allocation7 + $0x20] sm:$0xff]  }
 0x42a   :  { %8412 = vmatprep.mubr.msk.bf16.mxu0 %vm9630_vm1, %v9629_v16 }
 0x42d   :  { %v8236_v9 = vpop.f32.mrb[16].mxu1 }
 0x42e   :  { %v1294_v19 = vpop.f32.mrb[17].mxu1 }
 0x42f   :  { %v8237_v54 = vpop.f32.mrb[18].mxu1 }
 0x430   :  { %v2317_v12 = vpack.c.bf16 %v8237_v54, %v8236_v9  ;;  %v1297_v14 = vpop.f32.mrb[19].mxu1 }
 0x431   :  { %v2316_v18 = vpack.c.bf16 %v1297_v14, %v1294_v19 }
 0x432   :  { %v2429_v28 = vmul.bf16 %v10325_v44, %v2317_v12 }
 0x433   :  { %v2428_v51 = vmul.bf16 %v10323_v7, %v2316_v18  ;;  %v10343_v18 = vld [vmem:[#allocation7 + $0x28] sm:$0xff]  }
 0x435   :  { %v8240_v29 = vpop.f32.mrb[20].mxu1  ;;  %8377 = vmatpush3.bf16.msra.mxu1 %v2428_v51  ;;  %v8254_v55 = vpop.f32.mrb[32].mxu0 }
 0x436   :  { %v1310_v35 = vpop.f32.mrb[21].mxu1  ;;  %8378 = vmatprep.subr.bf16.mxu1 %v9629_v16  ;;  %v1431_v31 = vpop.f32.mrb[33].mxu0 }
 0x437   :  { %v8241_v39 = vpop.f32.mrb[22].mxu1  ;;  %v8255_v42 = vpop.f32.mrb[34].mxu0 }
 0x438   :  { %v2319_v48 = vpack.c.bf16 %v8241_v39, %v8240_v29  ;;  %v1313_v25 = vpop.f32.mrb[23].mxu1  ;;  %v2325_v21 = vpack.c.bf16 %v8255_v42, %v8254_v55  ;;  %v1434_v52 = vpop.f32.mrb[35].mxu0 }
 0x439   :  { %v2318_v53 = vpack.c.bf16 %v1313_v25, %v1310_v35  ;;  %8379 = vmatpush3.bf16.msra.mxu1 %v2429_v28  ;;  %v2324_v1 = vpack.c.bf16 %v1434_v52, %v1431_v31  ;;  %v10353_v25 = vld [vmem:[#allocation7 + $0x30] sm:$0xff]  }
 0x43a   :  { %8380 = vmatprep.subr.bf16.mxu1 %v9629_v16  ;;  %v2431_v17 = vmul.bf16 %v10332_v27, %v2319_v48  ;;  %v2437_v32 = vmul.bf16 %v10325_v44, %v2325_v21 }
 0x43b   :  { %v2430_v2 = vmul.bf16 %v10330_v24, %v2318_v53  ;;  %v2436_v22 = vmul.bf16 %v10323_v7, %v2324_v1  ;;  %v10355_v53 = vld [vmem:[#allocation7 + $0x38] sm:$0xff]  }
 0x43d   :  { %v8244_v61 = vpop.f32.mrb[24].mxu1  ;;  %8381 = vmatpush3.bf16.msra.mxu1 %v2430_v2  ;;  %v8258_v4 = vpop.f32.mrb[36].mxu0  ;;  %8397 = vmatpush3.bf16.msra.mxu0 %v2436_v22 }
 0x43e   :  { %v1326_v43 = vpop.f32.mrb[25].mxu1  ;;  %8382 = vmatprep.subr.bf16.mxu1 %v9629_v16  ;;  %v1447_v5 = vpop.f32.mrb[37].mxu0  ;;  %8398 = vmatprep.subr.bf16.mxu0 %v9629_v16 }
 0x43f   :  { %v8245_v36 = vpop.f32.mrb[26].mxu1  ;;  %v8259_v9 = vpop.f32.mrb[38].mxu0 }
 0x440   :  { %v2321_v19 = vpack.c.bf16 %v8245_v36, %v8244_v61  ;;  %v1329_v54 = vpop.f32.mrb[27].mxu1  ;;  %v2327_v12 = vpack.c.bf16 %v8259_v9, %v8258_v4  ;;  %v1450_v14 = vpop.f32.mrb[39].mxu0 }
 0x441   :  { %v2320_v51 = vpack.c.bf16 %v1329_v54, %v1326_v43  ;;  %8383 = vmatpush3.bf16.msra.mxu1 %v2431_v17  ;;  %v2326_v28 = vpack.c.bf16 %v1450_v14, %v1447_v5  ;;  %8399 = vmatpush3.bf16.msra.mxu0 %v2437_v32 }
 0x442   :  { %8384 = vmatprep.subr.bf16.mxu1 %v9629_v16  ;;  %8400 = vmatprep.subr.bf16.mxu0 %v9629_v16  ;;  %v2433_v35 = vmul.bf16 %v10343_v18, %v2321_v19  ;;  %v2439_v39 = vmul.bf16 %v10332_v27, %v2327_v12 }
 0x443   :  { %v2432_v29 = vmul.bf16 %v10341_v59, %v2320_v51  ;;  %v2438_v55 = vmul.bf16 %v10330_v24, %v2326_v28 }
 0x445   :  { %v8248_v31 = vpop.f32.mrb[28].mxu1  ;;  %8385 = vmatpush3.bf16.msra.mxu1 %v2432_v29  ;;  %8401 = vmatpush3.bf16.msra.mxu0 %v2438_v55 }
 0x446   :  { %v1342_v42 = vpop.f32.mrb[29].mxu1  ;;  %8386 = vmatprep.subr.bf16.mxu1 %v9629_v16  ;;  %8402 = vmatprep.subr.bf16.mxu0 %v9629_v16 }
 0x447   :  { %v8249_v48 = vpop.f32.mrb[30].mxu1 }
 0x448   :  { %v2323_v21 = vpack.c.bf16 %v8249_v48, %v8248_v31  ;;  %v1345_v52 = vpop.f32.mrb[31].mxu1 }
 0x449   :  { %v2322_v1 = vpack.c.bf16 %v1345_v52, %v1342_v42  ;;  %8387 = vmatpush3.bf16.msra.mxu1 %v2433_v35  ;;  %8403 = vmatpush3.bf16.msra.mxu0 %v2439_v39 }
 0x44a   :  { %8388 = vmatprep.subr.bf16.mxu1 %v9629_v16  ;;  %8404 = vmatprep.subr.bf16.mxu0 %v9629_v16  ;;  %v2435_v22 = vmul.bf16 %v10355_v53, %v2323_v21 }
 0x44b   :  { %v2434_v2 = vmul.bf16 %v10353_v25, %v2322_v1 }
 0x44d   :  { %v8262_v17 = vpop.f32.mrb[32].mxu1  ;;  %8389 = vmatpush3.bf16.msra.mxu1 %v2434_v2 }
 0x44e   :  { %v1463_v61 = vpop.f32.mrb[33].mxu1  ;;  %8390 = vmatprep.subr.bf16.mxu1 %v9629_v16 }
 0x44f   :  { %v8263_v32 = vpop.f32.mrb[34].mxu1 }
 0x450   :  { %v2329_v4 = vpack.c.bf16 %v8263_v32, %v8262_v17  ;;  %v1466_v43 = vpop.f32.mrb[35].mxu1 }
 0x451   :  { %v2328_v5 = vpack.c.bf16 %v1466_v43, %v1463_v61  ;;  %8391 = vmatpush3.bf16.msra.mxu1 %v2435_v22 }
 0x452   :  { %8416 = vmatprep.subr.bf16.mxu1 %v9629_v16  ;;  %v2441_v9 = vmul.bf16 %v10343_v18, %v2329_v4 }
 0x453   :  { %v2440_v36 = vmul.bf16 %v10341_v59, %v2328_v5 }
 0x454   :  { %8393 = vmatmul.mubr.bf16.vlgmr.msra.gmra.mrb[88].mxu1 %v1179_v3 }
 0x455   :  { %v8266_v19 = vpop.f32.mrb[36].mxu1  ;;  %8405 = vmatpush3.bf16.msra.mxu0 %v2440_v36  ;;  %8432 = vmatprep.mubr.msk.bf16.mxu1 %vm9630_vm1, %v9629_v16 }
 0x456   :  { %v1479_v54 = vpop.f32.mrb[37].mxu1  ;;  %8406 = vmatprep.subr.bf16.mxu0 %v9629_v16  ;;  %v8290_v12 = vpop.f32.mrb[40].mxu0 }
 0x457   :  { %v8267_v14 = vpop.f32.mrb[38].mxu1  ;;  %v1705_v51 = vpop.f32.mrb[41].mxu0 }
 0x458   :  { %v2331_v28 = vpack.c.bf16 %v8267_v14, %v8266_v19  ;;  %v1482_v29 = vpop.f32.mrb[39].mxu1  ;;  %v8291_v55 = vpop.f32.mrb[42].mxu0 }
 0x459   :  { %v2330_v35 = vpack.c.bf16 %v1482_v29, %v1479_v54  ;;  %8407 = vmatpush3.bf16.msra.mxu0 %v2441_v9  ;;  %v2341_v13 = vpack.c.bf16 %v8291_v55, %v8290_v12  ;;  %v1708_v63 = vpop.f32.mrb[43].mxu0 }
 0x45a   :  { %8408 = vmatprep.subr.bf16.mxu0 %v9629_v16  ;;  %v2340_v3 = vpack.c.bf16 %v1708_v63, %v1705_v51  ;;  %v2443_v39 = vmul.bf16 %v10355_v53, %v2331_v28 }
 0x45b   :  { %v2442_v31 = vmul.bf16 %v10353_v25, %v2330_v35  ;;  %v2453_v19 = vmul.bf16 %v10325_v44, %v2341_v13 }
 0x45c   :  { %v2452_v61 = vmul.bf16 %v10323_v7, %v2340_v3 }
 0x45d   :  { %v8272_v42 = vpop.f32.mrb[40].mxu1  ;;  %8409 = vmatpush3.bf16.msra.mxu0 %v2442_v31 }
 0x45e   :  { %v1568_v48 = vpop.f32.mrb[41].mxu1  ;;  %8410 = vmatprep.subr.bf16.mxu0 %v9629_v16 }
 0x45f   :  { %v8273_v21 = vpop.f32.mrb[42].mxu1  ;;  %v8294_v52 = vpop.f32.mrb[44].mxu0 }
 0x460   :  { %v2333_v1 = vpack.c.bf16 %v8273_v21, %v8272_v42  ;;  %v1571_v2 = vpop.f32.mrb[43].mxu1  ;;  %v1721_v22 = vpop.f32.mrb[45].mxu0 }
 0x461   :  { %v2332_v17 = vpack.c.bf16 %v1571_v2, %v1568_v48  ;;  %8411 = vmatpush3.bf16.msra.mxu0 %v2443_v39  ;;  %v8295_v32 = vpop.f32.mrb[46].mxu0 }
 0x462   :  { %8436 = vmatprep.subr.bf16.mxu0 %v9629_v16  ;;  %v2343_v4 = vpack.c.bf16 %v8295_v32, %v8294_v52  ;;  %v1724_v43 = vpop.f32.mrb[47].mxu0  ;;  %v2445_v9 = vmul.bf16 %v10325_v44, %v2333_v1 }
 0x463   :  { %v2444_v5 = vmul.bf16 %v10323_v7, %v2332_v17  ;;  %v2342_v36 = vpack.c.bf16 %v1724_v43, %v1721_v22 }
 0x464   :  { %8413 = vmatmul.mubr.bf16.vlgmr.msra.gmra.mrb[88].mxu0 %v1180_v23  ;;  %v2455_v39 = vmul.bf16 %v10332_v27, %v2343_v4 }
 0x465   :  { %v8276_v54 = vpop.f32.mrb[44].mxu1  ;;  %8417 = vmatpush3.bf16.msra.mxu1 %v2444_v5  ;;  %8437 = vmatpush3.bf16.msra.mxu0 %v2452_v61  ;;  %v2454_v29 = vmul.bf16 %v10330_v24, %v2342_v36 }
 0x466   :  { %v1584_v12 = vpop.f32.mrb[45].mxu1  ;;  %8418 = vmatprep.subr.bf16.mxu1 %v9629_v16  ;;  %8438 = vmatprep.subr.bf16.mxu0 %v9629_v16 }
 0x467   :  { %v8277_v14 = vpop.f32.mrb[46].mxu1  ;;  %v8298_v51 = vpop.f32.mrb[48].mxu0  ;;  %8452 = vmatprep.mubr.msk.bf16.mxu0 %vm9630_vm1, %v9629_v16 }
 0x468   :  { %v2335_v28 = vpack.c.bf16 %v8277_v14, %v8276_v54  ;;  %v1587_v10 = vpop.f32.mrb[47].mxu1  ;;  %v1737_v40 = vpop.f32.mrb[49].mxu0 }
 0x469   :  { %v2334_v23 = vpack.c.bf16 %v1587_v10, %v1584_v12  ;;  %8419 = vmatpush3.bf16.msra.mxu1 %v2445_v9  ;;  %8439 = vmatpush3.bf16.msra.mxu0 %v2453_v19  ;;  %v8299_v55 = vpop.f32.mrb[50].mxu0 }
 0x46a   :  { %8420 = vmatprep.subr.bf16.mxu1 %v9629_v16  ;;  %8440 = vmatprep.subr.bf16.mxu0 %v9629_v16  ;;  %v2345_v35 = vpack.c.bf16 %v8299_v55, %v8298_v51  ;;  %v1740_v13 = vpop.f32.mrb[51].mxu0  ;;  %v2447_v31 = vmul.bf16 %v10332_v27, %v2335_v28 }
 0x46b   :  { %v2446_v63 = vmul.bf16 %v10330_v24, %v2334_v23  ;;  %v2344_v3 = vpack.c.bf16 %v1740_v13, %v1737_v40 }
 0x46c   :  { %v2457_v19 = vmul.bf16 %v10343_v18, %v2345_v35 }
 0x46d   :  { %v8280_v42 = vpop.f32.mrb[48].mxu1  ;;  %8421 = vmatpush3.bf16.msra.mxu1 %v2446_v63  ;;  %8441 = vmatpush3.bf16.msra.mxu0 %v2454_v29  ;;  %v2456_v61 = vmul.bf16 %v10341_v59, %v2344_v3 }
 0x46e   :  { %v1600_v48 = vpop.f32.mrb[49].mxu1  ;;  %8422 = vmatprep.subr.bf16.mxu1 %v9629_v16  ;;  %8442 = vmatprep.subr.bf16.mxu0 %v9629_v16 }
 0x46f   :  { %v8281_v21 = vpop.f32.mrb[50].mxu1  ;;  %v8302_v52 = vpop.f32.mrb[52].mxu0 }
 0x470   :  { %v2337_v1 = vpack.c.bf16 %v8281_v21, %v8280_v42  ;;  %v1603_v2 = vpop.f32.mrb[51].mxu1  ;;  %v1753_v22 = vpop.f32.mrb[53].mxu0 }
 0x471   :  { %v2336_v17 = vpack.c.bf16 %v1603_v2, %v1600_v48  ;;  %8423 = vmatpush3.bf16.msra.mxu1 %v2447_v31  ;;  %8443 = vmatpush3.bf16.msra.mxu0 %v2455_v39  ;;  %v8303_v32 = vpop.f32.mrb[54].mxu0 }
 0x472   :  { %8424 = vmatprep.subr.bf16.mxu1 %v9629_v16  ;;  %8444 = vmatprep.subr.bf16.mxu0 %v9629_v16  ;;  %v2347_v4 = vpack.c.bf16 %v8303_v32, %v8302_v52  ;;  %v1756_v43 = vpop.f32.mrb[55].mxu0  ;;  %v2449_v9 = vmul.bf16 %v10343_v18, %v2337_v1 }
 0x473   :  { %v2448_v5 = vmul.bf16 %v10341_v59, %v2336_v17  ;;  %v2346_v36 = vpack.c.bf16 %v1756_v43, %v1753_v22 }
 0x474   :  { %v2459_v55 = vmul.bf16 %v10355_v53, %v2347_v4 }
 0x475   :  { %v8284_v54 = vpop.f32.mrb[52].mxu1  ;;  %8425 = vmatpush3.bf16.msra.mxu1 %v2448_v5  ;;  %8445 = vmatpush3.bf16.msra.mxu0 %v2456_v61  ;;  %v2458_v40 = vmul.bf16 %v10353_v25, %v2346_v36 }
 0x476   :  { %v1616_v12 = vpop.f32.mrb[53].mxu1  ;;  %8426 = vmatprep.subr.bf16.mxu1 %v9629_v16  ;;  %8446 = vmatprep.subr.bf16.mxu0 %v9629_v16 }
 0x477   :  { %v8285_v14 = vpop.f32.mrb[54].mxu1 }
 0x478   :  { %v2339_v51 = vpack.c.bf16 %v8285_v14, %v8284_v54  ;;  %v1619_v28 = vpop.f32.mrb[55].mxu1 }
 0x479   :  { %v2338_v10 = vpack.c.bf16 %v1619_v28, %v1616_v12  ;;  %8427 = vmatpush3.bf16.msra.mxu1 %v2449_v9  ;;  %8447 = vmatpush3.bf16.msra.mxu0 %v2457_v19 }
 0x47a   :  { %8428 = vmatprep.subr.bf16.mxu1 %v9629_v16  ;;  %8448 = vmatprep.subr.bf16.mxu0 %v9629_v16  ;;  %v2451_v29 = vmul.bf16 %v10355_v53, %v2339_v51 }
 0x47b   :  { %v2450_v23 = vmul.bf16 %v10353_v25, %v2338_v10 }
 0x47d   :  { %v8308_v35 = vpop.f32.mrb[56].mxu1  ;;  %8429 = vmatpush3.bf16.msra.mxu1 %v2450_v23  ;;  %8449 = vmatpush3.bf16.msra.mxu0 %v2458_v40 }
 0x47e   :  { %v1842_v13 = vpop.f32.mrb[57].mxu1  ;;  %8430 = vmatprep.subr.bf16.mxu1 %v9629_v16  ;;  %8450 = vmatprep.subr.bf16.mxu0 %v9629_v16 }
 0x47f   :  { %v8309_v63 = vpop.f32.mrb[58].mxu1 }
 0x480   :  { %v2349_v3 = vpack.c.bf16 %v8309_v63, %v8308_v35  ;;  %v1845_v31 = vpop.f32.mrb[59].mxu1 }
 0x481   :  { %v2348_v39 = vpack.c.bf16 %v1845_v31, %v1842_v13  ;;  %8431 = vmatpush3.bf16.msra.mxu1 %v2451_v29  ;;  %8451 = vmatpush3.bf16.msra.mxu0 %v2459_v55 }
 0x482   :  { %8456 = vmatprep.subr.bf16.mxu1 %v9629_v16  ;;  %8476 = vmatprep.subr.bf16.mxu0 %v9629_v16  ;;  %v2461_v48 = vmul.bf16 %v10325_v44, %v2349_v3 }
 0x483   :  { %v2460_v42 = vmul.bf16 %v10323_v7, %v2348_v39 }
 0x484   :  { %8433 = vmatmul.mubr.bf16.vlgmr.msra.gmra.mrb[92].mxu1 %v1181_v47  ;;  %8453 = vmatmul.mubr.bf16.vlgmr.msra.gmra.mrb[92].mxu0 %v1182_v41 }
 0x485   :  { %v8312_v21 = vpop.f32.mrb[60].mxu1  ;;  %8457 = vmatpush3.bf16.msra.mxu1 %v2460_v42  ;;  %8472 = vmatprep.mubr.msk.bf16.mxu1 %vm9630_vm1, %v9629_v16 }
 0x486   :  { %v1858_v52 = vpop.f32.mrb[61].mxu1  ;;  %8458 = vmatprep.subr.bf16.mxu1 %v9629_v16  ;;  %8492 = vmatprep.mubr.msk.bf16.mxu0 %vm9630_vm1, %v9629_v16 }
 0x487   :  { %v8313_v1 = vpop.f32.mrb[62].mxu1 }
 0x488   :  { %v2351_v30 = vpack.c.bf16 %v8313_v1, %v8312_v21  ;;  %v1861_v33 = vpop.f32.mrb[63].mxu1 }
 0x489   :  { %v2350_v47 = vpack.c.bf16 %v1861_v33, %v1858_v52  ;;  %8459 = vmatpush3.bf16.msra.mxu1 %v2461_v48 }
 0x48a   :  { %8460 = vmatprep.subr.bf16.mxu1 %v9629_v16  ;;  %v2463_v58 = vmul.bf16 %v10332_v27, %v2351_v30 }
 0x48b   :  { %v2462_v46 = vmul.bf16 %v10330_v24, %v2350_v47 }
 0x48d   :  { %v8316_v41 = vpop.f32.mrb[64].mxu1  ;;  %8461 = vmatpush3.bf16.msra.mxu1 %v2462_v46 }
 0x48e   :  { %v1874_v2 = vpop.f32.mrb[65].mxu1  ;;  %8462 = vmatprep.subr.bf16.mxu1 %v9629_v16 }
 0x48f   :  { %v8317_v22 = vpop.f32.mrb[66].mxu1 }
 0x490   :  { %v2353_v17 = vpack.c.bf16 %v8317_v22, %v8316_v41  ;;  %v1877_v61 = vpop.f32.mrb[67].mxu1 }
 0x491   :  { %v2352_v32 = vpack.c.bf16 %v1877_v61, %v1874_v2  ;;  %8463 = vmatpush3.bf16.msra.mxu1 %v2463_v58 }
 0x492   :  { %8464 = vmatprep.subr.bf16.mxu1 %v9629_v16  ;;  %v2465_v43 = vmul.bf16 %v10343_v18, %v2353_v17 }
 0x493   :  { %v2464_v4 = vmul.bf16 %v10341_v59, %v2352_v32 }
 0x495   :  { %v8320_v5 = vpop.f32.mrb[68].mxu1  ;;  %8465 = vmatpush3.bf16.msra.mxu1 %v2464_v4 }
 0x496   :  { %v1890_v36 = vpop.f32.mrb[69].mxu1  ;;  %8466 = vmatprep.subr.bf16.mxu1 %v9629_v16 }
 0x497   :  { %v8321_v9 = vpop.f32.mrb[70].mxu1 }
 0x498   :  { %v2355_v19 = vpack.c.bf16 %v8321_v9, %v8320_v5  ;;  %v1893_v54 = vpop.f32.mrb[71].mxu1 }
 0x499   :  { %v2354_v12 = vpack.c.bf16 %v1893_v54, %v1890_v36  ;;  %8467 = vmatpush3.bf16.msra.mxu1 %v2465_v43 }
 0x49a   :  { %8468 = vmatprep.subr.bf16.mxu1 %v9629_v16  ;;  %v2467_v51 = vmul.bf16 %v10355_v53, %v2355_v19 }
 0x49b   :  { %v2466_v14 = vmul.bf16 %v10353_v25, %v2354_v12 }
 0x49d   :  { %8469 = vmatpush3.bf16.msra.mxu1 %v2466_v14 }
 0x49e   :  { %8470 = vmatprep.subr.bf16.mxu1 %v9629_v16 }
 0x4a1   :  { %8471 = vmatpush3.bf16.msra.mxu1 %v2467_v51 }
 0x4a2   :  { %8496 = vmatprep.subr.bf16.mxu1 %v9629_v16 }
 0x4a4   :  { %8473 = vmatmul.mubr.bf16.vlgmr.msra.gmra.mrb[96].mxu1 %v1183_v37 }
 0x4a5   :  { %8512 = vmatprep.mubr.msk.bf16.mxu1 %vm9630_vm1, %v9629_v16 }
 0x4c4   :  { %v8326_v28 = vpop.f32.mrb[56].mxu0 }
 0x4c5   :  { %v1979_v10 = vpop.f32.mrb[57].mxu0 }
 0x4c6   :  { %v8327_v40 = vpop.f32.mrb[58].mxu0 }
 0x4c7   :  { %v2357_v23 = vpack.c.bf16 %v8327_v40, %v8326_v28  ;;  %v1982_v29 = vpop.f32.mrb[59].mxu0 }
 0x4c8   :  { %v2356_v55 = vpack.c.bf16 %v1982_v29, %v1979_v10 }
 0x4c9   :  { %v2469_v6 = vmul.bf16 %v10325_v44, %v2357_v23 }
 0x4ca   :  { %v2468_v35 = vmul.bf16 %v10323_v7, %v2356_v55 }
 0x4cb   :  { %v8344_v63 = vpop.f32.mrb[72].mxu1 }
 0x4cc   :  { %v8330_v13 = vpop.f32.mrb[60].mxu0  ;;  %8477 = vmatpush3.bf16.msra.mxu0 %v2468_v35  ;;  %v2116_v31 = vpop.f32.mrb[73].mxu1 }
 0x4cd   :  { %v1995_v3 = vpop.f32.mrb[61].mxu0  ;;  %8478 = vmatprep.subr.bf16.mxu0 %v9629_v16  ;;  %v8345_v37 = vpop.f32.mrb[74].mxu1 }
 0x4ce   :  { %v8331_v57 = vpop.f32.mrb[62].mxu0  ;;  %v2365_v42 = vpack.c.bf16 %v8345_v37, %v8344_v63  ;;  %v2119_v21 = vpop.f32.mrb[75].mxu1 }
 0x4cf   :  { %v2359_v39 = vpack.c.bf16 %v8331_v57, %v8330_v13  ;;  %v1998_v48 = vpop.f32.mrb[63].mxu0  ;;  %v2364_v1 = vpack.c.bf16 %v2119_v21, %v2116_v31 }
 0x4d0   :  { %v2358_v52 = vpack.c.bf16 %v1998_v48, %v1995_v3  ;;  %8479 = vmatpush3.bf16.msra.mxu0 %v2469_v6  ;;  %v2477_v47 = vmul.bf16 %v10325_v44, %v2365_v42 }
 0x4d1   :  { %8480 = vmatprep.subr.bf16.mxu0 %v9629_v16  ;;  %v2476_v33 = vmul.bf16 %v10323_v7, %v2364_v1  ;;  %v2471_v22 = vmul.bf16 %v10332_v27, %v2359_v39 }
 0x4d2   :  { %v2470_v30 = vmul.bf16 %v10330_v24, %v2358_v52 }
 0x4d3   :  { %v8348_v58 = vpop.f32.mrb[76].mxu1  ;;  %8497 = vmatpush3.bf16.msra.mxu1 %v2476_v33 }
 0x4d4   :  { %v8334_v46 = vpop.f32.mrb[64].mxu0  ;;  %8481 = vmatpush3.bf16.msra.mxu0 %v2470_v30  ;;  %v2132_v2 = vpop.f32.mrb[77].mxu1  ;;  %8498 = vmatprep.subr.bf16.mxu1 %v9629_v16 }
 0x4d5   :  { %v2011_v41 = vpop.f32.mrb[65].mxu0  ;;  %8482 = vmatprep.subr.bf16.mxu0 %v9629_v16  ;;  %v8349_v61 = vpop.f32.mrb[78].mxu1 }
 0x4d6   :  { %v8335_v17 = vpop.f32.mrb[66].mxu0  ;;  %v2367_v4 = vpack.c.bf16 %v8349_v61, %v8348_v58  ;;  %v2135_v5 = vpop.f32.mrb[79].mxu1 }
 0x4d7   :  { %v2361_v32 = vpack.c.bf16 %v8335_v17, %v8334_v46  ;;  %v2014_v43 = vpop.f32.mrb[67].mxu0  ;;  %v2366_v9 = vpack.c.bf16 %v2135_v5, %v2132_v2  ;;  %8499 = vmatpush3.bf16.msra.mxu1 %v2477_v47 }
 0x4d8   :  { %v2360_v36 = vpack.c.bf16 %v2014_v43, %v2011_v41  ;;  %8483 = vmatpush3.bf16.msra.mxu0 %v2471_v22  ;;  %8500 = vmatprep.subr.bf16.mxu1 %v9629_v16  ;;  %v2479_v12 = vmul.bf16 %v10332_v27, %v2367_v4 }
 0x4d9   :  { %8484 = vmatprep.subr.bf16.mxu0 %v9629_v16  ;;  %v2478_v54 = vmul.bf16 %v10330_v24, %v2366_v9  ;;  %v2473_v40 = vmul.bf16 %v10343_v18, %v2361_v32 }
 0x4da   :  { %v2472_v19 = vmul.bf16 %v10341_v59, %v2360_v36 }
 0x4db   :  { %v8352_v51 = vpop.f32.mrb[80].mxu1  ;;  %8501 = vmatpush3.bf16.msra.mxu1 %v2478_v54 }
 0x4dc   :  { %v8338_v14 = vpop.f32.mrb[68].mxu0  ;;  %8485 = vmatpush3.bf16.msra.mxu0 %v2472_v19  ;;  %v2148_v10 = vpop.f32.mrb[81].mxu1  ;;  %8502 = vmatprep.subr.bf16.mxu1 %v9629_v16 }
 0x4dd   :  { %v2027_v28 = vpop.f32.mrb[69].mxu0  ;;  %8486 = vmatprep.subr.bf16.mxu0 %v9629_v16  ;;  %v8353_v29 = vpop.f32.mrb[82].mxu1 }
 0x4de   :  { %v8339_v23 = vpop.f32.mrb[70].mxu0  ;;  %v2369_v35 = vpack.c.bf16 %v8353_v29, %v8352_v51  ;;  %v2151_v63 = vpop.f32.mrb[83].mxu1 }
 0x4df   :  { %v2363_v55 = vpack.c.bf16 %v8339_v23, %v8338_v14  ;;  %v2030_v13 = vpop.f32.mrb[71].mxu0  ;;  %v2368_v31 = vpack.c.bf16 %v2151_v63, %v2148_v10  ;;  %8503 = vmatpush3.bf16.msra.mxu1 %v2479_v12 }
 0x4e0   :  { %v2362_v3 = vpack.c.bf16 %v2030_v13, %v2027_v28  ;;  %8487 = vmatpush3.bf16.msra.mxu0 %v2473_v40  ;;  %8504 = vmatprep.subr.bf16.mxu1 %v9629_v16  ;;  %v2481_v37 = vmul.bf16 %v10343_v18, %v2369_v35 }
 0x4e1   :  { %8488 = vmatprep.subr.bf16.mxu0 %v9629_v16  ;;  %v2480_v57 = vmul.bf16 %v10341_v59, %v2368_v31  ;;  %v2475_v52 = vmul.bf16 %v10355_v53, %v2363_v55 }
 0x4e2   :  { %v2474_v6 = vmul.bf16 %v10353_v25, %v2362_v3 }
 0x4e3   :  { %v8356_v39 = vpop.f32.mrb[84].mxu1  ;;  %8505 = vmatpush3.bf16.msra.mxu1 %v2480_v57 }
 0x4e4   :  { %v8362_v42 = vpop.f32.mrb[72].mxu0  ;;  %8489 = vmatpush3.bf16.msra.mxu0 %v2474_v6  ;;  %v2164_v48 = vpop.f32.mrb[85].mxu1  ;;  %8506 = vmatprep.subr.bf16.mxu1 %v9629_v16 }
 0x4e5   :  { %v2253_v21 = vpop.f32.mrb[73].mxu0  ;;  %8490 = vmatprep.subr.bf16.mxu0 %v9629_v16  ;;  %v8357_v1 = vpop.f32.mrb[86].mxu1 }
 0x4e6   :  { %v8363_v30 = vpop.f32.mrb[74].mxu0  ;;  %v2371_v33 = vpack.c.bf16 %v8357_v1, %v8356_v39  ;;  %v2167_v46 = vpop.f32.mrb[87].mxu1 }
 0x4e7   :  { %v2373_v47 = vpack.c.bf16 %v8363_v30, %v8362_v42  ;;  %v2256_v58 = vpop.f32.mrb[75].mxu0  ;;  %v2370_v41 = vpack.c.bf16 %v2167_v46, %v2164_v48  ;;  %8507 = vmatpush3.bf16.msra.mxu1 %v2481_v37 }
 0x4e8   :  { %v2372_v2 = vpack.c.bf16 %v2256_v58, %v2253_v21  ;;  %8491 = vmatpush3.bf16.msra.mxu0 %v2475_v52  ;;  %8508 = vmatprep.subr.bf16.mxu1 %v9629_v16  ;;  %v2483_v61 = vmul.bf16 %v10355_v53, %v2371_v33 }
 0x4e9   :  { %8516 = vmatprep.subr.bf16.mxu0 %v9629_v16  ;;  %v2482_v22 = vmul.bf16 %v10353_v25, %v2370_v41  ;;  %v2485_v43 = vmul.bf16 %v10325_v44, %v2373_v47 }
 0x4ea   :  { %v2484_v17 = vmul.bf16 %v10323_v7, %v2372_v2 }
 0x4eb   :  { %8493 = vmatmul.mubr.bf16.vlgmr.msra.gmra.mrb[96].mxu0 %v1184_v8  ;;  %8509 = vmatpush3.bf16.msra.mxu1 %v2482_v22 }
 0x4ec   :  { %v8366_v32 = vpop.f32.mrb[76].mxu0  ;;  %8517 = vmatpush3.bf16.msra.mxu0 %v2484_v17  ;;  %8510 = vmatprep.subr.bf16.mxu1 %v9629_v16 }
 0x4ed   :  { %v2269_v4 = vpop.f32.mrb[77].mxu0  ;;  %8518 = vmatprep.subr.bf16.mxu0 %v9629_v16  ;;  %8532 = vmatprep.mubr.msk.bf16.mxu0 %vm9630_vm1, %v9629_v16 }
 0x4ee   :  { %v8367_v5 = vpop.f32.mrb[78].mxu0 }
 0x4ef   :  { %v2375_v36 = vpack.c.bf16 %v8367_v5, %v8366_v32  ;;  %v2272_v9 = vpop.f32.mrb[79].mxu0  ;;  %8511 = vmatpush3.bf16.msra.mxu1 %v2483_v61 }
 0x4f0   :  { %v2374_v56 = vpack.c.bf16 %v2272_v9, %v2269_v4  ;;  %8519 = vmatpush3.bf16.msra.mxu0 %v2485_v43  ;;  %8536 = vmatprep.subr.bf16.mxu1 %v10323_v7 }
 0x4f1   :  { %8520 = vmatprep.subr.bf16.mxu0 %v9629_v16  ;;  %v2487_v54 = vmul.bf16 %v10332_v27, %v2375_v36 }
 0x4f2   :  { %v2486_v26 = vmul.bf16 %v10330_v24, %v2374_v56  ;;  %8513 = vmatmul.mubr.bf16.vlgmr.msra.gmra.mrb[100].mxu1 %v1185_v45 }
 0x4f3   :  { %8537 = vmatpush3.bf16.msra.mxu1 %v10323_v7 }
 0x4f4   :  { %v8370_v8 = vpop.f32.mrb[80].mxu0  ;;  %8521 = vmatpush3.bf16.msra.mxu0 %v2486_v26  ;;  %8538 = vmatprep.subr.bf16.mxu1 %v10325_v44 }
 0x4f5   :  { %v2285_v19 = vpop.f32.mrb[81].mxu0  ;;  %8522 = vmatprep.subr.bf16.mxu0 %v9629_v16 }
 0x4f6   :  { %v8371_v12 = vpop.f32.mrb[82].mxu0 }
 0x4f7   :  { %v2377_v14 = vpack.c.bf16 %v8371_v12, %v8370_v8  ;;  %v2288_v51 = vpop.f32.mrb[83].mxu0  ;;  %8539 = vmatpush3.bf16.msra.mxu1 %v10325_v44 }
 0x4f8   :  { %v2376_v28 = vpack.c.bf16 %v2288_v51, %v2285_v19  ;;  %8523 = vmatpush3.bf16.msra.mxu0 %v2487_v54  ;;  %8540 = vmatprep.subr.bf16.mxu1 %v10330_v24 }
 0x4f9   :  { %8524 = vmatprep.subr.bf16.mxu0 %v9629_v16  ;;  %v2489_v7 = vmul.bf16 %v10343_v18, %v2377_v14 }
 0x4fa   :  { %v2488_v20 = vmul.bf16 %v10341_v59, %v2376_v28 }
 0x4fb   :  { %8541 = vmatpush3.bf16.msra.mxu1 %v10330_v24 }
 0x4fc   :  { %v8374_v50 = vpop.f32.mrb[84].mxu0  ;;  %8525 = vmatpush3.bf16.msra.mxu0 %v2488_v20  ;;  %8542 = vmatprep.subr.bf16.mxu1 %v10332_v27 }
 0x4fd   :  { %v2301_v45 = vpop.f32.mrb[85].mxu0  ;;  %8526 = vmatprep.subr.bf16.mxu0 %v9629_v16 }
 0x4fe   :  { %v8375_v10 = vpop.f32.mrb[86].mxu0 }
 0x4ff   :  { %v2379_v40 = vpack.c.bf16 %v8375_v10, %v8374_v50  ;;  %v2304_v44 = vpop.f32.mrb[87].mxu0  ;;  %8543 = vmatpush3.bf16.msra.mxu1 %v10332_v27 }
 0x500   :  { %v2378_v23 = vpack.c.bf16 %v2304_v44, %v2301_v45  ;;  %8527 = vmatpush3.bf16.msra.mxu0 %v2489_v7  ;;  %8544 = vmatprep.subr.bf16.mxu1 %v10341_v59 }
 0x501   :  { %8528 = vmatprep.subr.bf16.mxu0 %v9629_v16  ;;  %v2491_v29 = vmul.bf16 %v10355_v53, %v2379_v40 }
 0x502   :  { %v2490_v24 = vmul.bf16 %v10353_v25, %v2378_v23 }
 0x503   :  { %8545 = vmatpush3.bf16.msra.mxu1 %v10341_v59 }
 0x504   :  { %8529 = vmatpush3.bf16.msra.mxu0 %v2490_v24  ;;  %8546 = vmatprep.subr.bf16.mxu1 %v10343_v18 }
 0x505   :  { %8530 = vmatprep.subr.bf16.mxu0 %v9629_v16 }
 0x507   :  { %8547 = vmatpush3.bf16.msra.mxu1 %v10343_v18 }
 0x508   :  { %8531 = vmatpush3.bf16.msra.mxu0 %v2491_v29  ;;  %8548 = vmatprep.subr.bf16.mxu1 %v10353_v25 }
 0x50b   :  { %8533 = vmatmul.mubr.bf16.vlgmr.msra.gmra.mrb[100].mxu0 %v1186_v38  ;;  %8549 = vmatpush3.bf16.msra.mxu1 %v10353_v25 }
 0x50c   :  { %8550 = vmatprep.subr.bf16.mxu1 %v10355_v53 }
 0x50f   :  { %8551 = vmatpush3.bf16.msra.mxu1 %v10355_v53 }
 0x527   :  { %v2526_v16 = vpop.f32.mrb[88].mxu1 }
 0x528   :  { %v2820_v27 = vmul.f32 0.35355338, %v2526_v16  ;;  %v8394_v59 = vpop.f32.mrb[89].mxu1 }
 0x529   :  { %v2529_v55 = vpop.f32.mrb[90].mxu1 }
 0x52a   :  { %v2821_v35 = vmul.f32 0.35355338, %v2529_v55  ;;  %2836 = vmax.xlane.f32.xlu0 %v2820_v27  ;;  %v8395_v13 = vpop.f32.mrb[91].mxu1 }
 0x52c   :  { %2838 = vmax.xlane.f32.xlu1 %v2821_v35 }
 0x537   :  { %v2567_v18 = vpop.f32.mrb[88].mxu0 }
 0x538   :  { %v2822_v63 = vmul.f32 0.35355338, %v2567_v18  ;;  %v8414_v3 = vpop.f32.mrb[89].mxu0 }
 0x539   :  { %v2570_v31 = vpop.f32.mrb[90].mxu0 }
 0x53a   :  { %v2823_v62 = vmul.f32 0.35355338, %v2570_v31  ;;  %v8415_v0 = vpop.f32.mrb[91].mxu0  ;;  %2840 = vmax.xlane.f32.xlu0 %v2822_v63 }
 0x53c   :  { %2842 = vmax.xlane.f32.xlu1 %v2823_v62 }
 0x557   :  { %v2608_v38 = vpop.f32.mrb[92].mxu1  ;;  %v2649_v25 = vpop.f32.mrb[92].mxu0 }
 0x558   :  { %v10517_v6 = vmul.f32 0.35355338, %v2608_v38  ;;  %v8434_v53 = vpop.f32.mrb[93].mxu1  ;;  %v8454_v57 = vpop.f32.mrb[93].mxu0  ;;  %v10522_v52 = vmul.f32 0.35355338, %v2649_v25 }
 0x559   :  { %v2611_v37 = vpop.f32.mrb[94].mxu1  ;;  %v2652_v39 = vpop.f32.mrb[94].mxu0 }
 0x55a   :  { %v10519_v42 = vmul.f32 0.35355338, %v2611_v37  ;;  %v8455_v48 = vpop.f32.mrb[95].mxu0  ;;  %2844 = vmax.xlane.f32.xlu0 %v10517_v6  ;;  %v8435_v21 = vpop.f32.mrb[95].mxu1  ;;  %v10525_v1 = vmul.f32 0.35355338, %v2652_v39 }
 0x55c   :  { %2846 = vmax.xlane.f32.xlu1 %v10519_v42 }
 0x55e   :  { %2848 = vmax.xlane.f32.xlu0 %v10522_v52 }
 0x560   :  { %2850 = vmax.xlane.f32.xlu1 %v10525_v1 }
 0x577   :  { %v2690_v30 = vpop.f32.mrb[96].mxu1 }
 0x578   :  { %v10529_v33 = vmul.f32 0.35355338, %v2690_v30  ;;  %v8474_v47 = vpop.f32.mrb[97].mxu1 }
 0x579   :  { %v2693_v46 = vpop.f32.mrb[98].mxu1 }
 0x57a   :  { %v10531_v58 = vmul.f32 0.35355338, %v2693_v46  ;;  %2852 = vmax.xlane.f32.xlu0 %v10529_v33  ;;  %v8475_v41 = vpop.f32.mrb[99].mxu1  ;;  %v8794_v46 = vld [vmem:[#allocation10 + $0x8] sm:$0xff]  }
 0x57b   :  { %v8795_v41 = vld [vmem:[#allocation10 + $0x10] sm:$0xff]  }
 0x57c   :  { %2854 = vmax.xlane.f32.xlu1 %v10531_v58 }
 0x5b7   :  { %v2837_v2 = vpop.xlane.xlu0 %2836 }
 0x5b8   :  { %v2868_v22 = vsub.f32 %v2820_v27, %v2837_v2 }
 0x5b9   :  { %v2839_v17 = vpop.xlane.xlu1 %2838 }
 0x5ba   :  { %v2884_v61 = vmul.f32 1.442695, %v2868_v22  ;;  %v2869_v32 = vsub.f32 %v2821_v35, %v2839_v17 }
 0x5bc   :  { %v2886_v4 = vmul.f32 1.442695, %v2869_v32  ;;  %9073 = vpow2.f32 %v2884_v61 }
 0x5be   :  { %9075 = vpow2.f32 %v2886_v4  ;;  %v2731_v43 = vpop.f32.mrb[96].mxu0 }
 0x5bf   :  { %v10535_v5 = vmul.f32 0.35355338, %v2731_v43  ;;  %v8494_v36 = vpop.f32.mrb[97].mxu0 }
 0x5c0   :  { %v2734_v9 = vpop.f32.mrb[98].mxu0 }
 0x5c1   :  { %v10537_v56 = vmul.f32 0.35355338, %v2734_v9  ;;  %v8495_v26 = vpop.f32.mrb[99].mxu0  ;;  %2856 = vmax.xlane.f32.xlu0 %v10535_v5 }
 0x5c2   :  { %v8796_v26 = vld [vmem:[#allocation10 + $0x18] sm:$0xff]  }
 0x5c3   :  { %2858 = vmax.xlane.f32.xlu1 %v10537_v56 }
 0x5c5   :  { %v2772_v8 = vpop.f32.mrb[100].mxu1 }
 0x5c6   :  { %v10541_v19 = vpop.eup %9073  ;;  %v10543_v12 = vmul.f32 0.35355338, %v2772_v8  ;;  %v8514_v14 = vpop.f32.mrb[101].mxu1  ;;  %v8798_v8 = vld [vmem:[#allocation10 + $0x28] sm:$0xff]  }
 0x5c7   :  { %v2841_v54 = vpop.xlane.xlu0 %2840  ;;  %v2775_v20 = vpop.f32.mrb[102].mxu1 }
 0x5c8   :  { %v10545_v51 = vpop.eup %9075  ;;  %v2870_v28 = vsub.f32 %v2822_v63, %v2841_v54  ;;  %v10547_v45 = vmul.f32 0.35355338, %v2775_v20  ;;  %2860 = vmax.xlane.f32.xlu0 %v10543_v12  ;;  %v8515_v7 = vpop.f32.mrb[103].mxu1  ;;  %v8800_v54 = vld [vmem:[#allocation10 + $0x38] sm:$0xff]  }
 0x5c9   :  { %v2843_v50 = vpop.xlane.xlu1 %2842  ;;  %v2916_v10 = vpack.c.bf16 %v10545_v51, %v10541_v19 }
 0x5ca   :  { %v2888_v40 = vmul.f32 1.442695, %v2870_v28  ;;  %v2871_v44 = vsub.f32 %v2823_v62, %v2843_v50  ;;  %2862 = vmax.xlane.f32.xlu1 %v10547_v45 }
 0x5cb   :  { %8552 = vmatprep.mubr.bf16.mxu1 %v2916_v10 }
 0x5cc   :  { %v2890_v23 = vmul.f32 1.442695, %v2871_v44  ;;  %9077 = vpow2.f32 %v2888_v40 }
 0x5ce   :  { %9079 = vpow2.f32 %v2890_v23 }
 0x5d6   :  { %v10553_v24 = vpop.eup %9077 }
 0x5d8   :  { %v10555_v29 = vpop.eup %9079 }
 0x5d9   :  { %v2917_v16 = vpack.c.bf16 %v10555_v29, %v10553_v24 }
 0x5db   :  { %8553 = vmatmul.mubr.bf16.vlgmr.msra.gmra.mrb[104].mxu1 %v2917_v16 }
 0x5de   :  { %v2813_v27 = vpop.f32.mrb[100].mxu0 }
 0x5df   :  { %v10559_v59 = vmul.f32 0.35355338, %v2813_v27  ;;  %v8534_v55 = vpop.f32.mrb[101].mxu0 }
 0x5e0   :  { %v2816_v35 = vpop.f32.mrb[102].mxu0 }
 0x5e1   :  { %v10561_v13 = vmul.f32 0.35355338, %v2816_v35  ;;  %v8535_v18 = vpop.f32.mrb[103].mxu0  ;;  %2864 = vmax.xlane.f32.xlu0 %v10559_v59 }
 0x5e3   :  { %2866 = vmax.xlane.f32.xlu1 %v10561_v13 }
 0x5e7   :  { %v2845_v63 = vpop.xlane.xlu0 %2844 }
 0x5e8   :  { %v2872_v3 = vsub.f32 %v10517_v6, %v2845_v63 }
 0x5e9   :  { %v2847_v31 = vpop.xlane.xlu1 %2846 }
 0x5ea   :  { %v2892_v62 = vmul.f32 1.442695, %v2872_v3  ;;  %v2873_v0 = vsub.f32 %v10519_v42, %v2847_v31 }
 0x5eb   :  { %v2849_v38 = vpop.xlane.xlu0 %2848 }
 0x5ec   :  { %v2894_v25 = vmul.f32 1.442695, %v2873_v0  ;;  %v2874_v53 = vsub.f32 %v10522_v52, %v2849_v38  ;;  %9081 = vpow2.f32 %v2892_v62 }
 0x5ed   :  { %v2851_v57 = vpop.xlane.xlu1 %2850 }
 0x5ee   :  { %9083 = vpow2.f32 %v2894_v25  ;;  %v2896_v37 = vmul.f32 1.442695, %v2874_v53  ;;  %v2875_v39 = vsub.f32 %v10525_v1, %v2851_v57  ;;  %v8793_v1 = vld [vmem:[#allocation10] sm:$0xff]  }
 0x5ef   :  { %8568 = vmatprep.subr.bf16.mxu0 %v8793_v1 }
 0x5f0   :  { %v2898_v48 = vmul.f32 1.442695, %v2875_v39  ;;  %9085 = vpow2.f32 %v2896_v37  ;;  %8569 = vmatpush3.bf16.msra.mxu0 %v8793_v1 }
 0x5f1   :  { %8570 = vmatprep.subr.bf16.mxu0 %v8794_v46 }
 0x5f2   :  { %9087 = vpow2.f32 %v2898_v48 }
 0x5f4   :  { %8571 = vmatpush3.bf16.msra.mxu0 %v8794_v46 }
 0x5f5   :  { %8572 = vmatprep.subr.bf16.mxu0 %v8795_v41 }
 0x5f6   :  { %v10569_v21 = vpop.eup %9081 }
 0x5f8   :  { %v10571_v6 = vpop.eup %9083  ;;  %8573 = vmatpush3.bf16.msra.mxu0 %v8795_v41 }
 0x5f9   :  { %v2918_v42 = vpack.c.bf16 %v10571_v6, %v10569_v21  ;;  %8574 = vmatprep.subr.bf16.mxu0 %v8796_v26 }
 0x5fa   :  { %v10575_v30 = vpop.eup %9085 }
 0x5fb   :  { %8556 = vmatprep.mubr.bf16.mxu1 %v2918_v42 }
 0x5fc   :  { %v10577_v52 = vpop.eup %9087  ;;  %8575 = vmatpush3.bf16.msra.mxu0 %v8796_v26 }
 0x5fd   :  { %v2919_v47 = vpack.c.bf16 %v10577_v52, %v10575_v30 }
 0x5ff   :  { %8557 = vmatmul.mubr.bf16.gmra.mrb[108].mxu1 %v2919_v47 }
 0x607   :  { %v2853_v2 = vpop.xlane.xlu0 %2852 }
 0x608   :  { %v2876_v22 = vsub.f32 %v10529_v33, %v2853_v2  ;;  %v8797_v33 = vld [vmem:[#allocation10 + $0x20] sm:$0xff]  }
 0x609   :  { %v2855_v17 = vpop.xlane.xlu1 %2854  ;;  %8576 = vmatprep.subr.bf16.mxu0 %v8797_v33 }
 0x60a   :  { %v2900_v61 = vmul.f32 1.442695, %v2876_v22  ;;  %v2877_v32 = vsub.f32 %v10531_v58, %v2855_v17  ;;  %8577 = vmatpush3.bf16.msra.mxu0 %v8797_v33  ;;  %v8799_v58 = vld [vmem:[#allocation10 + $0x30] sm:$0xff]  }
 0x60b   :  { %8578 = vmatprep.subr.bf16.mxu0 %v8798_v8 }
 0x60c   :  { %v2902_v4 = vmul.f32 1.442695, %v2877_v32  ;;  %9089 = vpow2.f32 %v2900_v61 }
 0x60e   :  { %9091 = vpow2.f32 %v2902_v4  ;;  %8579 = vmatpush3.bf16.msra.mxu0 %v8798_v8 }
 0x60f   :  { %8580 = vmatprep.subr.bf16.mxu0 %v8799_v58 }
 0x612   :  { %8581 = vmatpush3.bf16.msra.mxu0 %v8799_v58 }
 0x613   :  { %8582 = vmatprep.subr.bf16.mxu0 %v8800_v54 }
 0x616   :  { %v10583_v43 = vpop.eup %9089  ;;  %8583 = vmatpush3.bf16.msra.mxu0 %v8800_v54 }
 0x618   :  { %v10585_v36 = vpop.eup %9091 }
 0x619   :  { %v2920_v9 = vpack.c.bf16 %v10585_v36, %v10583_v43 }
 0x61b   :  { %8560 = vmatprep.mubr.bf16.mxu1 %v2920_v9 }
 0x64e   :  { %v2857_v14 = vpop.xlane.xlu0 %2856 }
 0x64f   :  { %v2878_v28 = vsub.f32 %v10535_v5, %v2857_v14 }
 0x650   :  { %v2859_v20 = vpop.xlane.xlu1 %2858 }
 0x651   :  { %v2904_v50 = vmul.f32 1.442695, %v2878_v28  ;;  %v2879_v7 = vsub.f32 %v10537_v56, %v2859_v20 }
 0x653   :  { %v2906_v10 = vmul.f32 1.442695, %v2879_v7  ;;  %9093 = vpow2.f32 %v2904_v50 }
 0x655   :  { %9095 = vpow2.f32 %v2906_v10  ;;  %v2861_v40 = vpop.xlane.xlu0 %2860 }
 0x656   :  { %v2880_v44 = vsub.f32 %v10543_v12, %v2861_v40 }
 0x657   :  { %v2863_v23 = vpop.xlane.xlu1 %2862 }
 0x658   :  { %v2908_v16 = vmul.f32 1.442695, %v2880_v44  ;;  %v2881_v27 = vsub.f32 %v10547_v45, %v2863_v23 }
 0x65a   :  { %v2910_v55 = vmul.f32 1.442695, %v2881_v27  ;;  %9097 = vpow2.f32 %v2908_v16  ;;  %v8801_v27 = vld [vmem:[#allocation11] ss:$12 sps:$4 sm:$0xff]  }
 0x65c   :  { %9099 = vpow2.f32 %v2910_v55  ;;  %v8803_v55 = vld [vmem:[#allocation11 + $0x4] ss:$12 sps:$4 sm:$0xff]  }
 0x65d   :  { %v10593_v35 = vpop.eup %9093  ;;  %3442 = vmatprep.subr.bf16.mxu1 %v8803_v55 }
 0x65e   :  { %3443 = vmatpush1.bf16.msra.mxu1 %v8801_v27 }
 0x65f   :  { %v10595_v5 = vpop.eup %9095 }
 0x660   :  { %v2921_v56 = vpack.c.bf16 %v10595_v5, %v10593_v35 }
 0x662   :  { %8561 = vmatmul.mubr.bf16.gmra.mrb[112].mxu1 %v2921_v56  ;;  %v8804_v56 = vld [vmem:[#allocation11 + $0x8] ss:$12 sps:$4 sm:$0xff]  }
 0x663   :  { %8600 = vmatprep.subr.bf16.mxu0 %v8804_v56 }
 0x664   :  { %v10599_v18 = vpop.eup %9097 }
 0x666   :  { %v10601_v63 = vpop.eup %9099 }
 0x667   :  { %v2922_v12 = vpack.c.bf16 %v10601_v63, %v10599_v18 }
 0x669   :  { %8564 = vmatprep.mubr.bf16.mxu1 %v2922_v12  ;;  %v8807_v12 = vld [vmem:[#allocation11 + $0x1c] ss:$12 sps:$4 sm:$0xff]  }
 0x66a   :  { %3444 = vmatprep.subr.bf16.mxu1 %v8807_v12 }
 0x66e   :  { %v2865_v45 = vpop.xlane.xlu0 %2864 }
 0x66f   :  { %v2882_v3 = vsub.f32 %v10559_v59, %v2865_v45  ;;  %v8808_v45 = vld [vmem:[#allocation11 + $0x20] ss:$12 sps:$4 sm:$0xff]  }
 0x670   :  { %v2867_v31 = vpop.xlane.xlu1 %2866 }
 0x671   :  { %v2912_v62 = vmul.f32 1.442695, %v2882_v3  ;;  %v2883_v0 = vsub.f32 %v10561_v13, %v2867_v31  ;;  %v8815_v3 = vld [vmem:[#allocation11 + $0x4c] ss:$12 sps:$4 sm:$0xff]   ;;  %v8816_v31 = vld [vmem:[#allocation11 + $0x50] ss:$12 sps:$4 sm:$0xff]  }
 0x673   :  { %v2914_v38 = vmul.f32 1.442695, %v2883_v0  ;;  %9101 = vpow2.f32 %v2912_v62  ;;  %v8813_v62 = vld [vmem:[#allocation11 + $0x48] ss:$12 sps:$4 sm:$0xff]   ;;  %v8819_v0 = vld [vmem:[#allocation11 + $0x64] ss:$12 sps:$4 sm:$0xff]  }
 0x675   :  { %9103 = vpow2.f32 %v2914_v38  ;;  %v8820_v38 = vld [vmem:[#allocation11 + $0x68] ss:$12 sps:$4 sm:$0xff]  }
 0x67d   :  { %v10607_v25 = vpop.eup %9101 }
 0x67f   :  { %v10609_v53 = vpop.eup %9103 }
 0x680   :  { %v2923_v57 = vpack.c.bf16 %v10609_v53, %v10607_v25 }
 0x682   :  { %8565 = vmatmul.mubr.bf16.gmra.mrb[116].mxu1 %v2923_v57  ;;  %v8817_v57 = vld [vmem:[#allocation11 + $0x60] ss:$12 sps:$4 sm:$0xff]  }
 0x683   :  { %3474 = vmatprep.mubr.bf16.mxu1 %v12517_v15 }
 0x6ae   :  { %v8554_v37 = vpop.f32.mrb[104].mxu1 }
 0x6af   :  { %v3023_v39 = vmax.f32 %v8554_v37, 1e-30  ;;  %v2958_v59 = vpop.f32.mrb[105].mxu1  ;;  %v8823_v37 = vld [vmem:[#allocation11 + $0x7c] ss:$12 sps:$4 sm:$0xff]  }
 0x6b0   :  { %v3021_v48 = vmax.f32 %v2958_v59, 1e-30  ;;  %v8555_v42 = vpop.f32.mrb[106].mxu1  ;;  %v8821_v59 = vld [vmem:[#allocation11 + $0x78] ss:$12 sps:$4 sm:$0xff]  }
 0x6b1   :  { %9105 = vrcp.f32 %v3023_v39  ;;  %v3024_v13 = vmax.f32 %v8555_v42, 1e-30  ;;  %v2961_v47 = vpop.f32.mrb[107].mxu1  ;;  %v8824_v39 = vld [vmem:[#allocation11 + $0x80] ss:$12 sps:$4 sm:$0xff]  }
 0x6b2   :  { %9107 = vrcp.f32 %v3021_v48  ;;  %v3022_v1 = vmax.f32 %v2961_v47, 1e-30  ;;  %v8827_v48 = vld [vmem:[#allocation11 + $0x94] ss:$12 sps:$4 sm:$0xff]   ;;  %v8825_v42 = vld [vmem:[#allocation11 + $0x90] ss:$12 sps:$4 sm:$0xff]  }
 0x6b3   :  { %9109 = vrcp.f32 %v3024_v13  ;;  %v8828_v13 = vld [vmem:[#allocation11 + $0x98] ss:$12 sps:$4 sm:$0xff]  }
 0x6b4   :  { %9111 = vrcp.f32 %v3022_v1  ;;  %v8831_v47 = vld [vmem:[#allocation11 + $0xac] ss:$12 sps:$4 sm:$0xff]   ;;  %v8829_v1 = vld [vmem:[#allocation11 + $0xa8] ss:$12 sps:$4 sm:$0xff]  }
 0x6bb   :  { %v9106_v46 = vpop.eup %9105 }
 0x6bc   :  { %v9108_v41 = vpop.eup %9107  ;;  %v3055_v17 = vmul.f32 %v9106_v46, %v10553_v24  ;;  %v8832_v46 = vld [vmem:[#allocation11 + $0xb0] ss:$12 sps:$4 sm:$0xff]  }
 0x6bd   :  { %v9110_v2 = vpop.eup %9109  ;;  %v3053_v32 = vmul.f32 %v9108_v41, %v10541_v19 }
 0x6be   :  { %v9112_v22 = vpop.eup %9111  ;;  %v3056_v61 = vmul.f32 %v9110_v2, %v10555_v29 }
 0x6bf   :  { %v3054_v4 = vmul.f32 %v9112_v22, %v10545_v51 }
 0x6c0   :  { %v3086_v9 = vpack.c.bf16 %v3056_v61, %v3055_v17 }
 0x6c1   :  { %v3085_v26 = vpack.c.bf16 %v3054_v4, %v3053_v32 }
 0x6c3   :  { %8584 = vmatprep.mubr.bf16.mxu0 %v3085_v26 }
 0x6c4   :  { %8585 = vmatmul.mubr.bf16.vlgmr.msra.gmra.mrb[104].mxu0 %v3086_v9 }
 0x6c5   :  { %8601 = vmatpush3.bf16.msra.mxu0 %v8804_v56 }
 0x6c6   :  { %8602 = vmatprep.subr.bf16.mxu0 %v8808_v45 }
 0x6c9   :  { %8603 = vmatpush3.bf16.msra.mxu0 %v8808_v45 }
 0x6d2   :  { %v8558_v33 = vpop.f32.mrb[108].mxu1 }
 0x6d3   :  { %v3027_v8 = vmax.f32 %v8558_v33, 1e-30  ;;  %v2974_v58 = vpop.f32.mrb[109].mxu1 }
 0x6d4   :  { %v3025_v54 = vmax.f32 %v2974_v58, 1e-30  ;;  %v8559_v14 = vpop.f32.mrb[110].mxu1 }
 0x6d5   :  { %9113 = vrcp.f32 %v3027_v8  ;;  %v3028_v28 = vmax.f32 %v8559_v14, 1e-30  ;;  %v2977_v20 = vpop.f32.mrb[111].mxu1 }
 0x6d6   :  { %9115 = vrcp.f32 %v3025_v54  ;;  %v3026_v24 = vmax.f32 %v2977_v20, 1e-30 }
 0x6d7   :  { %9117 = vrcp.f32 %v3028_v28 }
 0x6d8   :  { %9119 = vrcp.f32 %v3026_v24 }
 0x6df   :  { %v9114_v29 = vpop.eup %9113 }
 0x6e0   :  { %v9116_v19 = vpop.eup %9115  ;;  %v3059_v7 = vmul.f32 %v9114_v29, %v10575_v30  ;;  %v8805_v30 = vld [vmem:[#allocation11 + $0x18] ss:$12 sps:$4 sm:$0xff]  }
 0x6e1   :  { %v9118_v50 = vpop.eup %9117  ;;  %v3057_v40 = vmul.f32 %v9116_v19, %v10569_v21  ;;  %v8812_v21 = vld [vmem:[#allocation11 + $0x38] ss:$12 sps:$4 sm:$0xff]   ;;  %3445 = vmatpush1.bf16.msra.mxu1 %v8805_v30  ;;  %v10630_v30 = vld [vmem:[#allocation5] sm:$0xff] }
 0x6e2   :  { %v9120_v51 = vpop.eup %9119  ;;  %v3060_v10 = vmul.f32 %v9118_v50, %v10577_v52  ;;  %v8811_v52 = vld [vmem:[#allocation11 + $0x34] ss:$12 sps:$4 sm:$0xff]   ;;  %8604 = vmatprep.subr.bf16.mxu0 %v8812_v21 }
 0x6e3   :  { %v3058_v44 = vmul.f32 %v9120_v51, %v10571_v6  ;;  %v8809_v6 = vld [vmem:[#allocation11 + $0x30] ss:$12 sps:$4 sm:$0xff]   ;;  %3446 = vmatprep.subr.bf16.mxu1 %v8811_v52  ;;  %8605 = vmatpush3.bf16.msra.mxu0 %v8812_v21  ;;  %v3096_v52 = vrot.slane %v10630_v30, %v10152_v60 }
 0x6e4   :  { %v3088_v23 = vpack.c.bf16 %v3060_v10, %v3059_v7  ;;  %8606 = vmatprep.subr.bf16.mxu0 %v8816_v31 }
 0x6e5   :  { %v3087_v16 = vpack.c.bf16 %v3058_v44, %v3057_v40  ;;  %3447 = vmatpush1.bf16.msra.mxu1 %v8809_v6 }
 0x6e6   :  { %3448 = vmatprep.subr.bf16.mxu1 %v8815_v3 }
 0x6e7   :  { %8588 = vmatprep.mubr.bf16.mxu0 %v3087_v16  ;;  %8607 = vmatpush3.bf16.msra.mxu0 %v8816_v31 }
 0x6e8   :  { %8589 = vmatmul.mubr.bf16.gmra.mrb[108].mxu0 %v3088_v23  ;;  %8608 = vmatprep.subr.bf16.mxu0 %v8820_v38 }
 0x6e9   :  { %3449 = vmatpush1.bf16.msra.mxu1 %v8813_v62 }
 0x6ea   :  { %3450 = vmatprep.subr.bf16.mxu1 %v8819_v0 }
 0x6eb   :  { %8609 = vmatpush3.bf16.msra.mxu0 %v8820_v38 }
 0x6ec   :  { %8610 = vmatprep.subr.bf16.mxu0 %v8824_v39 }
 0x6ed   :  { %3451 = vmatpush1.bf16.msra.mxu1 %v8817_v57 }
 0x6ee   :  { %3452 = vmatprep.subr.bf16.mxu1 %v8823_v37 }
 0x6ef   :  { %8611 = vmatpush3.bf16.msra.mxu0 %v8824_v39 }
 0x6f0   :  { %8612 = vmatprep.subr.bf16.mxu0 %v8828_v13 }
 0x6f1   :  { %3453 = vmatpush1.bf16.msra.mxu1 %v8821_v59 }
 0x6f2   :  { %3454 = vmatprep.subr.bf16.mxu1 %v8827_v48 }
 0x6f3   :  { %8613 = vmatpush3.bf16.msra.mxu0 %v8828_v13 }
 0x6f4   :  { %8614 = vmatprep.subr.bf16.mxu0 %v8832_v46 }
 0x6f5   :  { %3455 = vmatpush1.bf16.msra.mxu1 %v8825_v42 }
 0x6f6   :  { %3456 = vmatprep.subr.bf16.mxu1 %v8831_v47 }
 0x6f7   :  { %8615 = vmatpush3.bf16.msra.mxu0 %v8832_v46 }
 0x6f9   :  { %3457 = vmatpush1.bf16.msra.mxu1 %v8829_v1 }
 0x735   :  { %v8562_v41 = vpop.f32.mrb[112].mxu1 }
 0x736   :  { %v3031_v2 = vmax.f32 %v8562_v41, 1e-30  ;;  %v2990_v22 = vpop.f32.mrb[113].mxu1 }
 0x737   :  { %v3029_v17 = vmax.f32 %v2990_v22, 1e-30  ;;  %v8563_v61 = vpop.f32.mrb[114].mxu1 }
 0x738   :  { %9121 = vrcp.f32 %v3031_v2  ;;  %v3032_v32 = vmax.f32 %v8563_v61, 1e-30  ;;  %v2993_v4 = vpop.f32.mrb[115].mxu1 }
 0x739   :  { %9123 = vrcp.f32 %v3029_v17  ;;  %v3030_v9 = vmax.f32 %v2993_v4, 1e-30 }
 0x73a   :  { %9125 = vrcp.f32 %v3032_v32 }
 0x73b   :  { %9127 = vrcp.f32 %v3030_v9 }
 0x742   :  { %v9122_v26 = vpop.eup %9121 }
 0x743   :  { %v9124_v33 = vpop.eup %9123  ;;  %v3063_v54 = vmul.f32 %v9122_v26, %v10593_v35 }
 0x744   :  { %v9126_v8 = vpop.eup %9125  ;;  %v3061_v28 = vmul.f32 %v9124_v33, %v10583_v43 }
 0x745   :  { %v9128_v58 = vpop.eup %9127  ;;  %v3064_v14 = vmul.f32 %v9126_v8, %v10595_v5 }
 0x746   :  { %v3062_v20 = vmul.f32 %v9128_v58, %v10585_v36 }
 0x747   :  { %v3090_v24 = vpack.c.bf16 %v3064_v14, %v3063_v54 }
 0x748   :  { %v3089_v29 = vpack.c.bf16 %v3062_v20, %v3061_v28 }
 0x74a   :  { %8592 = vmatprep.mubr.bf16.mxu0 %v3089_v29 }
 0x74b   :  { %8593 = vmatmul.mubr.bf16.gmra.mrb[112].mxu0 %v3090_v24 }
 0x755   :  { %v8566_v19 = vpop.f32.mrb[116].mxu1 }
 0x756   :  { %v3035_v50 = vmax.f32 %v8566_v19, 1e-30  ;;  %v3006_v51 = vpop.f32.mrb[117].mxu1 }
 0x757   :  { %v3033_v7 = vmax.f32 %v3006_v51, 1e-30  ;;  %v8567_v10 = vpop.f32.mrb[118].mxu1 }
 0x758   :  { %9129 = vrcp.f32 %v3035_v50  ;;  %v3036_v40 = vmax.f32 %v8567_v10, 1e-30  ;;  %v3009_v44 = vpop.f32.mrb[119].mxu1  ;;  %v216_v50 = vadd.s32 8, %v9988_v11 }
 0x759   :  { %9131 = vrcp.f32 %v3033_v7  ;;  %v3034_v35 = vmax.f32 %v3009_v44, 1e-30  ;;  %v217_v44 = vadd.s32 16, %v9988_v11 }
 0x75a   :  { %9133 = vrcp.f32 %v3036_v40  ;;  %v242_v7 = vand.u32 15, %v216_v50  ;;  %v219_v50 = vadd.s32 32, %v9988_v11 }
 0x75b   :  { %9135 = vrcp.f32 %v3034_v35 }
 0x75c   :  { %vm10702_vm4 = vcmp.eq.s32.totalorder %v242_v7, 15  ;;  %v218_v7 = vadd.s32 24, %v9988_v11 }
 0x762   :  { %v9130_v5 = vpop.eup %9129 }
 0x763   :  { %v9132_v43 = vpop.eup %9131  ;;  %v3067_v16 = vmul.f32 %v9130_v5, %v10607_v25 }
 0x764   :  { %v9134_v23 = vpop.eup %9133  ;;  %v3065_v55 = vmul.f32 %v9132_v43, %v10599_v18 }
 0x765   :  { %v9136_v36 = vpop.eup %9135  ;;  %v3068_v27 = vmul.f32 %v9134_v23, %v10609_v53 }
 0x766   :  { %v3066_v56 = vmul.f32 %v9136_v36, %v10601_v63 }
 0x767   :  { %v3092_v12 = vpack.c.bf16 %v3068_v27, %v3067_v16 }
 0x768   :  { %v3091_v45 = vpack.c.bf16 %v3066_v56, %v3065_v55  ;;  %v12613_v56 = vmov 0 }
 0x769   :  { %v12614_v56 = vsel %vm10702_vm4, 4294967295, %v12613_v56 }
 0x76a   :  { %8596 = vmatprep.mubr.bf16.mxu0 %v3091_v45  ;;  %12615 = vst [vmem:[#allocation39_spill] sm:$0xff] %v12614_v56 }
 0x76b   :  { %8597 = vmatmul.mubr.bf16.gmra.mrb[116].mxu0 %v3092_v12 }
 0x797   :  { %v8586_v21 = vpop.f32.mrb[104].mxu0 }
 0x798   :  { %v3179_v6 = vpop.f32.mrb[105].mxu0  ;;  %v10640_v63 = vadd.f32 %v8586_v21, %v3096_v52 }
 0x799   :  { %v8587_v3 = vpop.f32.mrb[106].mxu0  ;;  %v10636_v53 = vadd.f32 %v3179_v6, %v3096_v52  ;;  %v249_v6 = vand.u32 15, %v217_v44  ;;  %v10735_v44 = vsub.s32 3, %v9988_v11 }
 0x79a   :  { %v10634_v31 = vadd.f32 %v8587_v3, %v3096_v52  ;;  %v3182_v25 = vpop.f32.mrb[107].mxu0  ;;  %12606 = vst [vmem:[#allocation32_spill] sm:$0xff] %v10640_v63 }
 0x79b   :  { %v10638_v18 = vadd.f32 %v3182_v25, %v3096_v52  ;;  %vm10723_vm5 = vcmp.eq.s32.totalorder %v249_v6, 0  ;;  %12619 = vst [vmem:[#allocation41_spill] sm:$0xff] %v10735_v44 }
 0x79c   :  { %v3307_v0 = vpack.c.bf16 %v10634_v31, %v10640_v63 }
 0x79d   :  { %v3306_v62 = vpack.c.bf16 %v10638_v18, %v10636_v53 }
 0x79f   :  { %3475 = vmatmul.mubr.bf16.vlgmr.msra.gmra.mrb[120].mxu1 %v3306_v62  ;;  %8616 = vmatprep.mubr.bf16.mxu0 %v3306_v62 }
 0x7a0   :  { %8617 = vmatmul.mubr.bf16.vlgmr.msra.gmra.mrb[120].mxu0 %v3307_v0  ;;  %3484 = vmatprep.mubr.bf16.mxu1 %v12517_v15 }
 0x7a7   :  { %3485 = vmatmul.mubr.bf16.gmra.mrb[124].mxu1 %v3307_v0 }
 0x7a8   :  { %3494 = vmatprep.mubr.bf16.mxu1 %v12517_v15 }
 0x7bb   :  { %v8590_v38 = vpop.f32.mrb[108].mxu0 }
 0x7bc   :  { %v3195_v57 = vpop.f32.mrb[109].mxu0  ;;  %v10654_v13 = vadd.f32 %v8590_v38, %v3096_v52 }
 0x7bd   :  { %v8591_v37 = vpop.f32.mrb[110].mxu0  ;;  %v10650_v48 = vadd.f32 %v3195_v57, %v3096_v52 }
 0x7be   :  { %v10648_v39 = vadd.f32 %v8591_v37, %v3096_v52  ;;  %v3198_v59 = vpop.f32.mrb[111].mxu0  ;;  %12608 = vst [vmem:[#allocation34_spill] sm:$0xff] %v10654_v13 }
 0x7bf   :  { %12607 = vst [vmem:[#allocation33_spill] sm:$0xff] %v10650_v48  ;;  %v10652_v42 = vadd.f32 %v3198_v59, %v3096_v52 }
 0x7c0   :  { %v3309_v1 = vpack.c.bf16 %v10648_v39, %v10654_v13 }
 0x7c1   :  { %v3308_v47 = vpack.c.bf16 %v10652_v42, %v10650_v48 }
 0x7c3   :  { %3495 = vmatmul.mubr.bf16.gmra.mrb[128].mxu1 %v3308_v47  ;;  %8620 = vmatprep.mubr.bf16.mxu0 %v3308_v47  ;;  %v12616_v47 = vmov 0 }
 0x7c4   :  { %8621 = vmatmul.mubr.bf16.gmra.mrb[124].mxu0 %v3309_v1  ;;  %3504 = vmatprep.mubr.bf16.mxu1 %v12517_v15  ;;  %v12617_v47 = vsel %vm10723_vm5, 4294967295, %v12616_v47 }
 0x7c5   :  { %12618 = vst [vmem:[#allocation40_spill] sm:$0xff] %v12617_v47  ;;  %v8964_v47 = vld [vmem:[#allocation17 + $0x20] ss:$12 sps:$4 sm:$0xff]  }
 0x7cb   :  { %3505 = vmatmul.mubr.bf16.gmra.mrb[132].mxu1 %v3309_v1 }
 0x7cc   :  { %3514 = vmatprep.mubr.bf16.mxu1 %v12517_v15 }
 0x81e   :  { %v8594_v46 = vpop.f32.mrb[112].mxu0 }
 0x81f   :  { %v3211_v41 = vpop.f32.mrb[113].mxu0  ;;  %v10668_v4 = vadd.f32 %v8594_v46, %v3096_v52 }
 0x820   :  { %v8595_v2 = vpop.f32.mrb[114].mxu0  ;;  %v10664_v61 = vadd.f32 %v3211_v41, %v3096_v52 }
 0x821   :  { %v10662_v22 = vadd.f32 %v8595_v2, %v3096_v52  ;;  %v3214_v17 = vpop.f32.mrb[115].mxu0  ;;  %12610 = vst [vmem:[#allocation36_spill] sm:$0xff] %v10668_v4 }
 0x822   :  { %12609 = vst [vmem:[#allocation35_spill] sm:$0xff] %v10664_v61  ;;  %v10666_v32 = vadd.f32 %v3214_v17, %v3096_v52 }
 0x823   :  { %v3311_v26 = vpack.c.bf16 %v10662_v22, %v10668_v4 }
 0x824   :  { %v3310_v9 = vpack.c.bf16 %v10666_v32, %v10664_v61 }
 0x826   :  { %3515 = vmatmul.mubr.bf16.gmra.mrb[136].mxu1 %v3310_v9  ;;  %8624 = vmatprep.mubr.bf16.mxu0 %v3310_v9 }
 0x827   :  { %8625 = vmatmul.mubr.bf16.gmra.mrb[128].mxu0 %v3311_v26  ;;  %3524 = vmatprep.mubr.bf16.mxu1 %v12517_v15 }
 0x82e   :  { %3525 = vmatmul.mubr.bf16.gmra.mrb[140].mxu1 %v3311_v26 }
 0x82f   :  { %3534 = vmatprep.mubr.bf16.mxu1 %v12517_v15 }
 0x83e   :  { %v8598_v33 = vpop.f32.mrb[116].mxu0 }
 0x83f   :  { %v3227_v8 = vpop.f32.mrb[117].mxu0  ;;  %v10682_v24 = vadd.f32 %v8598_v33, %v3096_v52 }
 0x840   :  { %v8599_v58 = vpop.f32.mrb[118].mxu0  ;;  %v10678_v28 = vadd.f32 %v3227_v8, %v3096_v52 }
 0x841   :  { %v10676_v54 = vadd.f32 %v8599_v58, %v3096_v52  ;;  %v3230_v14 = vpop.f32.mrb[119].mxu0  ;;  %12612 = vst [vmem:[#allocation38_spill] sm:$0xff] %v10682_v24 }
 0x842   :  { %12611 = vst [vmem:[#allocation37_spill] sm:$0xff] %v10678_v28  ;;  %v10680_v20 = vadd.f32 %v3230_v14, %v3096_v52  ;;  %v8833_v14 = vld [vmem:[#allocation13] ss:$12 sps:$4 sm:$0xff]  }
 0x843   :  { %v3313_v19 = vpack.c.bf16 %v10676_v54, %v10682_v24 }
 0x844   :  { %v3312_v29 = vpack.c.bf16 %v10680_v20, %v10678_v28 }
 0x846   :  { %3535 = vmatmul.mubr.bf16.gmra.mrb[144].mxu1 %v3312_v29  ;;  %8628 = vmatprep.mubr.bf16.mxu0 %v3312_v29  ;;  %v8835_v29 = vld [vmem:[#allocation13 + $0x4] ss:$12 sps:$4 sm:$0xff]  }
 0x847   :  { %8629 = vmatmul.mubr.bf16.gmra.mrb[132].mxu0 %v3313_v19  ;;  %3544 = vmatprep.mubr.bf16.mxu1 %v12517_v15 }
 0x848   :  { %4156 = vmatprep.mubr.bf16.mxu0 %v12517_v15  ;;  %4124 = vmatprep.subr.bf16.mxu0 %v8835_v29 }
 0x849   :  { %4125 = vmatpush1.bf16.msra.mxu0 %v8833_v14 }
 0x84e   :  { %3545 = vmatmul.mubr.bf16.gmra.mrb[148].mxu1 %v3313_v19  ;;  %v8836_v19 = vld [vmem:[#allocation13 + $0x8] ss:$12 sps:$4 sm:$0xff]  }
 0x84f   :  { %8632 = vmatprep.subr.bf16.mxu1 %v8836_v19 }
 0x850   :  { %8633 = vmatpush3.bf16.msra.mxu1 %v8836_v19 }
 0x872   :  { %v10691_v51 = vpop.f32.mrb[120].mxu1 }
 0x873   :  { %v10693_v10 = vpop.f32.mrb[121].mxu1  ;;  %v8618_v40 = vpop.f32.mrb[120].mxu0  ;;  %v12519_v43 = vrot.slane %v10691_v51, 7 }
 0x874   :  { %v3480_v35 = vpop.f32.mrb[122].mxu1  ;;  %v10696_v5 = vpop.f32.mrb[121].mxu0  ;;  %v3786_v27 = vrot.slane %v8618_v40, 1  ;;  %v220_v40 = vadd.s32 40, %v9988_v11 }
 0x875   :  { %v3672_v23 = vrot.slane %v3480_v35, 7  ;;  %v3482_v36 = vpop.f32.mrb[123].mxu1  ;;  %v10699_v16 = vpop.f32.mrb[122].mxu0  ;;  %v12520_v45 = vrot.slane %v10696_v5, 1  ;;  %v263_v35 = vand.u32 15, %v219_v50  ;;  %v12654_v63 = vrot.slane %v10696_v5, 1 }
 0x876   :  { %v3788_v55 = vrot.slane %v10699_v16, 1  ;;  %v3592_v12 = vpop.f32.mrb[123].mxu0  ;;  %v12655_v5 = vmov 0 }
 0x877   :  { %v3673_v52 = vsel %vm12553_vm2, %v12519_v43, %v3672_v23  ;;  %v3784_v21 = vrot.slane %v3592_v12, 1  ;;  %v10740_v12 = vrot.slane %v10630_v30, %v10735_v44  ;;  %vm10743_vm6 = vcmp.eq.s32.totalorder %v263_v35, 0  ;;  %v8837_v35 = vld [vmem:[#allocation13 + $0x18] ss:$12 sps:$4 sm:$0xff]  }
 0x878   :  { %v3881_v3 = vadd.f32 %v3673_v52, %v3482_v36  ;;  %v3789_v25 = vsel %vm12535_vm3, %v3786_v27, %v3788_v55  ;;  %v270_v36 = vand.u32 15, %v220_v40  ;;  %v12515_v52 = vsub.s32 4, %v9988_v11 }
 0x879   :  { %v10716_v62 = vsel %vm12535_vm3, %v12520_v45, %v3784_v21  ;;  %v3787_v0 = vsel %vm12535_vm3, %v3784_v21, %v3786_v27  ;;  %v221_v27 = vadd.s32 48, %v9988_v11 }
 0x87a   :  { %v3865_v38 = vsel %vm10702_vm4, 0.0, %v3787_v0  ;;  %v3486_v57 = vpop.f32.mrb[124].mxu1  ;;  %vm10753_vm8 = vcmp.eq.s32.totalorder %v270_v36, 15 }
 0x87b   :  { %v10721_v37 = vadd.f32 %v3881_v3, %v3865_v38  ;;  %v3674_v59 = vrot.slane %v3486_v57, 7  ;;  %v3488_v1 = vpop.f32.mrb[125].mxu1  ;;  %v12620_v3 = vmov 0  ;;  %v12516_v38 = vsub.s32 5, %v9988_v11 }
 0x87c   :  { %v3490_v46 = vpop.f32.mrb[126].mxu1  ;;  %v12621_v3 = vsel %vm10743_vm6, 4294967295, %v12620_v3  ;;  %v277_v29 = vand.u32 15, %v221_v27 }
 0x87d   :  { %v3675_v41 = vsel %vm12553_vm2, %v3672_v23, %v3674_v59  ;;  %v3676_v2 = vrot.slane %v3490_v46, 7  ;;  %v3492_v17 = vpop.f32.mrb[127].mxu1  ;;  %v256_v23 = vand.u32 15, %v218_v7  ;;  %12622 = vst [vmem:[#allocation42_spill] sm:$0xff] %v12621_v3  ;;  %v8945_v3 = vld [vmem:[#allocation17] ss:$12 sps:$4 sm:$0xff]  }
 0x87e   :  { %v3752_v9 = vsel %vm10723_vm5, 0.0, %v3675_v41  ;;  %v12626_v41 = vmov 0  ;;  %vm10788_vm9 = vcmp.eq.s32.totalorder %v277_v29, 0 }
 0x87f   :  { %v3882_v26 = vadd.f32 %v3752_v9, %v3488_v1  ;;  %v3677_v33 = vsel %vm12553_vm2, %v3674_v59, %v3676_v2  ;;  %vm10749_vm7 = vcmp.eq.s32.totalorder %v256_v23, 15  ;;  %v12623_v1 = vmov 0 }
 0x880   :  { %v3883_v8 = vadd.f32 %v3677_v33, %v3492_v17  ;;  %v12624_v1 = vsel %vm10749_vm7, 4294967295, %v12623_v1  ;;  %v12627_v41 = vsel %vm10753_vm8, 4294967295, %v12626_v41 }
 0x881   :  { %v3898_v58 = vadd.f32 %v3882_v26, %v3789_v25  ;;  %12625 = vst [vmem:[#allocation43_spill] sm:$0xff] %v12624_v1  ;;  %12628 = vst [vmem:[#allocation44_spill] sm:$0xff] %v12627_v41 }
 0x883   :  { %v3918_v57 = vadd.f32 %v10740_v12, %v3898_v58  ;;  %v10763_v58 = vrot.slane %v10630_v30, %v12515_v52 }
 0x896   :  { %v3496_v21 = vpop.f32.mrb[128].mxu1 }
 0x897   :  { %v3678_v6 = vrot.slane %v3496_v21, 7  ;;  %v3498_v25 = vpop.f32.mrb[129].mxu1  ;;  %v8622_v0 = vpop.f32.mrb[124].mxu0  ;;  %v8839_v21 = vld [vmem:[#allocation13 + $0x1c] ss:$12 sps:$4 sm:$0xff]  }
 0x898   :  { %v3500_v59 = vpop.f32.mrb[130].mxu1  ;;  %v3605_v46 = vpop.f32.mrb[125].mxu0  ;;  %v3794_v50 = vrot.slane %v8622_v0, 1  ;;  %4126 = vmatprep.subr.bf16.mxu0 %v8839_v21 }
 0x899   :  { %v3679_v17 = vsel %vm12553_vm2, %v3676_v2, %v3678_v6  ;;  %v3680_v9 = vrot.slane %v3500_v59, 7  ;;  %v3790_v26 = vrot.slane %v3605_v46, 1  ;;  %v3502_v33 = vpop.f32.mrb[131].mxu1  ;;  %v10758_v14 = vpop.f32.mrb[126].mxu0  ;;  %v8840_v59 = vld [vmem:[#allocation13 + $0x20] ss:$12 sps:$4 sm:$0xff]   ;;  %v3938_v46 = vmul.f32 %v10763_v58, %v3918_v57  ;;  %4127 = vmatpush1.bf16.msra.mxu0 %v8837_v35 }
 0x89a   :  { %v3754_v19 = vsel %vm10743_vm6, 0.0, %v3679_v17  ;;  %v3796_v7 = vrot.slane %v10758_v14, 1  ;;  %v3608_v40 = vpop.f32.mrb[127].mxu0  ;;  %8634 = vmatprep.subr.bf16.mxu1 %v8840_v59  ;;  %v8844_v35 = vld [vmem:[#allocation13 + $0x38] ss:$12 sps:$4 sm:$0xff]  }
 0x89b   :  { %v3884_v2 = vadd.f32 %v3754_v19, %v3498_v25  ;;  %v3791_v23 = vsel %vm12535_vm3, %v3788_v55, %v3790_v26  ;;  %v3681_v36 = vsel %vm12553_vm2, %v3678_v6, %v3680_v9  ;;  %v3792_v27 = vrot.slane %v3608_v40, 1  ;;  %8635 = vmatpush3.bf16.msra.mxu1 %v8840_v59  ;;  %v8843_v40 = vld [vmem:[#allocation13 + $0x34] ss:$12 sps:$4 sm:$0xff]  }
 0x89c   :  { %v3867_v17 = vsel %vm10749_vm7, 0.0, %v3791_v23  ;;  %v3885_v0 = vadd.f32 %v3681_v36, %v3502_v33  ;;  %v3797_v52 = vsel %vm12535_vm3, %v3794_v50, %v3796_v7  ;;  %v10783_v6 = vrot.slane %v10630_v30, %v12516_v38  ;;  %4128 = vmatprep.subr.bf16.mxu0 %v8843_v40  ;;  %8636 = vmatprep.subr.bf16.mxu1 %v8844_v35  ;;  %v8845_v40 = vld [vmem:[#allocation13 + $0x48] ss:$12 sps:$4 sm:$0xff]  }
 0x89d   :  { %v3899_v25 = vadd.f32 %v3883_v8, %v3867_v17  ;;  %v3793_v16 = vsel %vm12535_vm3, %v3790_v26, %v3792_v27  ;;  %v3795_v55 = vsel %vm12535_vm3, %v3792_v27, %v3794_v50  ;;  %v12629_v50 = vmov 0  ;;  %v8841_v27 = vld [vmem:[#allocation13 + $0x30] ss:$12 sps:$4 sm:$0xff]  }
 0x89e   :  { %v3869_v57 = vsel %vm10753_vm8, 0.0, %v3795_v55  ;;  %v3900_v33 = vadd.f32 %v3884_v2, %v3793_v16  ;;  %v3506_v19 = vpop.f32.mrb[132].mxu1  ;;  %v12630_v50 = vsel %vm10788_vm9, 4294967295, %v12629_v50  ;;  %v3958_v21 = vadd.f32 %v10783_v6, %v3938_v46  ;;  %4129 = vmatpush1.bf16.msra.mxu0 %v8841_v27  ;;  %v8847_v46 = vld [vmem:[#allocation13 + $0x4c] ss:$12 sps:$4 sm:$0xff]  }
 0x89f   :  { %v3919_v8 = vadd.f32 %v10740_v12, %v3899_v25  ;;  %v3901_v26 = vadd.f32 %v3885_v0, %v3869_v57  ;;  %v3682_v23 = vrot.slane %v3506_v19, 7  ;;  %12631 = vst [vmem:[#allocation45_spill] sm:$0xff] %v12630_v50  ;;  %v3508_v36 = vpop.f32.mrb[133].mxu1  ;;  %8637 = vmatpush3.bf16.msra.mxu1 %v8844_v35  ;;  %4130 = vmatprep.subr.bf16.mxu0 %v8847_v46  ;;  %v8849_v35 = vld [vmem:[#allocation13 + $0x60] ss:$12 sps:$4 sm:$0xff]  }
 0x8a0   :  { %v3920_v17 = vadd.f32 %v10740_v12, %v3900_v33  ;;  %v10794_v55 = vpop.f32.mrb[134].mxu1  ;;  %v3974_v27 = vmax.f32 %v3958_v21, 0.0  ;;  %v8855_v21 = vld [vmem:[#allocation13 + $0x7c] ss:$12 sps:$4 sm:$0xff]  }
 0x8a1   :  { %v3939_v2 = vmul.f32 %v10763_v58, %v3919_v8  ;;  %v3921_v59 = vadd.f32 %v10740_v12, %v3901_v26  ;;  %v3683_v0 = vsel %vm12553_vm2, %v3680_v9, %v3682_v23  ;;  %v3684_v29 = vrot.slane %v10794_v55, 7  ;;  %v3512_v25 = vpop.f32.mrb[135].mxu1  ;;  %v8848_v8 = vld [vmem:[#allocation13 + $0x50] ss:$12 sps:$4 sm:$0xff]  }
 0x8a2   :  { %v3756_v16 = vsel %vm10788_vm9, 0.0, %v3683_v0  ;;  %v3940_v26 = vmul.f32 %v10763_v58, %v3920_v17  ;;  %8638 = vmatprep.subr.bf16.mxu1 %v8848_v8  ;;  %4131 = vmatpush1.bf16.msra.mxu0 %v8845_v40  ;;  %v8860_v40 = vld [vmem:[#allocation13 + $0x98] ss:$12 sps:$4 sm:$0xff]  }
 0x8a3   :  { %v3959_v57 = vadd.f32 %v10783_v6, %v3939_v2  ;;  %v3886_v33 = vadd.f32 %v3756_v16, %v3508_v36  ;;  %v3685_v19 = vsel %vm12553_vm2, %v3682_v23, %v3684_v29  ;;  %v3941_v0 = vmul.f32 %v10763_v58, %v3921_v59  ;;  %v8851_v36 = vld [vmem:[#allocation13 + $0x64] ss:$12 sps:$4 sm:$0xff]   ;;  %8639 = vmatpush3.bf16.msra.mxu1 %v8848_v8  ;;  %v8852_v16 = vld [vmem:[#allocation13 + $0x68] ss:$12 sps:$4 sm:$0xff]  }
 0x8a4   :  { %v10806_v9 = vadd.f32 %v3685_v19, %v3512_v25  ;;  %v3960_v2 = vadd.f32 %v10783_v6, %v3940_v26  ;;  %4132 = vmatprep.subr.bf16.mxu0 %v8851_v36  ;;  %8640 = vmatprep.subr.bf16.mxu1 %v8852_v16  ;;  %v8859_v19 = vld [vmem:[#allocation13 + $0x94] ss:$12 sps:$4 sm:$0xff]   ;;  %v8864_v8 = vld [vmem:[#allocation13 + $0xb0] ss:$12 sps:$4 sm:$0xff]   ;;  %v224_v36 = vadd.s32 72, %v9988_v11 }
 0x8a5   :  { %v3975_v38 = vmax.f32 %v3959_v57, 0.0  ;;  %v3902_v15 = vadd.f32 %v3886_v33, %v3797_v52  ;;  %v3961_v23 = vadd.f32 %v10783_v6, %v3941_v0  ;;  %v8853_v52 = vld [vmem:[#allocation13 + $0x78] ss:$12 sps:$4 sm:$0xff]   ;;  %v8856_v57 = vld [vmem:[#allocation13 + $0x80] ss:$12 sps:$4 sm:$0xff]   ;;  %v223_v0 = vadd.s32 64, %v9988_v11 }
 0x8a6   :  { %v3976_v46 = vmax.f32 %v3960_v2, 0.0  ;;  %4133 = vmatpush1.bf16.msra.mxu0 %v8849_v35  ;;  %v8857_v33 = vld [vmem:[#allocation13 + $0x90] ss:$12 sps:$4 sm:$0xff]   ;;  %v8861_v26 = vld [vmem:[#allocation13 + $0xa8] ss:$12 sps:$4 sm:$0xff]   ;;  %v298_v35 = vand.u32 15, %v224_v36 }
 0x8a7   :  { %v10812_v25 = vpack.c.bf16 %v3975_v38, %v3974_v27  ;;  %v3977_v17 = vmax.f32 %v3961_v23, 0.0  ;;  %8641 = vmatpush3.bf16.msra.mxu1 %v8852_v16  ;;  %4134 = vmatprep.subr.bf16.mxu0 %v8855_v21  ;;  %v8863_v38 = vld [vmem:[#allocation13 + $0xac] ss:$12 sps:$4 sm:$0xff]   ;;  %v222_v27 = vadd.s32 56, %v9988_v11  ;;  %v291_v2 = vand.u32 15, %v223_v0 }
 0x8a8   :  { %8642 = vmatprep.subr.bf16.mxu1 %v8856_v57  ;;  %v12632_v21 = vmov 0  ;;  %vm10834_vm12 = vcmp.eq.s32.totalorder %v298_v35, 15 }
 0x8a9   :  { %v10814_v59 = vpack.c.bf16 %v3977_v17, %v3976_v46  ;;  %v284_v23 = vand.u32 15, %v222_v27  ;;  %v225_v46 = vadd.s32 80, %v9988_v11  ;;  %vm10820_vm10 = vcmp.eq.s32.totalorder %v291_v2, 0 }
 0x8aa   :  { %4135 = vmatpush1.bf16.msra.mxu0 %v8853_v52  ;;  %v12633_v21 = vsel %vm10820_vm10, 4294967295, %v12632_v21  ;;  %v12638_v2 = vmov 0 }
 0x8ab   :  { %8643 = vmatpush3.bf16.msra.mxu1 %v8856_v57  ;;  %4136 = vmatprep.subr.bf16.mxu0 %v8859_v19  ;;  %12634 = vst [vmem:[#allocation46_spill] sm:$0xff] %v12633_v21  ;;  %vm10825_vm11 = vcmp.eq.s32.totalorder %v284_v23, 15  ;;  %v12639_v2 = vsel %vm10834_vm12, 4294967295, %v12638_v2  ;;  %v305_v45 = vand.u32 15, %v225_v46 }
 0x8ac   :  { %8644 = vmatprep.subr.bf16.mxu1 %v8860_v40  ;;  %12640 = vst [vmem:[#allocation48_spill] sm:$0xff] %v12639_v2 }
 0x8ad   :  { %vm10857_vm13 = vcmp.eq.s32.totalorder %v305_v45, 0 }
 0x8ae   :  { %4137 = vmatpush1.bf16.msra.mxu0 %v8857_v33  ;;  %v3922_v33 = vadd.f32 %v10740_v12, %v3902_v15 }
 0x8af   :  { %8645 = vmatpush3.bf16.msra.mxu1 %v8860_v40  ;;  %4138 = vmatprep.subr.bf16.mxu0 %v8863_v38  ;;  %v12635_v40 = vmov 0 }
 0x8b0   :  { %8646 = vmatprep.subr.bf16.mxu1 %v8864_v8  ;;  %v12636_v40 = vsel %vm10825_vm11, 4294967295, %v12635_v40  ;;  %v3942_v35 = vmul.f32 %v10763_v58, %v3922_v33 }
 0x8b1   :  { %12637 = vst [vmem:[#allocation47_spill] sm:$0xff] %v12636_v40 }
 0x8b2   :  { %4139 = vmatpush1.bf16.msra.mxu0 %v8861_v26 }
 0x8b3   :  { %8647 = vmatpush3.bf16.msra.mxu1 %v8864_v8 }
 0x8f9   :  { %v3516_v16 = vpop.f32.mrb[136].mxu1 }
 0x8fa   :  { %v3686_v17 = vrot.slane %v3516_v16, 7  ;;  %v3518_v52 = vpop.f32.mrb[137].mxu1  ;;  %v8626_v57 = vpop.f32.mrb[128].mxu0 }
 0x8fb   :  { %v3520_v19 = vpop.f32.mrb[138].mxu1  ;;  %v3621_v38 = vpop.f32.mrb[129].mxu0  ;;  %v3802_v23 = vrot.slane %v8626_v57, 1 }
 0x8fc   :  { %v3687_v8 = vsel %vm12553_vm2, %v3684_v29, %v3686_v17  ;;  %v3688_v26 = vrot.slane %v3520_v19, 7  ;;  %v3798_v0 = vrot.slane %v3621_v38, 1  ;;  %v3522_v27 = vpop.f32.mrb[139].mxu1  ;;  %v10832_v36 = vpop.f32.mrb[130].mxu0 }
 0x8fd   :  { %v3758_v15 = vsel %vm10820_vm10, 0.0, %v3687_v8  ;;  %v12525_v16 = vrot.slane %v10832_v36, 1  ;;  %v3624_v43 = vpop.f32.mrb[131].mxu0 }
 0x8fe   :  { %v3888_v55 = vadd.f32 %v3758_v15, %v3518_v52  ;;  %v3799_v29 = vsel %vm12535_vm3, %v3796_v7, %v3798_v0  ;;  %v3689_v19 = vsel %vm12553_vm2, %v3686_v17, %v3688_v26  ;;  %v3800_v38 = vrot.slane %v3624_v43, 1 }
 0x8ff   :  { %v3871_v44 = vsel %vm10825_vm11, 0.0, %v3799_v29  ;;  %v3889_v60 = vadd.f32 %v3689_v19, %v3522_v27  ;;  %v3805_v57 = vsel %vm12535_vm3, %v3802_v23, %v12525_v16  ;;  %v12641_v27 = vmov 0 }
 0x900   :  { %v3903_v46 = vadd.f32 %v10806_v9, %v3871_v44  ;;  %v3801_v52 = vsel %vm12535_vm3, %v3798_v0, %v3800_v38  ;;  %v3803_v14 = vsel %vm12535_vm3, %v3800_v38, %v3802_v23  ;;  %v12642_v27 = vsel %vm10857_vm13, 4294967295, %v12641_v27 }
 0x901   :  { %v3873_v7 = vsel %vm10834_vm12, 0.0, %v3803_v14  ;;  %v3904_v43 = vadd.f32 %v3888_v55, %v3801_v52  ;;  %v3526_v17 = vpop.f32.mrb[140].mxu1  ;;  %12643 = vst [vmem:[#allocation49_spill] sm:$0xff] %v12642_v27  ;;  %v3962_v0 = vadd.f32 %v10783_v6, %v3942_v35 }
 0x902   :  { %v3923_v33 = vadd.f32 %v10740_v12, %v3903_v46  ;;  %v3905_v8 = vadd.f32 %v3889_v60, %v3873_v7  ;;  %v3690_v15 = vrot.slane %v3526_v17, 7  ;;  %v3528_v29 = vpop.f32.mrb[141].mxu1 }
 0x903   :  { %v3924_v44 = vadd.f32 %v10740_v12, %v3904_v43  ;;  %v3530_v9 = vpop.f32.mrb[142].mxu1 }
 0x904   :  { %v3925_v23 = vadd.f32 %v10740_v12, %v3905_v8  ;;  %v3691_v19 = vsel %vm12553_vm2, %v3688_v26, %v3690_v15  ;;  %v3692_v55 = vrot.slane %v3530_v9, 7  ;;  %v3532_v38 = vpop.f32.mrb[143].mxu1  ;;  %v3943_v46 = vmul.f32 %v10763_v58, %v3923_v33 }
 0x905   :  { %v3760_v60 = vsel %vm10857_vm13, 0.0, %v3691_v19  ;;  %v3944_v45 = vmul.f32 %v10763_v58, %v3924_v44  ;;  %v3978_v8 = vmax.f32 %v3962_v0, 0.0 }
 0x906   :  { %v3890_v52 = vadd.f32 %v3760_v60, %v3528_v29  ;;  %v3693_v14 = vsel %vm12553_vm2, %v3690_v15, %v3692_v55  ;;  %v3963_v7 = vadd.f32 %v10783_v6, %v3943_v46  ;;  %v3945_v35 = vmul.f32 %v10763_v58, %v3925_v23 }
 0x907   :  { %v3891_v43 = vadd.f32 %v3693_v14, %v3532_v38  ;;  %v3964_v17 = vadd.f32 %v10783_v6, %v3944_v45  ;;  %v227_v15 = vadd.s32 96, %v9988_v11  ;;  %v226_v29 = vadd.s32 88, %v9988_v11 }
 0x908   :  { %v3906_v26 = vadd.f32 %v3890_v52, %v3805_v57  ;;  %v3979_v9 = vmax.f32 %v3963_v7, 0.0  ;;  %v3965_v33 = vadd.f32 %v10783_v6, %v3945_v35  ;;  %v228_v23 = vadd.s32 104, %v9988_v11 }
 0x909   :  { %v3980_v16 = vmax.f32 %v3964_v17, 0.0  ;;  %v319_v38 = vand.u32 15, %v227_v15  ;;  %v312_v46 = vand.u32 15, %v226_v29  ;;  %v229_v57 = vadd.s32 112, %v9988_v11 }
 0x90a   :  { %v10874_v49 = vpack.c.bf16 %v3979_v9, %v3978_v8  ;;  %v3981_v19 = vmax.f32 %v3965_v33, 0.0  ;;  %v326_v60 = vand.u32 15, %v228_v23  ;;  %v3926_v0 = vadd.f32 %v10740_v12, %v3906_v26 }
 0x90b   :  { %vm10883_vm14 = vcmp.eq.s32.totalorder %v319_v38, 0  ;;  %v12644_v14 = vmov 0  ;;  %vm10887_vm15 = vcmp.eq.s32.totalorder %v312_v46, 15  ;;  %v12647_v17 = vmov 0 }
 0x90c   :  { %v10876_v44 = vpack.c.bf16 %v3981_v19, %v3980_v16  ;;  %v12645_v14 = vsel %vm10883_vm14, 4294967295, %v12644_v14  ;;  %v12648_v17 = vsel %vm10887_vm15, 4294967295, %v12647_v17  ;;  %vm10891_vm0 = vcmp.eq.s32.totalorder %v326_v60, 15 }
 0x90d   :  { %12646 = vst [vmem:[#allocation50_spill] sm:$0xff] %v12645_v14  ;;  %12649 = vst [vmem:[#allocation51_spill] sm:$0xff] %v12648_v17  ;;  %v12650_v9 = vmov 0  ;;  %v333_v33 = vand.u32 15, %v229_v57  ;;  %v230_v26 = vadd.s32 120, %v9988_v11  ;;  %v3946_v46 = vmul.f32 %v10763_v58, %v3926_v0 }
 0x90e   :  { %v12651_v9 = vsel %vm10891_vm0, 4294967295, %v12650_v9  ;;  %v12653_v57 = vrot.slane %v10832_v36, 1 }
 0x90f   :  { %12652 = vst [vmem:[#allocation52_spill] sm:$0xff] %v12651_v9  ;;  %vm10917_vm1 = vcmp.eq.s32.totalorder %v333_v33, 0 }
 0x910   :  { %v12656_v5 = vsel %vm10917_vm1, 4294967295, %v12655_v5 }
 0x911   :  { %12657 = vst [vmem:[#allocation53_spill] sm:$0xff] %v12656_v5 }
 0x919   :  { %v3536_v45 = vpop.f32.mrb[144].mxu1 }
 0x91a   :  { %v3694_v52 = vrot.slane %v3536_v45, 7  ;;  %v3538_v16 = vpop.f32.mrb[145].mxu1  ;;  %v8630_v7 = vpop.f32.mrb[132].mxu0  ;;  %v235_v45 = vand.u32 15, %v9988_v11 }
 0x91b   :  { %v3540_v35 = vpop.f32.mrb[146].mxu1  ;;  %v3637_v8 = vpop.f32.mrb[133].mxu0  ;;  %v3810_v60 = vrot.slane %v8630_v7, 1 }
 0x91c   :  { %v3695_v19 = vsel %vm12553_vm2, %v3692_v55, %v3694_v52  ;;  %v3696_v15 = vrot.slane %v3540_v35, 7  ;;  %v3806_v29 = vrot.slane %v3637_v8, 1  ;;  %v3542_v23 = vpop.f32.mrb[147].mxu1  ;;  %v8631_v38 = vpop.f32.mrb[134].mxu0 }
 0x91d   :  { %v3762_v24 = vsel %vm10883_vm14, 0.0, %v3695_v19  ;;  %v3812_v28 = vrot.slane %v8631_v38, 1  ;;  %v3640_v4 = vpop.f32.mrb[135].mxu0  ;;  %v340_v38 = vand.u32 15, %v230_v26 }
 0x91e   :  { %v3892_v61 = vadd.f32 %v3762_v24, %v3538_v16  ;;  %v3807_v13 = vsel %vm12535_vm3, %v12653_v57, %v3806_v29  ;;  %v3697_v55 = vsel %vm12553_vm2, %v3694_v52, %v3696_v15  ;;  %v3808_v35 = vrot.slane %v3640_v4, 1 }
 0x91f   :  { %v3875_v8 = vsel %vm10887_vm15, 0.0, %v3807_v13  ;;  %v3893_v48 = vadd.f32 %v3697_v55, %v3542_v23  ;;  %v3813_v0 = vsel %vm12535_vm3, %v3810_v60, %v3812_v28  ;;  %v3831_v7 = vsel %vm12535_vm3, %v3812_v28, %v12654_v63 }
 0x920   :  { %v3907_v19 = vadd.f32 %v3891_v43, %v3875_v8  ;;  %v3809_v24 = vsel %vm12535_vm3, %v3806_v29, %v3808_v35  ;;  %v3811_v36 = vsel %vm12535_vm3, %v3808_v35, %v3810_v60  ;;  %v3966_v13 = vadd.f32 %v10783_v6, %v3946_v46 }
 0x921   :  { %v3877_v16 = vsel %vm10891_vm0, 0.0, %v3811_v36  ;;  %v3908_v52 = vadd.f32 %v3892_v61, %v3809_v24  ;;  %v3546_v4 = vpop.f32.mrb[148].mxu1  ;;  %v3917_v28 = vadd.f32 %v10740_v12, %v10721_v37  ;;  %vm10924_vm3 = vcmp.eq.s32.totalorder %v235_v45, 0 }
 0x922   :  { %v3927_v23 = vadd.f32 %v10740_v12, %v3907_v19  ;;  %v3909_v57 = vadd.f32 %v3893_v48, %v3877_v16  ;;  %v3698_v55 = vrot.slane %v3546_v4, 7  ;;  %v3548_v63 = vpop.f32.mrb[149].mxu1  ;;  %v12658_v61 = vmov 0 }
 0x923   :  { %v3928_v43 = vadd.f32 %v10740_v12, %v3908_v52  ;;  %v12659_v61 = vsel %vm10924_vm3, 4294967295, %v12658_v61  ;;  %v3550_v26 = vpop.f32.mrb[150].mxu1  ;;  %vm10933_vm0 = vcmp.eq.s32.totalorder %v340_v38, 15  ;;  %v12661_v37 = vmov 0 }
 0x924   :  { %12660 = vst [vmem:[#allocation54_spill] sm:$0xff] %v12659_v61  ;;  %v3929_v29 = vadd.f32 %v10740_v12, %v3909_v57  ;;  %v3699_v48 = vsel %vm12553_vm2, %v3696_v15, %v3698_v55  ;;  %v3653_v46 = vrot.slane %v3550_v26, 7  ;;  %v3552_v33 = vpop.f32.mrb[151].mxu1  ;;  %v3947_v60 = vmul.f32 %v10763_v58, %v3927_v23 }
 0x925   :  { %v3764_v35 = vsel %vm10917_vm1, 0.0, %v3699_v48  ;;  %v12662_v37 = vsel %vm10933_vm0, 4294967295, %v12661_v37  ;;  %v3982_v45 = vmax.f32 %v3966_v13, 0.0  ;;  %v3948_v8 = vmul.f32 %v10763_v58, %v3928_v43 }
 0x926   :  { %12663 = vst [vmem:[#allocation55_spill] sm:$0xff] %v12662_v37  ;;  %v3894_v19 = vadd.f32 %v3764_v35, %v3548_v63  ;;  %v12664_v24 = vrot.slane %v10691_v51, 7  ;;  %v3700_v15 = vsel %vm12553_vm2, %v3698_v55, %v3653_v46  ;;  %v3967_v16 = vadd.f32 %v10783_v6, %v3947_v60 }
 0x927   :  { %v3895_v4 = vadd.f32 %v3700_v15, %v3552_v33  ;;  %v3949_v38 = vmul.f32 %v10763_v58, %v3929_v29  ;;  %v3968_v23 = vadd.f32 %v10783_v6, %v3948_v8  ;;  %v3879_v51 = vsel %vm10933_vm0, 0.0, %v3831_v7 }
 0x928   :  { %v3717_v36 = vsel %vm12553_vm2, %v3653_v46, %v12664_v24  ;;  %v3910_v13 = vadd.f32 %v3894_v19, %v3813_v0  ;;  %v3983_v63 = vmax.f32 %v3967_v16, 0.0  ;;  %v3937_v48 = vmul.f32 %v10763_v58, %v3917_v28 }
 0x929   :  { %v3750_v52 = vsel %vm10924_vm3, 0.0, %v3717_v36  ;;  %v3911_v43 = vadd.f32 %v3895_v4, %v3879_v51  ;;  %v3969_v55 = vadd.f32 %v10783_v6, %v3949_v38  ;;  %v3984_v26 = vmax.f32 %v3968_v23, 0.0 }
 0x92a   :  { %v3880_v57 = vadd.f32 %v3750_v52, %v10693_v10  ;;  %v3930_v46 = vadd.f32 %v10740_v12, %v3910_v13  ;;  %v3993_v29 = vpack.c.bf16 %v3983_v63, %v3982_v45  ;;  %v3957_v19 = vadd.f32 %v10783_v6, %v3937_v48 }
 0x92b   :  { %v3931_v60 = vadd.f32 %v10740_v12, %v3911_v43  ;;  %v3985_v0 = vmax.f32 %v3969_v55, 0.0  ;;  %v12547_v51 = vsub.s32 6, %v9988_v11  ;;  %vm12666_vm0 = vcmask 1046528  }
 0x92c   :  { %v3896_v33 = vadd.f32 %v3880_v57, %v10716_v62  ;;  %v3950_v10 = vmul.f32 %v10763_v58, %v3930_v46  ;;  %v3973_v16 = vmax.f32 %v3957_v19, 0.0  ;;  %vm12667_vm3 = vmmov %vm12666_vm0 }
 0x92d   :  { %v3951_v7 = vmul.f32 %v10763_v58, %v3931_v60  ;;  %v3994_v8 = vpack.c.bf16 %v3985_v0, %v3984_v26  ;;  %v12546_v60 = vsub.s32 7, %v9988_v11  ;;  %vm12668_vm1 = vmmov %vm12666_vm0 }
 0x92e   :  { %v3916_v35 = vadd.f32 %v10740_v12, %v3896_v33  ;;  %v3970_v28 = vadd.f32 %v10783_v6, %v3950_v10  ;;  %v12665_v12 = vmov 0  }
 0x92f   :  { %v3971_v36 = vadd.f32 %v10783_v6, %v3951_v7 }
 0x930   :  { %v3936_v24 = vmul.f32 %v10763_v58, %v3916_v35  ;;  %v3986_v45 = vmax.f32 %v3970_v28, 0.0  ;;  %v11003_v35 = vrot.slane %v10630_v30, %v12547_v51 }
 0x931   :  { %v3987_v15 = vmax.f32 %v3971_v36, 0.0 }
 0x932   :  { %v3956_v62 = vadd.f32 %v10783_v6, %v3936_v24 }
 0x933   :  { %v3995_v4 = vpack.c.bf16 %v3987_v15, %v3986_v45  ;;  %v11012_v45 = vrot.slane %v10630_v30, %v12546_v60 }
 0x934   :  { %v3972_v52 = vmax.f32 %v3956_v62, 0.0  ;;  %v11007_v62 = vld [vmem:[#allocation5 + $0x8] sm:$0xff] }
 0x935   :  { %v11020_v30 = vrot.slane %v11007_v62, %v10013_v34 }
 0x936   :  { %v3988_v38 = vpack.c.bf16 %v3973_v16, %v3972_v52 }
 0x938   :  { %4157 = vmatmul.mubr.bf16.vlgmr.msra.gmra.mrb[136].mxu0 %v3988_v38  ;;  %8648 = vmatprep.mubr.bf16.mxu1 %v3988_v38 }
 0x939   :  { %8649 = vmatmul.mubr.bf16.vlgmr.msra.gmra.mrb[152].mxu1 %v10812_v25  ;;  %4166 = vmatprep.mubr.bf16.mxu0 %v12665_v12 }
 0x93a   :  { %8652 = vmatprep.mubr.bf16.mxu1 %v10814_v59 }
 0x940   :  { %4167 = vmatmul.mubr.bf16.gmra.mrb[140].mxu0 %v10812_v25 }
 0x941   :  { %8653 = vmatmul.mubr.bf16.gmra.mrb[156].mxu1 %v10874_v49  ;;  %4176 = vmatprep.mubr.bf16.mxu0 %v12665_v12 }
 0x942   :  { %8656 = vmatprep.mubr.bf16.mxu1 %v10876_v44 }
 0x948   :  { %4177 = vmatmul.mubr.bf16.gmra.mrb[144].mxu0 %v10814_v59 }
 0x949   :  { %8657 = vmatmul.mubr.bf16.gmra.mrb[160].mxu1 %v3993_v29  ;;  %4186 = vmatprep.mubr.bf16.mxu0 %v12665_v12 }
 0x94a   :  { %8660 = vmatprep.mubr.bf16.mxu1 %v3994_v8 }
 0x950   :  { %4187 = vmatmul.mubr.bf16.gmra.mrb[148].mxu0 %v10874_v49 }
 0x951   :  { %8661 = vmatmul.mubr.bf16.gmra.mrb[164].mxu1 %v3995_v4  ;;  %4196 = vmatprep.mubr.bf16.mxu0 %v12665_v12 }
 0x952   :  { %5202 = vmatprep.mubr.bf16.mxu1 %v12665_v12 }
 0x958   :  { %4197 = vmatmul.mubr.bf16.gmra.mrb[152].mxu0 %v10876_v44 }
 0x959   :  { %4206 = vmatprep.mubr.bf16.mxu0 %v12665_v12 }
 0x960   :  { %4207 = vmatmul.mubr.bf16.gmra.mrb[156].mxu0 %v3993_v29 }
 0x961   :  { %4216 = vmatprep.mubr.bf16.mxu0 %v12665_v12 }
 0x968   :  { %4217 = vmatmul.mubr.bf16.gmra.mrb[160].mxu0 %v3994_v8 }
 0x969   :  { %4226 = vmatprep.mubr.bf16.mxu0 %v12665_v12 }
 0x970   :  { %4227 = vmatmul.mubr.bf16.gmra.mrb[164].mxu0 %v3995_v4 }
 0x971   :  { %5315 = vmatprep.mubr.bf16.mxu0 %v12665_v12 }
 0xa0b   :  { %v10980_v58 = vpop.f32.mrb[136].mxu0 }
 0xa0c   :  { %v10982_v49 = vpop.f32.mrb[137].mxu0  ;;  %v8650_v6 = vpop.f32.mrb[152].mxu1  ;;  %v12549_v44 = vrot.slane %v10980_v58, 7 }
 0xa0d   :  { %v4162_v25 = vpop.f32.mrb[138].mxu0  ;;  %v10984_v59 = vpop.f32.mrb[153].mxu1  ;;  %v4434_v63 = vrot.slane %v8650_v6, 1 }
 0xa0e   :  { %v4353_v23 = vrot.slane %v4162_v25, 7  ;;  %v4164_v13 = vpop.f32.mrb[139].mxu0  ;;  %v8651_v57 = vpop.f32.mrb[154].mxu1  ;;  %v12550_v26 = vrot.slane %v10984_v59, 1 }
 0xa0f   :  { %v4436_v43 = vrot.slane %v8651_v57, 1  ;;  %v4274_v55 = vpop.f32.mrb[155].mxu1 }
 0xa10   :  { %v4354_v48 = vsel %vm12553_vm2, %v12549_v44, %v4353_v23  ;;  %v4432_v46 = vrot.slane %v4274_v55, 1 }
 0xa11   :  { %v4497_v33 = vadd.f32 %v4354_v48, %v4164_v13  ;;  %v4437_v29 = vsel %vm12666_vm0, %v4434_v63, %v4436_v43 }
 0xa12   :  { %v10997_v0 = vsel %vm12667_vm3, %v12550_v26, %v4432_v46  ;;  %v4435_v10 = vsel %vm12668_vm1, %v4432_v46, %v4434_v63  ;;  %vm12669_vm3 = vmmov %vm12666_vm0 }
 0xa13   :  { %v4481_v7 = vsel %vm10702_vm4, 0.0, %v4435_v10  ;;  %v4168_v8 = vpop.f32.mrb[140].mxu0  ;;  %vm12670_vm1 = vmmov %vm12666_vm0 }
 0xa14   :  { %v4513_v19 = vadd.f32 %v4497_v33, %v4481_v7  ;;  %v4355_v24 = vrot.slane %v4168_v8, 7  ;;  %v4170_v28 = vpop.f32.mrb[141].mxu0  ;;  %v8654_v36 = vpop.f32.mrb[156].mxu1  ;;  %vm12671_vm4 = vmmov %vm12666_vm0 }
 0xa15   :  { %v4172_v15 = vpop.f32.mrb[142].mxu0  ;;  %v4287_v16 = vpop.f32.mrb[157].mxu1  ;;  %v4442_v63 = vrot.slane %v8654_v36, 1 }
 0xa16   :  { %v4533_v52 = vadd.f32 %v11003_v35, %v4513_v19  ;;  %v4356_v4 = vsel %vm12553_vm2, %v4353_v23, %v4355_v24  ;;  %v4357_v38 = vrot.slane %v4172_v15, 7  ;;  %v4438_v6 = vrot.slane %v4287_v16, 1  ;;  %v4174_v25 = vpop.f32.mrb[143].mxu0  ;;  %v8655_v13 = vpop.f32.mrb[158].mxu1 }
 0xa17   :  { %v4401_v57 = vsel %vm10723_vm5, 0.0, %v4356_v4  ;;  %v4444_v55 = vrot.slane %v8655_v13, 1  ;;  %v4290_v48 = vpop.f32.mrb[159].mxu1 }
 0xa18   :  { %v4498_v46 = vadd.f32 %v4401_v57, %v4170_v28  ;;  %v4358_v33 = vsel %vm12553_vm2, %v4355_v24, %v4357_v38  ;;  %v4439_v10 = vsel %vm12669_vm3, %v4436_v43, %v4438_v6  ;;  %v4440_v23 = vrot.slane %v4290_v48, 1  ;;  %vm12673_vm3 = vmmov %vm12666_vm0 }
 0xa19   :  { %v4483_v7 = vsel %vm10749_vm7, 0.0, %v4439_v10  ;;  %v4499_v8 = vadd.f32 %v4358_v33, %v4174_v25  ;;  %v4553_v19 = vmul.f32 %v11012_v45, %v4533_v52  ;;  %v11028_v36 = vsel %vm12666_vm0, %v4442_v63, %v4444_v55 }
 0xa1a   :  { %v11030_v15 = vadd.f32 %v4498_v46, %v4437_v29  ;;  %v4441_v16 = vsel %vm12670_vm1, %v4438_v6, %v4440_v23  ;;  %v4443_v28 = vsel %vm12671_vm4, %v4440_v23, %v4442_v63  ;;  %vm12672_vm4 = vmmov %vm12666_vm0 }
 0xa1b   :  { %v4515_v4 = vadd.f32 %v4499_v8, %v4483_v7  ;;  %v4178_v24 = vpop.f32.mrb[144].mxu0  ;;  %v4573_v43 = vadd.f32 %v11020_v30, %v4553_v19  ;;  %vm12674_vm1 = vmmov %vm12666_vm0 }
 0xa1c   :  { %v4359_v13 = vrot.slane %v4178_v24, 7  ;;  %v4180_v57 = vpop.f32.mrb[145].mxu0  ;;  %v8658_v48 = vpop.f32.mrb[160].mxu1 }
 0xa1d   :  { %v4535_v25 = vadd.f32 %v11003_v35, %v4515_v4  ;;  %v4182_v33 = vpop.f32.mrb[146].mxu0  ;;  %v4303_v52 = vpop.f32.mrb[161].mxu1  ;;  %v11037_v10 = vadd.f32 %v4573_v43, %v10638_v18  ;;  %v4450_v46 = vrot.slane %v8658_v48, 1 }
 0xa1e   :  { %v4360_v29 = vsel %vm12553_vm2, %v4357_v38, %v4359_v13  ;;  %v4361_v6 = vrot.slane %v4182_v33, 7  ;;  %v4446_v60 = vrot.slane %v4303_v52, 1  ;;  %v4184_v63 = vpop.f32.mrb[147].mxu0  ;;  %v8659_v23 = vpop.f32.mrb[162].mxu1 }
 0xa1f   :  { %v4555_v7 = vmul.f32 %v11012_v45, %v4535_v25  ;;  %v4403_v8 = vsel %vm10743_vm6, 0.0, %v4360_v29  ;;  %v4452_v19 = vrot.slane %v8659_v23, 1  ;;  %v4306_v24 = vpop.f32.mrb[163].mxu1  ;;  %v12548_v4 = vmax.f32 %v11037_v10, 0.0 }
 0xa20   :  { %v4500_v51 = vadd.f32 %v4403_v8, %v4180_v57  ;;  %v4362_v18 = vsel %vm12553_vm2, %v4359_v13, %v4361_v6  ;;  %v4448_v43 = vrot.slane %v4306_v24, 1  ;;  %v4447_v38 = vsel %vm12672_vm4, %v4444_v55, %v4446_v60  ;;  %vm12675_vm4 = vmmov %vm12666_vm0 }
 0xa21   :  { %v4501_v48 = vadd.f32 %v4362_v18, %v4184_v63  ;;  %4622 = vadd.xlane.f32.xlu1 %v12548_v4  ;;  %v4575_v33 = vadd.f32 %v11020_v30, %v4555_v7  ;;  %v11050_v25 = vsel %vm12673_vm3, %v4450_v46, %v4452_v19  ;;  %v4485_v29 = vsel %vm10753_vm8, 0.0, %v4443_v28  ;;  %vm12676_vm3 = vmmov %vm12666_vm0 }
 0xa22   :  { %v4516_v52 = vadd.f32 %v4500_v51, %v4441_v16  ;;  %v4449_v57 = vsel %vm12666_vm0, %v4446_v60, %v4448_v43  ;;  %v4451_v13 = vsel %vm12674_vm1, %v4448_v43, %v4450_v46  ;;  %vm12677_vm1 = vmmov %vm12666_vm0 }
 0xa23   :  { %v4517_v23 = vadd.f32 %v4501_v48, %v4485_v29  ;;  %v4188_v8 = vpop.f32.mrb[148].mxu0  ;;  %v11057_v55 = vadd.f32 %v4575_v33, %v10634_v31 }
 0xa24   :  { %v4536_v63 = vadd.f32 %v11003_v35, %v4516_v52  ;;  %v4363_v24 = vrot.slane %v4188_v8, 7  ;;  %v4190_v7 = vpop.f32.mrb[149].mxu0  ;;  %v8662_v18 = vpop.f32.mrb[164].mxu1 }
 0xa25   :  { %v4537_v4 = vadd.f32 %v11003_v35, %v4517_v23  ;;  %v4192_v51 = vpop.f32.mrb[150].mxu0  ;;  %v4319_v16 = vpop.f32.mrb[165].mxu1  ;;  %v4607_v28 = vmax.f32 %v11057_v55, 0.0  ;;  %v4458_v8 = vrot.slane %v8662_v18, 1 }
 0xa26   :  { %v4556_v60 = vmul.f32 %v11012_v45, %v4536_v63  ;;  %v4364_v46 = vsel %vm12553_vm2, %v4361_v6, %v4363_v24  ;;  %v4365_v43 = vrot.slane %v4192_v51, 7  ;;  %v4454_v48 = vrot.slane %v4319_v16, 1  ;;  %v4194_v29 = vpop.f32.mrb[151].mxu0  ;;  %v8663_v31 = vpop.f32.mrb[166].mxu1 }
 0xa27   :  { %v4557_v33 = vmul.f32 %v11012_v45, %v4537_v4  ;;  %v4405_v52 = vsel %vm10788_vm9, 0.0, %v4364_v46  ;;  %v4460_v44 = vrot.slane %v8663_v31, 1  ;;  %4626 = vadd.xlane.f32.xlu1 %v4607_v28  ;;  %v4322_v23 = vpop.f32.mrb[167].mxu1  ;;  %v4487_v51 = vsel %vm10825_vm11, 0.0, %v4447_v38 }
 0xa28   :  { %v4502_v26 = vadd.f32 %v4405_v52, %v4190_v7  ;;  %v4366_v63 = vsel %vm12553_vm2, %v4363_v24, %v4365_v43  ;;  %v4456_v41 = vrot.slane %v4322_v23, 1  ;;  %v4455_v6 = vsel %vm12675_vm4, %v4452_v19, %v4454_v48  ;;  %vm12679_vm4 = vmmov %vm12666_vm0 }
 0xa29   :  { %v4503_v16 = vadd.f32 %v4366_v63, %v4194_v29  ;;  %v4577_v4 = vadd.f32 %v11020_v30, %v4557_v33  ;;  %v11075_v46 = vsel %vm12676_vm3, %v4458_v8, %v4460_v44  ;;  %v12678_v24 = vrot.slane %v10984_v59, 1 }
 0xa2a   :  { %v4518_v18 = vadd.f32 %v4502_v26, %v11028_v36  ;;  %v11079_v31 = vsel %vm12666_vm0, %v4454_v48, %v4456_v41  ;;  %v11082_v7 = vsel %vm12677_vm1, %v4456_v41, %v4458_v8  ;;  %v11094_v36 = vadd.f32 %v11020_v30, %v4556_v60 }
 0xa2b   :  { %v11087_v19 = vsel %vm12679_vm4, %v4460_v44, %v12678_v24  ;;  %v4519_v38 = vadd.f32 %v4503_v16, %v4487_v51  ;;  %v4198_v29 = vpop.f32.mrb[152].mxu0  ;;  %v11090_v33 = vadd.f32 %v4577_v4, %v10652_v42  ;;  %vm12680_vm3 = vnez %v12651_v9 }
 0xa2c   :  { %v4538_v52 = vadd.f32 %v11003_v35, %v4518_v18  ;;  %v4367_v23 = vrot.slane %v4198_v29, 7  ;;  %v4200_v26 = vpop.f32.mrb[153].mxu0  ;;  %v4489_v29 = vsel %vm10834_vm12, 0.0, %v4451_v13  ;;  %vm12681_vm0 = vnez %v12656_v5 }
 0xa2d   :  { %v4539_v41 = vadd.f32 %v11003_v35, %v4519_v38  ;;  %v4202_v48 = vpop.f32.mrb[154].mxu0  ;;  %v4609_v59 = vmax.f32 %v11090_v33, 0.0  ;;  %vm12683_vm1 = vnez %v12659_v61  ;;  %vm12684_vm4 = vnez %v12662_v37 }
 0xa2e   :  { %v4558_v44 = vmul.f32 %v11012_v45, %v4538_v52  ;;  %v4368_v8 = vsel %vm12553_vm2, %v4365_v43, %v4367_v23  ;;  %v4369_v63 = vrot.slane %v4202_v48, 7  ;;  %v4204_v51 = vpop.f32.mrb[155].mxu0 }
 0xa2f   :  { %v4559_v42 = vmul.f32 %v11012_v45, %v4539_v41  ;;  %v4407_v16 = vsel %vm10820_vm10, 0.0, %v4368_v8  ;;  %4630 = vadd.xlane.f32.xlu1 %v4609_v59 }
 0xa30   :  { %v4504_v60 = vadd.f32 %v4407_v16, %v4200_v26  ;;  %v4370_v4 = vsel %vm12553_vm2, %v4367_v23, %v4369_v63  ;;  %v11107_v18 = vadd.f32 %v11020_v30, %v4558_v44 }
 0xa31   :  { %v4505_v24 = vadd.f32 %v4370_v4, %v4204_v51  ;;  %v4579_v38 = vadd.f32 %v11020_v30, %v4559_v42 }
 0xa32   :  { %v4520_v43 = vadd.f32 %v4504_v60, %v4449_v57 }
 0xa33   :  { %v4521_v52 = vadd.f32 %v4505_v24, %v4489_v29  ;;  %v4208_v41 = vpop.f32.mrb[156].mxu0  ;;  %v11113_v48 = vadd.f32 %v4579_v38, %v10648_v39 }
 0xa34   :  { %v4540_v8 = vadd.f32 %v11003_v35, %v4520_v43  ;;  %v4371_v26 = vrot.slane %v4208_v41, 7  ;;  %v4210_v16 = vpop.f32.mrb[157].mxu0  ;;  %v4491_v41 = vsel %vm10887_vm15, 0.0, %v4455_v6 }
 0xa35   :  { %v4541_v23 = vadd.f32 %v11003_v35, %v4521_v52  ;;  %v4212_v44 = vpop.f32.mrb[158].mxu0  ;;  %v4611_v51 = vmax.f32 %v11113_v48, 0.0 }
 0xa36   :  { %v4560_v42 = vmul.f32 %v11012_v45, %v4540_v8  ;;  %v4372_v57 = vsel %vm12553_vm2, %v4369_v63, %v4371_v26  ;;  %v4373_v60 = vrot.slane %v4212_v44, 7  ;;  %v4214_v13 = vpop.f32.mrb[159].mxu0 }
 0xa37   :  { %v4561_v4 = vmul.f32 %v11012_v45, %v4541_v23  ;;  %v4409_v39 = vsel %vm10857_vm13, 0.0, %v4372_v57  ;;  %4634 = vadd.xlane.f32.xlu1 %v4611_v51 }
 0xa38   :  { %v4506_v24 = vadd.f32 %v4409_v39, %v4210_v16  ;;  %v4374_v38 = vsel %vm12553_vm2, %v4371_v26, %v4373_v60  ;;  %v11127_v43 = vadd.f32 %v11020_v30, %v4560_v42 }
 0xa39   :  { %v4507_v29 = vadd.f32 %v4374_v38, %v4214_v13  ;;  %v4581_v52 = vadd.f32 %v11020_v30, %v4561_v4 }
 0xa3a   :  { %v4522_v63 = vadd.f32 %v4506_v24, %v11050_v25 }
 0xa3b   :  { %v4523_v8 = vadd.f32 %v4507_v29, %v4491_v41  ;;  %v4218_v23 = vpop.f32.mrb[160].mxu0  ;;  %v11134_v44 = vadd.f32 %v4581_v52, %v10666_v32 }
 0xa3c   :  { %v4542_v16 = vadd.f32 %v11003_v35, %v4522_v63  ;;  %v4375_v57 = vrot.slane %v4218_v23, 7  ;;  %v4220_v26 = vpop.f32.mrb[161].mxu0  ;;  %v4493_v23 = vsel %vm12680_vm3, 0.0, %v11082_v7 }
 0xa3d   :  { %v4543_v42 = vadd.f32 %v11003_v35, %v4523_v8  ;;  %v4222_v39 = vpop.f32.mrb[162].mxu0  ;;  %v4613_v13 = vmax.f32 %v11134_v44, 0.0 }
 0xa3e   :  { %v4562_v4 = vmul.f32 %v11012_v45, %v4542_v16  ;;  %v4376_v25 = vsel %vm12553_vm2, %v4373_v60, %v4375_v57  ;;  %v4377_v24 = vrot.slane %v4222_v39, 7  ;;  %v4224_v6 = vpop.f32.mrb[163].mxu0 }
 0xa3f   :  { %v4563_v38 = vmul.f32 %v11012_v45, %v4543_v42  ;;  %v4411_v32 = vsel %vm10883_vm14, 0.0, %v4376_v25  ;;  %4638 = vadd.xlane.f32.xlu1 %v4613_v13 }
 0xa40   :  { %v4508_v29 = vadd.f32 %v4411_v32, %v4220_v26  ;;  %v4378_v52 = vsel %vm12553_vm2, %v4375_v57, %v4377_v24  ;;  %v11148_v63 = vadd.f32 %v11020_v30, %v4562_v4 }
 0xa41   :  { %v4509_v41 = vadd.f32 %v4378_v52, %v4224_v6  ;;  %v4583_v8 = vadd.f32 %v11020_v30, %v4563_v38 }
 0xa42   :  { %v4524_v60 = vadd.f32 %v4508_v29, %v11079_v31 }
 0xa43   :  { %v4525_v16 = vadd.f32 %v4509_v41, %v4493_v23  ;;  %v4228_v42 = vpop.f32.mrb[164].mxu0  ;;  %v11156_v39 = vadd.f32 %v4583_v8, %v10662_v22  ;;  %v12682_v8 = vrot.slane %v10980_v58, 7  ;;  %v4495_v58 = vsel %vm12684_vm4, 0.0, %v11087_v19 }
 0xa44   :  { %v4544_v26 = vadd.f32 %v11003_v35, %v4524_v60  ;;  %v4379_v57 = vrot.slane %v4228_v42, 7  ;;  %v4230_v25 = vpop.f32.mrb[165].mxu0 }
 0xa45   :  { %v4545_v4 = vadd.f32 %v11003_v35, %v4525_v16  ;;  %v4232_v6 = vpop.f32.mrb[166].mxu0  ;;  %v4615_v38 = vmax.f32 %v11156_v39, 0.0 }
 0xa46   :  { %v4564_v31 = vmul.f32 %v11012_v45, %v4544_v26  ;;  %v4380_v32 = vsel %vm12553_vm2, %v4377_v24, %v4379_v57  ;;  %v4335_v29 = vrot.slane %v4232_v6, 7  ;;  %v4234_v7 = vpop.f32.mrb[167].mxu0 }
 0xa47   :  { %v4565_v52 = vmul.f32 %v11012_v45, %v4545_v4  ;;  %v4413_v22 = vsel %vm12681_vm0, 0.0, %v4380_v32  ;;  %4642 = vadd.xlane.f32.xlu1 %v4615_v38  ;;  %v4534_v4 = vadd.f32 %v11003_v35, %v11030_v15 }
 0xa48   :  { %v4510_v41 = vadd.f32 %v4413_v22, %v4230_v25  ;;  %v4398_v60 = vsel %vm12553_vm2, %v4335_v29, %v12682_v8  ;;  %v4381_v23 = vsel %vm12553_vm2, %v4379_v57, %v4335_v29  ;;  %v4584_v16 = vadd.f32 %v11020_v30, %v4564_v31 }
 0xa49   :  { %v4399_v24 = vsel %vm12683_vm1, 0.0, %v4398_v60  ;;  %v4511_v42 = vadd.f32 %v4381_v23, %v4234_v7  ;;  %v4585_v26 = vadd.f32 %v11020_v30, %v4565_v52 }
 0xa4a   :  { %v4526_v6 = vadd.f32 %v4510_v41, %v11075_v46  ;;  %v4496_v25 = vadd.f32 %v4399_v24, %v10982_v49  ;;  %v4554_v46 = vmul.f32 %v11012_v45, %v4534_v4  ;;  %v12687_v4 = vld [vmem:[#allocation34_spill] sm:$0xff] }
 0xa4b   :  { %v4527_v57 = vadd.f32 %v4511_v42, %v4495_v58  ;;  %v11184_v31 = vadd.f32 %v4585_v26, %v10680_v20  ;;  %v12685_v42 = vld [vmem:[#allocation32_spill] sm:$0xff]  ;;  %v12688_v58 = vld [vmem:[#allocation35_spill] sm:$0xff] }
 0xa4c   :  { %v4546_v32 = vadd.f32 %v11003_v35, %v4526_v6  ;;  %v4512_v29 = vadd.f32 %v4496_v25, %v10997_v0  ;;  %v4574_v8 = vadd.f32 %v11020_v30, %v4554_v46  ;;  %v11226_v6 = vadd.f32 %v11107_v18, %v12687_v4 }
 0xa4d   :  { %v4547_v7 = vadd.f32 %v11003_v35, %v4527_v57  ;;  %v4617_v15 = vmax.f32 %v11184_v31, 0.0  ;;  %v11233_v57 = vadd.f32 %v11127_v43, %v12688_v58 }
 0xa4e   :  { %v4566_v49 = vmul.f32 %v11012_v45, %v4546_v32  ;;  %v4532_v52 = vadd.f32 %v11003_v35, %v4512_v29  ;;  %v4610_v25 = vmax.f32 %v11226_v6, 0.0  ;;  %v12689_v32 = vld [vmem:[#allocation36_spill] sm:$0xff] }
 0xa4f   :  { %v4567_v19 = vmul.f32 %v11012_v45, %v4547_v7  ;;  %4646 = vadd.xlane.f32.xlu1 %v4617_v15  ;;  %v11240_v29 = vadd.f32 %v11148_v63, %v12689_v32  ;;  %v12690_v7 = vld [vmem:[#allocation37_spill] sm:$0xff] }
 0xa50   :  { %v4552_v20 = vmul.f32 %v11012_v45, %v4532_v52  ;;  %v4586_v22 = vadd.f32 %v11020_v30, %v4566_v49  ;;  %v11210_v45 = vadd.f32 %v4574_v8, %v12685_v42  ;;  %v11246_v46 = vadd.f32 %v4584_v16, %v12690_v7  ;;  %v12691_v49 = vld [vmem:[#allocation38_spill] sm:$0xff] }
 0xa51   :  { %v4587_v0 = vadd.f32 %v11020_v30, %v4567_v19  ;;  %v4614_v18 = vmax.f32 %v11240_v29, 0.0  ;;  %v12692_v16 = vmax.f32 %v11037_v10, 0.0 }
 0xa52   :  { %v4572_v41 = vadd.f32 %v11020_v30, %v4552_v20  ;;  %v4606_v30 = vmax.f32 %v11210_v45, 0.0  ;;  %v4616_v43 = vmax.f32 %v11246_v46, 0.0  ;;  %v11252_v52 = vadd.f32 %v4586_v22, %v12691_v49  ;;  %v8867_v45 = vld [vmem:[#allocation14 + $0xc] ss:$16 sps:$4 sm:$0xff]  }
 0xa53   :  { %v11202_v60 = vadd.f32 %v4587_v0, %v10676_v54  ;;  %v12686_v54 = vld [vmem:[#allocation33_spill] sm:$0xff]  ;;  %5283 = vmatprep.subr.bf16.mxu0 %v8867_v45  ;;  %v8892_v45 = vld [vmem:[#allocation14 + $0x60] ss:$16 sps:$4 sm:$0xff]  }
 0xa54   :  { %v11205_v35 = vadd.f32 %v4572_v41, %v10636_v53  ;;  %v11219_v26 = vadd.f32 %v11094_v36, %v12686_v54  ;;  %v4612_v36 = vmax.f32 %v11233_v57, 0.0  ;;  %v4618_v63 = vmax.f32 %v11252_v52, 0.0  ;;  %v8894_v52 = vld [vmem:[#allocation14 + $0x64] ss:$16 sps:$4 sm:$0xff]  }
 0xa55   :  { %v4619_v23 = vmax.f32 %v11202_v60, 0.0 }
 0xa56   :  { %v4604_v24 = vmax.f32 %v11205_v35, 0.0  ;;  %v4608_v53 = vmax.f32 %v11219_v26, 0.0 }
 0xa57   :  { %4650 = vadd.xlane.f32.xlu1 %v4619_v23 }
 0xa58   :  { %4620 = vadd.xlane.f32.xlu0 %v4604_v24 }
 0xa5c   :  { %4624 = vadd.xlane.f32.xlu0 %v4606_v30 }
 0xa60   :  { %4628 = vadd.xlane.f32.xlu0 %v4608_v53 }
 0xa64   :  { %4632 = vadd.xlane.f32.xlu0 %v4610_v25 }
 0xa68   :  { %4636 = vadd.xlane.f32.xlu0 %v4612_v36 }
 0xa6c   :  { %4640 = vadd.xlane.f32.xlu0 %v4614_v18 }
 0xa70   :  { %4644 = vadd.xlane.f32.xlu0 %v4616_v43 }
 0xa74   :  { %4648 = vadd.xlane.f32.xlu0 %v4618_v63 }
 0xaae   :  { %v4623_v19 = vpop.xlane.xlu1 %4622 }
 0xaaf   :  { %v4653_v20 = vmul.f32 0.0078125, %v4623_v19 }
 0xab1   :  { %v11261_v0 = vsub.f32 %v12692_v16, %v4653_v20 }
 0xab3   :  { %v4685_v41 = vmul.f32 %v11261_v0, %v11261_v0 }
 0xab4   :  { %v4627_v8 = vpop.xlane.xlu1 %4626 }
 0xab5   :  { %v4655_v22 = vmul.f32 0.0078125, %v4627_v8  ;;  %4702 = vadd.xlane.f32.xlu1 %v4685_v41 }
 0xab7   :  { %v11267_v42 = vsub.f32 %v4607_v28, %v4655_v22 }
 0xab9   :  { %v4687_v54 = vmul.f32 %v11267_v42, %v11267_v42 }
 0xabb   :  { %4706 = vadd.xlane.f32.xlu1 %v4687_v54 }
 0xabc   :  { %v4631_v4 = vpop.xlane.xlu1 %4630 }
 0xabd   :  { %v4657_v58 = vmul.f32 0.0078125, %v4631_v4 }
 0xabf   :  { %v11273_v10 = vsub.f32 %v4609_v59, %v4657_v58 }
 0xac1   :  { %v4689_v32 = vmul.f32 %v11273_v10, %v11273_v10 }
 0xac3   :  { %4710 = vadd.xlane.f32.xlu1 %v4689_v32 }
 0xac4   :  { %v4635_v7 = vpop.xlane.xlu1 %4634 }
 0xac5   :  { %v4659_v49 = vmul.f32 0.0078125, %v4635_v7 }
 0xac7   :  { %v11279_v55 = vsub.f32 %v4611_v51, %v4659_v49 }
 0xac9   :  { %v4691_v28 = vmul.f32 %v11279_v55, %v11279_v55 }
 0xacb   :  { %4714 = vadd.xlane.f32.xlu1 %v4691_v28 }
 0xacc   :  { %v4639_v19 = vpop.xlane.xlu1 %4638 }
 0xacd   :  { %v4661_v20 = vmul.f32 0.0078125, %v4639_v19 }
 0xacf   :  { %v11285_v33 = vsub.f32 %v4613_v13, %v4661_v20 }
 0xad1   :  { %v4693_v59 = vmul.f32 %v11285_v33, %v11285_v33 }
 0xad3   :  { %4718 = vadd.xlane.f32.xlu1 %v4693_v59 }
 0xad4   :  { %v4643_v16 = vpop.xlane.xlu1 %4642 }
 0xad5   :  { %v4663_v41 = vmul.f32 0.0078125, %v4643_v16  ;;  %v8865_v16 = vld [vmem:[#allocation14 + $0x8] ss:$16 sps:$4 sm:$0xff]  }
 0xad6   :  { %5284 = vmatpush1.bf16.msra.mxu0 %v8865_v16  ;;  %v8882_v16 = vld [vmem:[#allocation14 + $0x8c] ss:$16 sps:$4 sm:$0xff]  }
 0xad7   :  { %v11291_v48 = vsub.f32 %v4615_v38, %v4663_v41 }
 0xad9   :  { %v4695_v51 = vmul.f32 %v11291_v48, %v11291_v48 }
 0xadb   :  { %4722 = vadd.xlane.f32.xlu1 %v4695_v51 }
 0xadc   :  { %v4647_v8 = vpop.xlane.xlu1 %4646 }
 0xadd   :  { %v4665_v22 = vmul.f32 0.0078125, %v4647_v8 }
 0xadf   :  { %v11297_v44 = vsub.f32 %v4617_v15, %v4665_v22 }
 0xae1   :  { %v4697_v13 = vmul.f32 %v11297_v44, %v11297_v44 }
 0xae3   :  { %4726 = vadd.xlane.f32.xlu1 %v4697_v13  ;;  %v8870_v13 = vld [vmem:[#allocation14 + $0x2c] ss:$16 sps:$4 sm:$0xff]  }
 0xae4   :  { %v4651_v54 = vpop.xlane.xlu1 %4650  ;;  %5285 = vmatprep.subr.bf16.mxu0 %v8870_v13  ;;  %v8906_v13 = vld [vmem:[#allocation14 + $0xc4] ss:$16 sps:$4 sm:$0xff]  }
 0xae5   :  { %v4667_v4 = vmul.f32 0.0078125, %v4651_v54  ;;  %v4621_v58 = vpop.xlane.xlu0 %4620 }
 0xae6   :  { %v4652_v39 = vmul.f32 0.0078125, %v4621_v58 }
 0xae7   :  { %v11303_v38 = vsub.f32 %v4619_v23, %v4667_v4 }
 0xae8   :  { %v11307_v32 = vsub.f32 %v4604_v24, %v4652_v39 }
 0xae9   :  { %v4625_v7 = vpop.xlane.xlu0 %4624  ;;  %v4699_v31 = vmul.f32 %v11303_v38, %v11303_v38 }
 0xaea   :  { %v4654_v15 = vmul.f32 0.0078125, %v4625_v7  ;;  %v4684_v49 = vmul.f32 %v11307_v32, %v11307_v32 }
 0xaeb   :  { %4730 = vadd.xlane.f32.xlu1 %v4699_v31  ;;  %v8873_v31 = vld [vmem:[#allocation14 + $0x4c] ss:$16 sps:$4 sm:$0xff]  }
 0xaec   :  { %v11315_v28 = vsub.f32 %v4606_v30, %v4654_v15  ;;  %4700 = vadd.xlane.f32.xlu0 %v4684_v49  ;;  %v8877_v15 = vld [vmem:[#allocation14] ss:$16 sps:$4 sm:$0xff]   ;;  %v8879_v49 = vld [vmem:[#allocation14 + $0x4] ss:$16 sps:$4 sm:$0xff]  }
 0xaed   :  { %v4629_v60 = vpop.xlane.xlu0 %4628  ;;  %5170 = vmatprep.subr.bf16.mxu1 %v8879_v49 }
 0xaee   :  { %v4656_v23 = vmul.f32 0.0078125, %v4629_v60  ;;  %v4686_v35 = vmul.f32 %v11315_v28, %v11315_v28  ;;  %5171 = vmatpush1.bf16.msra.mxu1 %v8877_v15 }
 0xaf0   :  { %v11321_v24 = vsub.f32 %v4608_v53, %v4656_v23  ;;  %4704 = vadd.xlane.f32.xlu0 %v4686_v35  ;;  %v8883_v23 = vld [vmem:[#allocation14 + $0x20] ss:$16 sps:$4 sm:$0xff]   ;;  %v8888_v35 = vld [vmem:[#allocation14 + $0x44] ss:$16 sps:$4 sm:$0xff]  }
 0xaf1   :  { %v4633_v19 = vpop.xlane.xlu0 %4632 }
 0xaf2   :  { %v4658_v20 = vmul.f32 0.0078125, %v4633_v19  ;;  %v4688_v59 = vmul.f32 %v11321_v24, %v11321_v24  ;;  %v8886_v19 = vld [vmem:[#allocation14 + $0x40] ss:$16 sps:$4 sm:$0xff]  }
 0xaf4   :  { %v11327_v30 = vsub.f32 %v4610_v25, %v4658_v20  ;;  %4708 = vadd.xlane.f32.xlu0 %v4688_v59  ;;  %v8868_v25 = vld [vmem:[#allocation14 + $0x28] ss:$16 sps:$4 sm:$0xff]   ;;  %v8876_v59 = vld [vmem:[#allocation14 + $0x6c] ss:$16 sps:$4 sm:$0xff]  }
 0xaf5   :  { %v4637_v41 = vpop.xlane.xlu0 %4636  ;;  %5286 = vmatpush1.bf16.msra.mxu0 %v8868_v25  ;;  %v8874_v20 = vld [vmem:[#allocation14 + $0x68] ss:$16 sps:$4 sm:$0xff]   ;;  %v8900_v25 = vld [vmem:[#allocation14 + $0xcc] ss:$16 sps:$4 sm:$0xff]  }
 0xaf6   :  { %v4660_v51 = vmul.f32 0.0078125, %v4637_v41  ;;  %v4690_v26 = vmul.f32 %v11327_v30, %v11327_v30  ;;  %5287 = vmatprep.subr.bf16.mxu0 %v8873_v31  ;;  %v8897_v41 = vld [vmem:[#allocation14 + $0x84] ss:$16 sps:$4 sm:$0xff]  }
 0xaf7   :  { %v8915_v31 = vld [vmem:[#allocation16 + $0xc0] sm:$0xff]  }
 0xaf8   :  { %v11333_v53 = vsub.f32 %v4612_v36, %v4660_v51  ;;  %4712 = vadd.xlane.f32.xlu0 %v4690_v26  ;;  %v8895_v51 = vld [vmem:[#allocation14 + $0x80] ss:$16 sps:$4 sm:$0xff]   ;;  %v8891_v26 = vld [vmem:[#allocation14 + $0xac] ss:$16 sps:$4 sm:$0xff]  }
 0xaf9   :  { %v4641_v8 = vpop.xlane.xlu0 %4640 }
 0xafa   :  { %v4662_v22 = vmul.f32 0.0078125, %v4641_v8  ;;  %v4692_v6 = vmul.f32 %v11333_v53, %v11333_v53  ;;  %v8903_v8 = vld [vmem:[#allocation14 + $0xa4] ss:$16 sps:$4 sm:$0xff]  }
 0xafc   :  { %v11339_v54 = vsub.f32 %v4614_v18, %v4662_v22  ;;  %4716 = vadd.xlane.f32.xlu0 %v4692_v6  ;;  %v8871_v18 = vld [vmem:[#allocation14 + $0x48] ss:$16 sps:$4 sm:$0xff]   ;;  %v8901_v6 = vld [vmem:[#allocation14 + $0xa0] ss:$16 sps:$4 sm:$0xff]  }
 0xafd   :  { %v4645_v4 = vpop.xlane.xlu0 %4644  ;;  %5288 = vmatpush1.bf16.msra.mxu0 %v8871_v18  ;;  %v8889_v22 = vld [vmem:[#allocation14 + $0xa8] ss:$16 sps:$4 sm:$0xff]   ;;  %v8913_v18 = vld [vmem:[#allocation16 + $0x40] sm:$0xff]  }
 0xafe   :  { %v4664_v58 = vmul.f32 0.0078125, %v4645_v4  ;;  %v4694_v57 = vmul.f32 %v11339_v54, %v11339_v54  ;;  %5289 = vmatprep.subr.bf16.mxu0 %v8876_v59  ;;  %v8898_v4 = vld [vmem:[#allocation14 + $0xc8] ss:$16 sps:$4 sm:$0xff]  }
 0xb00   :  { %v11345_v36 = vsub.f32 %v4616_v43, %v4664_v58  ;;  %4720 = vadd.xlane.f32.xlu0 %v4694_v57  ;;  %v8885_v43 = vld [vmem:[#allocation14 + $0x24] ss:$16 sps:$4 sm:$0xff]   ;;  %v8904_v58 = vld [vmem:[#allocation14 + $0xc0] ss:$16 sps:$4 sm:$0xff]   ;;  %v8909_v57 = vld [vmem:[#allocation14 + $0xec] ss:$16 sps:$4 sm:$0xff]  }
 0xb01   :  { %v4649_v39 = vpop.xlane.xlu0 %4648  ;;  %5172 = vmatprep.subr.bf16.mxu1 %v8885_v43  ;;  %5290 = vmatpush1.bf16.msra.mxu0 %v8874_v20 }
 0xb02   :  { %v4666_v7 = vmul.f32 0.0078125, %v4649_v39  ;;  %v4696_v29 = vmul.f32 %v11345_v36, %v11345_v36  ;;  %5173 = vmatpush1.bf16.msra.mxu1 %v8883_v23  ;;  %5291 = vmatprep.subr.bf16.mxu0 %v8882_v16  ;;  %v8912_v39 = vld [vmem:[#allocation14 + $0xe4] ss:$16 sps:$4 sm:$0xff]  }
 0xb03   :  { %5174 = vmatprep.subr.bf16.mxu1 %v8888_v35 }
 0xb04   :  { %v11351_v60 = vsub.f32 %v4618_v63, %v4666_v7  ;;  %4724 = vadd.xlane.f32.xlu0 %v4696_v29  ;;  %v8880_v63 = vld [vmem:[#allocation14 + $0x88] ss:$16 sps:$4 sm:$0xff]   ;;  %v8910_v29 = vld [vmem:[#allocation14 + $0xe0] ss:$16 sps:$4 sm:$0xff]  }
 0xb05   :  { %5292 = vmatpush1.bf16.msra.mxu0 %v8880_v63  ;;  %v8907_v7 = vld [vmem:[#allocation14 + $0xe8] ss:$16 sps:$4 sm:$0xff]  }
 0xb06   :  { %v4698_v46 = vmul.f32 %v11351_v60, %v11351_v60  ;;  %5175 = vmatpush1.bf16.msra.mxu1 %v8886_v19  ;;  %5293 = vmatprep.subr.bf16.mxu0 %v8891_v26 }
 0xb07   :  { %5176 = vmatprep.subr.bf16.mxu1 %v8894_v52 }
 0xb08   :  { %4728 = vadd.xlane.f32.xlu0 %v4698_v46 }
 0xb09   :  { %5294 = vmatpush1.bf16.msra.mxu0 %v8889_v22 }
 0xb0a   :  { %5177 = vmatpush1.bf16.msra.mxu1 %v8892_v45  ;;  %5295 = vmatprep.subr.bf16.mxu0 %v8900_v25 }
 0xb0b   :  { %5178 = vmatprep.subr.bf16.mxu1 %v8897_v41 }
 0xb0d   :  { %5296 = vmatpush1.bf16.msra.mxu0 %v8898_v4 }
 0xb0e   :  { %5179 = vmatpush1.bf16.msra.mxu1 %v8895_v51  ;;  %5297 = vmatprep.subr.bf16.mxu0 %v8909_v57 }
 0xb0f   :  { %5180 = vmatprep.subr.bf16.mxu1 %v8903_v8 }
 0xb11   :  { %5298 = vmatpush1.bf16.msra.mxu0 %v8907_v7 }
 0xb12   :  { %5181 = vmatpush1.bf16.msra.mxu1 %v8901_v6  ;;  %8104 = vmatprep.subr.bf16.mxu0 %v8915_v31 }
 0xb13   :  { %5182 = vmatprep.subr.bf16.mxu1 %v8906_v13 }
 0xb16   :  { %5183 = vmatpush1.bf16.msra.mxu1 %v8904_v58 }
 0xb17   :  { %5184 = vmatprep.subr.bf16.mxu1 %v8912_v39 }
 0xb1a   :  { %5185 = vmatpush1.bf16.msra.mxu1 %v8910_v29 }
 0xb1b   :  { %8040 = vmatprep.subr.bf16.mxu1 %v8913_v18 }
 0xb42   :  { %v4703_v15 = vpop.xlane.xlu1 %4702 }
 0xb43   :  { %v4733_v49 = vmul.f32 0.007874016, %v4703_v15 }
 0xb45   :  { %9137 = vrsqrt.f32 %v4733_v49  ;;  %vm4757_vm2 = vcmp.eq.f32.partialorder %v4733_v49, inf  ;;  %v4760_v45 = vand.u32 2147483648, %v4733_v49  ;;  %vm4759_vm3 = vcmp.eq.f32.partialorder %v4733_v49, 0.0 }
 0xb48   :  { %v4707_v46 = vpop.xlane.xlu1 %4706 }
 0xb49   :  { %v4735_v43 = vmul.f32 0.007874016, %v4707_v46 }
 0xb4b   :  { %9139 = vrsqrt.f32 %v4735_v43  ;;  %vm4771_vm4 = vcmp.eq.f32.partialorder %v4735_v43, inf  ;;  %v4774_v31 = vand.u32 2147483648, %v4735_v43 }
 0xb4f   :  { %v9138_v35 = vpop.eup %9137 }
 0xb50   :  { %v4711_v23 = vpop.xlane.xlu1 %4710  ;;  %v4756_v20 = vmul.f32 %v9138_v35, %v4733_v49 }
 0xb51   :  { %v11355_v19 = vmul.f32 0.007874016, %v4711_v23 }
 0xb52   :  { %v4758_v63 = vsel %vm4757_vm2, %v4733_v49, %v4756_v20  ;;  %vm4773_vm2 = vcmp.eq.f32.partialorder %v4735_v43, 0.0 }
 0xb53   :  { %9141 = vrsqrt.f32 %v11355_v19  ;;  %v4761_v8 = vsel %vm4759_vm3, %v4760_v45, %v4758_v63 }
 0xb54   :  { %v4861_v4 = vadd.f32 1e-06, %v4761_v8 }
 0xb55   :  { %v9140_v26 = vpop.eup %9139 }
 0xb56   :  { %v4770_v25 = vmul.f32 %v9140_v26, %v4735_v43 }
 0xb58   :  { %v4715_v41 = vpop.xlane.xlu1 %4714  ;;  %v4772_v29 = vsel %vm4771_vm4, %v4735_v43, %v4770_v25  ;;  %vm4785_vm4 = vcmp.eq.f32.partialorder %v11355_v19, inf }
 0xb59   :  { %v11358_v22 = vmul.f32 0.007874016, %v4715_v41  ;;  %v4775_v23 = vsel %vm4773_vm2, %v4774_v31, %v4772_v29 }
 0xb5a   :  { %v4863_v26 = vadd.f32 1e-06, %v4775_v23 }
 0xb5d   :  { %v9142_v58 = vpop.eup %9141 }
 0xb5e   :  { %v4784_v35 = vmul.f32 %v9142_v58, %v11355_v19  ;;  %v4788_v58 = vand.u32 2147483648, %v11355_v19 }
 0xb60   :  { %v4719_v57 = vpop.xlane.xlu1 %4718 }
 0xb61   :  { %v11363_v49 = vmul.f32 0.007874016, %v4719_v57 }
 0xb68   :  { %v4723_v57 = vpop.xlane.xlu1 %4722 }
 0xb79   :  { %v4701_v59 = vpop.xlane.xlu0 %4700 }
 0xb7a   :  { %v4732_v52 = vmul.f32 0.007874016, %v4701_v59 }
 0xb7c   :  { %9143 = vrsqrt.f32 %v4732_v52  ;;  %vm4750_vm3 = vcmp.eq.f32.partialorder %v4732_v52, inf  ;;  %v4753_v46 = vand.u32 2147483648, %v4732_v52  ;;  %vm4752_vm1 = vcmp.eq.f32.partialorder %v4732_v52, 0.0 }
 0xb7d   :  { %v4705_v16 = vpop.xlane.xlu0 %4704 }
 0xb7e   :  { %v4734_v51 = vmul.f32 0.007874016, %v4705_v16 }
 0xb80   :  { %9145 = vrsqrt.f32 %v4734_v51  ;;  %vm4764_vm15 = vcmp.eq.f32.partialorder %v4734_v51, inf  ;;  %v4767_v8 = vand.u32 2147483648, %v4734_v51  ;;  %vm4766_vm2 = vcmp.eq.f32.partialorder %v4734_v51, 0.0 }
 0xb81   :  { %v4709_v6 = vpop.xlane.xlu0 %4708 }
 0xb82   :  { %v4736_v13 = vmul.f32 0.007874016, %v4709_v6  ;;  %v4786_v6 = vsel %vm4785_vm4, %v11355_v19, %v4784_v35  ;;  %v11377_v35 = vmul.f32 0.007874016, %v4723_v57  ;;  %v4727_v57 = vpop.xlane.xlu1 %4726 }
 0xb84   :  { %9147 = vrsqrt.f32 %v4736_v13  ;;  %v4781_v23 = vand.u32 2147483648, %v4736_v13 }
 0xb85   :  { %9149 = vrsqrt.f32 %v11358_v22  ;;  %v4713_v39 = vpop.xlane.xlu0 %4712 }
 0xb86   :  { %v9144_v7 = vpop.eup %9143  ;;  %v11361_v18 = vmul.f32 0.007874016, %v4713_v39  ;;  %9151 = vrcp.f32 %v4861_v4 }
 0xb87   :  { %v4749_v15 = vmul.f32 %v9144_v7, %v4732_v52 }
 0xb88   :  { %9153 = vrsqrt.f32 %v11361_v18  ;;  %vm4792_vm4 = vcmp.eq.f32.partialorder %v11361_v18, inf }
 0xb89   :  { %v4751_v20 = vsel %vm4750_vm3, %v4732_v52, %v4749_v15  ;;  %v4717_v59 = vpop.xlane.xlu0 %4716  ;;  %9155 = vrsqrt.f32 %v11363_v49  ;;  %vm4778_vm3 = vcmp.eq.f32.partialorder %v4736_v13, inf }
 0xb8a   :  { %v9146_v63 = vpop.eup %9145  ;;  %v4754_v16 = vsel %vm4752_vm1, %v4753_v46, %v4751_v20  ;;  %v11367_v45 = vmul.f32 0.007874016, %v4717_v59  ;;  %vm4787_vm1 = vcmp.eq.f32.partialorder %v11355_v19, 0.0 }
 0xb8b   :  { %v4860_v43 = vadd.f32 1e-06, %v4754_v16  ;;  %v4763_v41 = vmul.f32 %v9146_v63, %v4734_v51  ;;  %v4789_v46 = vsel %vm4787_vm1, %v4788_v58, %v4786_v6  ;;  %v12693_v6 = vld [vmem:[#allocation30_spill] sm:$0xff]  ;;  %vm4794_vm1 = vcmp.eq.f32.partialorder %v11361_v18, 0.0 }
 0xb8d   :  { %9157 = vrcp.f32 %v4860_v43  ;;  %v4765_v25 = vsel %vm4764_vm15, %v4734_v51, %v4763_v41  ;;  %v4721_v52 = vpop.xlane.xlu0 %4720  ;;  %vm4780_vm15 = vcmp.eq.f32.partialorder %v4736_v13, 0.0  ;;  %v4865_v41 = vadd.f32 1e-06, %v4789_v46 }
 0xb8e   :  { %v9148_v4 = vpop.eup %9147  ;;  %v4768_v39 = vsel %vm4766_vm2, %v4767_v8, %v4765_v25  ;;  %9159 = vrsqrt.f32 %v11367_v45  ;;  %v11375_v15 = vmul.f32 0.007874016, %v4721_v52  ;;  %v11386_v25 = vrot.slane %v11007_v62, %v12693_v6 }
 0xb8f   :  { %v9150_v7 = vpop.eup %9149  ;;  %v4862_v29 = vadd.f32 1e-06, %v4768_v39  ;;  %v4777_v31 = vmul.f32 %v9148_v4, %v4736_v13  ;;  %9161 = vrcp.f32 %v4863_v26  ;;  %vm4799_vm2 = vcmp.eq.f32.partialorder %v11358_v22, inf }
 0xb90   :  { %v9152_v51 = vpop.eup %9151  ;;  %v4798_v63 = vmul.f32 %v9150_v7, %v11358_v22  ;;  %v4795_v52 = vand.u32 2147483648, %v11361_v18  ;;  %v4802_v39 = vand.u32 2147483648, %v11358_v22 }
 0xb91   :  { %v4779_v20 = vsel %vm4778_vm3, %v4736_v13, %v4777_v31  ;;  %9163 = vrcp.f32 %v4862_v29  ;;  %v4725_v8 = vpop.xlane.xlu0 %4724  ;;  %v4893_v26 = vmul.f32 %v9152_v51, %v11261_v0  ;;  %vm4801_vm3 = vcmp.eq.f32.partialorder %v11358_v22, 0.0 }
 0xb92   :  { %v9154_v59 = vpop.eup %9153  ;;  %v4782_v16 = vsel %vm4780_vm15, %v4781_v23, %v4779_v20  ;;  %9165 = vrsqrt.f32 %v11375_v15  ;;  %v4800_v58 = vsel %vm4799_vm2, %v11358_v22, %v4798_v63  ;;  %v11395_v29 = vmul.f32 0.007874016, %v4725_v8  ;;  %v12694_v23 = vld [vmem:[#allocation31_spill] sm:$0xff] }
 0xb93   :  { %v4864_v43 = vadd.f32 1e-06, %v4782_v16  ;;  %v4791_v19 = vmul.f32 %v9154_v59, %v11361_v18  ;;  %9167 = vrsqrt.f32 %v11377_v35  ;;  %v9156_v4 = vpop.eup %9155  ;;  %v4913_v46 = vmul.f32 %v11386_v25, %v4893_v26 }
 0xb94   :  { %v11401_v51 = vrot.slane %v11007_v62, %v12694_v23  ;;  %v4803_v20 = vsel %vm4801_vm3, %v4802_v39, %v4800_v58  ;;  %v11403_v59 = vmul.f32 0.007874016, %v4727_v57  ;;  %vm4813_vm15 = vcmp.eq.f32.partialorder %v11363_v49, inf }
 0xb95   :  { %v4793_v13 = vsel %vm4792_vm4, %v11361_v18, %v4791_v19  ;;  %9169 = vrcp.f32 %v4864_v43  ;;  %v4812_v43 = vmul.f32 %v9156_v4, %v11363_v49  ;;  %vm4806_vm4 = vcmp.eq.f32.partialorder %v11367_v45, inf  ;;  %v4729_v26 = vpop.xlane.xlu0 %4728 }
 0xb96   :  { %v4796_v7 = vsel %vm4794_vm1, %v4795_v52, %v4793_v13  ;;  %9171 = vrcp.f32 %v4865_v41  ;;  %v4867_v22 = vadd.f32 1e-06, %v4803_v20  ;;  %v4933_v13 = vadd.f32 %v11401_v51, %v4913_v46 }
 0xb97   :  { %v9158_v0 = vpop.eup %9157  ;;  %v4866_v19 = vadd.f32 1e-06, %v4796_v7  ;;  %9173 = vrsqrt.f32 %v11395_v29  ;;  %v4809_v4 = vand.u32 2147483648, %v11367_v45  ;;  %v4816_v39 = vand.u32 2147483648, %v11363_v49  ;;  %v4731_v7 = vpop.xlane.xlu1 %4730 }
 0xb98   :  { %v9160_v31 = vpop.eup %9159  ;;  %v4892_v63 = vmul.f32 %v9158_v0, %v11307_v32  ;;  %9175 = vrsqrt.f32 %v11403_v59  ;;  %v4814_v0 = vsel %vm4813_vm15, %v11363_v49, %v4812_v43  ;;  %vm4808_vm2 = vcmp.eq.f32.partialorder %v11367_v45, 0.0  ;;  %v8919_v43 = vld [vmem:[#allocation16 + $0xc8] sm:$0xff]  }
 0xb99   :  { %v4805_v18 = vmul.f32 %v9160_v31, %v11367_v45  ;;  %v9162_v16 = vpop.eup %9161  ;;  %9177 = vrcp.f32 %v4866_v19  ;;  %vm4815_vm1 = vcmp.eq.f32.partialorder %v11363_v49, 0.0  ;;  %vm4820_vm3 = vcmp.eq.f32.partialorder %v11375_v15, inf }
 0xb9a   :  { %v4912_v62 = vmul.f32 %v11386_v25, %v4892_v63  ;;  %v4895_v57 = vmul.f32 %v9162_v16, %v11267_v42  ;;  %v8914_v63 = vld [vmem:[#allocation16] sm:$0xff]   ;;  %9179 = vrcp.f32 %v4867_v22  ;;  %v8917_v16 = vld [vmem:[#allocation16 + $0x48] sm:$0xff]   ;;  %v4817_v9 = vsel %vm4815_vm1, %v4816_v39, %v4814_v0  ;;  %v8923_v0 = vld [vmem:[#allocation16 + $0xd0] sm:$0xff]  }
 0xb9b   :  { %v9164_v8 = vpop.eup %9163  ;;  %v4807_v41 = vsel %vm4806_vm4, %v11367_v45, %v4805_v18  ;;  %v11427_v45 = vmul.f32 0.007874016, %v4731_v7  ;;  %vm4827_vm15 = vcmp.eq.f32.partialorder %v11377_v35, inf  ;;  %v4823_v7 = vand.u32 2147483648, %v11375_v15 }
 0xb9c   :  { %v4894_v32 = vmul.f32 %v9164_v8, %v11315_v28  ;;  %v9166_v52 = vpop.eup %9165  ;;  %v4932_v58 = vadd.f32 %v11401_v51, %v4912_v62  ;;  %v4810_v46 = vsel %vm4808_vm2, %v4809_v4, %v4807_v41  ;;  %v11422_v28 = vmul.f32 0.007874016, %v4729_v26  ;;  %v8916_v8 = vld [vmem:[#allocation16 + $0x80] sm:$0xff]  }
 0xb9d   :  { %v9168_v31 = vpop.eup %9167  ;;  %v4819_v42 = vmul.f32 %v9166_v52, %v11375_v15  ;;  %v4915_v19 = vmul.f32 %v11386_v25, %v4895_v57  ;;  %v8920_v52 = vld [vmem:[#allocation16 + $0x88] sm:$0xff]   ;;  %v4869_v4 = vadd.f32 1e-06, %v4817_v9  ;;  %v8921_v57 = vld [vmem:[#allocation16 + $0x50] sm:$0xff]   ;;  %vm4822_vm4 = vcmp.eq.f32.partialorder %v11375_v15, 0.0 }
 0xb9e   :  { %v4980_v20 = vpack.c.bf16 %v4933_v13, %v4932_v58  ;;  %v4914_v18 = vmul.f32 %v11386_v25, %v4894_v32  ;;  %v4826_v26 = vmul.f32 %v9168_v31, %v11377_v35  ;;  %v4868_v13 = vadd.f32 1e-06, %v4810_v46  ;;  %v8918_v32 = vld [vmem:[#allocation16 + $0x8] sm:$0xff]  }
 0xb9f   :  { %v9170_v62 = vpop.eup %9169  ;;  %9181 = vrsqrt.f32 %v11422_v28  ;;  %v4821_v58 = vsel %vm4820_vm3, %v11375_v15, %v4819_v42  ;;  %v8924_v42 = vld [vmem:[#allocation16 + $0x90] sm:$0xff]   ;;  %vm4829_vm2 = vcmp.eq.f32.partialorder %v11377_v35, 0.0  ;;  %v8925_v15 = vld [vmem:[#allocation16 + $0x58] sm:$0xff]   ;;  %vm4834_vm1 = vcmp.eq.f32.partialorder %v11395_v29, inf }
 0xba0   :  { %5203 = vmatmul.mubr.bf16.vlgmr.msra.gmra.mrb[168].mxu1 %v4980_v20  ;;  %5316 = vmatmul.mubr.bf16.vlgmr.msra.gmra.mrb[168].mxu0 %v4980_v20  ;;  %v9172_v41 = vpop.eup %9171  ;;  %v4934_v49 = vadd.f32 %v11401_v51, %v4914_v18  ;;  %v4896_v22 = vmul.f32 %v9170_v62, %v11321_v24  ;;  %9183 = vrsqrt.f32 %v11427_v45  ;;  %v4935_v24 = vadd.f32 %v11401_v51, %v4915_v19  ;;  %v8922_v62 = vld [vmem:[#allocation16 + $0x10] sm:$0xff]  }
 0xba1   :  { %5212 = vmatprep.mubr.bf16.mxu1 %v12665_v12  ;;  %5325 = vmatprep.mubr.bf16.mxu0 %v12665_v12  ;;  %v9174_v39 = vpop.eup %9173  ;;  %v4897_v31 = vmul.f32 %v9172_v41, %v11273_v10  ;;  %v4828_v46 = vsel %vm4827_vm15, %v11377_v35, %v4826_v26  ;;  %9185 = vrcp.f32 %v4868_v13  ;;  %v4830_v20 = vand.u32 2147483648, %v11377_v35 }
 0xba2   :  { %8041 = vmatpush3.bf16.msra.mxu1 %v8914_v63  ;;  %8105 = vmatpush3.bf16.msra.mxu0 %v8916_v8  ;;  %v9176_v9 = vpop.eup %9175  ;;  %v4824_v18 = vsel %vm4822_vm4, %v4823_v7, %v4821_v58  ;;  %v4981_v63 = vpack.c.bf16 %v4935_v24, %v4934_v49  ;;  %v4916_v8 = vmul.f32 %v11386_v25, %v4896_v22  ;;  %9187 = vrcp.f32 %v4869_v4 }
 0xba3   :  { %8042 = vmatprep.subr.bf16.mxu1 %v8917_v16  ;;  %8106 = vmatprep.subr.bf16.mxu0 %v8919_v43  ;;  %v9178_v16 = vpop.eup %9177  ;;  %v4833_v10 = vmul.f32 %v9174_v39, %v11395_v29  ;;  %v8927_v43 = vld [vmem:[#allocation16 + $0xd8] sm:$0xff]   ;;  %v4831_v19 = vsel %vm4829_vm2, %v4830_v20, %v4828_v46  ;;  %v4917_v41 = vmul.f32 %v11386_v25, %v4897_v31  ;;  %v4870_v49 = vadd.f32 1e-06, %v4824_v18 }
 0xba4   :  { %v9180_v26 = vpop.eup %9179  ;;  %v4840_v13 = vmul.f32 %v9176_v9, %v11403_v59  ;;  %v4936_v35 = vadd.f32 %v11401_v51, %v4916_v8  ;;  %v4898_v22 = vmul.f32 %v9178_v16, %v11327_v30  ;;  %v4871_v4 = vadd.f32 1e-06, %v4831_v19  ;;  %v8930_v8 = vld [vmem:[#allocation16 + $0x20] sm:$0xff]  }
 0xba5   :  { %v4835_v58 = vsel %vm4834_vm1, %v11395_v29, %v4833_v10  ;;  %vm4841_vm3 = vcmp.eq.f32.partialorder %v11403_v59, inf  ;;  %v4837_v7 = vand.u32 2147483648, %v11395_v29  ;;  %v4937_v24 = vadd.f32 %v11401_v51, %v4917_v41 }
 0xba6   :  { %8043 = vmatpush3.bf16.msra.mxu1 %v8918_v32  ;;  %8107 = vmatpush3.bf16.msra.mxu0 %v8920_v52  ;;  %v8926_v32 = vld [vmem:[#allocation16 + $0x18] sm:$0xff]   ;;  %v4899_v30 = vmul.f32 %v9180_v26, %v11279_v55  ;;  %v4842_v31 = vsel %vm4841_vm3, %v11403_v59, %v4840_v13  ;;  %vm4836_vm15 = vcmp.eq.f32.partialorder %v11395_v29, 0.0  ;;  %9189 = vrcp.f32 %v4870_v49 }
 0xba7   :  { %8044 = vmatprep.subr.bf16.mxu1 %v8921_v57  ;;  %8108 = vmatprep.subr.bf16.mxu0 %v8923_v0  ;;  %v8928_v52 = vld [vmem:[#allocation16 + $0x98] sm:$0xff]   ;;  %v8929_v57 = vld [vmem:[#allocation16 + $0x60] sm:$0xff]   ;;  %v4844_v9 = vand.u32 2147483648, %v11403_v59  ;;  %v4838_v20 = vsel %vm4836_vm15, %v4837_v7, %v4835_v58  ;;  %v4982_v18 = vpack.c.bf16 %v4937_v24, %v4936_v35  ;;  %vm4843_vm4 = vcmp.eq.f32.partialorder %v11403_v59, 0.0 }
 0xba8   :  { %5213 = vmatmul.mubr.bf16.gmra.mrb[172].mxu1 %v4981_v63  ;;  %5326 = vmatmul.mubr.bf16.gmra.mrb[172].mxu0 %v4981_v63  ;;  %v8931_v0 = vld [vmem:[#allocation16 + $0xe0] sm:$0xff]   ;;  %v4918_v63 = vmul.f32 %v11386_v25, %v4898_v22  ;;  %9191 = vrcp.f32 %v4871_v4  ;;  %v4919_v16 = vmul.f32 %v11386_v25, %v4899_v30  ;;  %vm4848_vm2 = vcmp.eq.f32.partialorder %v11422_v28, inf }
 0xba9   :  { %5222 = vmatprep.mubr.bf16.mxu1 %v12665_v12  ;;  %5335 = vmatprep.mubr.bf16.mxu0 %v12665_v12  ;;  %v9182_v39 = vpop.eup %9181  ;;  %v4845_v29 = vsel %vm4843_vm4, %v4844_v9, %v4842_v31  ;;  %vm4855_vm1 = vcmp.eq.f32.partialorder %v11427_v45, inf  ;;  %v4851_v13 = vand.u32 2147483648, %v11422_v28  ;;  %vm4850_vm3 = vcmp.eq.f32.partialorder %v11422_v28, 0.0 }
 0xbaa   :  { %8045 = vmatpush3.bf16.msra.mxu1 %v8922_v62  ;;  %8109 = vmatpush3.bf16.msra.mxu0 %v8924_v42  ;;  %v9184_v46 = vpop.eup %9183  ;;  %v8932_v62 = vld [vmem:[#allocation16 + $0xa0] sm:$0xff]   ;;  %v4847_v55 = vmul.f32 %v9182_v39, %v11422_v28  ;;  %v4938_v59 = vadd.f32 %v11401_v51, %v4918_v63  ;;  %v4873_v41 = vadd.f32 1e-06, %v4845_v29  ;;  %v4939_v49 = vadd.f32 %v11401_v51, %v4919_v16 }
 0xbab   :  { %8046 = vmatprep.subr.bf16.mxu1 %v8925_v15  ;;  %8110 = vmatprep.subr.bf16.mxu0 %v8927_v43  ;;  %v9186_v42 = vpop.eup %9185  ;;  %v4854_v15 = vmul.f32 %v9184_v46, %v11427_v45  ;;  %v4872_v43 = vadd.f32 1e-06, %v4838_v20  ;;  %vm4857_vm15 = vcmp.eq.f32.partialorder %v11427_v45, 0.0  ;;  %vm12721_vm4 = vcmask 1040384  }
 0xbac   :  { %v9188_v10 = vpop.eup %9187  ;;  %v4900_v19 = vmul.f32 %v9186_v42, %v11333_v53  ;;  %v4849_v26 = vsel %vm4848_vm2, %v11422_v28, %v4847_v55  ;;  %v4858_v53 = vand.u32 2147483648, %v11427_v45  ;;  %vm12722_vm2 = vmmov %vm12721_vm4 }
 0xbad   :  { %v4901_v35 = vmul.f32 %v9188_v10, %v11285_v33  ;;  %v4856_v22 = vsel %vm4855_vm1, %v11427_v45, %v4854_v15  ;;  %9193 = vrcp.f32 %v4872_v43  ;;  %vm12724_vm1 = vcmask 1046528  }
 0xbae   :  { %8047 = vmatpush3.bf16.msra.mxu1 %v8926_v32  ;;  %8111 = vmatpush3.bf16.msra.mxu0 %v8928_v52  ;;  %v4852_v32 = vsel %vm4850_vm3, %v4851_v13, %v4849_v26  ;;  %v4983_v52 = vpack.c.bf16 %v4939_v49, %v4938_v59  ;;  %v4920_v4 = vmul.f32 %v11386_v25, %v4900_v19  ;;  %9195 = vrcp.f32 %v4873_v41  ;;  %v8933_v13 = vld [vmem:[#allocation16 + $0x68] sm:$0xff]   ;;  %vm12725_vm3 = vmmov %vm12722_vm2 }
 0xbaf   :  { %8048 = vmatprep.subr.bf16.mxu1 %v8929_v57  ;;  %8112 = vmatprep.subr.bf16.mxu0 %v8931_v0  ;;  %v4859_v57 = vsel %vm4857_vm15, %v4858_v53, %v4856_v22  ;;  %v4921_v33 = vmul.f32 %v11386_v25, %v4901_v35  ;;  %v4874_v39 = vadd.f32 1e-06, %v4852_v32  ;;  %v8935_v49 = vld [vmem:[#allocation16 + $0xe8] sm:$0xff]   ;;  %v8938_v22 = vld [vmem:[#allocation16 + $0x30] sm:$0xff]   ;;  %vm12726_vm15 = vmmov %vm12724_vm1 }
 0xbb0   :  { %5223 = vmatmul.mubr.bf16.gmra.mrb[176].mxu1 %v4982_v18  ;;  %5336 = vmatmul.mubr.bf16.gmra.mrb[176].mxu0 %v4982_v18  ;;  %v9190_v58 = vpop.eup %9189  ;;  %v4940_v28 = vadd.f32 %v11401_v51, %v4920_v4  ;;  %v4875_v24 = vadd.f32 1e-06, %v4859_v57  ;;  %v8936_v35 = vld [vmem:[#allocation16 + $0xa8] sm:$0xff]   ;;  %v8939_v53 = vld [vmem:[#allocation16 + $0xf0] sm:$0xff]   ;;  %v8943_v4 = vld [vmem:[#allocation16 + $0xf8] sm:$0xff]  }
 0xbb1   :  { %5232 = vmatprep.mubr.bf16.mxu1 %v12665_v12  ;;  %5345 = vmatprep.mubr.bf16.mxu0 %v12665_v12  ;;  %v4902_v7 = vmul.f32 %v9190_v58, %v11339_v54  ;;  %v4941_v30 = vadd.f32 %v11401_v51, %v4921_v33  ;;  %9197 = vrcp.f32 %v4874_v39  ;;  %v8940_v32 = vld [vmem:[#allocation16 + $0xb0] sm:$0xff]   ;;  %v8944_v58 = vld [vmem:[#allocation16 + $0xb8] sm:$0xff]   ;;  %v4988_v57 = vld [vmem:[%s12504_s3] sm:$0xf]  ;;  %s9631_s3 = smov [#allocation20]  }
 0xbb2   :  { %8049 = vmatpush3.bf16.msra.mxu1 %v8930_v8  ;;  %8113 = vmatpush3.bf16.msra.mxu0 %v8932_v62  ;;  %v9192_v0 = vpop.eup %9191  ;;  %9199 = vrcp.f32 %v4875_v24  ;;  %v8947_v33 = vld [vmem:[#allocation17 + $0x4] ss:$12 sps:$4 sm:$0xff]   ;;  %v11520_v39 = vrot.slane %v4988_v57, %v12694_v23  ;;  %s7535_s18 = sshll.u32 %s9631_s3, 4  ;;  %s7536_s18 = int_to_ptr.vmem [resolvable:$true] %s7535_s18 }
 0xbb3   :  { %v4903_v45 = vmul.f32 %v9192_v0, %v11291_v48  ;;  %v4984_v31 = vpack.c.bf16 %v4941_v30, %v4940_v28  ;;  %v4922_v46 = vmul.f32 %v11386_v25, %v4902_v7  ;;  %8050 = vmatprep.subr.bf16.mxu1 %v8933_v13  ;;  %8114 = vmatprep.subr.bf16.mxu0 %v8935_v49  ;;  %v12695_v7 = vld [vmem:[#allocation41_spill] sm:$0xff]  ;;  %s9573_s14 = scalar_lea.vmem %s7536_s18, 2048  ;;  %p9578_p5 = scmp.lt.s32.totalorder %s7536_s18, %s7536_s18 }
 0xbb4   :  { %v11517_v0 = vrot.slane %v4988_v57, %v10013_v34  ;;  %v11523_v28 = vrot.slane %v4988_v57, %v12693_v6  ;;  %v11526_v24 = vrot.slane %v4988_v57, %v12695_v7  ;;  %v11528_v30 = vld [vmem:[#allocation17 + $0x8] ss:$12 sps:$4 sm:$0xff]   ;;  %p9574_p4 = scmp.ne.s32.totalorder %s7536_s18, %s9573_s14  ;;  %p9579_p6 = scmp.lt.s32.totalorder %s9573_s14, %s9573_s14 }
 0xbb5   :  { %v4923_v20 = vmul.f32 %v11386_v25, %v4903_v45  ;;  %v4942_v54 = vadd.f32 %v11401_v51, %v4922_v46 }
 0xbb6   :  { %8115 = vmatpush3.bf16.msra.mxu0 %v8936_v35  ;;  %p9580_p7 = por %p9579_p6, %p9578_p5 }
 0xbb7   :  { %v9194_v9 = vpop.eup %9193  ;;  %v4943_v48 = vadd.f32 %v11401_v51, %v4923_v20  ;;  %8116 = vmatprep.subr.bf16.mxu0 %v8939_v53 }
 0xbb8   :  { %5233 = vmatmul.mubr.bf16.gmra.mrb[180].mxu1 %v4983_v52  ;;  %5346 = vmatmul.mubr.bf16.gmra.mrb[180].mxu0 %v4983_v52  ;;  %v9196_v18 = vpop.eup %9195  ;;  %v4904_v63 = vmul.f32 %v9194_v9, %v11345_v36  ;;  %v8942_v52 = vld [vmem:[#allocation16 + $0x38] sm:$0xff]   ;;  %p9581_p8 = pnand %p9580_p7, %p9574_p4 }
 0xbb9   :  { %5242 = vmatprep.mubr.bf16.mxu1 %v12665_v12  ;;  %5355 = vmatprep.mubr.bf16.mxu0 %v12665_v12  ;;  %v4905_v8 = vmul.f32 %v9196_v18, %v11297_v44  ;;  %v4985_v62 = vpack.c.bf16 %v4943_v48, %v4942_v54 }
 0xbba   :  { %v4924_v42 = vmul.f32 %v11386_v25, %v4904_v63  ;;  %8117 = vmatpush3.bf16.msra.mxu0 %v8940_v32 }
 0xbbb   :  { %v9198_v55 = vpop.eup %9197  ;;  %v4925_v29 = vmul.f32 %v11386_v25, %v4905_v8  ;;  %8118 = vmatprep.subr.bf16.mxu0 %v8943_v4 }
 0xbbc   :  { %v9200_v16 = vpop.eup %9199  ;;  %v4944_v10 = vadd.f32 %v11401_v51, %v4924_v42  ;;  %v4906_v36 = vmul.f32 %v9198_v55, %v11351_v60 }
 0xbbd   :  { %v4945_v15 = vadd.f32 %v11401_v51, %v4925_v29  ;;  %v4907_v44 = vmul.f32 %v9200_v16, %v11303_v38  ;;  %v8934_v38 = vld [vmem:[#allocation16 + $0x28] sm:$0xff]  }
 0xbbe   :  { %v4926_v59 = vmul.f32 %v11386_v25, %v4906_v36  ;;  %8051 = vmatpush3.bf16.msra.mxu1 %v8934_v38  ;;  %8119 = vmatpush3.bf16.msra.mxu0 %v8944_v58 }
 0xbbf   :  { %v4986_v43 = vpack.c.bf16 %v4945_v15, %v4944_v10  ;;  %v4927_v19 = vmul.f32 %v11386_v25, %v4907_v44  ;;  %v8937_v25 = vld [vmem:[#allocation16 + $0x70] sm:$0xff]   ;;  %8664 = vmatprep.subr.bf16.mxu0 %v11528_v30 }
 0xbc0   :  { %5243 = vmatmul.mubr.bf16.gmra.mrb[184].mxu1 %v4984_v31  ;;  %5356 = vmatmul.mubr.bf16.gmra.mrb[184].mxu0 %v4984_v31  ;;  %v4946_v41 = vadd.f32 %v11401_v51, %v4926_v59 }
 0xbc1   :  { %5252 = vmatprep.mubr.bf16.mxu1 %v12665_v12  ;;  %5365 = vmatprep.mubr.bf16.mxu0 %v12665_v12  ;;  %v4947_v26 = vadd.f32 %v11401_v51, %v4927_v19  ;;  %v8941_v51 = vld [vmem:[#allocation16 + $0x78] sm:$0xff]  }
 0xbc2   :  { %8052 = vmatprep.subr.bf16.mxu1 %v8937_v25 }
 0xbc3   :  { %v4987_v60 = vpack.c.bf16 %v4947_v26, %v4946_v41  ;;  %8053 = vmatpush3.bf16.msra.mxu1 %v8938_v22 }
 0xbc4   :  { %8054 = vmatprep.subr.bf16.mxu1 %v8941_v51 }
 0xbc7   :  { %8055 = vmatpush3.bf16.msra.mxu1 %v8942_v52 }
 0xbc8   :  { %5253 = vmatmul.mubr.bf16.gmra.mrb[188].mxu1 %v4985_v62  ;;  %5366 = vmatmul.mubr.bf16.gmra.mrb[188].mxu0 %v4985_v62 }
 0xbc9   :  { %5262 = vmatprep.mubr.bf16.mxu1 %v12665_v12  ;;  %5375 = vmatprep.mubr.bf16.mxu0 %v12665_v12 }
 0xbca   :  { %6402 = vmatprep.subr.bf16.mxu1 %v8947_v33 }
 0xbd0   :  { %5263 = vmatmul.mubr.bf16.gmra.mrb[192].mxu1 %v4986_v43  ;;  %5376 = vmatmul.mubr.bf16.gmra.mrb[192].mxu0 %v4986_v43 }
 0xbd1   :  { %5272 = vmatprep.mubr.bf16.mxu1 %v12665_v12  ;;  %5385 = vmatprep.mubr.bf16.mxu0 %v12665_v12 }
 0xbd8   :  { %5273 = vmatmul.mubr.bf16.gmra.mrb[196].mxu1 %v4987_v60  ;;  %5386 = vmatmul.mubr.bf16.gmra.mrb[196].mxu0 %v4987_v60 }
 0xc73   :  { %v5204_v45 = vpop.f32.mrb[168].mxu1  ;;  %v5317_v31 = vpop.f32.mrb[168].mxu0 }
 0xc74   :  { %v5205_v46 = vadd.f32 %v5204_v45, %v11517_v0  ;;  %v5318_v9 = vadd.f32 %v5317_v31, %v11520_v39  ;;  %v5206_v20 = vpop.f32.mrb[169].mxu1  ;;  %v5319_v18 = vpop.f32.mrb[169].mxu0 }
 0xc75   :  { %v5207_v23 = vadd.f32 %v5206_v20, %v11523_v28  ;;  %v5320_v54 = vadd.f32 %v5319_v18, %v11526_v24  ;;  %v5208_v63 = vpop.f32.mrb[170].mxu1  ;;  %v5321_v48 = vpop.f32.mrb[170].mxu0 }
 0xc76   :  { %v5460_v8 = vmul.f32 0.70710677, %v5205_v46  ;;  %v5462_v62 = vmul.f32 0.70710677, %v5318_v9  ;;  %v5209_v29 = vadd.f32 %v5208_v63, %v11517_v0  ;;  %v5322_v16 = vadd.f32 %v5321_v48, %v11520_v39  ;;  %v5210_v10 = vpop.f32.mrb[171].mxu1  ;;  %v5323_v36 = vpop.f32.mrb[171].mxu0 }
 0xc77   :  { %v5461_v42 = vmul.f32 0.70710677, %v5207_v23  ;;  %v5463_v55 = vmul.f32 0.70710677, %v5320_v54  ;;  %v5211_v15 = vadd.f32 %v5210_v10, %v11523_v28  ;;  %v5324_v44 = vadd.f32 %v5323_v36, %v11526_v24 }
 0xc78   :  { %9201 = verf.f32 %v5460_v8  ;;  %v5464_v43 = vmul.f32 0.70710677, %v5209_v29  ;;  %v5466_v59 = vmul.f32 0.70710677, %v5322_v16  ;;  %v5396_v57 = vmul.f32 0.5, %v5205_v46 }
 0xc79   :  { %9203 = verf.f32 %v5462_v62  ;;  %v5465_v19 = vmul.f32 0.70710677, %v5211_v15  ;;  %v5467_v26 = vmul.f32 0.70710677, %v5324_v44  ;;  %v5398_v48 = vmul.f32 0.5, %v5318_v9 }
 0xc7a   :  { %9205 = verf.f32 %v5461_v42  ;;  %v5397_v8 = vmul.f32 0.5, %v5207_v23  ;;  %v11546_v62 = vmul.f32 0.5, %v5320_v54  ;;  %v5400_v42 = vmul.f32 0.5, %v5209_v29 }
 0xc7b   :  { %9207 = verf.f32 %v5463_v55  ;;  %v5214_v41 = vpop.f32.mrb[172].mxu1  ;;  %v5327_v13 = vpop.f32.mrb[172].mxu0  ;;  %v5402_v36 = vmul.f32 0.5, %v5322_v16 }
 0xc7c   :  { %9209 = verf.f32 %v5464_v43  ;;  %v5215_v60 = vadd.f32 %v5214_v41, %v11517_v0  ;;  %v5216_v38 = vpop.f32.mrb[173].mxu1  ;;  %v5328_v49 = vadd.f32 %v5327_v13, %v11520_v39  ;;  %v5329_v25 = vpop.f32.mrb[173].mxu0  ;;  %v11548_v41 = vmul.f32 0.5, %v5211_v15 }
 0xc7d   :  { %9211 = verf.f32 %v5466_v59  ;;  %v5217_v35 = vadd.f32 %v5216_v38, %v11523_v28  ;;  %v5218_v22 = vpop.f32.mrb[174].mxu1  ;;  %v5330_v32 = vadd.f32 %v5329_v25, %v11526_v24  ;;  %v5331_v51 = vpop.f32.mrb[174].mxu0 }
 0xc7e   :  { %9213 = verf.f32 %v5465_v19  ;;  %v5468_v53 = vmul.f32 0.70710677, %v5215_v60  ;;  %v5220_v52 = vpop.f32.mrb[175].mxu1  ;;  %v5470_v4 = vmul.f32 0.70710677, %v5328_v49  ;;  %v5333_v58 = vpop.f32.mrb[175].mxu0  ;;  %v5219_v31 = vadd.f32 %v5218_v22, %v11517_v0 }
 0xc7f   :  { %9215 = verf.f32 %v5467_v26  ;;  %v5469_v33 = vmul.f32 0.70710677, %v5217_v35  ;;  %v5471_v45 = vmul.f32 0.70710677, %v5330_v32  ;;  %v5332_v20 = vadd.f32 %v5331_v51, %v11520_v39 }
 0xc80   :  { %9217 = verf.f32 %v5468_v53  ;;  %v5221_v18 = vadd.f32 %v5220_v52, %v11523_v28  ;;  %v5472_v46 = vmul.f32 0.70710677, %v5219_v31  ;;  %v11550_v26 = vmul.f32 0.5, %v5324_v44 }
 0xc81   :  { %9219 = verf.f32 %v5470_v4  ;;  %v5474_v13 = vmul.f32 0.70710677, %v5332_v20  ;;  %v5334_v38 = vadd.f32 %v5333_v58, %v11526_v24  ;;  %v11553_v25 = vmul.f32 0.5, %v5215_v60 }
 0xc82   :  { %v9202_v63 = vpop.eup %9201  ;;  %9221 = verf.f32 %v5469_v33  ;;  %v5473_v29 = vmul.f32 0.70710677, %v5221_v18  ;;  %v11555_v51 = vmul.f32 0.5, %v5328_v49  ;;  %v11557_v52 = vmul.f32 0.5, %v5217_v35 }
 0xc83   :  { %v9204_v55 = vpop.eup %9203  ;;  %v5588_v10 = vadd.f32 1.0, %v9202_v63  ;;  %v5224_v43 = vpop.f32.mrb[176].mxu1  ;;  %9223 = verf.f32 %v5471_v45  ;;  %v11559_v15 = vmul.f32 0.5, %v5330_v32  ;;  %v11565_v45 = vmul.f32 0.5, %v5219_v31 }
 0xc84   :  { %v5337_v59 = vpop.f32.mrb[176].mxu0  ;;  %v9206_v19 = vpop.eup %9205  ;;  %v5590_v54 = vadd.f32 1.0, %v9204_v55  ;;  %9225 = verf.f32 %v5472_v46  ;;  %v5475_v35 = vmul.f32 0.70710677, %v5334_v38  ;;  %v5225_v32 = vadd.f32 %v5224_v43, %v11517_v0 }
 0xc85   :  { %v5226_v9 = vpop.f32.mrb[177].mxu1  ;;  %v9208_v23 = vpop.eup %9207  ;;  %v11563_v33 = vmul.f32 %v5588_v10, %v5396_v57  ;;  %v5589_v60 = vadd.f32 1.0, %v9206_v19  ;;  %9227 = verf.f32 %v5474_v13  ;;  %v5338_v57 = vadd.f32 %v5337_v59, %v11520_v39 }
 0xc86   :  { %v5339_v16 = vpop.f32.mrb[177].mxu0  ;;  %v5228_v22 = vpop.f32.mrb[178].mxu1  ;;  %v11570_v46 = vmul.f32 %v5590_v54, %v5398_v48  ;;  %9229 = verf.f32 %v5473_v29  ;;  %v5591_v19 = vadd.f32 1.0, %v9208_v23  ;;  %v5227_v61 = vadd.f32 %v5226_v9, %v11523_v28 }
 0xc87   :  { %v9210_v53 = vpop.eup %9209  ;;  %v5341_v44 = vpop.f32.mrb[178].mxu0  ;;  %v11580_v43 = vmul.f32 0.5, %v5332_v20  ;;  %v11582_v48 = vmul.f32 0.5, %v5221_v18  ;;  %v11588_v59 = vmul.f32 %v5589_v60, %v5397_v8  ;;  %9231 = verf.f32 %v5475_v35 }
 0xc88   :  { %v11561_v4 = vpop.f32.mrb[179].mxu1  ;;  %v9212_v58 = vpop.eup %9211  ;;  %v5592_v63 = vadd.f32 1.0, %v9210_v53  ;;  %v5476_v53 = vmul.f32 0.70710677, %v5225_v32  ;;  %v11601_v8 = vmul.f32 %v5591_v19, %v11546_v62 }
 0xc89   :  { %v11567_v55 = vpop.f32.mrb[179].mxu0  ;;  %v9214_v6 = vpop.eup %9213  ;;  %v5594_v49 = vadd.f32 1.0, %v9212_v58 }
 0xc8a   :  { %v9216_v34 = vpop.eup %9215  ;;  %v11572_v37 = vmul.f32 %v5592_v63, %v5400_v42  ;;  %v11584_v42 = vmul.f32 0.5, %v5334_v38  ;;  %v5593_v23 = vadd.f32 1.0, %v9214_v6  ;;  %9233 = verf.f32 %v5476_v53 }
 0xc8b   :  { %v9218_v10 = vpop.eup %9217  ;;  %v11575_v31 = vmul.f32 %v5594_v49, %v5402_v36  ;;  %v5234_v54 = vpop.f32.mrb[180].mxu1  ;;  %v5595_v49 = vadd.f32 1.0, %v9216_v34  ;;  %v5478_v38 = vmul.f32 0.70710677, %v5338_v57  ;;  %v5477_v36 = vmul.f32 0.70710677, %v5227_v61 }
 0xc8c   :  { %v9220_v58 = vpop.eup %9219  ;;  %v11586_v29 = vpop.f32.mrb[180].mxu0  ;;  %v5596_v18 = vadd.f32 1.0, %v9218_v10  ;;  %v5340_v6 = vadd.f32 %v5339_v16, %v11526_v24  ;;  %v11608_v34 = vmul.f32 0.5, %v5225_v32  ;;  %v5229_v10 = vadd.f32 %v5228_v22, %v11517_v0 }
 0xc8d   :  { %v11592_v9 = vpop.f32.mrb[181].mxu1  ;;  %v11594_v63 = vpop.f32.mrb[181].mxu0  ;;  %v5598_v60 = vadd.f32 1.0, %v9220_v58  ;;  %9235 = verf.f32 %v5478_v38  ;;  %v5342_v53 = vadd.f32 %v5341_v44, %v11520_v39  ;;  %v5657_v62 = vmul.f32 %v5593_v23, %v11548_v41 }
 0xc8e   :  { %v9222_v20 = vpop.eup %9221  ;;  %v11596_v13 = vpop.f32.mrb[182].mxu1  ;;  %v11613_v58 = vmul.f32 0.5, %v5338_v57  ;;  %9237 = verf.f32 %v5477_v36  ;;  %v5659_v16 = vmul.f32 %v5595_v49, %v11550_v26  ;;  %v11617_v40 = vmul.f32 %v5596_v18, %v11553_v25 }
 0xc8f   :  { %v11598_v17 = vpop.f32.mrb[182].mxu0  ;;  %v11604_v35 = vpop.f32.mrb[183].mxu1  ;;  %v5597_v19 = vadd.f32 1.0, %v9222_v20  ;;  %v5479_v27 = vmul.f32 0.70710677, %v5340_v6  ;;  %v11620_v38 = vmul.f32 %v5598_v60, %v11555_v51  ;;  %v11622_v44 = vmul.f32 0.5, %v5227_v61 }
 0xc90   :  { %v11606_v5 = vpop.f32.mrb[183].mxu0  ;;  %v9224_v14 = vpop.eup %9223  ;;  %v5480_v32 = vmul.f32 0.70710677, %v5229_v10  ;;  %v5482_v1 = vmul.f32 0.70710677, %v5342_v53  ;;  %v5231_v57 = vadd.f32 %v11561_v4, %v11523_v28  ;;  %v5344_v26 = vadd.f32 %v11567_v55, %v11526_v24 }
 0xc91   :  { %v9226_v2 = vpop.eup %9225  ;;  %v5599_v22 = vadd.f32 1.0, %v9224_v14  ;;  %9239 = verf.f32 %v5479_v27  ;;  %v11633_v51 = vmul.f32 %v5597_v19, %v11557_v52  ;;  %v11635_v14 = vmul.f32 0.5, %v5340_v6 }
 0xc92   :  { %v9228_v21 = vpop.eup %9227  ;;  %v5600_v23 = vadd.f32 1.0, %v9226_v2  ;;  %9241 = verf.f32 %v5480_v32  ;;  %v11638_v61 = vadd.f32 %v5234_v54, %v11517_v0  ;;  %v11644_v20 = vmul.f32 0.5, %v5229_v10 }
 0xc93   :  { %v9230_v41 = vpop.eup %9229  ;;  %v11628_v25 = vpop.f32.mrb[184].mxu1  ;;  %v5602_v4 = vadd.f32 1.0, %v9228_v21  ;;  %9243 = verf.f32 %v5482_v1  ;;  %v5481_v55 = vmul.f32 0.70710677, %v5231_v57  ;;  %v11651_v60 = vmul.f32 %v5599_v22, %v11559_v15 }
 0xc94   :  { %v11630_v36 = vpop.f32.mrb[184].mxu0  ;;  %v11640_v2 = vpop.f32.mrb[185].mxu1  ;;  %v5601_v6 = vadd.f32 1.0, %v9230_v41  ;;  %v5483_v54 = vmul.f32 0.70710677, %v5344_v26  ;;  %v11657_v21 = vmul.f32 %v5600_v23, %v11565_v45  ;;  %v5348_v1 = vadd.f32 %v11586_v29, %v11520_v39 }
 0xc95   :  { %v11642_v27 = vpop.f32.mrb[185].mxu0  ;;  %v11646_v49 = vpop.f32.mrb[186].mxu1  ;;  %v5484_v19 = vmul.f32 0.70710677, %v11638_v61  ;;  %9245 = verf.f32 %v5481_v55  ;;  %v5237_v10 = vadd.f32 %v11592_v9, %v11523_v28  ;;  %v5350_v15 = vadd.f32 %v11594_v63, %v11526_v24  ;;  %v8950_v45 = vld [vmem:[#allocation17 + $0x1c] ss:$12 sps:$4 sm:$0xff]  }
 0xc96   :  { %v11648_v18 = vpop.f32.mrb[186].mxu0  ;;  %v9232_v52 = vpop.eup %9231  ;;  %9247 = verf.f32 %v5483_v54  ;;  %v5781_v22 = vpack.c.bf16 %v5657_v62, %v11588_v59  ;;  %v5783_v41 = vpack.c.bf16 %v5659_v16, %v11601_v8  ;;  %v11670_v55 = vmul.f32 %v5602_v4, %v11580_v43  ;;  %v8948_v8 = vld [vmem:[#allocation17 + $0x18] ss:$12 sps:$4 sm:$0xff]  }
 0xc97   :  { %v11654_v32 = vpop.f32.mrb[187].mxu1  ;;  %v9234_v50 = vpop.eup %9233  ;;  %v5603_v29 = vadd.f32 1.0, %v9232_v52  ;;  %v11672_v56 = vmul.f32 0.5, %v5342_v53  ;;  %v5486_v9 = vmul.f32 0.70710677, %v5348_v1  ;;  %v11675_v54 = vmul.f32 %v5601_v6, %v11582_v48 }
 0xc98   :  { %v11663_v11 = vpop.f32.mrb[187].mxu0  ;;  %v9236_v23 = vpop.eup %9235  ;;  %v5604_v63 = vadd.f32 1.0, %v9234_v50  ;;  %9249 = verf.f32 %v5484_v19  ;;  %v5485_v59 = vmul.f32 0.70710677, %v5237_v10  ;;  %6040 = vmatprep.mubr.bf16.mxu1 %v5781_v22  ;;  %6137 = vmatprep.mubr.bf16.mxu0 %v5783_v41  ;;  %v11677_v62 = vmul.f32 0.5, %v5231_v57 }
 0xc99   :  { %v9238_v7 = vpop.eup %9237  ;;  %v11679_v16 = vmul.f32 0.5, %v5344_v26  ;;  %v5487_v43 = vmul.f32 0.70710677, %v5350_v15  ;;  %v11683_v53 = vadd.f32 %v11596_v13, %v11517_v0  ;;  %v12696_v4 = vpack.c.bf16 %v11572_v37, %v11563_v33  ;;  %v8953_v57 = vld [vmem:[#allocation17 + $0x34] ss:$12 sps:$4 sm:$0xff]  }
 0xc9a   :  { %v12697_v50 = vpack.c.bf16 %v11575_v31, %v11570_v46  ;;  %v5606_v26 = vadd.f32 1.0, %v9236_v23  ;;  %9251 = verf.f32 %v5486_v9  ;;  %v11697_v6 = vadd.f32 %v11598_v17, %v11520_v39  ;;  %v8968_v46 = vld [vmem:[#allocation17 + $0x38] ss:$12 sps:$4 sm:$0xff]  }
 0xc9b   :  { %6041 = vmatmul.mubr.bf16.vlgmr.msra.gmra.mrb[200].mxu1 %v12696_v4  ;;  %v11691_v48 = vpop.f32.mrb[188].mxu1  ;;  %v11693_v52 = vpop.f32.mrb[188].mxu0  ;;  %v11701_v13 = vadd.f32 %v11604_v35, %v11523_v28  ;;  %v11709_v19 = vmul.f32 %v5603_v29, %v11584_v42  ;;  %v5605_v22 = vadd.f32 1.0, %v9238_v7  ;;  %9253 = verf.f32 %v5485_v59 }
 0xc9c   :  { %6138 = vmatmul.mubr.bf16.vlgmr.msra.gmra.mrb[200].mxu0 %v12697_v50  ;;  %v11703_v37 = vpop.f32.mrb[189].mxu1  ;;  %v11705_v33 = vpop.f32.mrb[189].mxu0  ;;  %6403 = vmatpush1.bf16.msra.mxu1 %v8945_v3  ;;  %v5488_v17 = vmul.f32 0.70710677, %v11683_v53  ;;  %v11717_v3 = vmul.f32 %v5604_v63, %v11608_v34  ;;  %9255 = verf.f32 %v5487_v43  ;;  %v5490_v42 = vmul.f32 0.70710677, %v11697_v6 }
 0xc9d   :  { %8665 = vmatpush3.bf16.msra.mxu0 %v11528_v30  ;;  %v9240_v31 = vpop.eup %9239  ;;  %v11712_v41 = vpop.f32.mrb[190].mxu1  ;;  %6404 = vmatprep.subr.bf16.mxu1 %v8950_v45  ;;  %v11720_v30 = vmul.f32 0.5, %v11638_v61  ;;  %v11725_v9 = vmul.f32 0.5, %v5348_v1  ;;  %v11727_v59 = vmul.f32 0.5, %v5237_v10  ;;  %v5489_v45 = vmul.f32 0.70710677, %v11701_v13 }
 0xc9e   :  { %v11714_v35 = vpop.f32.mrb[190].mxu0  ;;  %8666 = vmatprep.subr.bf16.mxu0 %v8964_v47  ;;  %v9242_v23 = vpop.eup %9241  ;;  %v5354_v4 = vadd.f32 %v11606_v5, %v11526_v24  ;;  %v11735_v61 = vmul.f32 %v5606_v26, %v11613_v58  ;;  %v11737_v63 = vmul.f32 0.5, %v5350_v15  ;;  %9257 = verf.f32 %v5488_v17  ;;  %v8951_v1 = vld [vmem:[#allocation17 + $0x30] ss:$12 sps:$4 sm:$0xff]  }
 0xc9f   :  { %v11723_v7 = vpop.f32.mrb[191].mxu1  ;;  %v9244_v29 = vpop.eup %9243  ;;  %v5245_v43 = vadd.f32 %v11628_v25, %v11517_v0  ;;  %v11742_v50 = vmul.f32 %v5605_v22, %v11622_v44  ;;  %v5607_v12 = vadd.f32 1.0, %v9240_v31  ;;  %9259 = verf.f32 %v5490_v42 }
 0xca0   :  { %12698 = vst [vmem:[#allocation32_spill] sm:$0xff] %v11723_v7  ;;  %v11732_v34 = vpop.f32.mrb[191].mxu0  ;;  %6405 = vmatpush1.bf16.msra.mxu1 %v8948_v8  ;;  %v9246_v10 = vpop.eup %9245  ;;  %v5491_v5 = vmul.f32 0.70710677, %v5354_v4  ;;  %v5608_v15 = vadd.f32 1.0, %v9242_v23  ;;  %v5610_v26 = vadd.f32 1.0, %v9244_v29  ;;  %9261 = verf.f32 %v5489_v45 }
 0xca1   :  { %12699 = vst [vmem:[#allocation33_spill] sm:$0xff] %v11732_v34  ;;  %8667 = vmatpush3.bf16.msra.mxu0 %v8964_v47  ;;  %6406 = vmatprep.subr.bf16.mxu1 %v8953_v57  ;;  %v8956_v34 = vld [vmem:[#allocation17 + $0x4c] ss:$12 sps:$4 sm:$0xff]   ;;  %v9248_v58 = vpop.eup %9247  ;;  %v5492_v17 = vmul.f32 0.70710677, %v5245_v43  ;;  %v5609_v7 = vadd.f32 1.0, %v9246_v10  ;;  %v5358_v47 = vadd.f32 %v11630_v36, %v11520_v39  ;;  %v5247_v44 = vadd.f32 %v11640_v2, %v11523_v28 }
 0xca2   :  { %8668 = vmatprep.subr.bf16.mxu0 %v8968_v46  ;;  %9263 = verf.f32 %v5491_v5  ;;  %v8954_v57 = vld [vmem:[#allocation17 + $0x48] ss:$12 sps:$4 sm:$0xff]   ;;  %v9250_v31 = vpop.eup %9249  ;;  %v5611_v22 = vadd.f32 1.0, %v9248_v58  ;;  %v11753_v23 = vmul.f32 0.5, %v11683_v53  ;;  %v5360_v42 = vadd.f32 %v11642_v27, %v11526_v24  ;;  %v8959_v2 = vld [vmem:[#allocation17 + $0x64] ss:$12 sps:$4 sm:$0xff]  }
 0xca3   :  { %v11748_v25 = vpop.f32.mrb[192].mxu1  ;;  %v11750_v8 = vpop.f32.mrb[192].mxu0  ;;  %9265 = verf.f32 %v5492_v17  ;;  %v11762_v45 = vmul.f32 %v5607_v12, %v11635_v14  ;;  %v11765_v10 = vmul.f32 0.5, %v11697_v6  ;;  %v11768_v53 = vmul.f32 0.5, %v11701_v13 }
 0xca4   :  { %v11757_v29 = vpop.f32.mrb[193].mxu1  ;;  %v11759_v36 = vpop.f32.mrb[193].mxu0  ;;  %6407 = vmatpush1.bf16.msra.mxu1 %v8951_v1  ;;  %v5494_v5 = vmul.f32 0.70710677, %v5358_v47  ;;  %v11775_v1 = vmul.f32 %v5608_v15, %v11644_v20  ;;  %v11780_v12 = vmul.f32 0.5, %v5354_v4  ;;  %v11782_v14 = vmul.f32 0.5, %v5245_v43 }
 0xca5   :  { %12700 = vst [vmem:[#allocation34_spill] sm:$0xff] %v11759_v36  ;;  %8669 = vmatpush3.bf16.msra.mxu0 %v8968_v46  ;;  %v11770_v58 = vpop.f32.mrb[194].mxu1  ;;  %v11772_v27 = vpop.f32.mrb[194].mxu0  ;;  %6408 = vmatprep.subr.bf16.mxu1 %v8956_v34  ;;  %v11778_v46 = vmul.f32 %v5610_v26, %v11672_v56  ;;  %v5612_v34 = vadd.f32 1.0, %v9250_v31  ;;  %v5785_v20 = vpack.c.bf16 %v11675_v54, %v11633_v51  ;;  %v5495_v4 = vmul.f32 0.70710677, %v5360_v42 }
 0xca6   :  { %12701 = vst [vmem:[#allocation35_spill] sm:$0xff] %v11770_v58  ;;  %12702 = vst [vmem:[#allocation36_spill] sm:$0xff] %v11772_v27  ;;  %v9252_v17 = vpop.eup %9251  ;;  %v11784_v6 = vpop.f32.mrb[195].mxu1  ;;  %v11789_v58 = vmul.f32 %v5609_v7, %v11677_v62  ;;  %v5493_v27 = vmul.f32 0.70710677, %v5247_v44  ;;  %v11794_v56 = vmul.f32 %v5611_v22, %v11679_v16  ;;  %9267 = verf.f32 %v5494_v5 }
 0xca7   :  { %v11786_v13 = vpop.f32.mrb[195].mxu0  ;;  %v9254_v36 = vpop.eup %9253  ;;  %v5787_v43 = vpack.c.bf16 %v11709_v19, %v11651_v60  ;;  %v5614_v26 = vadd.f32 1.0, %v9252_v17  ;;  %6048 = vmatprep.mubr.bf16.mxu1 %v5785_v20  ;;  %v5249_v62 = vadd.f32 %v11646_v49, %v11517_v0  ;;  %v5362_v51 = vadd.f32 %v11648_v18, %v11520_v39  ;;  %v8957_v54 = vld [vmem:[#allocation17 + $0x60] ss:$12 sps:$4 sm:$0xff]  }
 0xca8   :  { %12703 = vst [vmem:[#allocation37_spill] sm:$0xff] %v11786_v13  ;;  %v9256_v15 = vpop.eup %9255  ;;  %6409 = vmatpush1.bf16.msra.mxu1 %v8954_v57  ;;  %v11798_v13 = vmul.f32 0.5, %v5358_v47  ;;  %v5613_v7 = vadd.f32 1.0, %v9254_v36  ;;  %v11804_v31 = vmul.f32 0.5, %v5247_v44  ;;  %v5784_v60 = vpack.c.bf16 %v11657_v21, %v11617_v40  ;;  %v8962_v47 = vld [vmem:[#allocation17 + $0x7c] ss:$12 sps:$4 sm:$0xff]  }
 0xca9   :  { %6410 = vmatprep.subr.bf16.mxu1 %v8959_v2  ;;  %v9258_v16 = vpop.eup %9257  ;;  %6145 = vmatprep.mubr.bf16.mxu0 %v5787_v43  ;;  %v5786_v19 = vpack.c.bf16 %v11670_v55, %v11620_v38  ;;  %v11811_v49 = vmul.f32 %v5612_v34, %v11720_v30  ;;  %v5615_v22 = vadd.f32 1.0, %v9256_v15  ;;  %9269 = verf.f32 %v5493_v27 }
 0xcaa   :  { %v9260_v57 = vpop.eup %9259  ;;  %v5496_v18 = vmul.f32 0.70710677, %v5249_v62  ;;  %v11815_v44 = vmul.f32 0.5, %v5360_v42  ;;  %9271 = verf.f32 %v5495_v4  ;;  %v5498_v5 = vmul.f32 0.70710677, %v5362_v51  ;;  %6049 = vmatmul.mubr.bf16.gmra.mrb[204].mxu1 %v5784_v60 }
 0xcab   :  { %v11813_v2 = vpop.f32.mrb[196].mxu1  ;;  %v9262_v36 = vpop.eup %9261  ;;  %6146 = vmatmul.mubr.bf16.gmra.mrb[204].mxu0 %v5786_v19  ;;  %v5251_v40 = vadd.f32 %v11654_v32, %v11523_v28  ;;  %v11824_v30 = vmul.f32 %v5614_v26, %v11725_v9  ;;  %v5364_v42 = vadd.f32 %v11663_v11, %v11526_v24  ;;  %v5255_v27 = vadd.f32 %v11691_v48, %v11517_v0  ;;  %v8960_v32 = vld [vmem:[#allocation17 + $0x78] ss:$12 sps:$4 sm:$0xff]   ;;  %v8967_v11 = vld [vmem:[#allocation17 + $0x94] ss:$12 sps:$4 sm:$0xff]  }
 0xcac   :  { %v11819_v38 = vpop.f32.mrb[196].mxu0  ;;  %v11821_v21 = vpop.f32.mrb[197].mxu1  ;;  %9273 = verf.f32 %v5496_v18  ;;  %6411 = vmatpush1.bf16.msra.mxu1 %v8957_v54  ;;  %v11835_v15 = vmul.f32 %v5613_v7, %v11727_v59  ;;  %v5616_v4 = vadd.f32 1.0, %v9258_v16  ;;  %v5618_v9 = vadd.f32 1.0, %v9260_v57  ;;  %v8965_v57 = vld [vmem:[#allocation17 + $0x90] ss:$12 sps:$4 sm:$0xff]  }
 0xcad   :  { %v9264_v55 = vpop.eup %9263  ;;  %v11830_v17 = vpop.f32.mrb[197].mxu0  ;;  %9275 = verf.f32 %v5498_v5  ;;  %6412 = vmatprep.subr.bf16.mxu1 %v8962_v47  ;;  %v11842_v48 = vmul.f32 %v5615_v22, %v11737_v63  ;;  %v5617_v60 = vadd.f32 1.0, %v9262_v36  ;;  %v5497_v19 = vmul.f32 0.70710677, %v5251_v40 }
 0xcae   :  { %12704 = vst [vmem:[#allocation38_spill] sm:$0xff] %v11830_v17  ;;  %v11832_v34 = vpop.f32.mrb[198].mxu1  ;;  %v9266_v20 = vpop.eup %9265  ;;  %v5499_v54 = vmul.f32 0.70710677, %v5364_v42  ;;  %v5619_v18 = vadd.f32 1.0, %v9264_v55  ;;  %v11844_v17 = vmul.f32 0.5, %v5249_v62  ;;  %v5368_v59 = vadd.f32 %v11693_v52, %v11520_v39 }
 0xcaf   :  { %12705 = vst [vmem:[#allocation31_spill] sm:$0xff] %v11832_v34  ;;  %v11837_v43 = vpop.f32.mrb[198].mxu0  ;;  %v11839_v26 = vpop.f32.mrb[199].mxu1  ;;  %v5620_v34 = vadd.f32 1.0, %v9266_v20  ;;  %9277 = verf.f32 %v5497_v19  ;;  %v5500_v7 = vmul.f32 0.70710677, %v5255_v27  ;;  %v5257_v47 = vadd.f32 %v11703_v37, %v11523_v28 }
 0xcb0   :  { %v11848_v16 = vpop.f32.mrb[199].mxu0  ;;  %v5370_v63 = vadd.f32 %v11705_v33, %v11526_v24  ;;  %6413 = vmatpush1.bf16.msra.mxu1 %v8960_v32  ;;  %v9268_v22 = vpop.eup %9267  ;;  %v11855_v36 = vmul.f32 %v5616_v4, %v11753_v23  ;;  %v11858_v62 = vmul.f32 %v5618_v9, %v11765_v10  ;;  %v11860_v52 = vmul.f32 0.5, %v5362_v51 }
 0xcb1   :  { %v5502_v5 = vmul.f32 0.70710677, %v5368_v59  ;;  %6414 = vmatprep.subr.bf16.mxu1 %v8967_v11  ;;  %v11863_v55 = vmul.f32 %v5617_v60, %v11768_v53  ;;  %v11865_v37 = vmul.f32 0.5, %v5251_v40  ;;  %9279 = verf.f32 %v5499_v54 }
 0xcb2   :  { %v5501_v33 = vmul.f32 0.70710677, %v5257_v47  ;;  %v11868_v32 = vmul.f32 %v5619_v18, %v11780_v12  ;;  %v11871_v23 = vmul.f32 %v5620_v34, %v11782_v14  ;;  %v11873_v20 = vmul.f32 0.5, %v5364_v42 }
 0xcb3   :  { %v11875_v10 = vmul.f32 0.5, %v5255_v27  ;;  %v9270_v51 = vpop.eup %9269  ;;  %v5622_v4 = vadd.f32 1.0, %v9268_v22  ;;  %9281 = verf.f32 %v5500_v7  ;;  %v5503_v9 = vmul.f32 0.70710677, %v5370_v63 }
 0xcb4   :  { %v5789_v53 = vpack.c.bf16 %v11789_v58, %v11742_v50  ;;  %6415 = vmatpush1.bf16.msra.mxu1 %v8965_v57  ;;  %v9272_v40 = vpop.eup %9271  ;;  %9283 = verf.f32 %v5502_v5  ;;  %v5791_v12 = vpack.c.bf16 %v11794_v56, %v11762_v45  ;;  %v5259_v14 = vadd.f32 %v11712_v41, %v11517_v0  ;;  %v12706_v58 = vld [vmem:[#allocation32_spill] sm:$0xff] }
 0xcb5   :  { %v5372_v42 = vadd.f32 %v11714_v35, %v11520_v39  ;;  %9285 = verf.f32 %v5501_v33  ;;  %v5788_v34 = vpack.c.bf16 %v11775_v1, %v11717_v3  ;;  %v5790_v50 = vpack.c.bf16 %v11778_v46, %v11735_v61  ;;  %v12707_v61 = vld [vmem:[#allocation33_spill] sm:$0xff] }
 0xcb6   :  { %v9274_v27 = vpop.eup %9273  ;;  %6056 = vmatprep.mubr.bf16.mxu1 %v5789_v53  ;;  %v5261_v11 = vadd.f32 %v12706_v58, %v11523_v28  ;;  %v5621_v45 = vadd.f32 1.0, %v9270_v51  ;;  %v11891_v56 = vmul.f32 0.5, %v5368_v59  ;;  %9287 = verf.f32 %v5503_v9  ;;  %6153 = vmatprep.mubr.bf16.mxu0 %v5791_v12 }
 0xcb7   :  { %v9276_v60 = vpop.eup %9275  ;;  %v5504_v41 = vmul.f32 0.70710677, %v5259_v14  ;;  %v5623_v35 = vadd.f32 1.0, %v9272_v40  ;;  %v11893_v19 = vmul.f32 0.5, %v5257_v47  ;;  %v5506_v54 = vmul.f32 0.70710677, %v5372_v42  ;;  %6057 = vmatmul.mubr.bf16.gmra.mrb[208].mxu1 %v5788_v34  ;;  %6154 = vmatmul.mubr.bf16.gmra.mrb[208].mxu0 %v5790_v50 }
 0xcb8   :  { %v5505_v3 = vmul.f32 0.70710677, %v5261_v11  ;;  %v11896_v1 = vmul.f32 %v5622_v4, %v11798_v13  ;;  %v5374_v46 = vadd.f32 %v12707_v61, %v11526_v24  ;;  %v5265_v18 = vadd.f32 %v11748_v25, %v11517_v0 }
 0xcb9   :  { %9289 = verf.f32 %v5504_v41  ;;  %v9278_v59 = vpop.eup %9277  ;;  %v5624_v7 = vadd.f32 1.0, %v9274_v27  ;;  %v5626_v57 = vadd.f32 1.0, %v9276_v60  ;;  %v5378_v47 = vadd.f32 %v11750_v8, %v11520_v39  ;;  %v12708_v60 = vld [vmem:[#allocation34_spill] sm:$0xff] }
 0xcba   :  { %9291 = verf.f32 %v5506_v54  ;;  %v11904_v22 = vmul.f32 0.5, %v5370_v63  ;;  %v5507_v5 = vmul.f32 0.70710677, %v5374_v46  ;;  %v5267_v13 = vadd.f32 %v11757_v29, %v11523_v28  ;;  %v12709_v54 = vld [vmem:[#allocation35_spill] sm:$0xff] }
 0xcbb   :  { %9293 = verf.f32 %v5505_v3  ;;  %v9280_v33 = vpop.eup %9279  ;;  %v11909_v51 = vmul.f32 %v5621_v45, %v11804_v31  ;;  %v11912_v25 = vmul.f32 %v5623_v35, %v11815_v44  ;;  %v11914_v4 = vmul.f32 0.5, %v5259_v14 }
 0xcbc   :  { %v5508_v9 = vmul.f32 0.70710677, %v5265_v18  ;;  %v5625_v53 = vadd.f32 1.0, %v9278_v59  ;;  %v11916_v40 = vmul.f32 0.5, %v5372_v42  ;;  %9295 = verf.f32 %v5507_v5 }
 0xcbd   :  { %v5510_v8 = vmul.f32 0.70710677, %v5378_v47  ;;  %v9282_v63 = vpop.eup %9281  ;;  %v11919_v12 = vmul.f32 %v5624_v7, %v11844_v17  ;;  %v11922_v29 = vmul.f32 %v5626_v57, %v11860_v52  ;;  %v11924_v31 = vmul.f32 0.5, %v5261_v11 }
 0xcbe   :  { %9297 = verf.f32 %v5508_v9  ;;  %v9284_v44 = vpop.eup %9283  ;;  %v5627_v27 = vadd.f32 1.0, %v9280_v33  ;;  %v11926_v14 = vmul.f32 0.5, %v5374_v46  ;;  %v11928_v34 = vmul.f32 0.5, %v5265_v18  ;;  %v12710_v18 = vld [vmem:[#allocation36_spill] sm:$0xff] }
 0xcbf   :  { %v5509_v42 = vmul.f32 0.70710677, %v5267_v13  ;;  %v9286_v50 = vpop.eup %9285  ;;  %v11930_v58 = vmul.f32 0.5, %v5378_v47  ;;  %v5380_v17 = vadd.f32 %v12708_v60, %v11526_v24  ;;  %v5793_v52 = vpack.c.bf16 %v11863_v55, %v11835_v15 }
 0xcc0   :  { %v5795_v11 = vpack.c.bf16 %v11868_v32, %v11842_v48  ;;  %v9288_v45 = vpop.eup %9287  ;;  %v11939_v41 = vmul.f32 %v5625_v53, %v11865_v37  ;;  %v5628_v35 = vadd.f32 1.0, %v9282_v63  ;;  %9299 = verf.f32 %v5510_v8 }
 0xcc1   :  { %v5269_v3 = vadd.f32 %v12709_v54, %v11517_v0  ;;  %v5630_v61 = vadd.f32 1.0, %v9284_v44  ;;  %v5511_v46 = vmul.f32 0.70710677, %v5380_v17  ;;  %6064 = vmatprep.mubr.bf16.mxu1 %v5793_v52  ;;  %v5382_v59 = vadd.f32 %v12710_v18, %v11520_v39 }
 0xcc2   :  { %6161 = vmatprep.mubr.bf16.mxu0 %v5795_v11  ;;  %v5792_v15 = vpack.c.bf16 %v11855_v36, %v11811_v49  ;;  %v5629_v55 = vadd.f32 1.0, %v9286_v50  ;;  %9301 = verf.f32 %v5509_v42  ;;  %v5794_v32 = vpack.c.bf16 %v11858_v62, %v11824_v30  ;;  %v12711_v36 = vld [vmem:[#allocation37_spill] sm:$0xff] }
 0xcc3   :  { %v9290_v48 = vpop.eup %9289  ;;  %v5512_v37 = vmul.f32 0.70710677, %v5269_v3  ;;  %v5691_v57 = vmul.f32 %v5627_v27, %v11873_v20  ;;  %v5631_v47 = vadd.f32 1.0, %v9288_v45  ;;  %9303 = verf.f32 %v5511_v46 }
 0xcc4   :  { %v9292_v7 = vpop.eup %9291  ;;  %v5514_v5 = vmul.f32 0.70710677, %v5382_v59  ;;  %6065 = vmatmul.mubr.bf16.gmra.mrb[212].mxu1 %v5792_v15  ;;  %v11950_v9 = vmul.f32 0.5, %v5267_v13  ;;  %6162 = vmatmul.mubr.bf16.gmra.mrb[212].mxu0 %v5794_v32  ;;  %v5271_v49 = vadd.f32 %v11784_v6, %v11523_v28  ;;  %v5384_v53 = vadd.f32 %v12711_v36, %v11526_v24  ;;  %v12712_v15 = vld [vmem:[#allocation38_spill] sm:$0xff] }
 0xcc5   :  { %v9294_v33 = vpop.eup %9293  ;;  %9305 = verf.f32 %v5512_v37  ;;  %v11957_v30 = vmul.f32 %v5628_v35, %v11875_v10  ;;  %v11960_v62 = vmul.f32 %v5630_v61, %v11891_v56  ;;  %v11964_v20 = vadd.f32 %v11813_v2, %v11517_v0 }
 0xcc6   :  { %9307 = verf.f32 %v5514_v5  ;;  %v9296_v13 = vpop.eup %9295  ;;  %v11967_v8 = vmul.f32 %v5629_v55, %v11893_v19  ;;  %v5632_v63 = vadd.f32 1.0, %v9290_v48  ;;  %v5634_v6 = vadd.f32 1.0, %v9292_v7 }
 0xcc7   :  { %v5513_v44 = vmul.f32 0.70710677, %v5271_v49  ;;  %v11970_v42 = vmul.f32 %v5631_v47, %v11904_v22  ;;  %v5633_v10 = vadd.f32 1.0, %v9294_v33  ;;  %v11972_v50 = vmul.f32 0.5, %v5380_v17 }
 0xcc8   :  { %v9298_v27 = vpop.eup %9297  ;;  %v5515_v56 = vmul.f32 0.70710677, %v5384_v53  ;;  %v5635_v60 = vadd.f32 1.0, %v9296_v13  ;;  %v5448_v52 = vmul.f32 0.5, %v5269_v3  ;;  %v11976_v2 = vadd.f32 %v11819_v38, %v11520_v39 }
 0xcc9   :  { %9309 = verf.f32 %v5513_v44  ;;  %v5450_v19 = vmul.f32 0.5, %v5382_v59  ;;  %v5516_v11 = vmul.f32 0.70710677, %v11964_v20  ;;  %v11981_v45 = vadd.f32 %v11821_v21, %v11523_v28 }
 0xcca   :  { %9311 = verf.f32 %v5515_v56  ;;  %v9300_v22 = vpop.eup %9299  ;;  %v11984_v17 = vmul.f32 %v5632_v63, %v11914_v4  ;;  %v11987_v35 = vmul.f32 %v5634_v6, %v11916_v40  ;;  %v5636_v54 = vadd.f32 1.0, %v9298_v27 }
 0xccb   :  { %v5518_v3 = vmul.f32 0.70710677, %v11976_v2  ;;  %v5697_v38 = vmul.f32 %v5633_v10, %v11924_v31  ;;  %v5449_v61 = vmul.f32 0.5, %v5271_v49  ;;  %v5451_v46 = vmul.f32 0.5, %v5384_v53  ;;  %v12713_v31 = vld [vmem:[#allocation31_spill] sm:$0xff] }
 0xccc   :  { %v5517_v18 = vmul.f32 0.70710677, %v11981_v45  ;;  %v9302_v59 = vpop.eup %9301  ;;  %v5699_v21 = vmul.f32 %v5635_v60, %v11926_v14  ;;  %v11995_v48 = vadd.f32 %v12712_v15, %v11526_v24  ;;  %v5797_v4 = vpack.c.bf16 %v11939_v41, %v11909_v51 }
 0xccd   :  { %v5799_v40 = vpack.c.bf16 %v5691_v57, %v11912_v25  ;;  %v9304_v55 = vpop.eup %9303  ;;  %v5638_v37 = vadd.f32 1.0, %v9300_v22  ;;  %9313 = verf.f32 %v5516_v11  ;;  %v5279_v32 = vadd.f32 %v12713_v31, %v11517_v0 }
 0xcce   :  { %v12004_v7 = vadd.f32 %v11837_v43, %v11520_v39  ;;  %v12007_v47 = vmul.f32 %v5636_v54, %v11928_v34  ;;  %9315 = verf.f32 %v5518_v3  ;;  %v5519_v5 = vmul.f32 0.70710677, %v11995_v48  ;;  %6072 = vmatprep.mubr.bf16.mxu1 %v5797_v4 }
 0xccf   :  { %v9306_v14 = vpop.eup %9305  ;;  %6169 = vmatprep.mubr.bf16.mxu0 %v5799_v40  ;;  %v5796_v51 = vpack.c.bf16 %v11919_v12, %v11871_v23  ;;  %v5637_v41 = vadd.f32 1.0, %v9302_v59  ;;  %9317 = verf.f32 %v5517_v18  ;;  %v5520_v0 = vmul.f32 0.70710677, %v5279_v32 }
 0xcd0   :  { %v9308_v25 = vpop.eup %9307  ;;  %v5640_v57 = vadd.f32 1.0, %v9306_v14  ;;  %v5639_v33 = vadd.f32 1.0, %v9304_v55  ;;  %9319 = verf.f32 %v5519_v5  ;;  %v5522_v43 = vmul.f32 0.70710677, %v12004_v7 }
 0xcd1   :  { %v5642_v39 = vadd.f32 1.0, %v9308_v25  ;;  %6073 = vmatmul.mubr.bf16.gmra.mrb[216].mxu1 %v5796_v51  ;;  %9321 = verf.f32 %v5520_v0  ;;  %v5798_v49 = vpack.c.bf16 %v11922_v29, %v11896_v1  ;;  %v5281_v36 = vadd.f32 %v11839_v26, %v11523_v28 }
 0xcd2   :  { %v5704_v34 = vmul.f32 %v5640_v57, %v5448_v52  ;;  %9323 = verf.f32 %v5522_v43  ;;  %v5394_v53 = vadd.f32 %v11848_v16, %v11526_v24  ;;  %v5801_v13 = vpack.c.bf16 %v5697_v38, %v11967_v8  ;;  %v8972_v43 = vld [vmem:[#allocation17 + $0xac] ss:$12 sps:$4 sm:$0xff]  }
 0xcd3   :  { %v9310_v23 = vpop.eup %9309  ;;  %v12017_v12 = vmul.f32 %v5642_v39, %v5450_v19  ;;  %v5702_v6 = vmul.f32 %v5638_v37, %v11930_v58  ;;  %6170 = vmatmul.mubr.bf16.gmra.mrb[216].mxu0 %v5798_v49  ;;  %v5521_v27 = vmul.f32 0.70710677, %v5281_v36  ;;  %v5803_v1 = vpack.c.bf16 %v5699_v21, %v11970_v42  ;;  %v8969_v39 = vld [vmem:[#allocation17 + $0x50] ss:$12 sps:$4 sm:$0xff]   ;;  %6416 = vmatprep.subr.bf16.mxu1 %v8972_v43  ;;  %v8974_v49 = vld [vmem:[#allocation17 + $0x80] ss:$12 sps:$4 sm:$0xff]  }
 0xcd4   :  { %v9312_v63 = vpop.eup %9311  ;;  %v5641_v44 = vadd.f32 1.0, %v9310_v23  ;;  %v5701_v29 = vmul.f32 %v5637_v41, %v11950_v9  ;;  %v5523_v26 = vmul.f32 0.70710677, %v5394_v53  ;;  %6080 = vmatprep.mubr.bf16.mxu1 %v5801_v13  ;;  %v5800_v10 = vpack.c.bf16 %v11984_v17, %v11957_v30  ;;  %8670 = vmatprep.subr.bf16.mxu0 %v8969_v39  ;;  %v8976_v23 = vld [vmem:[#allocation17 + $0xb0] ss:$12 sps:$4 sm:$0xff]  }
 0xcd5   :  { %v5643_v28 = vadd.f32 1.0, %v9312_v63  ;;  %v5703_v24 = vmul.f32 %v5639_v33, %v11972_v50  ;;  %9325 = verf.f32 %v5521_v27  ;;  %6177 = vmatprep.mubr.bf16.mxu0 %v5803_v1  ;;  %v5802_v58 = vpack.c.bf16 %v11987_v35, %v11960_v62  ;;  %8671 = vmatpush3.bf16.msra.mxu0 %v8969_v39  ;;  %v12038_v13 = vld [vmem:[#allocation5 + $0x8] sm:$0xff]  ;;  %v12715_v63 = vld [vmem:[#allocation41_spill] sm:$0xff] }
 0xcd6   :  { %v5705_v16 = vmul.f32 %v5641_v44, %v5449_v61  ;;  %9327 = verf.f32 %v5523_v26  ;;  %v5804_v42 = vpack.c.bf16 %v5704_v34, %v12007_v47  ;;  %v5806_v9 = vpack.c.bf16 %v12017_v12, %v5702_v6  ;;  %v8973_v34 = vld [vmem:[#allocation17 + $0x68] ss:$12 sps:$4 sm:$0xff]  }
 0xcd7   :  { %v5707_v8 = vmul.f32 %v5643_v28, %v5451_v46  ;;  %v9314_v56 = vpop.eup %9313  ;;  %v5452_v62 = vmul.f32 0.5, %v11964_v20  ;;  %v5456_v35 = vmul.f32 0.5, %v5279_v32  ;;  %v5454_v38 = vmul.f32 0.5, %v11976_v2  ;;  %8672 = vmatprep.subr.bf16.mxu0 %v8973_v34 }
 0xcd8   :  { %v5805_v60 = vpack.c.bf16 %v5705_v16, %v5701_v29  ;;  %v9316_v52 = vpop.eup %9315  ;;  %v5644_v11 = vadd.f32 1.0, %v9314_v56  ;;  %v5458_v61 = vmul.f32 0.5, %v12004_v7  ;;  %v5453_v31 = vmul.f32 0.5, %v11981_v45 }
 0xcd9   :  { %6081 = vmatmul.mubr.bf16.gmra.mrb[220].mxu1 %v5800_v10  ;;  %v5807_v19 = vpack.c.bf16 %v5707_v8, %v5703_v24  ;;  %v9318_v30 = vpop.eup %9317  ;;  %v5646_v17 = vadd.f32 1.0, %v9316_v52  ;;  %v5457_v14 = vmul.f32 0.5, %v5281_v36  ;;  %v5455_v47 = vmul.f32 0.5, %v11995_v48  ;;  %v8970_v48 = vld [vmem:[#allocation17 + $0xa8] ss:$12 sps:$4 sm:$0xff]   ;;  %8673 = vmatpush3.bf16.msra.mxu0 %v8973_v34 }
 0xcda   :  { %6088 = vmatprep.mubr.bf16.mxu1 %v5805_v60  ;;  %v9320_v50 = vpop.eup %9319  ;;  %v5708_v18 = vmul.f32 %v5644_v11, %v5452_v62  ;;  %v5645_v59 = vadd.f32 1.0, %v9318_v30  ;;  %v5459_v2 = vmul.f32 0.5, %v5394_v53  ;;  %v12714_v45 = vmov 0   ;;  %6417 = vmatpush1.bf16.msra.mxu1 %v8970_v48  ;;  %v8975_v36 = vld [vmem:[#allocation17 + $0x98] ss:$12 sps:$4 sm:$0xff]  }
 0xcdb   :  { %v9322_v22 = vpop.eup %9321  ;;  %6178 = vmatmul.mubr.bf16.gmra.mrb[220].mxu0 %v5802_v58  ;;  %v5710_v4 = vmul.f32 %v5646_v17, %v5454_v38  ;;  %v5647_v40 = vadd.f32 1.0, %v9320_v50  ;;  %8674 = vmatprep.subr.bf16.mxu0 %v8974_v49  ;;  %v12042_v6 = vrot.slane %v12038_v13, %v12715_v63 }
 0xcdc   :  { %v9324_v54 = vpop.eup %9323  ;;  %v5648_v3 = vadd.f32 1.0, %v9322_v22  ;;  %6185 = vmatprep.mubr.bf16.mxu0 %v5807_v19  ;;  %v5709_v51 = vmul.f32 %v5645_v59, %v5453_v31 }
 0xcdd   :  { %v5650_v46 = vadd.f32 1.0, %v9324_v54  ;;  %v5711_v41 = vmul.f32 %v5647_v40, %v5455_v47  ;;  %8675 = vmatpush3.bf16.msra.mxu0 %v8974_v49 }
 0xcde   :  { %v5712_v21 = vmul.f32 %v5648_v3, %v5456_v35  ;;  %8676 = vmatprep.subr.bf16.mxu0 %v8975_v36 }
 0xcdf   :  { %v9326_v15 = vpop.eup %9325  ;;  %v5714_v55 = vmul.f32 %v5650_v46, %v5458_v61 }
 0xce0   :  { %v9328_v37 = vpop.eup %9327  ;;  %v5649_v20 = vadd.f32 1.0, %v9326_v15  ;;  %v5808_v32 = vpack.c.bf16 %v5712_v21, %v5708_v18 }
 0xce1   :  { %6089 = vmatmul.mubr.bf16.gmra.mrb[224].mxu1 %v5804_v42  ;;  %v5651_v5 = vadd.f32 1.0, %v9328_v37  ;;  %v5810_v7 = vpack.c.bf16 %v5714_v55, %v5710_v4  ;;  %8677 = vmatpush3.bf16.msra.mxu0 %v8975_v36 }
 0xce2   :  { %v5713_v25 = vmul.f32 %v5649_v20, %v5457_v14  ;;  %8678 = vmatprep.subr.bf16.mxu0 %v8976_v23 }
 0xce3   :  { %v5715_v57 = vmul.f32 %v5651_v5, %v5459_v2  ;;  %6186 = vmatmul.mubr.bf16.gmra.mrb[224].mxu0 %v5806_v9 }
 0xce4   :  { %v5809_v0 = vpack.c.bf16 %v5713_v25, %v5709_v51 }
 0xce5   :  { %v5811_v33 = vpack.c.bf16 %v5715_v57, %v5711_v41  ;;  %8679 = vmatpush3.bf16.msra.mxu0 %v8976_v23 }
 0xce6   :  { %6096 = vmatprep.mubr.bf16.mxu1 %v5809_v0 }
 0xce7   :  { %6193 = vmatprep.mubr.bf16.mxu0 %v5811_v33 }
 0xce9   :  { %6097 = vmatmul.mubr.bf16.gmra.mrb[228].mxu1 %v5808_v32 }
 0xcea   :  { %6434 = vmatprep.mubr.bf16.mxu1 %v12714_v45 }
 0xceb   :  { %6194 = vmatmul.mubr.bf16.gmra.mrb[228].mxu0 %v5810_v7 }
 0xd6e   :  { %v8056_v12 = vpop.f32.mrb[200].mxu1 }
 0xd6f   :  { %v8120_v53 = vpop.f32.mrb[200].mxu0  ;;  %v8057_v44 = vpop.f32.mrb[201].mxu1 }
 0xd70   :  { %v8121_v27 = vpop.f32.mrb[201].mxu0  ;;  %v8058_v1 = vadd.f32 %v8057_v44, %v8056_v12  ;;  %v8059_v28 = vpop.f32.mrb[202].mxu1 }
 0xd71   :  { %v8122_v29 = vadd.f32 %v8121_v27, %v8120_v53  ;;  %v8123_v26 = vpop.f32.mrb[202].mxu0  ;;  %v8060_v10 = vpop.f32.mrb[203].mxu1 }
 0xd72   :  { %v8124_v24 = vpop.f32.mrb[203].mxu0  ;;  %v6043_v16 = vadd.f32 %v8058_v1, %v12042_v6  ;;  %v8061_v58 = vadd.f32 %v8060_v10, %v8059_v28 }
 0xd73   :  { %v8125_v8 = vadd.f32 %v8124_v24, %v8123_v26 }
 0xd74   :  { %v12045_v42 = vadd.f32 %v8122_v29, %v6043_v16  ;;  %v6046_v9 = vadd.f32 %v8061_v58, %v12042_v6 }
 0xd76   :  { %12716 = vst [vmem:[#allocation32_spill] sm:$0xff] %v12045_v42  ;;  %v12048_v56 = vadd.f32 %v8125_v8, %v6046_v9 }
 0xd78   :  { %v6266_v60 = vpack.c.bf16 %v12048_v56, %v12045_v42 }
 0xd7a   :  { %6435 = vmatmul.mubr.bf16.vlgmr.msra.gmra.mrb[232].mxu1 %v6266_v60  ;;  %8680 = vmatprep.mubr.bf16.mxu0 %v6266_v60 }
 0xd7b   :  { %6444 = vmatprep.mubr.bf16.mxu1 %v12714_v45 }
 0xd7d   :  { %v8062_v52 = vpop.f32.mrb[204].mxu1 }
 0xd7e   :  { %v8126_v19 = vpop.f32.mrb[204].mxu0  ;;  %v8063_v30 = vpop.f32.mrb[205].mxu1 }
 0xd7f   :  { %v8127_v50 = vpop.f32.mrb[205].mxu0  ;;  %v8064_v11 = vadd.f32 %v8063_v30, %v8062_v52  ;;  %v8065_v17 = vpop.f32.mrb[206].mxu1 }
 0xd80   :  { %v8128_v22 = vadd.f32 %v8127_v50, %v8126_v19  ;;  %v8129_v54 = vpop.f32.mrb[206].mxu0  ;;  %v8066_v62 = vpop.f32.mrb[207].mxu1 }
 0xd81   :  { %v8130_v35 = vpop.f32.mrb[207].mxu0  ;;  %v6051_v3 = vadd.f32 %v8064_v11, %v12042_v6  ;;  %v8067_v38 = vadd.f32 %v8066_v62, %v8065_v17 }
 0xd82   :  { %v8131_v61 = vadd.f32 %v8130_v35, %v8129_v54 }
 0xd83   :  { %v12054_v46 = vadd.f32 %v8128_v22, %v6051_v3  ;;  %v6054_v18 = vadd.f32 %v8067_v38, %v12042_v6 }
 0xd85   :  { %v12057_v59 = vadd.f32 %v8131_v61, %v6054_v18 }
 0xd87   :  { %v6267_v21 = vpack.c.bf16 %v12057_v59, %v12054_v46 }
 0xd89   :  { %6445 = vmatmul.mubr.bf16.gmra.mrb[236].mxu1 %v6267_v21  ;;  %8681 = vmatmul.mubr.bf16.vlgmr.msra.gmra.mrb[232].mxu0 %v6267_v21 }
 0xd8a   :  { %v8068_v15 = vpop.f32.mrb[208].mxu1  ;;  %v8132_v4 = vpop.f32.mrb[208].mxu0  ;;  %6454 = vmatprep.mubr.bf16.mxu1 %v12714_v45 }
 0xd8b   :  { %v8069_v40 = vpop.f32.mrb[209].mxu1  ;;  %v8133_v55 = vpop.f32.mrb[209].mxu0 }
 0xd8c   :  { %v8070_v37 = vadd.f32 %v8069_v40, %v8068_v15  ;;  %v8134_v31 = vadd.f32 %v8133_v55, %v8132_v4  ;;  %v8071_v14 = vpop.f32.mrb[210].mxu1  ;;  %v8135_v20 = vpop.f32.mrb[210].mxu0 }
 0xd8d   :  { %v8072_v32 = vpop.f32.mrb[211].mxu1  ;;  %v8136_v47 = vpop.f32.mrb[211].mxu0 }
 0xd8e   :  { %v6059_v2 = vadd.f32 %v8070_v37, %v12042_v6  ;;  %v8073_v5 = vadd.f32 %v8072_v32, %v8071_v14  ;;  %v8137_v7 = vadd.f32 %v8136_v47, %v8135_v20 }
 0xd90   :  { %v12063_v51 = vadd.f32 %v8134_v31, %v6059_v2  ;;  %v6062_v25 = vadd.f32 %v8073_v5, %v12042_v6 }
 0xd92   :  { %v12066_v41 = vadd.f32 %v8137_v7, %v6062_v25 }
 0xd94   :  { %v6268_v57 = vpack.c.bf16 %v12066_v41, %v12063_v51 }
 0xd96   :  { %6455 = vmatmul.mubr.bf16.gmra.mrb[240].mxu1 %v6268_v57  ;;  %8684 = vmatprep.mubr.bf16.mxu0 %v6268_v57 }
 0xd97   :  { %v8074_v0 = vpop.f32.mrb[212].mxu1  ;;  %v8138_v33 = vpop.f32.mrb[212].mxu0  ;;  %6464 = vmatprep.mubr.bf16.mxu1 %v12714_v45 }
 0xd98   :  { %v8075_v39 = vpop.f32.mrb[213].mxu1  ;;  %v8139_v43 = vpop.f32.mrb[213].mxu0 }
 0xd99   :  { %v8076_v48 = vadd.f32 %v8075_v39, %v8074_v0  ;;  %v8077_v34 = vpop.f32.mrb[214].mxu1  ;;  %v8140_v49 = vadd.f32 %v8139_v43, %v8138_v33  ;;  %v8141_v36 = vpop.f32.mrb[214].mxu0 }
 0xd9a   :  { %v8078_v23 = vpop.f32.mrb[215].mxu1  ;;  %v8142_v63 = vpop.f32.mrb[215].mxu0 }
 0xd9b   :  { %v6067_v12 = vadd.f32 %v8076_v48, %v12042_v6  ;;  %v8079_v53 = vadd.f32 %v8078_v23, %v8077_v34  ;;  %v8143_v44 = vadd.f32 %v8142_v63, %v8141_v36 }
 0xd9d   :  { %v12072_v27 = vadd.f32 %v8140_v49, %v6067_v12  ;;  %v6070_v1 = vadd.f32 %v8079_v53, %v12042_v6 }
 0xd9f   :  { %v12075_v29 = vadd.f32 %v8143_v44, %v6070_v1 }
 0xda1   :  { %v6269_v28 = vpack.c.bf16 %v12075_v29, %v12072_v27 }
 0xda3   :  { %6465 = vmatmul.mubr.bf16.gmra.mrb[244].mxu1 %v6269_v28  ;;  %8685 = vmatmul.mubr.bf16.gmra.mrb[236].mxu0 %v6269_v28 }
 0xda4   :  { %v8080_v26 = vpop.f32.mrb[216].mxu1  ;;  %6474 = vmatprep.mubr.bf16.mxu1 %v12714_v45 }
 0xda5   :  { %v8081_v10 = vpop.f32.mrb[217].mxu1 }
 0xda6   :  { %v8082_v24 = vadd.f32 %v8081_v10, %v8080_v26  ;;  %v8083_v16 = vpop.f32.mrb[218].mxu1  ;;  %v8144_v58 = vpop.f32.mrb[216].mxu0 }
 0xda7   :  { %v8084_v8 = vpop.f32.mrb[219].mxu1  ;;  %v8145_v60 = vpop.f32.mrb[217].mxu0 }
 0xda8   :  { %v6075_v9 = vadd.f32 %v8082_v24, %v12042_v6  ;;  %v8085_v52 = vadd.f32 %v8084_v8, %v8083_v16  ;;  %v8146_v19 = vadd.f32 %v8145_v60, %v8144_v58  ;;  %v8147_v30 = vpop.f32.mrb[218].mxu0 }
 0xda9   :  { %v8148_v11 = vpop.f32.mrb[219].mxu0 }
 0xdaa   :  { %v6078_v50 = vadd.f32 %v8085_v52, %v12042_v6  ;;  %v12082_v22 = vadd.f32 %v8146_v19, %v6075_v9  ;;  %v8149_v17 = vadd.f32 %v8148_v11, %v8147_v30 }
 0xdac   :  { %v8086_v54 = vpop.f32.mrb[220].mxu1  ;;  %v12084_v62 = vadd.f32 %v8149_v17, %v6078_v50 }
 0xdad   :  { %v8087_v35 = vpop.f32.mrb[221].mxu1 }
 0xdae   :  { %v8088_v3 = vadd.f32 %v8087_v35, %v8086_v54  ;;  %v8089_v38 = vpop.f32.mrb[222].mxu1  ;;  %v8150_v61 = vpop.f32.mrb[220].mxu0  ;;  %v6270_v21 = vpack.c.bf16 %v12084_v62, %v12082_v22  ;;  %v8979_v35 = vld [vmem:[#allocation19 + $0x4] ss:$12 sps:$4 sm:$0xff]  }
 0xdaf   :  { %v8090_v18 = vpop.f32.mrb[223].mxu1  ;;  %v8151_v4 = vpop.f32.mrb[221].mxu0  ;;  %7018 = vmatprep.subr.bf16.mxu0 %v8979_v35 }
 0xdb0   :  { %v6083_v15 = vadd.f32 %v8088_v3, %v12042_v6  ;;  %v8091_v40 = vadd.f32 %v8090_v18, %v8089_v38  ;;  %v8152_v55 = vadd.f32 %v8151_v4, %v8150_v61  ;;  %v8153_v37 = vpop.f32.mrb[222].mxu0  ;;  %6475 = vmatmul.mubr.bf16.gmra.mrb[248].mxu1 %v6270_v21  ;;  %8688 = vmatprep.mubr.bf16.mxu0 %v6270_v21  ;;  %v8977_v3 = vld [vmem:[#allocation19] ss:$12 sps:$4 sm:$0xff]   ;;  %v8980_v38 = vld [vmem:[#allocation19 + $0x8] ss:$12 sps:$4 sm:$0xff]  }
 0xdb1   :  { %v8154_v14 = vpop.f32.mrb[223].mxu0  ;;  %6484 = vmatprep.mubr.bf16.mxu1 %v12714_v45  ;;  %7019 = vmatpush1.bf16.msra.mxu0 %v8977_v3  ;;  %v8981_v61 = vld [vmem:[#allocation19 + $0x18] ss:$12 sps:$4 sm:$0xff]   ;;  %v8984_v18 = vld [vmem:[#allocation19 + $0x20] ss:$12 sps:$4 sm:$0xff]  }
 0xdb2   :  { %v6086_v31 = vadd.f32 %v8091_v40, %v12042_v6  ;;  %v12091_v20 = vadd.f32 %v8152_v55, %v6083_v15  ;;  %v8155_v32 = vadd.f32 %v8154_v14, %v8153_v37  ;;  %8696 = vmatprep.subr.bf16.mxu1 %v8980_v38  ;;  %v8987_v21 = vld [vmem:[#allocation19 + $0x34] ss:$12 sps:$4 sm:$0xff]   ;;  %v8985_v15 = vld [vmem:[#allocation19 + $0x30] ss:$12 sps:$4 sm:$0xff]   ;;  %v8988_v4 = vld [vmem:[#allocation19 + $0x38] ss:$12 sps:$4 sm:$0xff]  }
 0xdb3   :  { %8697 = vmatpush3.bf16.msra.mxu1 %v8980_v38  ;;  %v8991_v40 = vld [vmem:[#allocation19 + $0x4c] ss:$12 sps:$4 sm:$0xff]   ;;  %v8989_v55 = vld [vmem:[#allocation19 + $0x48] ss:$12 sps:$4 sm:$0xff]   ;;  %v8992_v37 = vld [vmem:[#allocation19 + $0x50] ss:$12 sps:$4 sm:$0xff]  }
 0xdb4   :  { %v8092_v47 = vpop.f32.mrb[224].mxu1  ;;  %v12093_v2 = vadd.f32 %v8155_v32, %v6086_v31  ;;  %8698 = vmatprep.subr.bf16.mxu1 %v8984_v18  ;;  %v8995_v31 = vld [vmem:[#allocation19 + $0x64] ss:$12 sps:$4 sm:$0xff]   ;;  %v8993_v14 = vld [vmem:[#allocation19 + $0x60] ss:$12 sps:$4 sm:$0xff]  }
 0xdb5   :  { %v8093_v5 = vpop.f32.mrb[225].mxu1  ;;  %v8996_v32 = vld [vmem:[#allocation19 + $0x68] ss:$12 sps:$4 sm:$0xff]  }
 0xdb6   :  { %v8094_v7 = vadd.f32 %v8093_v5, %v8092_v47  ;;  %v8095_v25 = vpop.f32.mrb[226].mxu1  ;;  %v8156_v57 = vpop.f32.mrb[224].mxu0  ;;  %v6271_v33 = vpack.c.bf16 %v12093_v2, %v12091_v20  ;;  %v8999_v47 = vld [vmem:[#allocation19 + $0x7c] ss:$12 sps:$4 sm:$0xff]   ;;  %v8997_v5 = vld [vmem:[#allocation19 + $0x78] ss:$12 sps:$4 sm:$0xff]  }
 0xdb7   :  { %v8096_v0 = vpop.f32.mrb[227].mxu1  ;;  %v8157_v48 = vpop.f32.mrb[225].mxu0  ;;  %8699 = vmatpush3.bf16.msra.mxu1 %v8984_v18 }
 0xdb8   :  { %v6091_v39 = vadd.f32 %v8094_v7, %v12042_v6  ;;  %v8097_v43 = vadd.f32 %v8096_v0, %v8095_v25  ;;  %v8158_v34 = vadd.f32 %v8157_v48, %v8156_v57  ;;  %v8159_v49 = vpop.f32.mrb[226].mxu0  ;;  %6485 = vmatmul.mubr.bf16.gmra.mrb[252].mxu1 %v6271_v33  ;;  %8689 = vmatmul.mubr.bf16.gmra.mrb[240].mxu0 %v6271_v33  ;;  %v9000_v7 = vld [vmem:[#allocation19 + $0x80] ss:$12 sps:$4 sm:$0xff]   ;;  %v9001_v57 = vld [vmem:[#allocation19 + $0x90] ss:$12 sps:$4 sm:$0xff]  }
 0xdb9   :  { %v8160_v23 = vpop.f32.mrb[227].mxu0  ;;  %6494 = vmatprep.mubr.bf16.mxu1 %v12714_v45  ;;  %8700 = vmatprep.subr.bf16.mxu1 %v8988_v4  ;;  %v9003_v25 = vld [vmem:[#allocation19 + $0x94] ss:$12 sps:$4 sm:$0xff]   ;;  %v9004_v0 = vld [vmem:[#allocation19 + $0x98] ss:$12 sps:$4 sm:$0xff]  }
 0xdba   :  { %v6094_v36 = vadd.f32 %v8097_v43, %v12042_v6  ;;  %v12100_v12 = vadd.f32 %v8158_v34, %v6091_v39  ;;  %v8161_v53 = vadd.f32 %v8160_v23, %v8159_v49  ;;  %v9005_v33 = vld [vmem:[#allocation19 + $0xa8] ss:$12 sps:$4 sm:$0xff]   ;;  %v9007_v39 = vld [vmem:[#allocation19 + $0xac] ss:$12 sps:$4 sm:$0xff]   ;;  %v9008_v48 = vld [vmem:[#allocation19 + $0xb0] ss:$12 sps:$4 sm:$0xff]  }
 0xdbb   :  { %8701 = vmatpush3.bf16.msra.mxu1 %v8988_v4 }
 0xdbc   :  { %12717 = vst [vmem:[#allocation33_spill] sm:$0xff] %v12100_v12  ;;  %v8098_v63 = vpop.f32.mrb[228].mxu1  ;;  %v12102_v44 = vadd.f32 %v8161_v53, %v6094_v36  ;;  %8702 = vmatprep.subr.bf16.mxu1 %v8992_v37 }
 0xdbd   :  { %v8099_v1 = vpop.f32.mrb[229].mxu1 }
 0xdbe   :  { %12718 = vst [vmem:[#allocation34_spill] sm:$0xff] %v12102_v44  ;;  %v8100_v28 = vadd.f32 %v8099_v1, %v8098_v63  ;;  %v8101_v26 = vpop.f32.mrb[230].mxu1  ;;  %v6272_v10 = vpack.c.bf16 %v12102_v44, %v12100_v12  ;;  %v8162_v24 = vpop.f32.mrb[228].mxu0 }
 0xdbf   :  { %v8102_v16 = vpop.f32.mrb[231].mxu1  ;;  %v8163_v8 = vpop.f32.mrb[229].mxu0  ;;  %8703 = vmatpush3.bf16.msra.mxu1 %v8992_v37 }
 0xdc0   :  { %v6099_v58 = vadd.f32 %v8100_v28, %v12042_v6  ;;  %v8103_v9 = vadd.f32 %v8102_v16, %v8101_v26  ;;  %v8164_v60 = vadd.f32 %v8163_v8, %v8162_v24  ;;  %v8165_v52 = vpop.f32.mrb[230].mxu0  ;;  %6495 = vmatmul.mubr.bf16.gmra.mrb[0].mxu1 %v6272_v10  ;;  %8692 = vmatprep.mubr.bf16.mxu0 %v6272_v10 }
 0xdc1   :  { %v8166_v30 = vpop.f32.mrb[231].mxu0  ;;  %6504 = vmatprep.mubr.bf16.mxu1 %v12714_v45  ;;  %8704 = vmatprep.subr.bf16.mxu1 %v8996_v32 }
 0xdc2   :  { %v6102_v19 = vadd.f32 %v8103_v9, %v12042_v6  ;;  %v12109_v50 = vadd.f32 %v8164_v60, %v6099_v58  ;;  %v8167_v11 = vadd.f32 %v8166_v30, %v8165_v52  ;;  %v8983_v6 = vld [vmem:[#allocation19 + $0x1c] ss:$12 sps:$4 sm:$0xff]  }
 0xdc3   :  { %7020 = vmatprep.subr.bf16.mxu0 %v8983_v6  ;;  %8705 = vmatpush3.bf16.msra.mxu1 %v8996_v32 }
 0xdc4   :  { %12719 = vst [vmem:[#allocation35_spill] sm:$0xff] %v12109_v50  ;;  %v12111_v17 = vadd.f32 %v8167_v11, %v6102_v19  ;;  %7021 = vmatpush1.bf16.msra.mxu0 %v8981_v61  ;;  %8706 = vmatprep.subr.bf16.mxu1 %v9000_v7 }
 0xdc5   :  { %7022 = vmatprep.subr.bf16.mxu0 %v8987_v21 }
 0xdc6   :  { %12720 = vst [vmem:[#allocation36_spill] sm:$0xff] %v12111_v17  ;;  %v6273_v54 = vpack.c.bf16 %v12111_v17, %v12109_v50 }
 0xdc7   :  { %8707 = vmatpush3.bf16.msra.mxu1 %v9000_v7 }
 0xdc8   :  { %6505 = vmatmul.mubr.bf16.gmra.mrb[4].mxu1 %v6273_v54  ;;  %8693 = vmatmul.mubr.bf16.gmra.mrb[244].mxu0 %v6273_v54 }
 0xdc9   :  { %7050 = vmatprep.mubr.bf16.mxu0 %v12714_v45  ;;  %7023 = vmatpush1.bf16.msra.mxu0 %v8985_v15 }
 0xdca   :  { %7024 = vmatprep.subr.bf16.mxu0 %v8991_v40  ;;  %8708 = vmatprep.subr.bf16.mxu1 %v9004_v0 }
 0xdcb   :  { %8709 = vmatpush3.bf16.msra.mxu1 %v9004_v0  ;;  %v12731_v0 = vld [vmem:[#allocation42_spill] sm:$0xff] }
 0xdcc   :  { %8710 = vmatprep.subr.bf16.mxu1 %v9008_v48 }
 0xdcd   :  { %7025 = vmatpush1.bf16.msra.mxu0 %v8989_v55  ;;  %v12728_v55 = vld [vmem:[#allocation39_spill] sm:$0xff] }
 0xdce   :  { %7026 = vmatprep.subr.bf16.mxu0 %v8995_v31 }
 0xdcf   :  { %8711 = vmatpush3.bf16.msra.mxu1 %v9008_v48 }
 0xdd1   :  { %7027 = vmatpush1.bf16.msra.mxu0 %v8993_v14 }
 0xdd2   :  { %7028 = vmatprep.subr.bf16.mxu0 %v8999_v47 }
 0xdd5   :  { %7029 = vmatpush1.bf16.msra.mxu0 %v8997_v5 }
 0xdd6   :  { %7030 = vmatprep.subr.bf16.mxu0 %v9003_v25 }
 0xdd9   :  { %7031 = vmatpush1.bf16.msra.mxu0 %v9001_v57 }
 0xdda   :  { %7032 = vmatprep.subr.bf16.mxu0 %v9007_v39 }
 0xddd   :  { %7033 = vmatpush1.bf16.msra.mxu0 %v9005_v33 }
 0xe4d   :  { %v12116_v43 = vpop.f32.mrb[232].mxu1 }
 0xe4e   :  { %v12118_v34 = vpop.f32.mrb[233].mxu1  ;;  %v12593_v36 = vrot.slane %v12116_v43, 7 }
 0xe4f   :  { %v6440_v49 = vpop.f32.mrb[234].mxu1 }
 0xe50   :  { %v6631_v23 = vrot.slane %v6440_v49, 7  ;;  %v6442_v53 = vpop.f32.mrb[235].mxu1 }
 0xe52   :  { %v6632_v63 = vsel %vm12721_vm4, %v12593_v36, %v6631_v23  ;;  %vm12727_vm4 = vmmov %vm12724_vm1 }
 0xe53   :  { %v6775_v1 = vadd.f32 %v6632_v63, %v6442_v53 }
 0xe5c   :  { %v6446_v28 = vpop.f32.mrb[236].mxu1  ;;  %v8682_v26 = vpop.f32.mrb[232].mxu0 }
 0xe5d   :  { %v6633_v10 = vrot.slane %v6446_v28, 7  ;;  %v6448_v24 = vpop.f32.mrb[237].mxu1  ;;  %v12124_v16 = vpop.f32.mrb[233].mxu0  ;;  %v6712_v9 = vrot.slane %v8682_v26, 1 }
 0xe5e   :  { %v6450_v58 = vpop.f32.mrb[238].mxu1  ;;  %v8683_v8 = vpop.f32.mrb[234].mxu0  ;;  %v12592_v3 = vrot.slane %v12124_v16, 1 }
 0xe5f   :  { %v6634_v60 = vsel %vm12722_vm2, %v6631_v23, %v6633_v10  ;;  %v6635_v52 = vrot.slane %v6450_v58, 7  ;;  %v6714_v19 = vrot.slane %v8683_v8, 1  ;;  %v6452_v30 = vpop.f32.mrb[239].mxu1  ;;  %v6552_v11 = vpop.f32.mrb[235].mxu0  ;;  %vm12729_vm2 = vnez %v12728_v55  ;;  %v12733_v23 = vld [vmem:[#allocation28_spill] sm:$0xff] }
 0xe60   :  { %v6679_v35 = vsel %vm10723_vm5, 0.0, %v6634_v60  ;;  %v6710_v38 = vrot.slane %v6552_v11, 1  ;;  %v12734_v53 = vsub.s32 4, %v12733_v23  ;;  %v12735_v28 = vsub.s32 5, %v12733_v23 }
 0xe61   :  { %v6776_v6 = vadd.f32 %v6679_v35, %v6448_v24  ;;  %v6715_v61 = vsel %vm12724_vm1, %v6712_v9, %v6714_v19  ;;  %v6636_v18 = vsel %vm12725_vm3, %v6633_v10, %v6635_v52  ;;  %vm12730_vm1 = vmmov %vm12725_vm3  ;;  %v12736_v60 = vsub.s32 6, %v12733_v23 }
 0xe62   :  { %v6777_v21 = vadd.f32 %v6636_v18, %v6452_v30  ;;  %v12135_v15 = vsel %vm12726_vm15, %v12592_v3, %v6710_v38  ;;  %v6713_v4 = vsel %vm12727_vm4, %v6710_v38, %v6712_v9  ;;  %vm12732_vm3 = vmmov %vm12730_vm1  ;;  %v12149_v63 = vrot.slane %v12038_v13, %v12734_v53 }
 0xe63   :  { %v6792_v40 = vadd.f32 %v6776_v6, %v6715_v61  ;;  %v6759_v37 = vsel %vm12729_vm2, 0.0, %v6713_v4  ;;  %v12155_v26 = vrot.slane %v12038_v13, %v12735_v28  ;;  %vm12737_vm15 = vmmov %vm12730_vm1 }
 0xe64   :  { %v12140_v31 = vadd.f32 %v6775_v1, %v6759_v37 }
 0xe65   :  { %v6812_v1 = vadd.f32 %v12149_v63, %v6792_v40 }
 0xe67   :  { %v6832_v37 = vmul.f32 %v12155_v26, %v6812_v1 }
 0xe69   :  { %v6456_v14 = vpop.f32.mrb[240].mxu1 }
 0xe6a   :  { %v6637_v32 = vrot.slane %v6456_v14, 7  ;;  %v6458_v47 = vpop.f32.mrb[241].mxu1 }
 0xe6b   :  { %v6460_v5 = vpop.f32.mrb[242].mxu1 }
 0xe6c   :  { %v6638_v7 = vsel %vm12730_vm1, %v6635_v52, %v6637_v32  ;;  %v6639_v25 = vrot.slane %v6460_v5, 7  ;;  %v6462_v57 = vpop.f32.mrb[243].mxu1  ;;  %v12160_v52 = vrot.slane %v12038_v13, %v12736_v60  ;;  %vm12740_vm1 = vmmov %vm12727_vm4 }
 0xe6d   :  { %v6681_v33 = vsel %vm10743_vm6, 0.0, %v6638_v7  ;;  %vm12742_vm6 = vmmov %vm12740_vm1 }
 0xe6e   :  { %v6778_v39 = vadd.f32 %v6681_v33, %v6458_v47  ;;  %v6640_v48 = vsel %vm12732_vm3, %v6637_v32, %v6639_v25 }
 0xe6f   :  { %v6779_v49 = vadd.f32 %v6640_v48, %v6462_v57 }
 0xe76   :  { %v6466_v10 = vpop.f32.mrb[244].mxu1  ;;  %v8686_v24 = vpop.f32.mrb[236].mxu0 }
 0xe77   :  { %v6641_v58 = vrot.slane %v6466_v10, 7  ;;  %v6468_v8 = vpop.f32.mrb[245].mxu1  ;;  %v6565_v9 = vpop.f32.mrb[237].mxu0  ;;  %v6720_v38 = vrot.slane %v8686_v24, 1 }
 0xe78   :  { %v6716_v30 = vrot.slane %v6565_v9, 1  ;;  %v6470_v11 = vpop.f32.mrb[246].mxu1  ;;  %v12162_v35 = vpop.f32.mrb[238].mxu0 }
 0xe79   :  { %v6642_v6 = vsel %vm12737_vm15, %v6639_v25, %v6641_v58  ;;  %v6643_v61 = vrot.slane %v6470_v11, 7  ;;  %v6722_v18 = vrot.slane %v12162_v35, 1  ;;  %v6472_v4 = vpop.f32.mrb[247].mxu1  ;;  %v6568_v40 = vpop.f32.mrb[239].mxu0  ;;  %vm12741_vm15 = vmmov %vm12740_vm1 }
 0xe7a   :  { %v6683_v32 = vsel %vm10788_vm9, 0.0, %v6642_v6  ;;  %v6717_v47 = vsel %vm12727_vm4, %v6714_v19, %v6716_v30  ;;  %v6718_v5 = vrot.slane %v6568_v40, 1  ;;  %v6852_v40 = vadd.f32 %v12160_v52, %v6832_v37  ;;  %vm12746_vm4 = vmmov %vm12732_vm3 }
 0xe7b   :  { %v6780_v7 = vadd.f32 %v6683_v32, %v6468_v8  ;;  %v6761_v33 = vsel %vm10749_vm7, 0.0, %v6717_v47  ;;  %v6723_v25 = vsel %vm12740_vm1, %v6720_v38, %v6722_v18  ;;  %v6644_v48 = vsel %vm12732_vm3, %v6641_v58, %v6643_v61  ;;  %vm12747_vm1 = vmmov %vm12732_vm3 }
 0xe7c   :  { %v6793_v53 = vadd.f32 %v6777_v21, %v6761_v33  ;;  %v6781_v28 = vadd.f32 %v6644_v48, %v6472_v4  ;;  %v6719_v1 = vsel %vm12741_vm15, %v6716_v30, %v6718_v5  ;;  %v6721_v10 = vsel %vm12742_vm6, %v6718_v5, %v6720_v38  ;;  %vm12744_vm6 = vmmov %vm12732_vm3 }
 0xe7d   :  { %v6796_v24 = vadd.f32 %v6780_v7, %v6723_v25  ;;  %v6763_v19 = vsel %vm10753_vm8, 0.0, %v6721_v10  ;;  %v6794_v8 = vadd.f32 %v6778_v39, %v6719_v1  ;;  %v6868_v39 = vmax.f32 %v6852_v40, 0.0  ;;  %vm12749_vm3 = vmmov %vm12741_vm15 }
 0xe7e   :  { %v6813_v60 = vadd.f32 %v12149_v63, %v6793_v53  ;;  %v6795_v11 = vadd.f32 %v6779_v49, %v6763_v19  ;;  %vm12751_vm15 = vmmov %vm12749_vm3 }
 0xe7f   :  { %v6814_v6 = vadd.f32 %v12149_v63, %v6794_v8 }
 0xe80   :  { %v6833_v58 = vmul.f32 %v12155_v26, %v6813_v60  ;;  %v6815_v21 = vadd.f32 %v12149_v63, %v6795_v11 }
 0xe81   :  { %v6834_v30 = vmul.f32 %v12155_v26, %v6814_v6 }
 0xe82   :  { %v6853_v38 = vadd.f32 %v12160_v52, %v6833_v58  ;;  %v6835_v4 = vmul.f32 %v12155_v26, %v6815_v21  ;;  %v6816_v21 = vadd.f32 %v12149_v63, %v6796_v24 }
 0xe83   :  { %v6854_v32 = vadd.f32 %v12160_v52, %v6834_v30  ;;  %v6476_v5 = vpop.f32.mrb[248].mxu1 }
 0xe84   :  { %v6869_v47 = vmax.f32 %v6853_v38, 0.0  ;;  %v6855_v49 = vadd.f32 %v12160_v52, %v6835_v4  ;;  %v6645_v7 = vrot.slane %v6476_v5, 7  ;;  %v6478_v33 = vpop.f32.mrb[249].mxu1 }
 0xe85   :  { %v6870_v37 = vmax.f32 %v6854_v32, 0.0  ;;  %v6480_v48 = vpop.f32.mrb[250].mxu1 }
 0xe86   :  { %v12190_v25 = vpack.c.bf16 %v6869_v47, %v6868_v39  ;;  %v6871_v53 = vmax.f32 %v6855_v49, 0.0  ;;  %v6646_v1 = vsel %vm12744_vm6, %v6643_v61, %v6645_v7  ;;  %v6647_v10 = vrot.slane %v6480_v48, 7  ;;  %v6482_v19 = vpop.f32.mrb[251].mxu1  ;;  %vm12752_vm6 = vmmov %vm12747_vm1 }
 0xe87   :  { %v6685_v60 = vsel %vm10820_vm10, 0.0, %v6646_v1  ;;  %v6836_v1 = vmul.f32 %v12155_v26, %v6816_v21 }
 0xe88   :  { %v12195_v11 = vpack.c.bf16 %v6871_v53, %v6870_v37  ;;  %v6782_v6 = vadd.f32 %v6685_v60, %v6478_v33  ;;  %v6648_v40 = vsel %vm12746_vm4, %v6645_v7, %v6647_v10  ;;  %vm12753_vm4 = vmmov %vm12749_vm3 }
 0xe89   :  { %v6783_v58 = vadd.f32 %v6648_v40, %v6482_v19 }
 0xe8b   :  { %v6486_v30 = vpop.f32.mrb[252].mxu1  ;;  %v8690_v38 = vpop.f32.mrb[240].mxu0 }
 0xe8c   :  { %v6649_v4 = vrot.slane %v6486_v30, 7  ;;  %v6488_v32 = vpop.f32.mrb[253].mxu1  ;;  %v6581_v39 = vpop.f32.mrb[241].mxu0  ;;  %v6728_v49 = vrot.slane %v8690_v38, 1 }
 0xe8d   :  { %v6724_v47 = vrot.slane %v6581_v39, 1  ;;  %v6490_v61 = vpop.f32.mrb[254].mxu1  ;;  %v12199_v5 = vpop.f32.mrb[242].mxu0 }
 0xe8e   :  { %v6650_v48 = vsel %vm12747_vm1, %v6647_v10, %v6649_v4  ;;  %v6651_v37 = vrot.slane %v6490_v61, 7  ;;  %v12596_v33 = vrot.slane %v12199_v5, 1  ;;  %v6492_v53 = vpop.f32.mrb[255].mxu1  ;;  %v6584_v7 = vpop.f32.mrb[243].mxu0  ;;  %vm12754_vm1 = vmmov %vm12749_vm3  ;;  %v12761_v44 = vrot.slane %v12199_v5, 1 }
 0xe8f   :  { %v6687_v19 = vsel %vm10857_vm13, 0.0, %v6650_v48  ;;  %v6725_v60 = vsel %vm12749_vm3, %v6722_v18, %v6724_v47  ;;  %v6726_v40 = vrot.slane %v6584_v7, 1  ;;  %vm12756_vm3 = vmmov %vm12752_vm6  ;;  %v12770_v5 = vrot.slane %v12124_v16, 1 }
 0xe90   :  { %v6784_v30 = vadd.f32 %v6687_v19, %v6488_v32  ;;  %v6765_v38 = vsel %vm10825_vm11, 0.0, %v6725_v60  ;;  %v6731_v10 = vsel %vm12751_vm15, %v6728_v49, %v12596_v33  ;;  %v6652_v61 = vsel %vm12752_vm6, %v6649_v4, %v6651_v37  ;;  %vm12758_vm15 = vmmov %vm12756_vm3 }
 0xe91   :  { %v6797_v3 = vadd.f32 %v6781_v28, %v6765_v38  ;;  %v6785_v21 = vadd.f32 %v6652_v61, %v6492_v53  ;;  %v6727_v36 = vsel %vm12753_vm4, %v6724_v47, %v6726_v40  ;;  %v6729_v48 = vsel %vm12754_vm1, %v6726_v40, %v6728_v49  ;;  %vm12759_vm6 = vmmov %vm12756_vm3 }
 0xe92   :  { %v6800_v35 = vadd.f32 %v6784_v30, %v6731_v10  ;;  %v6767_v18 = vsel %vm10834_vm12, 0.0, %v6729_v48  ;;  %v6798_v32 = vadd.f32 %v6782_v6, %v6727_v36  ;;  %v6856_v28 = vadd.f32 %v12160_v52, %v6836_v1  ;;  %v12757_v6 = vld [vmem:[#allocation50_spill] sm:$0xff]  ;;  %vm12762_vm4 = vmmov %vm12754_vm1 }
 0xe93   :  { %v6817_v7 = vadd.f32 %v12149_v63, %v6797_v3  ;;  %v6799_v19 = vadd.f32 %v6783_v58, %v6767_v18  ;;  %v6496_v60 = vpop.f32.mrb[0].mxu1 }
 0xe94   :  { %v6818_v17 = vadd.f32 %v12149_v63, %v6798_v32  ;;  %v6653_v33 = vrot.slane %v6496_v60, 7  ;;  %v6498_v50 = vpop.f32.mrb[1].mxu1  ;;  %v6872_v48 = vmax.f32 %v6856_v28, 0.0 }
 0xe95   :  { %v6837_v4 = vmul.f32 %v12155_v26, %v6817_v7  ;;  %v6819_v47 = vadd.f32 %v12149_v63, %v6799_v19  ;;  %v6500_v49 = vpop.f32.mrb[2].mxu1 }
 0xe96   :  { %v6654_v53 = vsel %vm12756_vm3, %v6651_v37, %v6653_v33  ;;  %v6655_v40 = vrot.slane %v6500_v49, 7  ;;  %v6502_v30 = vpop.f32.mrb[3].mxu1  ;;  %v6838_v36 = vmul.f32 %v12155_v26, %v6818_v17  ;;  %v6820_v17 = vadd.f32 %v12149_v63, %v6800_v35 }
 0xe97   :  { %v6857_v3 = vadd.f32 %v12160_v52, %v6837_v4  ;;  %v6689_v58 = vsel %vm10883_vm14, 0.0, %v6654_v53  ;;  %v6839_v38 = vmul.f32 %v12155_v26, %v6819_v47 }
 0xe98   :  { %v6786_v10 = vadd.f32 %v6689_v58, %v6498_v50  ;;  %v6656_v1 = vsel %vm12758_vm15, %v6653_v33, %v6655_v40  ;;  %v6858_v61 = vadd.f32 %v12160_v52, %v6838_v36  ;;  %v6811_v33 = vadd.f32 %v12149_v63, %v12140_v31  ;;  %vm12766_vm15 = vmmov %vm12762_vm4 }
 0xe99   :  { %v6873_v18 = vmax.f32 %v6857_v3, 0.0  ;;  %v6787_v32 = vadd.f32 %v6656_v1, %v6502_v30  ;;  %v6859_v37 = vadd.f32 %v12160_v52, %v6839_v38 }
 0xe9a   :  { %v6874_v7 = vmax.f32 %v6858_v61, 0.0 }
 0xe9b   :  { %v12233_v19 = vpack.c.bf16 %v6873_v18, %v6872_v48  ;;  %v6506_v60 = vpop.f32.mrb[4].mxu1  ;;  %v8694_v4 = vpop.f32.mrb[244].mxu0  ;;  %v6875_v49 = vmax.f32 %v6859_v37, 0.0  ;;  %v6840_v18 = vmul.f32 %v12155_v26, %v6820_v17  ;;  %v12767_v17 = vld [vmem:[#allocation54_spill] sm:$0xff] }
 0xe9c   :  { %v6657_v53 = vrot.slane %v6506_v60, 7  ;;  %v6508_v47 = vpop.f32.mrb[5].mxu1  ;;  %v6597_v50 = vpop.f32.mrb[245].mxu0  ;;  %v6736_v58 = vrot.slane %v8694_v4, 1 }
 0xe9d   :  { %v6732_v36 = vrot.slane %v6597_v50, 1  ;;  %v6510_v28 = vpop.f32.mrb[6].mxu1  ;;  %v8695_v3 = vpop.f32.mrb[246].mxu0  ;;  %v12238_v30 = vpack.c.bf16 %v6875_v49, %v6874_v7  ;;  %v12763_v7 = vld [vmem:[#allocation51_spill] sm:$0xff] }
 0xe9e   :  { %v6658_v38 = vsel %vm12759_vm6, %v6655_v40, %v6657_v53  ;;  %v6613_v1 = vrot.slane %v6510_v28, 7  ;;  %v6738_v61 = vrot.slane %v8695_v3, 1  ;;  %v6512_v35 = vpop.f32.mrb[7].mxu1  ;;  %v6600_v48 = vpop.f32.mrb[247].mxu0  ;;  %vm12764_vm1 = vnez %v12763_v7 }
 0xe9f   :  { %v6691_v60 = vsel %vm12681_vm0, 0.0, %v6658_v38  ;;  %v6733_v31 = vsel %vm12762_vm4, %v12761_v44, %v6732_v36  ;;  %v6734_v50 = vrot.slane %v6600_v48, 1  ;;  %v12765_v40 = vrot.slane %v12116_v43, 7  ;;  %vm12769_vm0 = vmmov %vm12756_vm3 }
 0xea0   :  { %v6788_v12 = vadd.f32 %v6691_v60, %v6508_v47  ;;  %v6769_v4 = vsel %vm12764_vm1, 0.0, %v6733_v31  ;;  %v6739_v28 = vsel %vm12766_vm15, %v6736_v58, %v6738_v61  ;;  %vm12768_vm6 = vnez %v12767_v17  ;;  %v12771_v60 = vld [vmem:[#allocation55_spill] sm:$0xff] }
 0xea1   :  { %v6676_v49 = vsel %vm12756_vm3, %v6613_v1, %v12765_v40  ;;  %v6801_v3 = vadd.f32 %v6785_v21, %v6769_v4  ;;  %v6659_v38 = vsel %vm12769_vm0, %v6657_v53, %v6613_v1  ;;  %v6757_v44 = vsel %vm12762_vm4, %v6738_v61, %v12770_v5  ;;  %vm12773_vm3 = vmmov %vm12762_vm4  ;;  %v12775_v61 = vld [vmem:[#allocation52_spill] sm:$0xff] }
 0xea2   :  { %v6677_v37 = vsel %vm12768_vm6, 0.0, %v6676_v49  ;;  %v6804_v48 = vadd.f32 %v6788_v12, %v6739_v28  ;;  %vm12772_vm14 = vnez %v12771_v60  ;;  %v6789_v31 = vadd.f32 %v6659_v38, %v6512_v35  ;;  %vm12774_vm15 = vmmov %vm12773_vm3 }
 0xea3   :  { %v6774_v47 = vadd.f32 %v6677_v37, %v12118_v34  ;;  %v6773_v43 = vsel %vm12772_vm14, 0.0, %v6757_v44  ;;  %v6831_v40 = vmul.f32 %v12155_v26, %v6811_v33  ;;  %v6821_v21 = vadd.f32 %v12149_v63, %v6801_v3  ;;  %vm12779_vm14 = vmmov %vm12773_vm3 }
 0xea4   :  { %v6735_v4 = vsel %vm12773_vm3, %v6732_v36, %v6734_v50  ;;  %v6737_v49 = vsel %vm12774_vm15, %v6734_v50, %v6736_v58  ;;  %v6824_v16 = vadd.f32 %v12149_v63, %v6804_v48  ;;  %v6805_v1 = vadd.f32 %v6789_v31, %v6773_v43  ;;  %vm12778_vm15 = vmmov %vm12773_vm3 }
 0xea5   :  { %v6790_v53 = vadd.f32 %v6774_v47, %v12135_v15  ;;  %vm12776_vm0 = vnez %v12775_v61  ;;  %v6860_v34 = vadd.f32 %v12160_v52, %v6840_v18  ;;  %v6841_v35 = vmul.f32 %v12155_v26, %v6821_v21 }
 0xea6   :  { %v6771_v12 = vsel %vm12776_vm0, 0.0, %v6737_v49  ;;  %v6802_v37 = vadd.f32 %v6786_v10, %v6735_v4  ;;  %v6844_v36 = vmul.f32 %v12155_v26, %v6824_v16  ;;  %v6825_v58 = vadd.f32 %v12149_v63, %v6805_v1 }
 0xea7   :  { %v6803_v33 = vadd.f32 %v6787_v32, %v6771_v12  ;;  %v6810_v28 = vadd.f32 %v12149_v63, %v6790_v53  ;;  %v6861_v15 = vadd.f32 %v12160_v52, %v6841_v35  ;;  %v6851_v38 = vadd.f32 %v12160_v52, %v6831_v40 }
 0xea8   :  { %v6822_v50 = vadd.f32 %v12149_v63, %v6802_v37  ;;  %v6864_v5 = vadd.f32 %v12160_v52, %v6844_v36  ;;  %v6845_v10 = vmul.f32 %v12155_v26, %v6825_v58  ;;  %v6876_v32 = vmax.f32 %v6860_v34, 0.0 }
 0xea9   :  { %v6823_v3 = vadd.f32 %v12149_v63, %v6803_v33  ;;  %v6830_v18 = vmul.f32 %v12155_v26, %v6810_v28  ;;  %v6877_v44 = vmax.f32 %v6861_v15, 0.0  ;;  %v6867_v49 = vmax.f32 %v6851_v38, 0.0 }
 0xeaa   :  { %v6842_v47 = vmul.f32 %v12155_v26, %v6822_v50  ;;  %v6880_v43 = vmax.f32 %v6864_v5, 0.0  ;;  %v6865_v31 = vadd.f32 %v12160_v52, %v6845_v10  ;;  %vm12777_vm4 = vcmask 1040384   ;;  %v213_v5 = vld [vmem:[#allocation5 + $0x10] sm:$0x3] }
 0xeab   :  { %v6843_v48 = vmul.f32 %v12155_v26, %v6823_v3  ;;  %v6850_v21 = vadd.f32 %v12160_v52, %v6830_v18  ;;  %v6887_v63 = vpack.c.bf16 %v6877_v44, %v6876_v32 }
 0xeac   :  { %v6862_v40 = vadd.f32 %v12160_v52, %v6842_v47  ;;  %v6881_v53 = vmax.f32 %v6865_v31, 0.0  ;;  %v12780_v47 = vsub.s32 7, %v12733_v23 }
 0xead   :  { %v6863_v4 = vadd.f32 %v12160_v52, %v6843_v48  ;;  %v6866_v16 = vmax.f32 %v6850_v21, 0.0 }
 0xeae   :  { %v6878_v1 = vmax.f32 %v6862_v40, 0.0  ;;  %v6889_v34 = vpack.c.bf16 %v6881_v53, %v6880_v43  ;;  %v12324_v48 = vrot.slane %v12038_v13, %v12780_v47 }
 0xeaf   :  { %v6879_v12 = vmax.f32 %v6863_v4, 0.0  ;;  %v6882_v35 = vpack.c.bf16 %v6867_v49, %v6866_v16  ;;  %v12782_v16 = vld [vmem:[#allocation30_spill] sm:$0xff] }
 0xeb1   :  { %v6888_v37 = vpack.c.bf16 %v6879_v12, %v6878_v1  ;;  %7051 = vmatmul.mubr.bf16.vlgmr.msra.gmra.mrb[248].mxu0 %v6882_v35  ;;  %8712 = vmatprep.mubr.bf16.mxu1 %v6882_v35  ;;  %v12332_v1 = vrot.slane %v213_v5, %v12782_v16 }
 0xeb2   :  { %8713 = vmatmul.mubr.bf16.vlgmr.msra.gmra.mrb[8].mxu1 %v12190_v25  ;;  %7060 = vmatprep.mubr.bf16.mxu0 %v12714_v45 }
 0xeb3   :  { %8716 = vmatprep.mubr.bf16.mxu1 %v12195_v11 }
 0xeb9   :  { %7061 = vmatmul.mubr.bf16.gmra.mrb[252].mxu0 %v12190_v25 }
 0xeba   :  { %8717 = vmatmul.mubr.bf16.gmra.mrb[12].mxu1 %v12233_v19  ;;  %7070 = vmatprep.mubr.bf16.mxu0 %v12714_v45 }
 0xebb   :  { %8720 = vmatprep.mubr.bf16.mxu1 %v12238_v30 }
 0xec1   :  { %7071 = vmatmul.mubr.bf16.gmra.mrb[0].mxu0 %v12195_v11 }
 0xec2   :  { %8721 = vmatmul.mubr.bf16.gmra.mrb[16].mxu1 %v6887_v63  ;;  %7080 = vmatprep.mubr.bf16.mxu0 %v12714_v45 }
 0xec3   :  { %8724 = vmatprep.mubr.bf16.mxu1 %v6888_v37 }
 0xec9   :  { %7081 = vmatmul.mubr.bf16.gmra.mrb[4].mxu0 %v12233_v19 }
 0xeca   :  { %8725 = vmatmul.mubr.bf16.gmra.mrb[20].mxu1 %v6889_v34  ;;  %7090 = vmatprep.mubr.bf16.mxu0 %v12714_v45 }
 0xed1   :  { %7091 = vmatmul.mubr.bf16.gmra.mrb[8].mxu0 %v12238_v30 }
 0xed2   :  { %7100 = vmatprep.mubr.bf16.mxu0 %v12714_v45 }
 0xed9   :  { %7101 = vmatmul.mubr.bf16.gmra.mrb[12].mxu0 %v6887_v63  ;;  %v12781_v63 = vld [vmem:[#allocation29_spill] sm:$0xff] }
 0xeda   :  { %7110 = vmatprep.mubr.bf16.mxu0 %v12714_v45  ;;  %v12329_v40 = vrot.slane %v213_v5, %v12781_v63 }
 0xee1   :  { %7111 = vmatmul.mubr.bf16.gmra.mrb[16].mxu0 %v6888_v37 }
 0xee2   :  { %7120 = vmatprep.mubr.bf16.mxu0 %v12714_v45 }
 0xee9   :  { %7121 = vmatmul.mubr.bf16.gmra.mrb[20].mxu0 %v6889_v34 }
 0xf84   :  { %v12303_v26 = vpop.f32.mrb[248].mxu0 }
 0xf85   :  { %v12305_v52 = vpop.f32.mrb[249].mxu0  ;;  %v8714_v25 = vpop.f32.mrb[8].mxu1  ;;  %v7246_v33 = vrot.slane %v12303_v26, 7 }
 0xf86   :  { %v7056_v11 = vpop.f32.mrb[250].mxu0  ;;  %v12307_v19 = vpop.f32.mrb[9].mxu1  ;;  %v7328_v58 = vrot.slane %v8714_v25, 1 }
 0xf87   :  { %v7247_v30 = vrot.slane %v7056_v11, 7  ;;  %v7058_v28 = vpop.f32.mrb[251].mxu0  ;;  %v8715_v36 = vpop.f32.mrb[10].mxu1  ;;  %v7325_v3 = vrot.slane %v12307_v19, 1 }
 0xf88   :  { %v7330_v15 = vrot.slane %v8715_v36, 1  ;;  %v7168_v50 = vpop.f32.mrb[11].mxu1 }
 0xf89   :  { %v7248_v45 = vsel %vm12777_vm4, %v7246_v33, %v7247_v30  ;;  %v7326_v38 = vrot.slane %v7168_v50, 1 }
 0xf8a   :  { %v7391_v18 = vadd.f32 %v7248_v45, %v7058_v28  ;;  %v7331_v10 = vsel %vm12773_vm3, %v7328_v58, %v7330_v15 }
 0xf8b   :  { %v12318_v32 = vsel %vm12778_vm15, %v7325_v3, %v7326_v38  ;;  %v7329_v44 = vsel %vm12779_vm14, %v7326_v38, %v7328_v58  ;;  %vm12783_vm14 = vmmov %vm12777_vm4 }
 0xf8c   :  { %v7375_v43 = vsel %vm12729_vm2, 0.0, %v7329_v44  ;;  %v7062_v31 = vpop.f32.mrb[252].mxu0  ;;  %vm12784_vm2 = vmmov %vm12777_vm4 }
 0xf8d   :  { %v7407_v21 = vadd.f32 %v7391_v18, %v7375_v43  ;;  %v7249_v4 = vrot.slane %v7062_v31, 7  ;;  %v7064_v49 = vpop.f32.mrb[253].mxu0  ;;  %v8718_v53 = vpop.f32.mrb[12].mxu1  ;;  %vm12785_vm4 = vmmov %vm12773_vm3 }
 0xf8e   :  { %v7066_v12 = vpop.f32.mrb[254].mxu0  ;;  %v7181_v34 = vpop.f32.mrb[13].mxu1  ;;  %v7336_v28 = vrot.slane %v8718_v53, 1  ;;  %vm12787_vm15 = vmmov %vm12773_vm3 }
 0xf8f   :  { %v7427_v23 = vadd.f32 %v12324_v48, %v7407_v21  ;;  %v7250_v13 = vsel %vm12783_vm14, %v7247_v30, %v7249_v4  ;;  %v7251_v35 = vrot.slane %v7066_v12, 7  ;;  %v7332_v55 = vrot.slane %v7181_v34, 1  ;;  %v7068_v37 = vpop.f32.mrb[255].mxu0  ;;  %v8719_v25 = vpop.f32.mrb[14].mxu1 }
 0xf90   :  { %v7295_v11 = vsel %vm10723_vm5, 0.0, %v7250_v13  ;;  %v7338_v36 = vrot.slane %v8719_v25, 1  ;;  %v7184_v58 = vpop.f32.mrb[15].mxu1  ;;  %vm12786_vm5 = vmmov %vm12773_vm3  ;;  %vm12789_vm14 = vnez %v12731_v0 }
 0xf91   :  { %v7447_v50 = vmul.f32 %v12329_v40, %v7427_v23  ;;  %v7392_v45 = vadd.f32 %v7295_v11, %v7064_v49  ;;  %v7252_v38 = vsel %vm12784_vm2, %v7249_v4, %v7251_v35  ;;  %v7333_v18 = vsel %vm12785_vm4, %v7330_v15, %v7332_v55  ;;  %vm12790_vm4 = vmmov %vm12773_vm3 }
 0xf92   :  { %v7377_v30 = vsel %vm10749_vm7, 0.0, %v7333_v18  ;;  %v7393_v5 = vadd.f32 %v7252_v38, %v7068_v37  ;;  %v7334_v44 = vrot.slane %v7184_v58, 1  ;;  %v12344_v47 = vsel %vm12773_vm3, %v7336_v28, %v7338_v36  ;;  %vm12788_vm7 = vmmov %vm12784_vm2 }
 0xf93   :  { %v7467_v54 = vadd.f32 %v12332_v1, %v7447_v50  ;;  %v7408_v43 = vadd.f32 %v7392_v45, %v7331_v10 }
 0xf94   :  { %v7409_v31 = vadd.f32 %v7393_v5, %v7377_v30  ;;  %v7072_v21 = vpop.f32.mrb[0].mxu0  ;;  %v7335_v63 = vsel %vm12786_vm5, %v7332_v55, %v7334_v44  ;;  %v7337_v49 = vsel %vm12787_vm15, %v7334_v44, %v7336_v28  ;;  %vm12791_vm5 = vmmov %vm12773_vm3 }
 0xf95   :  { %v7483_v4 = vadd.f32 %v7467_v54, %v12048_v56  ;;  %v7428_v15 = vadd.f32 %v12324_v48, %v7408_v43  ;;  %v7253_v57 = vrot.slane %v7072_v21, 7  ;;  %v7074_v53 = vpop.f32.mrb[1].mxu0  ;;  %v8722_v16 = vpop.f32.mrb[16].mxu1  ;;  %vm12792_vm15 = vmmov %vm12773_vm3 }
 0xf96   :  { %v7429_v12 = vadd.f32 %v12324_v48, %v7409_v31  ;;  %v7344_v34 = vrot.slane %v8722_v16, 1  ;;  %v7076_v23 = vpop.f32.mrb[2].mxu0  ;;  %v7197_v13 = vpop.f32.mrb[17].mxu1 }
 0xf97   :  { %v7499_v37 = vmax.f32 %v7483_v4, 0.0  ;;  %v7448_v10 = vmul.f32 %v12329_v40, %v7428_v15  ;;  %v7254_v25 = vsel %vm12788_vm7, %v7251_v35, %v7253_v57  ;;  %v7255_v55 = vrot.slane %v7076_v23, 7  ;;  %v7078_v11 = vpop.f32.mrb[3].mxu0  ;;  %v8723_v28 = vpop.f32.mrb[18].mxu1  ;;  %vm12794_vm7 = vmmov %vm12784_vm2 }
 0xf98   :  { %v7449_v56 = vmul.f32 %v12329_v40, %v7429_v12  ;;  %v7297_v58 = vsel %vm12789_vm14, 0.0, %v7254_v25  ;;  %v7340_v50 = vrot.slane %v7197_v13, 1  ;;  %v7346_v45 = vrot.slane %v8723_v28, 1  ;;  %v7200_v38 = vpop.f32.mrb[19].mxu1  ;;  %vm12795_vm14 = vmmov %vm12773_vm3 }
 0xf99   :  { %7515 = vst [vmem:[#allocation20 + $0x8] sm:$0xff] %v7499_v37  ;;  %v7468_v18 = vadd.f32 %v12332_v1, %v7448_v10  ;;  %v7394_v30 = vadd.f32 %v7297_v58, %v7074_v53  ;;  %v7256_v5 = vsel %vm12784_vm2, %v7253_v57, %v7255_v55  ;;  %v7342_v44 = vrot.slane %v7200_v38, 1 }
 0xf9a   :  { %v7469_v35 = vadd.f32 %v12332_v1, %v7449_v56  ;;  %v7395_v54 = vadd.f32 %v7256_v5, %v7078_v11  ;;  %v7341_v43 = vsel %vm12790_vm4, %v7338_v36, %v7340_v50  ;;  %v12362_v31 = vsel %vm12773_vm3, %v7344_v34, %v7346_v45 }
 0xf9b   :  { %v7484_v0 = vadd.f32 %v7468_v18, %v12054_v46  ;;  %v7410_v21 = vadd.f32 %v7394_v30, %v7335_v63  ;;  %v7379_v4 = vsel %vm10753_vm8, 0.0, %v7337_v49  ;;  %v12368_v15 = vsel %vm12791_vm5, %v7340_v50, %v7342_v44  ;;  %vm12793_vm8 = vmmov %vm12784_vm2 }
 0xf9c   :  { %v7485_v57 = vadd.f32 %v7469_v35, %v12057_v59  ;;  %v7411_v53 = vadd.f32 %v7395_v54, %v7379_v4  ;;  %v7082_v16 = vpop.f32.mrb[4].mxu0  ;;  %v12372_v12 = vsel %vm12792_vm15, %v7342_v44, %v7344_v34  ;;  %vm12796_vm2 = vmmov %vm12773_vm3 }
 0xf9d   :  { %v7500_v36 = vmax.f32 %v7484_v0, 0.0  ;;  %v7430_v23 = vadd.f32 %v12324_v48, %v7410_v21  ;;  %v7257_v13 = vrot.slane %v7082_v16, 7  ;;  %v7084_v37 = vpop.f32.mrb[5].mxu0  ;;  %v8726_v46 = vpop.f32.mrb[20].mxu1  ;;  %vm12798_vm4 = vmmov %vm12796_vm2 }
 0xf9e   :  { %v7501_v63 = vmax.f32 %v7485_v57, 0.0  ;;  %v7431_v9 = vadd.f32 %v12324_v48, %v7411_v53  ;;  %v7086_v49 = vpop.f32.mrb[6].mxu0  ;;  %v7213_v10 = vpop.f32.mrb[21].mxu1  ;;  %v7352_v38 = vrot.slane %v8726_v46, 1  ;;  %v7381_v53 = vsel %vm10825_vm11, 0.0, %v7341_v43  ;;  %vm12799_vm3 = vmmov %vm12796_vm2 }
 0xf9f   :  { %7516 = vst [vmem:[#allocation20 + $0x10] sm:$0xff] %v7500_v36  ;;  %v7450_v25 = vmul.f32 %v12329_v40, %v7430_v23  ;;  %v7258_v59 = vsel %vm12793_vm8, %v7255_v55, %v7257_v13  ;;  %v7259_v11 = vrot.slane %v7086_v49, 7  ;;  %v7348_v28 = vrot.slane %v7213_v10, 1  ;;  %v7088_v34 = vpop.f32.mrb[7].mxu0  ;;  %v8727_v56 = vpop.f32.mrb[22].mxu1  ;;  %vm12800_vm11 = vmmov %vm12794_vm7 }
 0xfa0   :  { %7517 = vst [vmem:[#allocation20 + $0x18] sm:$0xff] %v7501_v63  ;;  %v7451_v58 = vmul.f32 %v12329_v40, %v7431_v9  ;;  %v7299_v50 = vsel %vm10788_vm9, 0.0, %v7258_v59  ;;  %v7354_v18 = vrot.slane %v8727_v56, 1  ;;  %v7216_v30 = vpop.f32.mrb[23].mxu1  ;;  %vm12797_vm9 = vmmov %vm12796_vm2 }
 0xfa1   :  { %v7470_v5 = vadd.f32 %v12332_v1, %v7450_v25  ;;  %v7396_v44 = vadd.f32 %v7299_v50, %v7084_v37  ;;  %v7260_v35 = vsel %vm12794_vm7, %v7257_v13, %v7259_v11  ;;  %v7350_v54 = vrot.slane %v7216_v30, 1  ;;  %vm12801_vm5 = vmmov %vm12794_vm7 }
 0xfa2   :  { %v7471_v55 = vadd.f32 %v12332_v1, %v7451_v58  ;;  %v7397_v0 = vadd.f32 %v7260_v35, %v7088_v34  ;;  %v7349_v21 = vsel %vm12795_vm14, %v7346_v45, %v7348_v28  ;;  %v12386_v4 = vsel %vm12796_vm2, %v7352_v38, %v7354_v18  ;;  %vm12806_vm15 = vmmov %vm12801_vm5 }
 0xfa3   :  { %v7486_v14 = vadd.f32 %v7470_v5, %v12063_v51  ;;  %v7412_v57 = vadd.f32 %v7396_v44, %v12344_v47  ;;  %v12393_v16 = vsel %vm12797_vm9, %v7350_v54, %v7352_v38  ;;  %v12397_v37 = vsel %vm12798_vm4, %v7348_v28, %v7350_v54  ;;  %vm12807_vm8 = vmmov %vm12801_vm5 }
 0xfa4   :  { %v7487_v36 = vadd.f32 %v7471_v55, %v12066_v41  ;;  %v7413_v23 = vadd.f32 %v7397_v0, %v7381_v53  ;;  %v7092_v13 = vpop.f32.mrb[8].mxu0  ;;  %v12403_v39 = vsel %vm12799_vm3, %v7354_v18, %v7325_v3  ;;  %v7383_v38 = vsel %vm10834_vm12, 0.0, %v12372_v12  ;;  %vm12803_vm12 = vmmov %vm12801_vm5 }
 0xfa5   :  { %v7502_v45 = vmax.f32 %v7486_v14, 0.0  ;;  %v7432_v46 = vadd.f32 %v12324_v48, %v7412_v57  ;;  %v7261_v63 = vrot.slane %v7092_v13, 7  ;;  %v7094_v51 = vpop.f32.mrb[9].mxu0  ;;  %vm12810_vm7 = vmmov %vm12801_vm5  ;;  %vm12813_vm2 = vnez %v12771_v60 }
 0xfa6   :  { %v7503_v47 = vmax.f32 %v7487_v36, 0.0  ;;  %v7433_v43 = vadd.f32 %v12324_v48, %v7413_v23  ;;  %v7096_v9 = vpop.f32.mrb[10].mxu0  ;;  %vm12811_vm14 = vmmov %vm12801_vm5  ;;  %v7389_v26 = vsel %vm12813_vm2, 0.0, %v12403_v39 }
 0xfa7   :  { %7518 = vst [vmem:[#allocation20 + $0x20] sm:$0xff] %v7502_v45  ;;  %v7452_v41 = vmul.f32 %v12329_v40, %v7432_v46  ;;  %v7262_v49 = vsel %vm12800_vm11, %v7259_v11, %v7261_v63  ;;  %v7263_v10 = vrot.slane %v7096_v9, 7  ;;  %v7098_v25 = vpop.f32.mrb[11].mxu0 }
 0xfa8   :  { %7519 = vst [vmem:[#allocation20 + $0x28] sm:$0xff] %v7503_v47  ;;  %v7453_v59 = vmul.f32 %v12329_v40, %v7433_v43  ;;  %v7301_v19 = vsel %vm10820_vm10, 0.0, %v7262_v49  ;;  %vm12802_vm10 = vmmov %vm12801_vm5 }
 0xfa9   :  { %v7472_v3 = vadd.f32 %v12332_v1, %v7452_v41  ;;  %v7398_v28 = vadd.f32 %v7301_v19, %v7094_v51  ;;  %v7264_v34 = vsel %vm12801_vm5, %v7261_v63, %v7263_v10  ;;  %v7385_v51 = vsel %vm12764_vm1, 0.0, %v7349_v21 }
 0xfaa   :  { %v7473_v56 = vadd.f32 %v12332_v1, %v7453_v59  ;;  %v7399_v58 = vadd.f32 %v7264_v34, %v7098_v25  ;;  %vm12805_vm1 = vnez %v12757_v6 }
 0xfab   :  { %v7488_v50 = vadd.f32 %v7472_v3, %v12072_v27  ;;  %v7414_v11 = vadd.f32 %v7398_v28, %v12368_v15 }
 0xfac   :  { %v7489_v18 = vadd.f32 %v7473_v56, %v12075_v29  ;;  %v7415_v8 = vadd.f32 %v7399_v58, %v7383_v38  ;;  %v7102_v30 = vpop.f32.mrb[12].mxu0 }
 0xfad   :  { %v7504_v5 = vmax.f32 %v7488_v50, 0.0  ;;  %v7434_v44 = vadd.f32 %v12324_v48, %v7414_v11  ;;  %v7265_v35 = vrot.slane %v7102_v30, 7  ;;  %v7104_v54 = vpop.f32.mrb[13].mxu0 }
 0xfae   :  { %v7505_v55 = vmax.f32 %v7489_v18, 0.0  ;;  %v7435_v0 = vadd.f32 %v12324_v48, %v7415_v8  ;;  %v7106_v14 = vpop.f32.mrb[14].mxu0  ;;  %v7387_v18 = vsel %vm12776_vm0, 0.0, %v12393_v16 }
 0xfaf   :  { %7520 = vst [vmem:[#allocation20 + $0x30] sm:$0xff] %v7504_v5  ;;  %v7454_v27 = vmul.f32 %v12329_v40, %v7434_v44  ;;  %v7266_v15 = vsel %vm12802_vm10, %v7263_v10, %v7265_v35  ;;  %v7267_v42 = vrot.slane %v7106_v14, 7  ;;  %v7108_v12 = vpop.f32.mrb[15].mxu0 }
 0xfb0   :  { %7521 = vst [vmem:[#allocation20 + $0x38] sm:$0xff] %v7505_v55  ;;  %v7455_v29 = vmul.f32 %v12329_v40, %v7435_v0  ;;  %v7303_v57 = vsel %vm10857_vm13, 0.0, %v7266_v15  ;;  %vm12804_vm13 = vmmov %vm12801_vm5 }
 0xfb1   :  { %v7474_v53 = vadd.f32 %v12332_v1, %v7454_v27  ;;  %v7400_v36 = vadd.f32 %v7303_v57, %v7104_v54  ;;  %v7268_v23 = vsel %vm12803_vm12, %v7265_v35, %v7267_v42  ;;  %v12808_v27 = vld [vmem:[#allocation53_spill] sm:$0xff] }
 0xfb2   :  { %v7475_v13 = vadd.f32 %v12332_v1, %v7455_v29  ;;  %v7401_v45 = vadd.f32 %v7268_v23, %v7108_v12  ;;  %vm12809_vm0 = vnez %v12808_v27 }
 0xfb3   :  { %v7490_v46 = vadd.f32 %v7474_v53, %v12082_v22  ;;  %v7416_v63 = vadd.f32 %v7400_v36, %v12362_v31 }
 0xfb4   :  { %v7491_v47 = vadd.f32 %v7475_v13, %v12084_v62  ;;  %v7417_v43 = vadd.f32 %v7401_v45, %v7385_v51  ;;  %v7112_v24 = vpop.f32.mrb[16].mxu0  ;;  %v12812_v13 = vld [vmem:[#allocation33_spill] sm:$0xff]  ;;  %v12814_v51 = vld [vmem:[#allocation34_spill] sm:$0xff] }
 0xfb5   :  { %v7506_v9 = vmax.f32 %v7490_v46, 0.0  ;;  %v7436_v41 = vadd.f32 %v12324_v48, %v7416_v63  ;;  %v7269_v49 = vrot.slane %v7112_v24, 7  ;;  %v7114_v10 = vpop.f32.mrb[17].mxu0 }
 0xfb6   :  { %v7507_v25 = vmax.f32 %v7491_v47, 0.0  ;;  %v7437_v59 = vadd.f32 %v12324_v48, %v7417_v43  ;;  %v7116_v19 = vpop.f32.mrb[18].mxu0 }
 0xfb7   :  { %7522 = vst [vmem:[#allocation20 + $0x40] sm:$0xff] %v7506_v9  ;;  %v7456_v22 = vmul.f32 %v12329_v40, %v7436_v41  ;;  %v7270_v31 = vsel %vm12804_vm13, %v7267_v42, %v7269_v49  ;;  %v7271_v7 = vrot.slane %v7116_v19, 7  ;;  %v7118_v21 = vpop.f32.mrb[19].mxu0  ;;  %v12816_v19 = vld [vmem:[#allocation36_spill] sm:$0xff] }
 0xfb8   :  { %7523 = vst [vmem:[#allocation20 + $0x48] sm:$0xff] %v7507_v25  ;;  %v7457_v62 = vmul.f32 %v12329_v40, %v7437_v59  ;;  %v7305_v3 = vsel %vm12805_vm1, 0.0, %v7270_v31  ;;  %v12815_v25 = vld [vmem:[#allocation35_spill] sm:$0xff] }
 0xfb9   :  { %v7476_v28 = vadd.f32 %v12332_v1, %v7456_v22  ;;  %v7402_v34 = vadd.f32 %v7305_v3, %v7114_v10  ;;  %v7272_v56 = vsel %vm12806_vm15, %v7269_v49, %v7271_v7 }
 0xfba   :  { %v7477_v58 = vadd.f32 %v12332_v1, %v7457_v62  ;;  %v7403_v50 = vadd.f32 %v7272_v56, %v7118_v21 }
 0xfbb   :  { %v7492_v11 = vadd.f32 %v7476_v28, %v12091_v20  ;;  %v7418_v38 = vadd.f32 %v7402_v34, %v12397_v37 }
 0xfbc   :  { %v7493_v8 = vadd.f32 %v7477_v58, %v12093_v2  ;;  %v7419_v6 = vadd.f32 %v7403_v50, %v7387_v18  ;;  %v7122_v30 = vpop.f32.mrb[20].mxu0 }
 0xfbd   :  { %v7508_v5 = vmax.f32 %v7492_v11, 0.0  ;;  %v7438_v44 = vadd.f32 %v12324_v48, %v7418_v38  ;;  %v7273_v35 = vrot.slane %v7122_v30, 7  ;;  %v7124_v54 = vpop.f32.mrb[21].mxu0 }
 0xfbe   :  { %v7509_v55 = vmax.f32 %v7493_v8, 0.0  ;;  %v7439_v0 = vadd.f32 %v12324_v48, %v7419_v6  ;;  %v7126_v14 = vpop.f32.mrb[22].mxu0 }
 0xfbf   :  { %7524 = vst [vmem:[#allocation20 + $0x50] sm:$0xff] %v7508_v5  ;;  %v7458_v20 = vmul.f32 %v12329_v40, %v7438_v44  ;;  %v7274_v37 = vsel %vm12807_vm8, %v7271_v7, %v7273_v35  ;;  %v7229_v61 = vrot.slane %v7126_v14, 7  ;;  %v7128_v16 = vpop.f32.mrb[23].mxu0  ;;  %v12817_v7 = vld [vmem:[#allocation32_spill] sm:$0xff] }
 0xfc0   :  { %7525 = vst [vmem:[#allocation20 + $0x58] sm:$0xff] %v7509_v55  ;;  %v7459_v2 = vmul.f32 %v12329_v40, %v7439_v0  ;;  %v7307_v15 = vsel %vm12809_vm0, 0.0, %v7274_v37 }
 0xfc1   :  { %v7478_v42 = vadd.f32 %v12332_v1, %v7458_v20  ;;  %v7404_v12 = vadd.f32 %v7307_v15, %v7124_v54  ;;  %v7292_v29 = vsel %vm12810_vm7, %v7229_v61, %v7246_v33  ;;  %v7275_v57 = vsel %vm12811_vm14, %v7273_v35, %v7229_v61 }
 0xfc2   :  { %v7479_v53 = vadd.f32 %v12332_v1, %v7459_v2  ;;  %v7293_v36 = vsel %vm12768_vm6, 0.0, %v7292_v29  ;;  %v7405_v23 = vadd.f32 %v7275_v57, %v7128_v16 }
 0xfc3   :  { %v7494_v45 = vadd.f32 %v7478_v42, %v12812_v13  ;;  %v7420_v46 = vadd.f32 %v7404_v12, %v12386_v4  ;;  %v7390_v63 = vadd.f32 %v7293_v36, %v12305_v52 }
 0xfc4   :  { %v7495_v33 = vadd.f32 %v7479_v53, %v12814_v51  ;;  %v7421_v47 = vadd.f32 %v7405_v23, %v7389_v26 }
 0xfc5   :  { %v7510_v43 = vmax.f32 %v7494_v45, 0.0  ;;  %v7440_v24 = vadd.f32 %v12324_v48, %v7420_v46  ;;  %v7406_v17 = vadd.f32 %v7390_v63, %v12318_v32 }
 0xfc6   :  { %v7511_v9 = vmax.f32 %v7495_v33, 0.0  ;;  %v7441_v41 = vadd.f32 %v12324_v48, %v7421_v47 }
 0xfc7   :  { %7526 = vst [vmem:[#allocation20 + $0x60] sm:$0xff] %v7510_v43  ;;  %v7460_v4 = vmul.f32 %v12329_v40, %v7440_v24  ;;  %v7426_v52 = vadd.f32 %v12324_v48, %v7406_v17 }
 0xfc8   :  { %7527 = vst [vmem:[#allocation20 + $0x68] sm:$0xff] %v7511_v9  ;;  %v7461_v60 = vmul.f32 %v12329_v40, %v7441_v41 }
 0xfc9   :  { %v7480_v39 = vadd.f32 %v12332_v1, %v7460_v4  ;;  %v7446_v49 = vmul.f32 %v12329_v40, %v7426_v52 }
 0xfca   :  { %v7481_v10 = vadd.f32 %v12332_v1, %v7461_v60 }
 0xfcb   :  { %v7496_v59 = vadd.f32 %v7480_v39, %v12815_v25  ;;  %v7466_v32 = vadd.f32 %v12332_v1, %v7446_v49 }
 0xfcc   :  { %v7497_v22 = vadd.f32 %v7481_v10, %v12816_v19 }
 0xfcd   :  { %v7512_v31 = vmax.f32 %v7496_v59, 0.0  ;;  %v7482_v48 = vadd.f32 %v7466_v32, %v12817_v7 }
 0xfce   :  { %v7513_v21 = vmax.f32 %v7497_v22, 0.0 }
 0xfcf   :  { %7528 = vst [vmem:[#allocation20 + $0x70] sm:$0xff] %v7512_v31  ;;  %v7498_v62 = vmax.f32 %v7482_v48, 0.0 }
 0xfd0   :  { %7529 = vst [vmem:[#allocation20 + $0x78] sm:$0xff] %v7513_v21 }
 0xfd1   :  { %7514 = vst [vmem:[#allocation20] sm:$0xff] %v7498_v62 }
 0xfd2   :  { %9584 = shalt.err (!%p9581_p8)
}
 0xfd3   :  { %s9585_s4 = scalar_lea.hbm %s12514_s13, 2048 }
 0xfd4   :  { %p9586_p9 = scmp.ne.s32.totalorder %s12514_s13, %s9585_s4  ;;  %p9589_p10 = scmp.lt.u32.totalorder %s9585_s4, %s12514_s13 }
 0xfd6   :  { %p9591_p11 = pnand %p9589_p10, %p9586_p9 }
 0xfd8   :  { %9594 = shalt.err (!%p9591_p11)
}
 0xfd9   :  { %7541 = dma.vmem_to_hbm [thread:$0]  %s7536_s18, 2048, %s12514_s13, [#allocation4], %s9611_s20, %s9611_s20, %s9612_s21  }
 0xfda   :  { %9607 = dma.done.wait [#allocation4], 2048  }
 0xfdb   :  { %9608 = vsyncadd [#allocation4], 4294965248 }
 0xfdc   :  { %7545 = vsyncpa [#allocation3], 1 }
 0xfdd   :  { %7546 = vsyncpa [#allocation6], 1 }
 0xfde   :  { %7547 = vsyncpa [#allocation9], 1 }
 0xfdf   :  { %7548 = vsyncpa [#allocation12], 1 }
 0xfe0   :  { %7549 = vsyncpa [#allocation15], 1 }
 0xfe1   :  { %7550 = vsyncpa [#allocation18], 1 }
 0xfe2   :  { %7551 = vsyncpa [#allocation4], 1 }

</bundles_post_ra>
